<compile_context>
chip_gen: v5e
topology: v5e:2x2
jax: 0.10.0
libtpu: 0.0.40
codegen_flags: <defaults>
</compile_context>

<pallas_src>
import numpy as np
import jax
import jax.numpy as jnp
from jax import lax
from jax.experimental import pallas as pl
from jax.experimental.pallas import tpu as pltpu


def _round_up(x, m):
    return ((x + m - 1) // m) * m


def discriminator_kernel(x_ref, h0_ref,
                         wih0_ref, whh0_ref, bih0_ref, bhh0_ref,
                         wih1_ref, whh1_ref, bih1_ref, bhh1_ref,
                         w2h_ref, b2h_ref, w2o_ref, b2o_ref,
                         out_ref,
                         gi0f_ref, gi0b_ref, o0_ref, gi1f_ref, gi1b_ref):
    T, B, E = x_ref.shape
    Hp = whh0_ref.shape[1]          # lane-padded hidden (multiple of 128)
    G = 3 * Hp                      # gate width

    def gates(gi, h_prev, w_hh, b_hh):
        # gi already contains the input contribution + b_ih, shape (B, 3Hp)
        gh = jnp.dot(h_prev, w_hh, preferred_element_type=jnp.float32) + b_hh
        r = jax.nn.sigmoid(gi[:, 0:Hp] + gh[:, 0:Hp])
        z = jax.nn.sigmoid(gi[:, Hp:2 * Hp] + gh[:, Hp:2 * Hp])
        n = jnp.tanh(gi[:, 2 * Hp:3 * Hp] + r * gh[:, 2 * Hp:3 * Hp])
        return (1.0 - z) * n + z * h_prev

    # ---------- hoisted layer-0 input projection (one batched matmul per direction) ----------
    x_flat = x_ref[...].reshape(T * B, E)
    gi0f_ref[...] = (jnp.dot(x_flat, wih0_ref[0], preferred_element_type=jnp.float32)
                     + bih0_ref[0:1, :]).reshape(T, B, G)
    gi0b_ref[...] = (jnp.dot(x_flat, wih0_ref[1], preferred_element_type=jnp.float32)
                     + bih0_ref[1:2, :]).reshape(T, B, G)

    # Pre-broadcast recurrent biases once (JAX does not CSE broadcast_in_dim in loops).
    bhh0_f = jnp.broadcast_to(bhh0_ref[0:1, :], (B, G))
    bhh0_b = jnp.broadcast_to(bhh0_ref[1:2, :], (B, G))
    bhh1_f = jnp.broadcast_to(bhh1_ref[0:1, :], (B, G))
    bhh1_b = jnp.broadcast_to(bhh1_ref[1:2, :], (B, G))

    whh0_f = whh0_ref[0]
    whh0_b = whh0_ref[1]
    whh1_f = whh1_ref[0]
    whh1_b = whh1_ref[1]

    # ---------- layer 0 recurrence (fwd & bwd interleaved; only h @ W_hh per step) ----------
    def l0_body(t, carry):
        hf, hb = carry
        hf = gates(gi0f_ref[t], hf, whh0_f, bhh0_f)
        o0_ref[t, :, 0:Hp] = hf
        tb = T - 1 - t
        hb = gates(gi0b_ref[tb], hb, whh0_b, bhh0_b)
        o0_ref[tb, :, Hp:2 * Hp] = hb
        return hf, hb

    hf0, hb0 = lax.fori_loop(0, T, l0_body, (h0_ref[0], h0_ref[1]), unroll=True)

    # TODO(synk): GRU inter-layer dropout and nn.Dropout are training-only; eval-mode identity here.

    # ---------- hoisted layer-1 input projection: (T*B, 2Hp) @ (2Hp, 3Hp) per direction ----------
    o0_flat = o0_ref[...].reshape(T * B, 2 * Hp)
    gi1f_ref[...] = (jnp.dot(o0_flat, wih1_ref[0], preferred_element_type=jnp.float32)
                     + bih1_ref[0:1, :]).reshape(T, B, G)
    gi1b_ref[...] = (jnp.dot(o0_flat, wih1_ref[1], preferred_element_type=jnp.float32)
                     + bih1_ref[1:2, :]).reshape(T, B, G)

    # ---------- layer 1 recurrence ----------
    def l1_body(t, carry):
        hf, hb = carry
        hf = gates(gi1f_ref[t], hf, whh1_f, bhh1_f)
        tb = T - 1 - t
        hb = gates(gi1b_ref[tb], hb, whh1_b, bhh1_b)
        return hf, hb

    hf1, hb1 = lax.fori_loop(0, T, l1_body, (h0_ref[2], h0_ref[3]), unroll=True)

    # ---------- head: Linear(4Hp -> Hp) -> tanh -> Linear(Hp -> 1) -> sigmoid ----------
    # feat = concat([hf0, hb0, hf1, hb1], -1) @ W2h, as 4 tile-aligned partial matmuls.
    feat = (jnp.dot(hf0, w2h_ref[0 * Hp:1 * Hp, :], preferred_element_type=jnp.float32)
            + jnp.dot(hb0, w2h_ref[1 * Hp:2 * Hp, :], preferred_element_type=jnp.float32)
            + jnp.dot(hf1, w2h_ref[2 * Hp:3 * Hp, :], preferred_element_type=jnp.float32)
            + jnp.dot(hb1, w2h_ref[3 * Hp:4 * Hp, :], preferred_element_type=jnp.float32))
    hidden = jnp.tanh(feat + b2h_ref[...])
    logit = jnp.dot(hidden, w2o_ref[...], preferred_element_type=jnp.float32) + b2o_ref[...]
    out_ref[...] = jax.nn.sigmoid(logit)


def _pad_params(p, H, Hp):
    """Zero-pad hidden dim H -> Hp (lane tile) in the kernel weight layout."""
    def pad_gate_cols(w):
        # (..., 3H) -> (..., 3Hp): pad each of the 3 gate blocks independently.
        shp = w.shape
        w3 = w.reshape(shp[:-1] + (3, H))
        pad = [(0, 0)] * (w3.ndim - 1) + [(0, Hp - H)]
        return jnp.pad(w3, pad).reshape(shp[:-1] + (3 * Hp,))

    def pad_rows(w, nblocks):
        # (..., nblocks*H, cols) -> (..., nblocks*Hp, cols)
        shp = w.shape
        w4 = w.reshape(shp[:-2] + (nblocks, H, shp[-1]))
        pad = [(0, 0)] * (w4.ndim - 2) + [(0, Hp - H), (0, 0)]
        return jnp.pad(w4, pad).reshape(shp[:-2] + (nblocks * Hp, shp[-1]))

    w2h = jnp.pad(pad_rows(p["w2h"], 4), ((0, 0), (0, Hp - H)))     # (4Hp, Hp)
    return {
        "wih0": pad_gate_cols(p["wih0"]),                           # (2, E, 3Hp)
        "whh0": pad_gate_cols(pad_rows(p["whh0"], 1)),              # (2, Hp, 3Hp)
        "bih0": pad_gate_cols(p["bih0"]),                           # (2, 3Hp)
        "bhh0": pad_gate_cols(p["bhh0"]),
        "wih1": pad_gate_cols(pad_rows(p["wih1"], 2)),              # (2, 2Hp, 3Hp)
        "whh1": pad_gate_cols(pad_rows(p["whh1"], 1)),              # (2, Hp, 3Hp)
        "bih1": pad_gate_cols(p["bih1"]),
        "bhh1": pad_gate_cols(p["bhh1"]),
        "w2h": w2h,
        "b2h": jnp.pad(p["b2h"], ((0, 0), (0, Hp - H))),            # (1, Hp)
        "w2o": jnp.pad(p["w2o"], ((0, Hp - H), (0, 0))),            # (Hp, 1)
        "b2o": p["b2o"],
    }


def discriminator_forward(x_bte, h0, p):
    """x_bte: (B, T, E) float32; h0: (4, B, H) float32. Returns (B, 1) float32."""
    B, T, E = x_bte.shape
    H = p["whh0"].shape[1]
    Hp = _round_up(H, 128)          # lane-align gate slices / stores
    Bp = _round_up(B, 8)            # sublane-align per-step tiles

    x_tbe = jnp.transpose(x_bte, (1, 0, 2))                         # emb.permute(1, 0, 2)
    x_tbe = jnp.pad(x_tbe, ((0, 0), (0, Bp - B), (0, 0)))
    h0p = jnp.pad(h0, ((0, 0), (0, Bp - B), (0, Hp - H)))
    pp = _pad_params(p, H, Hp)

    n_in = 14
    out = pl.pallas_call(
        discriminator_kernel,
        out_shape=jax.ShapeDtypeStruct((Bp, 1), jnp.float32),
        in_specs=[pl.BlockSpec(memory_space=pltpu.MemorySpace.VMEM)] * n_in,
        out_specs=pl.BlockSpec(memory_space=pltpu.MemorySpace.VMEM),
        scratch_shapes=[
            pltpu.VMEM((T, Bp, 3 * Hp), jnp.float32),   # hoisted layer-0 fwd gi
            pltpu.VMEM((T, Bp, 3 * Hp), jnp.float32),   # hoisted layer-0 bwd gi
            pltpu.VMEM((T, Bp, 2 * Hp), jnp.float32),   # merged layer-0 outputs [fwd | bwd]
            pltpu.VMEM((T, Bp, 3 * Hp), jnp.float32),   # hoisted layer-1 fwd gi
            pltpu.VMEM((T, Bp, 3 * Hp), jnp.float32),   # hoisted layer-1 bwd gi
        ],
        compiler_params=pltpu.CompilerParams(vmem_limit_bytes=32 * 1024 * 1024),
    )(x_tbe, h0p,
      pp["wih0"], pp["whh0"], pp["bih0"], pp["bhh0"],
      pp["wih1"], pp["whh1"], pp["bih1"], pp["bhh1"],
      pp["w2h"], pp["b2h"], pp["w2o"], pp["b2o"])
    return out[:B]


def make_params(key, E, H):
    ks = jax.random.split(key, 12)
    k_gru = 1.0 / np.sqrt(H)

    def u(kk, shape, bound):
        return jax.random.uniform(kk, shape, jnp.float32, -bound, bound)

    params = {
        # GRU weights, pre-transposed to (in_features, 3H); stacked [fwd, bwd]
        "wih0": u(ks[0], (2, E, 3 * H), k_gru),
        "whh0": u(ks[1], (2, H, 3 * H), k_gru),
        "bih0": u(ks[2], (2, 3 * H), k_gru),
        "bhh0": u(ks[3], (2, 3 * H), k_gru),
        "wih1": u(ks[4], (2, 2 * H, 3 * H), k_gru),
        "whh1": u(ks[5], (2, H, 3 * H), k_gru),
        "bih1": u(ks[6], (2, 3 * H), k_gru),
        "bhh1": u(ks[7], (2, 3 * H), k_gru),
        # gru2hidden: Linear(4H, H), transposed -> (4H, H)
        "w2h": u(ks[8], (4 * H, H), 1.0 / np.sqrt(4 * H)),
        "b2h": u(ks[9], (1, H), 1.0 / np.sqrt(4 * H)),
        # hidden2out: Linear(H, 1), transposed -> (H, 1)
        "w2o": u(ks[10], (H, 1), 1.0 / np.sqrt(H)),
        "b2o": u(ks[11], (1, 1), 1.0 / np.sqrt(H)),
    }
    return params


def reference_forward(x_bte, h0, p):
    """Pure-JAX reference replicating torch.nn.GRU (eval mode) + head."""
    B, T, E = x_bte.shape
    H = p["whh0"].shape[1]

    def cell(xt, h, wih_t, whh_t, bih, bhh):
        gi = xt @ wih_t + bih
        gh = h @ whh_t + bhh
        r = jax.nn.sigmoid(gi[:, :H] + gh[:, :H])
        z = jax.nn.sigmoid(gi[:, H:2 * H] + gh[:, H:2 * H])
        n = jnp.tanh(gi[:, 2 * H:] + r * gh[:, 2 * H:])
        return (1.0 - z) * n + z * h

    # layer 0
    hf, hb = h0[0], h0[1]
    of = [None] * T
    ob = [None] * T
    for t in range(T):
        hf = cell(x_bte[:, t], hf, p["wih0"][0], p["whh0"][0], p["bih0"][0], p["bhh0"][0])
        of[t] = hf
    for t in range(T - 1, -1, -1):
        hb = cell(x_bte[:, t], hb, p["wih0"][1], p["whh0"][1], p["bih0"][1], p["bhh0"][1])
        ob[t] = hb
    l0 = [jnp.concatenate([of[t], ob[t]], axis=-1) for t in range(T)]
    # layer 1
    hf1, hb1 = h0[2], h0[3]
    for t in range(T):
        hf1 = cell(l0[t], hf1, p["wih1"][0], p["whh1"][0], p["bih1"][0], p["bhh1"][0])
    for t in range(T - 1, -1, -1):
        hb1 = cell(l0[t], hb1, p["wih1"][1], p["whh1"][1], p["bih1"][1], p["bhh1"][1])
    feat = jnp.concatenate([hf, hb, hf1, hb1], axis=-1)      # (B, 4H)
    hidden = jnp.tanh(feat @ p["w2h"] + p["b2h"])
    return jax.nn.sigmoid(hidden @ p["w2o"] + p["b2o"])


if __name__ == "__main__":
    B, T, E, H = 2, 8, 16, 32   # batch, max_seq_len, embedding_dim, hidden_dim

    key = jax.random.PRNGKey(0)
    k_x, k_p = jax.random.split(key)
    x = jax.random.normal(k_x, (B, T, E), dtype=jnp.float32)   # already-embedded input
    h0 = jnp.zeros((4, B, H), dtype=jnp.float32)               # init_hidden(B)
    params = make_params(k_p, E, H)

    out = jax.jit(discriminator_forward)(x, h0, params)
    out = jax.block_until_ready(out)

    ref = reference_forward(x, h0, params)
    np.testing.assert_allclose(np.asarray(out), np.asarray(ref), rtol=1e-5, atol=2e-5)

    print("KERNEL_OK")
</pallas_src>

<mosaic_0001>
module attributes {stable_mosaic.version = 11 : i64} {
  func.func @discriminator_kernel(%arg0: memref<8x8x16xf32, #tpu.memory_space<vmem>>, %arg1: memref<4x8x128xf32, #tpu.memory_space<vmem>>, %arg2: memref<2x16x384xf32, #tpu.memory_space<vmem>>, %arg3: memref<2x128x384xf32, #tpu.memory_space<vmem>>, %arg4: memref<2x384xf32, #tpu.memory_space<vmem>>, %arg5: memref<2x384xf32, #tpu.memory_space<vmem>>, %arg6: memref<2x256x384xf32, #tpu.memory_space<vmem>>, %arg7: memref<2x128x384xf32, #tpu.memory_space<vmem>>, %arg8: memref<2x384xf32, #tpu.memory_space<vmem>>, %arg9: memref<2x384xf32, #tpu.memory_space<vmem>>, %arg10: memref<512x128xf32, #tpu.memory_space<vmem>>, %arg11: memref<1x128xf32, #tpu.memory_space<vmem>>, %arg12: memref<128x1xf32, #tpu.memory_space<vmem>>, %arg13: memref<1x1xf32, #tpu.memory_space<vmem>>, %arg14: memref<8x1xf32, #tpu.memory_space<vmem>>, %arg15: memref<8x8x384xf32, #tpu.memory_space<vmem>>, %arg16: memref<8x8x384xf32, #tpu.memory_space<vmem>>, %arg17: memref<8x8x256xf32, #tpu.memory_space<vmem>>, %arg18: memref<8x8x384xf32, #tpu.memory_space<vmem>>, %arg19: memref<8x8x384xf32, #tpu.memory_space<vmem>>) attributes {dimension_semantics = [], scalar_prefetch = 0 : i64, scratch_operands = 5 : i64, tpu.core_type = #tpu.core_type<tc>} {
    %c0 = arith.constant 0 : index
    %c0_0 = arith.constant 0 : index
    %c0_1 = arith.constant 0 : index
    %0 = vector.load %arg0[%c0, %c0_0, %c0_1] : memref<8x8x16xf32, #tpu.memory_space<vmem>>, vector<8x8x16xf32>
    %1 = vector.shape_cast %0 : vector<8x8x16xf32> to vector<64x16xf32>
    %c0_2 = arith.constant 0 : index
    %c0_3 = arith.constant 0 : index
    %c0_4 = arith.constant 0 : index
    %2 = vector.load %arg2[%c0_2, %c0_3, %c0_4] : memref<2x16x384xf32, #tpu.memory_space<vmem>>, vector<1x16x384xf32>
    %3 = vector.shape_cast %2 : vector<1x16x384xf32> to vector<16x384xf32>
    %cst = arith.constant dense<0.000000e+00> : vector<64x384xf32>
    %4 = tpu.matmul %1, %3, %cst {dimension_numbers = #tpu.dot_dimension_numbers<[1], [0], [0], [1], [0, 0, 1, 1], [], []>} : vector<64x16xf32>, vector<16x384xf32>, vector<64x384xf32> -> vector<64x384xf32>
    %c0_5 = arith.constant 0 : index
    %c0_6 = arith.constant 0 : index
    %5 = vector.load %arg4[%c0_5, %c0_6] : memref<2x384xf32, #tpu.memory_space<vmem>>, vector<1x384xf32>
    %6 = vector.broadcast %5 : vector<1x384xf32> to vector<64x384xf32>
    %7 = arith.addf %4, %6 : vector<64x384xf32>
    %8 = vector.shape_cast %7 : vector<64x384xf32> to vector<8x8x384xf32>
    %c0_7 = arith.constant 0 : index
    %c0_8 = arith.constant 0 : index
    %c0_9 = arith.constant 0 : index
    %9 = vector.load %arg15[%c0_7, %c0_8, %c0_9] : memref<8x8x384xf32, #tpu.memory_space<vmem>>, vector<8x8x384xf32>
    tpu.vector_store %arg15[%c0_7, %c0_8, %c0_9], %8 {strides = array<i32>} : memref<8x8x384xf32, #tpu.memory_space<vmem>>, vector<8x8x384xf32>,
    %c1 = arith.constant 1 : index
    %c0_10 = arith.constant 0 : index
    %c0_11 = arith.constant 0 : index
    %10 = vector.load %arg2[%c1, %c0_10, %c0_11] : memref<2x16x384xf32, #tpu.memory_space<vmem>>, vector<1x16x384xf32>
    %11 = vector.shape_cast %10 : vector<1x16x384xf32> to vector<16x384xf32>
    %cst_12 = arith.constant dense<0.000000e+00> : vector<64x384xf32>
    %12 = tpu.matmul %1, %11, %cst_12 {dimension_numbers = #tpu.dot_dimension_numbers<[1], [0], [0], [1], [0, 0, 1, 1], [], []>} : vector<64x16xf32>, vector<16x384xf32>, vector<64x384xf32> -> vector<64x384xf32>
    %c1_13 = arith.constant 1 : index
    %c0_14 = arith.constant 0 : index
    %13 = vector.load %arg4[%c1_13, %c0_14] : memref<2x384xf32, #tpu.memory_space<vmem>>, vector<1x384xf32>
    %14 = vector.broadcast %13 : vector<1x384xf32> to vector<64x384xf32>
    %15 = arith.addf %12, %14 : vector<64x384xf32>
    %16 = vector.shape_cast %15 : vector<64x384xf32> to vector<8x8x384xf32>
    %c0_15 = arith.constant 0 : index
    %c0_16 = arith.constant 0 : index
    %c0_17 = arith.constant 0 : index
    %17 = vector.load %arg16[%c0_15, %c0_16, %c0_17] : memref<8x8x384xf32, #tpu.memory_space<vmem>>, vector<8x8x384xf32>
    tpu.vector_store %arg16[%c0_15, %c0_16, %c0_17], %16 {strides = array<i32>} : memref<8x8x384xf32, #tpu.memory_space<vmem>>, vector<8x8x384xf32>,
    %c0_18 = arith.constant 0 : index
    %c0_19 = arith.constant 0 : index
    %18 = vector.load %arg5[%c0_18, %c0_19] : memref<2x384xf32, #tpu.memory_space<vmem>>, vector<1x384xf32>
    %19 = vector.shape_cast %18 : vector<1x384xf32> to vector<1x384xf32>
    %20 = vector.broadcast %19 : vector<1x384xf32> to vector<8x384xf32>
    %c1_20 = arith.constant 1 : index
    %c0_21 = arith.constant 0 : index
    %21 = vector.load %arg5[%c1_20, %c0_21] : memref<2x384xf32, #tpu.memory_space<vmem>>, vector<1x384xf32>
    %22 = vector.shape_cast %21 : vector<1x384xf32> to vector<1x384xf32>
    %23 = vector.broadcast %22 : vector<1x384xf32> to vector<8x384xf32>
    %c0_22 = arith.constant 0 : index
    %c0_23 = arith.constant 0 : index
    %24 = vector.load %arg9[%c0_22, %c0_23] : memref<2x384xf32, #tpu.memory_space<vmem>>, vector<1x384xf32>
    %25 = vector.shape_cast %24 : vector<1x384xf32> to vector<1x384xf32>
    %26 = vector.broadcast %25 : vector<1x384xf32> to vector<8x384xf32>
    %c1_24 = arith.constant 1 : index
    %c0_25 = arith.constant 0 : index
    %27 = vector.load %arg9[%c1_24, %c0_25] : memref<2x384xf32, #tpu.memory_space<vmem>>, vector<1x384xf32>
    %28 = vector.shape_cast %27 : vector<1x384xf32> to vector<1x384xf32>
    %29 = vector.broadcast %28 : vector<1x384xf32> to vector<8x384xf32>
    %c0_26 = arith.constant 0 : index
    %c0_27 = arith.constant 0 : index
    %c0_28 = arith.constant 0 : index
    %30 = vector.load %arg3[%c0_26, %c0_27, %c0_28] : memref<2x128x384xf32, #tpu.memory_space<vmem>>, vector<1x128x384xf32>
    %31 = vector.shape_cast %30 : vector<1x128x384xf32> to vector<128x384xf32>
    %c1_29 = arith.constant 1 : index
    %c0_30 = arith.constant 0 : index
    %c0_31 = arith.constant 0 : index
    %32 = vector.load %arg3[%c1_29, %c0_30, %c0_31] : memref<2x128x384xf32, #tpu.memory_space<vmem>>, vector<1x128x384xf32>
    %33 = vector.shape_cast %32 : vector<1x128x384xf32> to vector<128x384xf32>
    %c0_32 = arith.constant 0 : index
    %c0_33 = arith.constant 0 : index
    %c0_34 = arith.constant 0 : index
    %34 = vector.load %arg7[%c0_32, %c0_33, %c0_34] : memref<2x128x384xf32, #tpu.memory_space<vmem>>, vector<1x128x384xf32>
    %35 = vector.shape_cast %34 : vector<1x128x384xf32> to vector<128x384xf32>
    %c1_35 = arith.constant 1 : index
    %c0_36 = arith.constant 0 : index
    %c0_37 = arith.constant 0 : index
    %36 = vector.load %arg7[%c1_35, %c0_36, %c0_37] : memref<2x128x384xf32, #tpu.memory_space<vmem>>, vector<1x128x384xf32>
    %37 = vector.shape_cast %36 : vector<1x128x384xf32> to vector<128x384xf32>
    %c0_38 = arith.constant 0 : index
    %c0_39 = arith.constant 0 : index
    %c0_40 = arith.constant 0 : index
    %38 = vector.load %arg1[%c0_38, %c0_39, %c0_40] : memref<4x8x128xf32, #tpu.memory_space<vmem>>, vector<1x8x128xf32>
    %39 = vector.shape_cast %38 : vector<1x8x128xf32> to vector<8x128xf32>
    %c1_41 = arith.constant 1 : index
    %c0_42 = arith.constant 0 : index
    %c0_43 = arith.constant 0 : index
    %40 = vector.load %arg1[%c1_41, %c0_42, %c0_43] : memref<4x8x128xf32, #tpu.memory_space<vmem>>, vector<1x8x128xf32>
    %41 = vector.shape_cast %40 : vector<1x8x128xf32> to vector<8x128xf32>
    %c0_i32 = arith.constant 0 : i32
    %42 = arith.index_cast %c0_i32 : i32 to index
    %c0_44 = arith.constant 0 : index
    %c0_45 = arith.constant 0 : index
    %43 = vector.load %arg15[%42, %c0_44, %c0_45] : memref<8x8x384xf32, #tpu.memory_space<vmem>>, vector<1x8x384xf32>
    %44 = vector.shape_cast %43 : vector<1x8x384xf32> to vector<8x384xf32>
    %cst_46 = arith.constant dense<0.000000e+00> : vector<8x384xf32>
    %45 = tpu.matmul %39, %31, %cst_46 {dimension_numbers = #tpu.dot_dimension_numbers<[1], [0], [0], [1], [0, 0, 1, 1], [], []>} : vector<8x128xf32>, vector<128x384xf32>, vector<8x384xf32> -> vector<8x384xf32>
    %46 = arith.addf %45, %20 : vector<8x384xf32>
    %47 = vector.extract_strided_slice %44 {offsets = [0, 0], sizes = [8, 128], strides = [1, 1]} : vector<8x384xf32> to vector<8x128xf32>
    %48 = vector.extract_strided_slice %46 {offsets = [0, 0], sizes = [8, 128], strides = [1, 1]} : vector<8x384xf32> to vector<8x128xf32>
    %49 = arith.addf %47, %48 : vector<8x128xf32>
    %50 = arith.negf %49 : vector<8x128xf32>
    %51 = math.exp %50 : vector<8x128xf32>
    %cst_47 = arith.constant 1.000000e+00 : f32
    %52 = vector.broadcast %cst_47 : f32 to vector<8x128xf32>
    %53 = arith.addf %52, %51 : vector<8x128xf32>
    %54 = arith.divf %52, %53 : vector<8x128xf32>
    %55 = vector.extract_strided_slice %44 {offsets = [0, 128], sizes = [8, 128], strides = [1, 1]} : vector<8x384xf32> to vector<8x128xf32>
    %56 = vector.extract_strided_slice %46 {offsets = [0, 128], sizes = [8, 128], strides = [1, 1]} : vector<8x384xf32> to vector<8x128xf32>
    %57 = arith.addf %55, %56 : vector<8x128xf32>
    %58 = arith.negf %57 : vector<8x128xf32>
    %59 = math.exp %58 : vector<8x128xf32>
    %cst_48 = arith.constant 1.000000e+00 : f32
    %60 = vector.broadcast %cst_48 : f32 to vector<8x128xf32>
    %61 = arith.addf %60, %59 : vector<8x128xf32>
    %62 = arith.divf %60, %61 : vector<8x128xf32>
    %63 = vector.extract_strided_slice %44 {offsets = [0, 256], sizes = [8, 128], strides = [1, 1]} : vector<8x384xf32> to vector<8x128xf32>
    %64 = vector.extract_strided_slice %46 {offsets = [0, 256], sizes = [8, 128], strides = [1, 1]} : vector<8x384xf32> to vector<8x128xf32>
    %65 = arith.mulf %54, %64 : vector<8x128xf32>
    %66 = arith.addf %63, %65 : vector<8x128xf32>
    %67 = math.tanh %66 : vector<8x128xf32>
    %cst_49 = arith.constant 1.000000e+00 : f32
    %68 = vector.broadcast %cst_49 : f32 to vector<8x128xf32>
    %69 = arith.subf %68, %62 : vector<8x128xf32>
    %70 = arith.mulf %69, %67 : vector<8x128xf32>
    %71 = arith.mulf %62, %39 : vector<8x128xf32>
    %72 = arith.addf %70, %71 : vector<8x128xf32>
    %73 = arith.index_cast %c0_i32 : i32 to index
    %c0_50 = arith.constant 0 : index
    %c0_51 = arith.constant 0 : index
    %74 = vector.load %arg17[%73, %c0_50, %c0_51] : memref<8x8x256xf32, #tpu.memory_space<vmem>>, vector<1x8x128xf32>
    %75 = vector.shape_cast %74 : vector<1x8x128xf32> to vector<8x128xf32>
    %76 = vector.shape_cast %72 : vector<8x128xf32> to vector<1x8x128xf32>
    tpu.vector_store %arg17[%73, %c0_50, %c0_51], %76 {strides = array<i32>} : memref<8x8x256xf32, #tpu.memory_space<vmem>>, vector<1x8x128xf32>,
    %c7_i32 = arith.constant 7 : i32
    %77 = arith.subi %c7_i32, %c0_i32 : i32
    %78 = arith.index_cast %77 : i32 to index
    %c0_52 = arith.constant 0 : index
    %c0_53 = arith.constant 0 : index
    %79 = vector.load %arg16[%78, %c0_52, %c0_53] : memref<8x8x384xf32, #tpu.memory_space<vmem>>, vector<1x8x384xf32>
    %80 = vector.shape_cast %79 : vector<1x8x384xf32> to vector<8x384xf32>
    %cst_54 = arith.constant dense<0.000000e+00> : vector<8x384xf32>
    %81 = tpu.matmul %41, %33, %cst_54 {dimension_numbers = #tpu.dot_dimension_numbers<[1], [0], [0], [1], [0, 0, 1, 1], [], []>} : vector<8x128xf32>, vector<128x384xf32>, vector<8x384xf32> -> vector<8x384xf32>
    %82 = arith.addf %81, %23 : vector<8x384xf32>
    %83 = vector.extract_strided_slice %80 {offsets = [0, 0], sizes = [8, 128], strides = [1, 1]} : vector<8x384xf32> to vector<8x128xf32>
    %84 = vector.extract_strided_slice %82 {offsets = [0, 0], sizes = [8, 128], strides = [1, 1]} : vector<8x384xf32> to vector<8x128xf32>
    %85 = arith.addf %83, %84 : vector<8x128xf32>
    %86 = arith.negf %85 : vector<8x128xf32>
    %87 = math.exp %86 : vector<8x128xf32>
    %cst_55 = arith.constant 1.000000e+00 : f32
    %88 = vector.broadcast %cst_55 : f32 to vector<8x128xf32>
    %89 = arith.addf %88, %87 : vector<8x128xf32>
    %90 = arith.divf %88, %89 : vector<8x128xf32>
    %91 = vector.extract_strided_slice %80 {offsets = [0, 128], sizes = [8, 128], strides = [1, 1]} : vector<8x384xf32> to vector<8x128xf32>
    %92 = vector.extract_strided_slice %82 {offsets = [0, 128], sizes = [8, 128], strides = [1, 1]} : vector<8x384xf32> to vector<8x128xf32>
    %93 = arith.addf %91, %92 : vector<8x128xf32>
    %94 = arith.negf %93 : vector<8x128xf32>
    %95 = math.exp %94 : vector<8x128xf32>
    %cst_56 = arith.constant 1.000000e+00 : f32
    %96 = vector.broadcast %cst_56 : f32 to vector<8x128xf32>
    %97 = arith.addf %96, %95 : vector<8x128xf32>
    %98 = arith.divf %96, %97 : vector<8x128xf32>
    %99 = vector.extract_strided_slice %80 {offsets = [0, 256], sizes = [8, 128], strides = [1, 1]} : vector<8x384xf32> to vector<8x128xf32>
    %100 = vector.extract_strided_slice %82 {offsets = [0, 256], sizes = [8, 128], strides = [1, 1]} : vector<8x384xf32> to vector<8x128xf32>
    %101 = arith.mulf %90, %100 : vector<8x128xf32>
    %102 = arith.addf %99, %101 : vector<8x128xf32>
    %103 = math.tanh %102 : vector<8x128xf32>
    %cst_57 = arith.constant 1.000000e+00 : f32
    %104 = vector.broadcast %cst_57 : f32 to vector<8x128xf32>
    %105 = arith.subf %104, %98 : vector<8x128xf32>
    %106 = arith.mulf %105, %103 : vector<8x128xf32>
    %107 = arith.mulf %98, %41 : vector<8x128xf32>
    %108 = arith.addf %106, %107 : vector<8x128xf32>
    %109 = arith.index_cast %77 : i32 to index
    %c0_58 = arith.constant 0 : index
    %c128 = arith.constant 128 : index
    %110 = vector.load %arg17[%109, %c0_58, %c128] : memref<8x8x256xf32, #tpu.memory_space<vmem>>, vector<1x8x128xf32>
    %111 = vector.shape_cast %110 : vector<1x8x128xf32> to vector<8x128xf32>
    %112 = vector.shape_cast %108 : vector<8x128xf32> to vector<1x8x128xf32>
    tpu.vector_store %arg17[%109, %c0_58, %c128], %112 {strides = array<i32>} : memref<8x8x256xf32, #tpu.memory_space<vmem>>, vector<1x8x128xf32>,
    %c1_i32 = arith.constant 1 : i32
    %113 = arith.index_cast %c1_i32 : i32 to index
    %c0_59 = arith.constant 0 : index
    %c0_60 = arith.constant 0 : index
    %114 = vector.load %arg15[%113, %c0_59, %c0_60] : memref<8x8x384xf32, #tpu.memory_space<vmem>>, vector<1x8x384xf32>
    %115 = vector.shape_cast %114 : vector<1x8x384xf32> to vector<8x384xf32>
    %cst_61 = arith.constant dense<0.000000e+00> : vector<8x384xf32>
    %116 = tpu.matmul %72, %31, %cst_61 {dimension_numbers = #tpu.dot_dimension_numbers<[1], [0], [0], [1], [0, 0, 1, 1], [], []>} : vector<8x128xf32>, vector<128x384xf32>, vector<8x384xf32> -> vector<8x384xf32>
    %117 = arith.addf %116, %20 : vector<8x384xf32>
    %118 = vector.extract_strided_slice %115 {offsets = [0, 0], sizes = [8, 128], strides = [1, 1]} : vector<8x384xf32> to vector<8x128xf32>
    %119 = vector.extract_strided_slice %117 {offsets = [0, 0], sizes = [8, 128], strides = [1, 1]} : vector<8x384xf32> to vector<8x128xf32>
    %120 = arith.addf %118, %119 : vector<8x128xf32>
    %121 = arith.negf %120 : vector<8x128xf32>
    %122 = math.exp %121 : vector<8x128xf32>
    %cst_62 = arith.constant 1.000000e+00 : f32
    %123 = vector.broadcast %cst_62 : f32 to vector<8x128xf32>
    %124 = arith.addf %123, %122 : vector<8x128xf32>
    %125 = arith.divf %123, %124 : vector<8x128xf32>
    %126 = vector.extract_strided_slice %115 {offsets = [0, 128], sizes = [8, 128], strides = [1, 1]} : vector<8x384xf32> to vector<8x128xf32>
    %127 = vector.extract_strided_slice %117 {offsets = [0, 128], sizes = [8, 128], strides = [1, 1]} : vector<8x384xf32> to vector<8x128xf32>
    %128 = arith.addf %126, %127 : vector<8x128xf32>
    %129 = arith.negf %128 : vector<8x128xf32>
    %130 = math.exp %129 : vector<8x128xf32>
    %cst_63 = arith.constant 1.000000e+00 : f32
    %131 = vector.broadcast %cst_63 : f32 to vector<8x128xf32>
    %132 = arith.addf %131, %130 : vector<8x128xf32>
    %133 = arith.divf %131, %132 : vector<8x128xf32>
    %134 = vector.extract_strided_slice %115 {offsets = [0, 256], sizes = [8, 128], strides = [1, 1]} : vector<8x384xf32> to vector<8x128xf32>
    %135 = vector.extract_strided_slice %117 {offsets = [0, 256], sizes = [8, 128], strides = [1, 1]} : vector<8x384xf32> to vector<8x128xf32>
    %136 = arith.mulf %125, %135 : vector<8x128xf32>
    %137 = arith.addf %134, %136 : vector<8x128xf32>
    %138 = math.tanh %137 : vector<8x128xf32>
    %cst_64 = arith.constant 1.000000e+00 : f32
    %139 = vector.broadcast %cst_64 : f32 to vector<8x128xf32>
    %140 = arith.subf %139, %133 : vector<8x128xf32>
    %141 = arith.mulf %140, %138 : vector<8x128xf32>
    %142 = arith.mulf %133, %72 : vector<8x128xf32>
    %143 = arith.addf %141, %142 : vector<8x128xf32>
    %144 = arith.index_cast %c1_i32 : i32 to index
    %c0_65 = arith.constant 0 : index
    %c0_66 = arith.constant 0 : index
    %145 = vector.load %arg17[%144, %c0_65, %c0_66] : memref<8x8x256xf32, #tpu.memory_space<vmem>>, vector<1x8x128xf32>
    %146 = vector.shape_cast %145 : vector<1x8x128xf32> to vector<8x128xf32>
    %147 = vector.shape_cast %143 : vector<8x128xf32> to vector<1x8x128xf32>
    tpu.vector_store %arg17[%144, %c0_65, %c0_66], %147 {strides = array<i32>} : memref<8x8x256xf32, #tpu.memory_space<vmem>>, vector<1x8x128xf32>,
    %c7_i32_67 = arith.constant 7 : i32
    %148 = arith.subi %c7_i32_67, %c1_i32 : i32
    %149 = arith.index_cast %148 : i32 to index
    %c0_68 = arith.constant 0 : index
    %c0_69 = arith.constant 0 : index
    %150 = vector.load %arg16[%149, %c0_68, %c0_69] : memref<8x8x384xf32, #tpu.memory_space<vmem>>, vector<1x8x384xf32>
    %151 = vector.shape_cast %150 : vector<1x8x384xf32> to vector<8x384xf32>
    %cst_70 = arith.constant dense<0.000000e+00> : vector<8x384xf32>
    %152 = tpu.matmul %108, %33, %cst_70 {dimension_numbers = #tpu.dot_dimension_numbers<[1], [0], [0], [1], [0, 0, 1, 1], [], []>} : vector<8x128xf32>, vector<128x384xf32>, vector<8x384xf32> -> vector<8x384xf32>
    %153 = arith.addf %152, %23 : vector<8x384xf32>
    %154 = vector.extract_strided_slice %151 {offsets = [0, 0], sizes = [8, 128], strides = [1, 1]} : vector<8x384xf32> to vector<8x128xf32>
    %155 = vector.extract_strided_slice %153 {offsets = [0, 0], sizes = [8, 128], strides = [1, 1]} : vector<8x384xf32> to vector<8x128xf32>
    %156 = arith.addf %154, %155 : vector<8x128xf32>
    %157 = arith.negf %156 : vector<8x128xf32>
    %158 = math.exp %157 : vector<8x128xf32>
    %cst_71 = arith.constant 1.000000e+00 : f32
    %159 = vector.broadcast %cst_71 : f32 to vector<8x128xf32>
    %160 = arith.addf %159, %158 : vector<8x128xf32>
    %161 = arith.divf %159, %160 : vector<8x128xf32>
    %162 = vector.extract_strided_slice %151 {offsets = [0, 128], sizes = [8, 128], strides = [1, 1]} : vector<8x384xf32> to vector<8x128xf32>
    %163 = vector.extract_strided_slice %153 {offsets = [0, 128], sizes = [8, 128], strides = [1, 1]} : vector<8x384xf32> to vector<8x128xf32>
    %164 = arith.addf %162, %163 : vector<8x128xf32>
    %165 = arith.negf %164 : vector<8x128xf32>
    %166 = math.exp %165 : vector<8x128xf32>
    %cst_72 = arith.constant 1.000000e+00 : f32
    %167 = vector.broadcast %cst_72 : f32 to vector<8x128xf32>
    %168 = arith.addf %167, %166 : vector<8x128xf32>
    %169 = arith.divf %167, %168 : vector<8x128xf32>
    %170 = vector.extract_strided_slice %151 {offsets = [0, 256], sizes = [8, 128], strides = [1, 1]} : vector<8x384xf32> to vector<8x128xf32>
    %171 = vector.extract_strided_slice %153 {offsets = [0, 256], sizes = [8, 128], strides = [1, 1]} : vector<8x384xf32> to vector<8x128xf32>
    %172 = arith.mulf %161, %171 : vector<8x128xf32>
    %173 = arith.addf %170, %172 : vector<8x128xf32>
    %174 = math.tanh %173 : vector<8x128xf32>
    %cst_73 = arith.constant 1.000000e+00 : f32
    %175 = vector.broadcast %cst_73 : f32 to vector<8x128xf32>
    %176 = arith.subf %175, %169 : vector<8x128xf32>
    %177 = arith.mulf %176, %174 : vector<8x128xf32>
    %178 = arith.mulf %169, %108 : vector<8x128xf32>
    %179 = arith.addf %177, %178 : vector<8x128xf32>
    %180 = arith.index_cast %148 : i32 to index
    %c0_74 = arith.constant 0 : index
    %c128_75 = arith.constant 128 : index
    %181 = vector.load %arg17[%180, %c0_74, %c128_75] : memref<8x8x256xf32, #tpu.memory_space<vmem>>, vector<1x8x128xf32>
    %182 = vector.shape_cast %181 : vector<1x8x128xf32> to vector<8x128xf32>
    %183 = vector.shape_cast %179 : vector<8x128xf32> to vector<1x8x128xf32>
    tpu.vector_store %arg17[%180, %c0_74, %c128_75], %183 {strides = array<i32>} : memref<8x8x256xf32, #tpu.memory_space<vmem>>, vector<1x8x128xf32>,
    %c2_i32 = arith.constant 2 : i32
    %184 = arith.index_cast %c2_i32 : i32 to index
    %c0_76 = arith.constant 0 : index
    %c0_77 = arith.constant 0 : index
    %185 = vector.load %arg15[%184, %c0_76, %c0_77] : memref<8x8x384xf32, #tpu.memory_space<vmem>>, vector<1x8x384xf32>
    %186 = vector.shape_cast %185 : vector<1x8x384xf32> to vector<8x384xf32>
    %cst_78 = arith.constant dense<0.000000e+00> : vector<8x384xf32>
    %187 = tpu.matmul %143, %31, %cst_78 {dimension_numbers = #tpu.dot_dimension_numbers<[1], [0], [0], [1], [0, 0, 1, 1], [], []>} : vector<8x128xf32>, vector<128x384xf32>, vector<8x384xf32> -> vector<8x384xf32>
    %188 = arith.addf %187, %20 : vector<8x384xf32>
    %189 = vector.extract_strided_slice %186 {offsets = [0, 0], sizes = [8, 128], strides = [1, 1]} : vector<8x384xf32> to vector<8x128xf32>
    %190 = vector.extract_strided_slice %188 {offsets = [0, 0], sizes = [8, 128], strides = [1, 1]} : vector<8x384xf32> to vector<8x128xf32>
    %191 = arith.addf %189, %190 : vector<8x128xf32>
    %192 = arith.negf %191 : vector<8x128xf32>
    %193 = math.exp %192 : vector<8x128xf32>
    %cst_79 = arith.constant 1.000000e+00 : f32
    %194 = vector.broadcast %cst_79 : f32 to vector<8x128xf32>
    %195 = arith.addf %194, %193 : vector<8x128xf32>
    %196 = arith.divf %194, %195 : vector<8x128xf32>
    %197 = vector.extract_strided_slice %186 {offsets = [0, 128], sizes = [8, 128], strides = [1, 1]} : vector<8x384xf32> to vector<8x128xf32>
    %198 = vector.extract_strided_slice %188 {offsets = [0, 128], sizes = [8, 128], strides = [1, 1]} : vector<8x384xf32> to vector<8x128xf32>
    %199 = arith.addf %197, %198 : vector<8x128xf32>
    %200 = arith.negf %199 : vector<8x128xf32>
    %201 = math.exp %200 : vector<8x128xf32>
    %cst_80 = arith.constant 1.000000e+00 : f32
    %202 = vector.broadcast %cst_80 : f32 to vector<8x128xf32>
    %203 = arith.addf %202, %201 : vector<8x128xf32>
    %204 = arith.divf %202, %203 : vector<8x128xf32>
    %205 = vector.extract_strided_slice %186 {offsets = [0, 256], sizes = [8, 128], strides = [1, 1]} : vector<8x384xf32> to vector<8x128xf32>
    %206 = vector.extract_strided_slice %188 {offsets = [0, 256], sizes = [8, 128], strides = [1, 1]} : vector<8x384xf32> to vector<8x128xf32>
    %207 = arith.mulf %196, %206 : vector<8x128xf32>
    %208 = arith.addf %205, %207 : vector<8x128xf32>
    %209 = math.tanh %208 : vector<8x128xf32>
    %cst_81 = arith.constant 1.000000e+00 : f32
    %210 = vector.broadcast %cst_81 : f32 to vector<8x128xf32>
    %211 = arith.subf %210, %204 : vector<8x128xf32>
    %212 = arith.mulf %211, %209 : vector<8x128xf32>
    %213 = arith.mulf %204, %143 : vector<8x128xf32>
    %214 = arith.addf %212, %213 : vector<8x128xf32>
    %215 = arith.index_cast %c2_i32 : i32 to index
    %c0_82 = arith.constant 0 : index
    %c0_83 = arith.constant 0 : index
    %216 = vector.load %arg17[%215, %c0_82, %c0_83] : memref<8x8x256xf32, #tpu.memory_space<vmem>>, vector<1x8x128xf32>
    %217 = vector.shape_cast %216 : vector<1x8x128xf32> to vector<8x128xf32>
    %218 = vector.shape_cast %214 : vector<8x128xf32> to vector<1x8x128xf32>
    tpu.vector_store %arg17[%215, %c0_82, %c0_83], %218 {strides = array<i32>} : memref<8x8x256xf32, #tpu.memory_space<vmem>>, vector<1x8x128xf32>,
    %c7_i32_84 = arith.constant 7 : i32
    %219 = arith.subi %c7_i32_84, %c2_i32 : i32
    %220 = arith.index_cast %219 : i32 to index
    %c0_85 = arith.constant 0 : index
    %c0_86 = arith.constant 0 : index
    %221 = vector.load %arg16[%220, %c0_85, %c0_86] : memref<8x8x384xf32, #tpu.memory_space<vmem>>, vector<1x8x384xf32>
    %222 = vector.shape_cast %221 : vector<1x8x384xf32> to vector<8x384xf32>
    %cst_87 = arith.constant dense<0.000000e+00> : vector<8x384xf32>
    %223 = tpu.matmul %179, %33, %cst_87 {dimension_numbers = #tpu.dot_dimension_numbers<[1], [0], [0], [1], [0, 0, 1, 1], [], []>} : vector<8x128xf32>, vector<128x384xf32>, vector<8x384xf32> -> vector<8x384xf32>
    %224 = arith.addf %223, %23 : vector<8x384xf32>
    %225 = vector.extract_strided_slice %222 {offsets = [0, 0], sizes = [8, 128], strides = [1, 1]} : vector<8x384xf32> to vector<8x128xf32>
    %226 = vector.extract_strided_slice %224 {offsets = [0, 0], sizes = [8, 128], strides = [1, 1]} : vector<8x384xf32> to vector<8x128xf32>
    %227 = arith.addf %225, %226 : vector<8x128xf32>
    %228 = arith.negf %227 : vector<8x128xf32>
    %229 = math.exp %228 : vector<8x128xf32>
    %cst_88 = arith.constant 1.000000e+00 : f32
    %230 = vector.broadcast %cst_88 : f32 to vector<8x128xf32>
    %231 = arith.addf %230, %229 : vector<8x128xf32>
    %232 = arith.divf %230, %231 : vector<8x128xf32>
    %233 = vector.extract_strided_slice %222 {offsets = [0, 128], sizes = [8, 128], strides = [1, 1]} : vector<8x384xf32> to vector<8x128xf32>
    %234 = vector.extract_strided_slice %224 {offsets = [0, 128], sizes = [8, 128], strides = [1, 1]} : vector<8x384xf32> to vector<8x128xf32>
    %235 = arith.addf %233, %234 : vector<8x128xf32>
    %236 = arith.negf %235 : vector<8x128xf32>
    %237 = math.exp %236 : vector<8x128xf32>
    %cst_89 = arith.constant 1.000000e+00 : f32
    %238 = vector.broadcast %cst_89 : f32 to vector<8x128xf32>
    %239 = arith.addf %238, %237 : vector<8x128xf32>
    %240 = arith.divf %238, %239 : vector<8x128xf32>
    %241 = vector.extract_strided_slice %222 {offsets = [0, 256], sizes = [8, 128], strides = [1, 1]} : vector<8x384xf32> to vector<8x128xf32>
    %242 = vector.extract_strided_slice %224 {offsets = [0, 256], sizes = [8, 128], strides = [1, 1]} : vector<8x384xf32> to vector<8x128xf32>
    %243 = arith.mulf %232, %242 : vector<8x128xf32>
    %244 = arith.addf %241, %243 : vector<8x128xf32>
    %245 = math.tanh %244 : vector<8x128xf32>
    %cst_90 = arith.constant 1.000000e+00 : f32
    %246 = vector.broadcast %cst_90 : f32 to vector<8x128xf32>
    %247 = arith.subf %246, %240 : vector<8x128xf32>
    %248 = arith.mulf %247, %245 : vector<8x128xf32>
    %249 = arith.mulf %240, %179 : vector<8x128xf32>
    %250 = arith.addf %248, %249 : vector<8x128xf32>
    %251 = arith.index_cast %219 : i32 to index
    %c0_91 = arith.constant 0 : index
    %c128_92 = arith.constant 128 : index
    %252 = vector.load %arg17[%251, %c0_91, %c128_92] : memref<8x8x256xf32, #tpu.memory_space<vmem>>, vector<1x8x128xf32>
    %253 = vector.shape_cast %252 : vector<1x8x128xf32> to vector<8x128xf32>
    %254 = vector.shape_cast %250 : vector<8x128xf32> to vector<1x8x128xf32>
    tpu.vector_store %arg17[%251, %c0_91, %c128_92], %254 {strides = array<i32>} : memref<8x8x256xf32, #tpu.memory_space<vmem>>, vector<1x8x128xf32>,
    %c3_i32 = arith.constant 3 : i32
    %255 = arith.index_cast %c3_i32 : i32 to index
    %c0_93 = arith.constant 0 : index
    %c0_94 = arith.constant 0 : index
    %256 = vector.load %arg15[%255, %c0_93, %c0_94] : memref<8x8x384xf32, #tpu.memory_space<vmem>>, vector<1x8x384xf32>
    %257 = vector.shape_cast %256 : vector<1x8x384xf32> to vector<8x384xf32>
    %cst_95 = arith.constant dense<0.000000e+00> : vector<8x384xf32>
    %258 = tpu.matmul %214, %31, %cst_95 {dimension_numbers = #tpu.dot_dimension_numbers<[1], [0], [0], [1], [0, 0, 1, 1], [], []>} : vector<8x128xf32>, vector<128x384xf32>, vector<8x384xf32> -> vector<8x384xf32>
    %259 = arith.addf %258, %20 : vector<8x384xf32>
    %260 = vector.extract_strided_slice %257 {offsets = [0, 0], sizes = [8, 128], strides = [1, 1]} : vector<8x384xf32> to vector<8x128xf32>
    %261 = vector.extract_strided_slice %259 {offsets = [0, 0], sizes = [8, 128], strides = [1, 1]} : vector<8x384xf32> to vector<8x128xf32>
    %262 = arith.addf %260, %261 : vector<8x128xf32>
    %263 = arith.negf %262 : vector<8x128xf32>
    %264 = math.exp %263 : vector<8x128xf32>
    %cst_96 = arith.constant 1.000000e+00 : f32
    %265 = vector.broadcast %cst_96 : f32 to vector<8x128xf32>
    %266 = arith.addf %265, %264 : vector<8x128xf32>
    %267 = arith.divf %265, %266 : vector<8x128xf32>
    %268 = vector.extract_strided_slice %257 {offsets = [0, 128], sizes = [8, 128], strides = [1, 1]} : vector<8x384xf32> to vector<8x128xf32>
    %269 = vector.extract_strided_slice %259 {offsets = [0, 128], sizes = [8, 128], strides = [1, 1]} : vector<8x384xf32> to vector<8x128xf32>
    %270 = arith.addf %268, %269 : vector<8x128xf32>
    %271 = arith.negf %270 : vector<8x128xf32>
    %272 = math.exp %271 : vector<8x128xf32>
    %cst_97 = arith.constant 1.000000e+00 : f32
    %273 = vector.broadcast %cst_97 : f32 to vector<8x128xf32>
    %274 = arith.addf %273, %272 : vector<8x128xf32>
    %275 = arith.divf %273, %274 : vector<8x128xf32>
    %276 = vector.extract_strided_slice %257 {offsets = [0, 256], sizes = [8, 128], strides = [1, 1]} : vector<8x384xf32> to vector<8x128xf32>
    %277 = vector.extract_strided_slice %259 {offsets = [0, 256], sizes = [8, 128], strides = [1, 1]} : vector<8x384xf32> to vector<8x128xf32>
    %278 = arith.mulf %267, %277 : vector<8x128xf32>
    %279 = arith.addf %276, %278 : vector<8x128xf32>
    %280 = math.tanh %279 : vector<8x128xf32>
    %cst_98 = arith.constant 1.000000e+00 : f32
    %281 = vector.broadcast %cst_98 : f32 to vector<8x128xf32>
    %282 = arith.subf %281, %275 : vector<8x128xf32>
    %283 = arith.mulf %282, %280 : vector<8x128xf32>
    %284 = arith.mulf %275, %214 : vector<8x128xf32>
    %285 = arith.addf %283, %284 : vector<8x128xf32>
    %286 = arith.index_cast %c3_i32 : i32 to index
    %c0_99 = arith.constant 0 : index
    %c0_100 = arith.constant 0 : index
    %287 = vector.load %arg17[%286, %c0_99, %c0_100] : memref<8x8x256xf32, #tpu.memory_space<vmem>>, vector<1x8x128xf32>
    %288 = vector.shape_cast %287 : vector<1x8x128xf32> to vector<8x128xf32>
    %289 = vector.shape_cast %285 : vector<8x128xf32> to vector<1x8x128xf32>
    tpu.vector_store %arg17[%286, %c0_99, %c0_100], %289 {strides = array<i32>} : memref<8x8x256xf32, #tpu.memory_space<vmem>>, vector<1x8x128xf32>,
    %c7_i32_101 = arith.constant 7 : i32
    %290 = arith.subi %c7_i32_101, %c3_i32 : i32
    %291 = arith.index_cast %290 : i32 to index
    %c0_102 = arith.constant 0 : index
    %c0_103 = arith.constant 0 : index
    %292 = vector.load %arg16[%291, %c0_102, %c0_103] : memref<8x8x384xf32, #tpu.memory_space<vmem>>, vector<1x8x384xf32>
    %293 = vector.shape_cast %292 : vector<1x8x384xf32> to vector<8x384xf32>
    %cst_104 = arith.constant dense<0.000000e+00> : vector<8x384xf32>
    %294 = tpu.matmul %250, %33, %cst_104 {dimension_numbers = #tpu.dot_dimension_numbers<[1], [0], [0], [1], [0, 0, 1, 1], [], []>} : vector<8x128xf32>, vector<128x384xf32>, vector<8x384xf32> -> vector<8x384xf32>
    %295 = arith.addf %294, %23 : vector<8x384xf32>
    %296 = vector.extract_strided_slice %293 {offsets = [0, 0], sizes = [8, 128], strides = [1, 1]} : vector<8x384xf32> to vector<8x128xf32>
    %297 = vector.extract_strided_slice %295 {offsets = [0, 0], sizes = [8, 128], strides = [1, 1]} : vector<8x384xf32> to vector<8x128xf32>
    %298 = arith.addf %296, %297 : vector<8x128xf32>
    %299 = arith.negf %298 : vector<8x128xf32>
    %300 = math.exp %299 : vector<8x128xf32>
    %cst_105 = arith.constant 1.000000e+00 : f32
    %301 = vector.broadcast %cst_105 : f32 to vector<8x128xf32>
    %302 = arith.addf %301, %300 : vector<8x128xf32>
    %303 = arith.divf %301, %302 : vector<8x128xf32>
    %304 = vector.extract_strided_slice %293 {offsets = [0, 128], sizes = [8, 128], strides = [1, 1]} : vector<8x384xf32> to vector<8x128xf32>
    %305 = vector.extract_strided_slice %295 {offsets = [0, 128], sizes = [8, 128], strides = [1, 1]} : vector<8x384xf32> to vector<8x128xf32>
    %306 = arith.addf %304, %305 : vector<8x128xf32>
    %307 = arith.negf %306 : vector<8x128xf32>
    %308 = math.exp %307 : vector<8x128xf32>
    %cst_106 = arith.constant 1.000000e+00 : f32
    %309 = vector.broadcast %cst_106 : f32 to vector<8x128xf32>
    %310 = arith.addf %309, %308 : vector<8x128xf32>
    %311 = arith.divf %309, %310 : vector<8x128xf32>
    %312 = vector.extract_strided_slice %293 {offsets = [0, 256], sizes = [8, 128], strides = [1, 1]} : vector<8x384xf32> to vector<8x128xf32>
    %313 = vector.extract_strided_slice %295 {offsets = [0, 256], sizes = [8, 128], strides = [1, 1]} : vector<8x384xf32> to vector<8x128xf32>
    %314 = arith.mulf %303, %313 : vector<8x128xf32>
    %315 = arith.addf %312, %314 : vector<8x128xf32>
    %316 = math.tanh %315 : vector<8x128xf32>
    %cst_107 = arith.constant 1.000000e+00 : f32
    %317 = vector.broadcast %cst_107 : f32 to vector<8x128xf32>
    %318 = arith.subf %317, %311 : vector<8x128xf32>
    %319 = arith.mulf %318, %316 : vector<8x128xf32>
    %320 = arith.mulf %311, %250 : vector<8x128xf32>
    %321 = arith.addf %319, %320 : vector<8x128xf32>
    %322 = arith.index_cast %290 : i32 to index
    %c0_108 = arith.constant 0 : index
    %c128_109 = arith.constant 128 : index
    %323 = vector.load %arg17[%322, %c0_108, %c128_109] : memref<8x8x256xf32, #tpu.memory_space<vmem>>, vector<1x8x128xf32>
    %324 = vector.shape_cast %323 : vector<1x8x128xf32> to vector<8x128xf32>
    %325 = vector.shape_cast %321 : vector<8x128xf32> to vector<1x8x128xf32>
    tpu.vector_store %arg17[%322, %c0_108, %c128_109], %325 {strides = array<i32>} : memref<8x8x256xf32, #tpu.memory_space<vmem>>, vector<1x8x128xf32>,
    %c4_i32 = arith.constant 4 : i32
    %326 = arith.index_cast %c4_i32 : i32 to index
    %c0_110 = arith.constant 0 : index
    %c0_111 = arith.constant 0 : index
    %327 = vector.load %arg15[%326, %c0_110, %c0_111] : memref<8x8x384xf32, #tpu.memory_space<vmem>>, vector<1x8x384xf32>
    %328 = vector.shape_cast %327 : vector<1x8x384xf32> to vector<8x384xf32>
    %cst_112 = arith.constant dense<0.000000e+00> : vector<8x384xf32>
    %329 = tpu.matmul %285, %31, %cst_112 {dimension_numbers = #tpu.dot_dimension_numbers<[1], [0], [0], [1], [0, 0, 1, 1], [], []>} : vector<8x128xf32>, vector<128x384xf32>, vector<8x384xf32> -> vector<8x384xf32>
    %330 = arith.addf %329, %20 : vector<8x384xf32>
    %331 = vector.extract_strided_slice %328 {offsets = [0, 0], sizes = [8, 128], strides = [1, 1]} : vector<8x384xf32> to vector<8x128xf32>
    %332 = vector.extract_strided_slice %330 {offsets = [0, 0], sizes = [8, 128], strides = [1, 1]} : vector<8x384xf32> to vector<8x128xf32>
    %333 = arith.addf %331, %332 : vector<8x128xf32>
    %334 = arith.negf %333 : vector<8x128xf32>
    %335 = math.exp %334 : vector<8x128xf32>
    %cst_113 = arith.constant 1.000000e+00 : f32
    %336 = vector.broadcast %cst_113 : f32 to vector<8x128xf32>
    %337 = arith.addf %336, %335 : vector<8x128xf32>
    %338 = arith.divf %336, %337 : vector<8x128xf32>
    %339 = vector.extract_strided_slice %328 {offsets = [0, 128], sizes = [8, 128], strides = [1, 1]} : vector<8x384xf32> to vector<8x128xf32>
    %340 = vector.extract_strided_slice %330 {offsets = [0, 128], sizes = [8, 128], strides = [1, 1]} : vector<8x384xf32> to vector<8x128xf32>
    %341 = arith.addf %339, %340 : vector<8x128xf32>
    %342 = arith.negf %341 : vector<8x128xf32>
    %343 = math.exp %342 : vector<8x128xf32>
    %cst_114 = arith.constant 1.000000e+00 : f32
    %344 = vector.broadcast %cst_114 : f32 to vector<8x128xf32>
    %345 = arith.addf %344, %343 : vector<8x128xf32>
    %346 = arith.divf %344, %345 : vector<8x128xf32>
    %347 = vector.extract_strided_slice %328 {offsets = [0, 256], sizes = [8, 128], strides = [1, 1]} : vector<8x384xf32> to vector<8x128xf32>
    %348 = vector.extract_strided_slice %330 {offsets = [0, 256], sizes = [8, 128], strides = [1, 1]} : vector<8x384xf32> to vector<8x128xf32>
    %349 = arith.mulf %338, %348 : vector<8x128xf32>
    %350 = arith.addf %347, %349 : vector<8x128xf32>
    %351 = math.tanh %350 : vector<8x128xf32>
    %cst_115 = arith.constant 1.000000e+00 : f32
    %352 = vector.broadcast %cst_115 : f32 to vector<8x128xf32>
    %353 = arith.subf %352, %346 : vector<8x128xf32>
    %354 = arith.mulf %353, %351 : vector<8x128xf32>
    %355 = arith.mulf %346, %285 : vector<8x128xf32>
    %356 = arith.addf %354, %355 : vector<8x128xf32>
    %357 = arith.index_cast %c4_i32 : i32 to index
    %c0_116 = arith.constant 0 : index
    %c0_117 = arith.constant 0 : index
    %358 = vector.load %arg17[%357, %c0_116, %c0_117] : memref<8x8x256xf32, #tpu.memory_space<vmem>>, vector<1x8x128xf32>
    %359 = vector.shape_cast %358 : vector<1x8x128xf32> to vector<8x128xf32>
    %360 = vector.shape_cast %356 : vector<8x128xf32> to vector<1x8x128xf32>
    tpu.vector_store %arg17[%357, %c0_116, %c0_117], %360 {strides = array<i32>} : memref<8x8x256xf32, #tpu.memory_space<vmem>>, vector<1x8x128xf32>,
    %c7_i32_118 = arith.constant 7 : i32
    %361 = arith.subi %c7_i32_118, %c4_i32 : i32
    %362 = arith.index_cast %361 : i32 to index
    %c0_119 = arith.constant 0 : index
    %c0_120 = arith.constant 0 : index
    %363 = vector.load %arg16[%362, %c0_119, %c0_120] : memref<8x8x384xf32, #tpu.memory_space<vmem>>, vector<1x8x384xf32>
    %364 = vector.shape_cast %363 : vector<1x8x384xf32> to vector<8x384xf32>
    %cst_121 = arith.constant dense<0.000000e+00> : vector<8x384xf32>
    %365 = tpu.matmul %321, %33, %cst_121 {dimension_numbers = #tpu.dot_dimension_numbers<[1], [0], [0], [1], [0, 0, 1, 1], [], []>} : vector<8x128xf32>, vector<128x384xf32>, vector<8x384xf32> -> vector<8x384xf32>
    %366 = arith.addf %365, %23 : vector<8x384xf32>
    %367 = vector.extract_strided_slice %364 {offsets = [0, 0], sizes = [8, 128], strides = [1, 1]} : vector<8x384xf32> to vector<8x128xf32>
    %368 = vector.extract_strided_slice %366 {offsets = [0, 0], sizes = [8, 128], strides = [1, 1]} : vector<8x384xf32> to vector<8x128xf32>
    %369 = arith.addf %367, %368 : vector<8x128xf32>
    %370 = arith.negf %369 : vector<8x128xf32>
    %371 = math.exp %370 : vector<8x128xf32>
    %cst_122 = arith.constant 1.000000e+00 : f32
    %372 = vector.broadcast %cst_122 : f32 to vector<8x128xf32>
    %373 = arith.addf %372, %371 : vector<8x128xf32>
    %374 = arith.divf %372, %373 : vector<8x128xf32>
    %375 = vector.extract_strided_slice %364 {offsets = [0, 128], sizes = [8, 128], strides = [1, 1]} : vector<8x384xf32> to vector<8x128xf32>
    %376 = vector.extract_strided_slice %366 {offsets = [0, 128], sizes = [8, 128], strides = [1, 1]} : vector<8x384xf32> to vector<8x128xf32>
    %377 = arith.addf %375, %376 : vector<8x128xf32>
    %378 = arith.negf %377 : vector<8x128xf32>
    %379 = math.exp %378 : vector<8x128xf32>
    %cst_123 = arith.constant 1.000000e+00 : f32
    %380 = vector.broadcast %cst_123 : f32 to vector<8x128xf32>
    %381 = arith.addf %380, %379 : vector<8x128xf32>
    %382 = arith.divf %380, %381 : vector<8x128xf32>
    %383 = vector.extract_strided_slice %364 {offsets = [0, 256], sizes = [8, 128], strides = [1, 1]} : vector<8x384xf32> to vector<8x128xf32>
    %384 = vector.extract_strided_slice %366 {offsets = [0, 256], sizes = [8, 128], strides = [1, 1]} : vector<8x384xf32> to vector<8x128xf32>
    %385 = arith.mulf %374, %384 : vector<8x128xf32>
    %386 = arith.addf %383, %385 : vector<8x128xf32>
    %387 = math.tanh %386 : vector<8x128xf32>
    %cst_124 = arith.constant 1.000000e+00 : f32
    %388 = vector.broadcast %cst_124 : f32 to vector<8x128xf32>
    %389 = arith.subf %388, %382 : vector<8x128xf32>
    %390 = arith.mulf %389, %387 : vector<8x128xf32>
    %391 = arith.mulf %382, %321 : vector<8x128xf32>
    %392 = arith.addf %390, %391 : vector<8x128xf32>
    %393 = arith.index_cast %361 : i32 to index
    %c0_125 = arith.constant 0 : index
    %c128_126 = arith.constant 128 : index
    %394 = vector.load %arg17[%393, %c0_125, %c128_126] : memref<8x8x256xf32, #tpu.memory_space<vmem>>, vector<1x8x128xf32>
    %395 = vector.shape_cast %394 : vector<1x8x128xf32> to vector<8x128xf32>
    %396 = vector.shape_cast %392 : vector<8x128xf32> to vector<1x8x128xf32>
    tpu.vector_store %arg17[%393, %c0_125, %c128_126], %396 {strides = array<i32>} : memref<8x8x256xf32, #tpu.memory_space<vmem>>, vector<1x8x128xf32>,
    %c5_i32 = arith.constant 5 : i32
    %397 = arith.index_cast %c5_i32 : i32 to index
    %c0_127 = arith.constant 0 : index
    %c0_128 = arith.constant 0 : index
    %398 = vector.load %arg15[%397, %c0_127, %c0_128] : memref<8x8x384xf32, #tpu.memory_space<vmem>>, vector<1x8x384xf32>
    %399 = vector.shape_cast %398 : vector<1x8x384xf32> to vector<8x384xf32>
    %cst_129 = arith.constant dense<0.000000e+00> : vector<8x384xf32>
    %400 = tpu.matmul %356, %31, %cst_129 {dimension_numbers = #tpu.dot_dimension_numbers<[1], [0], [0], [1], [0, 0, 1, 1], [], []>} : vector<8x128xf32>, vector<128x384xf32>, vector<8x384xf32> -> vector<8x384xf32>
    %401 = arith.addf %400, %20 : vector<8x384xf32>
    %402 = vector.extract_strided_slice %399 {offsets = [0, 0], sizes = [8, 128], strides = [1, 1]} : vector<8x384xf32> to vector<8x128xf32>
    %403 = vector.extract_strided_slice %401 {offsets = [0, 0], sizes = [8, 128], strides = [1, 1]} : vector<8x384xf32> to vector<8x128xf32>
    %404 = arith.addf %402, %403 : vector<8x128xf32>
    %405 = arith.negf %404 : vector<8x128xf32>
    %406 = math.exp %405 : vector<8x128xf32>
    %cst_130 = arith.constant 1.000000e+00 : f32
    %407 = vector.broadcast %cst_130 : f32 to vector<8x128xf32>
    %408 = arith.addf %407, %406 : vector<8x128xf32>
    %409 = arith.divf %407, %408 : vector<8x128xf32>
    %410 = vector.extract_strided_slice %399 {offsets = [0, 128], sizes = [8, 128], strides = [1, 1]} : vector<8x384xf32> to vector<8x128xf32>
    %411 = vector.extract_strided_slice %401 {offsets = [0, 128], sizes = [8, 128], strides = [1, 1]} : vector<8x384xf32> to vector<8x128xf32>
    %412 = arith.addf %410, %411 : vector<8x128xf32>
    %413 = arith.negf %412 : vector<8x128xf32>
    %414 = math.exp %413 : vector<8x128xf32>
    %cst_131 = arith.constant 1.000000e+00 : f32
    %415 = vector.broadcast %cst_131 : f32 to vector<8x128xf32>
    %416 = arith.addf %415, %414 : vector<8x128xf32>
    %417 = arith.divf %415, %416 : vector<8x128xf32>
    %418 = vector.extract_strided_slice %399 {offsets = [0, 256], sizes = [8, 128], strides = [1, 1]} : vector<8x384xf32> to vector<8x128xf32>
    %419 = vector.extract_strided_slice %401 {offsets = [0, 256], sizes = [8, 128], strides = [1, 1]} : vector<8x384xf32> to vector<8x128xf32>
    %420 = arith.mulf %409, %419 : vector<8x128xf32>
    %421 = arith.addf %418, %420 : vector<8x128xf32>
    %422 = math.tanh %421 : vector<8x128xf32>
    %cst_132 = arith.constant 1.000000e+00 : f32
    %423 = vector.broadcast %cst_132 : f32 to vector<8x128xf32>
    %424 = arith.subf %423, %417 : vector<8x128xf32>
    %425 = arith.mulf %424, %422 : vector<8x128xf32>
    %426 = arith.mulf %417, %356 : vector<8x128xf32>
    %427 = arith.addf %425, %426 : vector<8x128xf32>
    %428 = arith.index_cast %c5_i32 : i32 to index
    %c0_133 = arith.constant 0 : index
    %c0_134 = arith.constant 0 : index
    %429 = vector.load %arg17[%428, %c0_133, %c0_134] : memref<8x8x256xf32, #tpu.memory_space<vmem>>, vector<1x8x128xf32>
    %430 = vector.shape_cast %429 : vector<1x8x128xf32> to vector<8x128xf32>
    %431 = vector.shape_cast %427 : vector<8x128xf32> to vector<1x8x128xf32>
    tpu.vector_store %arg17[%428, %c0_133, %c0_134], %431 {strides = array<i32>} : memref<8x8x256xf32, #tpu.memory_space<vmem>>, vector<1x8x128xf32>,
    %c7_i32_135 = arith.constant 7 : i32
    %432 = arith.subi %c7_i32_135, %c5_i32 : i32
    %433 = arith.index_cast %432 : i32 to index
    %c0_136 = arith.constant 0 : index
    %c0_137 = arith.constant 0 : index
    %434 = vector.load %arg16[%433, %c0_136, %c0_137] : memref<8x8x384xf32, #tpu.memory_space<vmem>>, vector<1x8x384xf32>
    %435 = vector.shape_cast %434 : vector<1x8x384xf32> to vector<8x384xf32>
    %cst_138 = arith.constant dense<0.000000e+00> : vector<8x384xf32>
    %436 = tpu.matmul %392, %33, %cst_138 {dimension_numbers = #tpu.dot_dimension_numbers<[1], [0], [0], [1], [0, 0, 1, 1], [], []>} : vector<8x128xf32>, vector<128x384xf32>, vector<8x384xf32> -> vector<8x384xf32>
    %437 = arith.addf %436, %23 : vector<8x384xf32>
    %438 = vector.extract_strided_slice %435 {offsets = [0, 0], sizes = [8, 128], strides = [1, 1]} : vector<8x384xf32> to vector<8x128xf32>
    %439 = vector.extract_strided_slice %437 {offsets = [0, 0], sizes = [8, 128], strides = [1, 1]} : vector<8x384xf32> to vector<8x128xf32>
    %440 = arith.addf %438, %439 : vector<8x128xf32>
    %441 = arith.negf %440 : vector<8x128xf32>
    %442 = math.exp %441 : vector<8x128xf32>
    %cst_139 = arith.constant 1.000000e+00 : f32
    %443 = vector.broadcast %cst_139 : f32 to vector<8x128xf32>
    %444 = arith.addf %443, %442 : vector<8x128xf32>
    %445 = arith.divf %443, %444 : vector<8x128xf32>
    %446 = vector.extract_strided_slice %435 {offsets = [0, 128], sizes = [8, 128], strides = [1, 1]} : vector<8x384xf32> to vector<8x128xf32>
    %447 = vector.extract_strided_slice %437 {offsets = [0, 128], sizes = [8, 128], strides = [1, 1]} : vector<8x384xf32> to vector<8x128xf32>
    %448 = arith.addf %446, %447 : vector<8x128xf32>
    %449 = arith.negf %448 : vector<8x128xf32>
    %450 = math.exp %449 : vector<8x128xf32>
    %cst_140 = arith.constant 1.000000e+00 : f32
    %451 = vector.broadcast %cst_140 : f32 to vector<8x128xf32>
    %452 = arith.addf %451, %450 : vector<8x128xf32>
    %453 = arith.divf %451, %452 : vector<8x128xf32>
    %454 = vector.extract_strided_slice %435 {offsets = [0, 256], sizes = [8, 128], strides = [1, 1]} : vector<8x384xf32> to vector<8x128xf32>
    %455 = vector.extract_strided_slice %437 {offsets = [0, 256], sizes = [8, 128], strides = [1, 1]} : vector<8x384xf32> to vector<8x128xf32>
    %456 = arith.mulf %445, %455 : vector<8x128xf32>
    %457 = arith.addf %454, %456 : vector<8x128xf32>
    %458 = math.tanh %457 : vector<8x128xf32>
    %cst_141 = arith.constant 1.000000e+00 : f32
    %459 = vector.broadcast %cst_141 : f32 to vector<8x128xf32>
    %460 = arith.subf %459, %453 : vector<8x128xf32>
    %461 = arith.mulf %460, %458 : vector<8x128xf32>
    %462 = arith.mulf %453, %392 : vector<8x128xf32>
    %463 = arith.addf %461, %462 : vector<8x128xf32>
    %464 = arith.index_cast %432 : i32 to index
    %c0_142 = arith.constant 0 : index
    %c128_143 = arith.constant 128 : index
    %465 = vector.load %arg17[%464, %c0_142, %c128_143] : memref<8x8x256xf32, #tpu.memory_space<vmem>>, vector<1x8x128xf32>
    %466 = vector.shape_cast %465 : vector<1x8x128xf32> to vector<8x128xf32>
    %467 = vector.shape_cast %463 : vector<8x128xf32> to vector<1x8x128xf32>
    tpu.vector_store %arg17[%464, %c0_142, %c128_143], %467 {strides = array<i32>} : memref<8x8x256xf32, #tpu.memory_space<vmem>>, vector<1x8x128xf32>,
    %c6_i32 = arith.constant 6 : i32
    %468 = arith.index_cast %c6_i32 : i32 to index
    %c0_144 = arith.constant 0 : index
    %c0_145 = arith.constant 0 : index
    %469 = vector.load %arg15[%468, %c0_144, %c0_145] : memref<8x8x384xf32, #tpu.memory_space<vmem>>, vector<1x8x384xf32>
    %470 = vector.shape_cast %469 : vector<1x8x384xf32> to vector<8x384xf32>
    %cst_146 = arith.constant dense<0.000000e+00> : vector<8x384xf32>
    %471 = tpu.matmul %427, %31, %cst_146 {dimension_numbers = #tpu.dot_dimension_numbers<[1], [0], [0], [1], [0, 0, 1, 1], [], []>} : vector<8x128xf32>, vector<128x384xf32>, vector<8x384xf32> -> vector<8x384xf32>
    %472 = arith.addf %471, %20 : vector<8x384xf32>
    %473 = vector.extract_strided_slice %470 {offsets = [0, 0], sizes = [8, 128], strides = [1, 1]} : vector<8x384xf32> to vector<8x128xf32>
    %474 = vector.extract_strided_slice %472 {offsets = [0, 0], sizes = [8, 128], strides = [1, 1]} : vector<8x384xf32> to vector<8x128xf32>
    %475 = arith.addf %473, %474 : vector<8x128xf32>
    %476 = arith.negf %475 : vector<8x128xf32>
    %477 = math.exp %476 : vector<8x128xf32>
    %cst_147 = arith.constant 1.000000e+00 : f32
    %478 = vector.broadcast %cst_147 : f32 to vector<8x128xf32>
    %479 = arith.addf %478, %477 : vector<8x128xf32>
    %480 = arith.divf %478, %479 : vector<8x128xf32>
    %481 = vector.extract_strided_slice %470 {offsets = [0, 128], sizes = [8, 128], strides = [1, 1]} : vector<8x384xf32> to vector<8x128xf32>
    %482 = vector.extract_strided_slice %472 {offsets = [0, 128], sizes = [8, 128], strides = [1, 1]} : vector<8x384xf32> to vector<8x128xf32>
    %483 = arith.addf %481, %482 : vector<8x128xf32>
    %484 = arith.negf %483 : vector<8x128xf32>
    %485 = math.exp %484 : vector<8x128xf32>
    %cst_148 = arith.constant 1.000000e+00 : f32
    %486 = vector.broadcast %cst_148 : f32 to vector<8x128xf32>
    %487 = arith.addf %486, %485 : vector<8x128xf32>
    %488 = arith.divf %486, %487 : vector<8x128xf32>
    %489 = vector.extract_strided_slice %470 {offsets = [0, 256], sizes = [8, 128], strides = [1, 1]} : vector<8x384xf32> to vector<8x128xf32>
    %490 = vector.extract_strided_slice %472 {offsets = [0, 256], sizes = [8, 128], strides = [1, 1]} : vector<8x384xf32> to vector<8x128xf32>
    %491 = arith.mulf %480, %490 : vector<8x128xf32>
    %492 = arith.addf %489, %491 : vector<8x128xf32>
    %493 = math.tanh %492 : vector<8x128xf32>
    %cst_149 = arith.constant 1.000000e+00 : f32
    %494 = vector.broadcast %cst_149 : f32 to vector<8x128xf32>
    %495 = arith.subf %494, %488 : vector<8x128xf32>
    %496 = arith.mulf %495, %493 : vector<8x128xf32>
    %497 = arith.mulf %488, %427 : vector<8x128xf32>
    %498 = arith.addf %496, %497 : vector<8x128xf32>
    %499 = arith.index_cast %c6_i32 : i32 to index
    %c0_150 = arith.constant 0 : index
    %c0_151 = arith.constant 0 : index
    %500 = vector.load %arg17[%499, %c0_150, %c0_151] : memref<8x8x256xf32, #tpu.memory_space<vmem>>, vector<1x8x128xf32>
    %501 = vector.shape_cast %500 : vector<1x8x128xf32> to vector<8x128xf32>
    %502 = vector.shape_cast %498 : vector<8x128xf32> to vector<1x8x128xf32>
    tpu.vector_store %arg17[%499, %c0_150, %c0_151], %502 {strides = array<i32>} : memref<8x8x256xf32, #tpu.memory_space<vmem>>, vector<1x8x128xf32>,
    %c7_i32_152 = arith.constant 7 : i32
    %503 = arith.subi %c7_i32_152, %c6_i32 : i32
    %504 = arith.index_cast %503 : i32 to index
    %c0_153 = arith.constant 0 : index
    %c0_154 = arith.constant 0 : index
    %505 = vector.load %arg16[%504, %c0_153, %c0_154] : memref<8x8x384xf32, #tpu.memory_space<vmem>>, vector<1x8x384xf32>
    %506 = vector.shape_cast %505 : vector<1x8x384xf32> to vector<8x384xf32>
    %cst_155 = arith.constant dense<0.000000e+00> : vector<8x384xf32>
    %507 = tpu.matmul %463, %33, %cst_155 {dimension_numbers = #tpu.dot_dimension_numbers<[1], [0], [0], [1], [0, 0, 1, 1], [], []>} : vector<8x128xf32>, vector<128x384xf32>, vector<8x384xf32> -> vector<8x384xf32>
    %508 = arith.addf %507, %23 : vector<8x384xf32>
    %509 = vector.extract_strided_slice %506 {offsets = [0, 0], sizes = [8, 128], strides = [1, 1]} : vector<8x384xf32> to vector<8x128xf32>
    %510 = vector.extract_strided_slice %508 {offsets = [0, 0], sizes = [8, 128], strides = [1, 1]} : vector<8x384xf32> to vector<8x128xf32>
    %511 = arith.addf %509, %510 : vector<8x128xf32>
    %512 = arith.negf %511 : vector<8x128xf32>
    %513 = math.exp %512 : vector<8x128xf32>
    %cst_156 = arith.constant 1.000000e+00 : f32
    %514 = vector.broadcast %cst_156 : f32 to vector<8x128xf32>
    %515 = arith.addf %514, %513 : vector<8x128xf32>
    %516 = arith.divf %514, %515 : vector<8x128xf32>
    %517 = vector.extract_strided_slice %506 {offsets = [0, 128], sizes = [8, 128], strides = [1, 1]} : vector<8x384xf32> to vector<8x128xf32>
    %518 = vector.extract_strided_slice %508 {offsets = [0, 128], sizes = [8, 128], strides = [1, 1]} : vector<8x384xf32> to vector<8x128xf32>
    %519 = arith.addf %517, %518 : vector<8x128xf32>
    %520 = arith.negf %519 : vector<8x128xf32>
    %521 = math.exp %520 : vector<8x128xf32>
    %cst_157 = arith.constant 1.000000e+00 : f32
    %522 = vector.broadcast %cst_157 : f32 to vector<8x128xf32>
    %523 = arith.addf %522, %521 : vector<8x128xf32>
    %524 = arith.divf %522, %523 : vector<8x128xf32>
    %525 = vector.extract_strided_slice %506 {offsets = [0, 256], sizes = [8, 128], strides = [1, 1]} : vector<8x384xf32> to vector<8x128xf32>
    %526 = vector.extract_strided_slice %508 {offsets = [0, 256], sizes = [8, 128], strides = [1, 1]} : vector<8x384xf32> to vector<8x128xf32>
    %527 = arith.mulf %516, %526 : vector<8x128xf32>
    %528 = arith.addf %525, %527 : vector<8x128xf32>
    %529 = math.tanh %528 : vector<8x128xf32>
    %cst_158 = arith.constant 1.000000e+00 : f32
    %530 = vector.broadcast %cst_158 : f32 to vector<8x128xf32>
    %531 = arith.subf %530, %524 : vector<8x128xf32>
    %532 = arith.mulf %531, %529 : vector<8x128xf32>
    %533 = arith.mulf %524, %463 : vector<8x128xf32>
    %534 = arith.addf %532, %533 : vector<8x128xf32>
    %535 = arith.index_cast %503 : i32 to index
    %c0_159 = arith.constant 0 : index
    %c128_160 = arith.constant 128 : index
    %536 = vector.load %arg17[%535, %c0_159, %c128_160] : memref<8x8x256xf32, #tpu.memory_space<vmem>>, vector<1x8x128xf32>
    %537 = vector.shape_cast %536 : vector<1x8x128xf32> to vector<8x128xf32>
    %538 = vector.shape_cast %534 : vector<8x128xf32> to vector<1x8x128xf32>
    tpu.vector_store %arg17[%535, %c0_159, %c128_160], %538 {strides = array<i32>} : memref<8x8x256xf32, #tpu.memory_space<vmem>>, vector<1x8x128xf32>,
    %c7_i32_161 = arith.constant 7 : i32
    %539 = arith.index_cast %c7_i32_161 : i32 to index
    %c0_162 = arith.constant 0 : index
    %c0_163 = arith.constant 0 : index
    %540 = vector.load %arg15[%539, %c0_162, %c0_163] : memref<8x8x384xf32, #tpu.memory_space<vmem>>, vector<1x8x384xf32>
    %541 = vector.shape_cast %540 : vector<1x8x384xf32> to vector<8x384xf32>
    %cst_164 = arith.constant dense<0.000000e+00> : vector<8x384xf32>
    %542 = tpu.matmul %498, %31, %cst_164 {dimension_numbers = #tpu.dot_dimension_numbers<[1], [0], [0], [1], [0, 0, 1, 1], [], []>} : vector<8x128xf32>, vector<128x384xf32>, vector<8x384xf32> -> vector<8x384xf32>
    %543 = arith.addf %542, %20 : vector<8x384xf32>
    %544 = vector.extract_strided_slice %541 {offsets = [0, 0], sizes = [8, 128], strides = [1, 1]} : vector<8x384xf32> to vector<8x128xf32>
    %545 = vector.extract_strided_slice %543 {offsets = [0, 0], sizes = [8, 128], strides = [1, 1]} : vector<8x384xf32> to vector<8x128xf32>
    %546 = arith.addf %544, %545 : vector<8x128xf32>
    %547 = arith.negf %546 : vector<8x128xf32>
    %548 = math.exp %547 : vector<8x128xf32>
    %cst_165 = arith.constant 1.000000e+00 : f32
    %549 = vector.broadcast %cst_165 : f32 to vector<8x128xf32>
    %550 = arith.addf %549, %548 : vector<8x128xf32>
    %551 = arith.divf %549, %550 : vector<8x128xf32>
    %552 = vector.extract_strided_slice %541 {offsets = [0, 128], sizes = [8, 128], strides = [1, 1]} : vector<8x384xf32> to vector<8x128xf32>
    %553 = vector.extract_strided_slice %543 {offsets = [0, 128], sizes = [8, 128], strides = [1, 1]} : vector<8x384xf32> to vector<8x128xf32>
    %554 = arith.addf %552, %553 : vector<8x128xf32>
    %555 = arith.negf %554 : vector<8x128xf32>
    %556 = math.exp %555 : vector<8x128xf32>
    %cst_166 = arith.constant 1.000000e+00 : f32
    %557 = vector.broadcast %cst_166 : f32 to vector<8x128xf32>
    %558 = arith.addf %557, %556 : vector<8x128xf32>
    %559 = arith.divf %557, %558 : vector<8x128xf32>
    %560 = vector.extract_strided_slice %541 {offsets = [0, 256], sizes = [8, 128], strides = [1, 1]} : vector<8x384xf32> to vector<8x128xf32>
    %561 = vector.extract_strided_slice %543 {offsets = [0, 256], sizes = [8, 128], strides = [1, 1]} : vector<8x384xf32> to vector<8x128xf32>
    %562 = arith.mulf %551, %561 : vector<8x128xf32>
    %563 = arith.addf %560, %562 : vector<8x128xf32>
    %564 = math.tanh %563 : vector<8x128xf32>
    %cst_167 = arith.constant 1.000000e+00 : f32
    %565 = vector.broadcast %cst_167 : f32 to vector<8x128xf32>
    %566 = arith.subf %565, %559 : vector<8x128xf32>
    %567 = arith.mulf %566, %564 : vector<8x128xf32>
    %568 = arith.mulf %559, %498 : vector<8x128xf32>
    %569 = arith.addf %567, %568 : vector<8x128xf32>
    %570 = arith.index_cast %c7_i32_161 : i32 to index
    %c0_168 = arith.constant 0 : index
    %c0_169 = arith.constant 0 : index
    %571 = vector.load %arg17[%570, %c0_168, %c0_169] : memref<8x8x256xf32, #tpu.memory_space<vmem>>, vector<1x8x128xf32>
    %572 = vector.shape_cast %571 : vector<1x8x128xf32> to vector<8x128xf32>
    %573 = vector.shape_cast %569 : vector<8x128xf32> to vector<1x8x128xf32>
    tpu.vector_store %arg17[%570, %c0_168, %c0_169], %573 {strides = array<i32>} : memref<8x8x256xf32, #tpu.memory_space<vmem>>, vector<1x8x128xf32>,
    %c7_i32_170 = arith.constant 7 : i32
    %574 = arith.subi %c7_i32_170, %c7_i32_161 : i32
    %575 = arith.index_cast %574 : i32 to index
    %c0_171 = arith.constant 0 : index
    %c0_172 = arith.constant 0 : index
    %576 = vector.load %arg16[%575, %c0_171, %c0_172] : memref<8x8x384xf32, #tpu.memory_space<vmem>>, vector<1x8x384xf32>
    %577 = vector.shape_cast %576 : vector<1x8x384xf32> to vector<8x384xf32>
    %cst_173 = arith.constant dense<0.000000e+00> : vector<8x384xf32>
    %578 = tpu.matmul %534, %33, %cst_173 {dimension_numbers = #tpu.dot_dimension_numbers<[1], [0], [0], [1], [0, 0, 1, 1], [], []>} : vector<8x128xf32>, vector<128x384xf32>, vector<8x384xf32> -> vector<8x384xf32>
    %579 = arith.addf %578, %23 : vector<8x384xf32>
    %580 = vector.extract_strided_slice %577 {offsets = [0, 0], sizes = [8, 128], strides = [1, 1]} : vector<8x384xf32> to vector<8x128xf32>
    %581 = vector.extract_strided_slice %579 {offsets = [0, 0], sizes = [8, 128], strides = [1, 1]} : vector<8x384xf32> to vector<8x128xf32>
    %582 = arith.addf %580, %581 : vector<8x128xf32>
    %583 = arith.negf %582 : vector<8x128xf32>
    %584 = math.exp %583 : vector<8x128xf32>
    %cst_174 = arith.constant 1.000000e+00 : f32
    %585 = vector.broadcast %cst_174 : f32 to vector<8x128xf32>
    %586 = arith.addf %585, %584 : vector<8x128xf32>
    %587 = arith.divf %585, %586 : vector<8x128xf32>
    %588 = vector.extract_strided_slice %577 {offsets = [0, 128], sizes = [8, 128], strides = [1, 1]} : vector<8x384xf32> to vector<8x128xf32>
    %589 = vector.extract_strided_slice %579 {offsets = [0, 128], sizes = [8, 128], strides = [1, 1]} : vector<8x384xf32> to vector<8x128xf32>
    %590 = arith.addf %588, %589 : vector<8x128xf32>
    %591 = arith.negf %590 : vector<8x128xf32>
    %592 = math.exp %591 : vector<8x128xf32>
    %cst_175 = arith.constant 1.000000e+00 : f32
    %593 = vector.broadcast %cst_175 : f32 to vector<8x128xf32>
    %594 = arith.addf %593, %592 : vector<8x128xf32>
    %595 = arith.divf %593, %594 : vector<8x128xf32>
    %596 = vector.extract_strided_slice %577 {offsets = [0, 256], sizes = [8, 128], strides = [1, 1]} : vector<8x384xf32> to vector<8x128xf32>
    %597 = vector.extract_strided_slice %579 {offsets = [0, 256], sizes = [8, 128], strides = [1, 1]} : vector<8x384xf32> to vector<8x128xf32>
    %598 = arith.mulf %587, %597 : vector<8x128xf32>
    %599 = arith.addf %596, %598 : vector<8x128xf32>
    %600 = math.tanh %599 : vector<8x128xf32>
    %cst_176 = arith.constant 1.000000e+00 : f32
    %601 = vector.broadcast %cst_176 : f32 to vector<8x128xf32>
    %602 = arith.subf %601, %595 : vector<8x128xf32>
    %603 = arith.mulf %602, %600 : vector<8x128xf32>
    %604 = arith.mulf %595, %534 : vector<8x128xf32>
    %605 = arith.addf %603, %604 : vector<8x128xf32>
    %606 = arith.index_cast %574 : i32 to index
    %c0_177 = arith.constant 0 : index
    %c128_178 = arith.constant 128 : index
    %607 = vector.load %arg17[%606, %c0_177, %c128_178] : memref<8x8x256xf32, #tpu.memory_space<vmem>>, vector<1x8x128xf32>
    %608 = vector.shape_cast %607 : vector<1x8x128xf32> to vector<8x128xf32>
    %609 = vector.shape_cast %605 : vector<8x128xf32> to vector<1x8x128xf32>
    tpu.vector_store %arg17[%606, %c0_177, %c128_178], %609 {strides = array<i32>} : memref<8x8x256xf32, #tpu.memory_space<vmem>>, vector<1x8x128xf32>,
    %c8_i32 = arith.constant 8 : i32
    %c0_179 = arith.constant 0 : index
    %c0_180 = arith.constant 0 : index
    %c0_181 = arith.constant 0 : index
    %610 = vector.load %arg17[%c0_179, %c0_180, %c0_181] : memref<8x8x256xf32, #tpu.memory_space<vmem>>, vector<8x8x256xf32>
    %611 = vector.shape_cast %610 : vector<8x8x256xf32> to vector<64x256xf32>
    %c0_182 = arith.constant 0 : index
    %c0_183 = arith.constant 0 : index
    %c0_184 = arith.constant 0 : index
    %612 = vector.load %arg6[%c0_182, %c0_183, %c0_184] : memref<2x256x384xf32, #tpu.memory_space<vmem>>, vector<1x256x384xf32>
    %613 = vector.shape_cast %612 : vector<1x256x384xf32> to vector<256x384xf32>
    %cst_185 = arith.constant dense<0.000000e+00> : vector<64x384xf32>
    %614 = tpu.matmul %611, %613, %cst_185 {dimension_numbers = #tpu.dot_dimension_numbers<[1], [0], [0], [1], [0, 0, 1, 1], [], []>} : vector<64x256xf32>, vector<256x384xf32>, vector<64x384xf32> -> vector<64x384xf32>
    %c0_186 = arith.constant 0 : index
    %c0_187 = arith.constant 0 : index
    %615 = vector.load %arg8[%c0_186, %c0_187] : memref<2x384xf32, #tpu.memory_space<vmem>>, vector<1x384xf32>
    %616 = vector.broadcast %615 : vector<1x384xf32> to vector<64x384xf32>
    %617 = arith.addf %614, %616 : vector<64x384xf32>
    %618 = vector.shape_cast %617 : vector<64x384xf32> to vector<8x8x384xf32>
    %c0_188 = arith.constant 0 : index
    %c0_189 = arith.constant 0 : index
    %c0_190 = arith.constant 0 : index
    %619 = vector.load %arg18[%c0_188, %c0_189, %c0_190] : memref<8x8x384xf32, #tpu.memory_space<vmem>>, vector<8x8x384xf32>
    tpu.vector_store %arg18[%c0_188, %c0_189, %c0_190], %618 {strides = array<i32>} : memref<8x8x384xf32, #tpu.memory_space<vmem>>, vector<8x8x384xf32>,
    %c1_191 = arith.constant 1 : index
    %c0_192 = arith.constant 0 : index
    %c0_193 = arith.constant 0 : index
    %620 = vector.load %arg6[%c1_191, %c0_192, %c0_193] : memref<2x256x384xf32, #tpu.memory_space<vmem>>, vector<1x256x384xf32>
    %621 = vector.shape_cast %620 : vector<1x256x384xf32> to vector<256x384xf32>
    %cst_194 = arith.constant dense<0.000000e+00> : vector<64x384xf32>
    %622 = tpu.matmul %611, %621, %cst_194 {dimension_numbers = #tpu.dot_dimension_numbers<[1], [0], [0], [1], [0, 0, 1, 1], [], []>} : vector<64x256xf32>, vector<256x384xf32>, vector<64x384xf32> -> vector<64x384xf32>
    %c1_195 = arith.constant 1 : index
    %c0_196 = arith.constant 0 : index
    %623 = vector.load %arg8[%c1_195, %c0_196] : memref<2x384xf32, #tpu.memory_space<vmem>>, vector<1x384xf32>
    %624 = vector.broadcast %623 : vector<1x384xf32> to vector<64x384xf32>
    %625 = arith.addf %622, %624 : vector<64x384xf32>
    %626 = vector.shape_cast %625 : vector<64x384xf32> to vector<8x8x384xf32>
    %c0_197 = arith.constant 0 : index
    %c0_198 = arith.constant 0 : index
    %c0_199 = arith.constant 0 : index
    %627 = vector.load %arg19[%c0_197, %c0_198, %c0_199] : memref<8x8x384xf32, #tpu.memory_space<vmem>>, vector<8x8x384xf32>
    tpu.vector_store %arg19[%c0_197, %c0_198, %c0_199], %626 {strides = array<i32>} : memref<8x8x384xf32, #tpu.memory_space<vmem>>, vector<8x8x384xf32>,
    %c2 = arith.constant 2 : index
    %c0_200 = arith.constant 0 : index
    %c0_201 = arith.constant 0 : index
    %628 = vector.load %arg1[%c2, %c0_200, %c0_201] : memref<4x8x128xf32, #tpu.memory_space<vmem>>, vector<1x8x128xf32>
    %629 = vector.shape_cast %628 : vector<1x8x128xf32> to vector<8x128xf32>
    %c3 = arith.constant 3 : index
    %c0_202 = arith.constant 0 : index
    %c0_203 = arith.constant 0 : index
    %630 = vector.load %arg1[%c3, %c0_202, %c0_203] : memref<4x8x128xf32, #tpu.memory_space<vmem>>, vector<1x8x128xf32>
    %631 = vector.shape_cast %630 : vector<1x8x128xf32> to vector<8x128xf32>
    %c0_i32_204 = arith.constant 0 : i32
    %632 = arith.index_cast %c0_i32_204 : i32 to index
    %c0_205 = arith.constant 0 : index
    %c0_206 = arith.constant 0 : index
    %633 = vector.load %arg18[%632, %c0_205, %c0_206] : memref<8x8x384xf32, #tpu.memory_space<vmem>>, vector<1x8x384xf32>
    %634 = vector.shape_cast %633 : vector<1x8x384xf32> to vector<8x384xf32>
    %cst_207 = arith.constant dense<0.000000e+00> : vector<8x384xf32>
    %635 = tpu.matmul %629, %35, %cst_207 {dimension_numbers = #tpu.dot_dimension_numbers<[1], [0], [0], [1], [0, 0, 1, 1], [], []>} : vector<8x128xf32>, vector<128x384xf32>, vector<8x384xf32> -> vector<8x384xf32>
    %636 = arith.addf %635, %26 : vector<8x384xf32>
    %637 = vector.extract_strided_slice %634 {offsets = [0, 0], sizes = [8, 128], strides = [1, 1]} : vector<8x384xf32> to vector<8x128xf32>
    %638 = vector.extract_strided_slice %636 {offsets = [0, 0], sizes = [8, 128], strides = [1, 1]} : vector<8x384xf32> to vector<8x128xf32>
    %639 = arith.addf %637, %638 : vector<8x128xf32>
    %640 = arith.negf %639 : vector<8x128xf32>
    %641 = math.exp %640 : vector<8x128xf32>
    %cst_208 = arith.constant 1.000000e+00 : f32
    %642 = vector.broadcast %cst_208 : f32 to vector<8x128xf32>
    %643 = arith.addf %642, %641 : vector<8x128xf32>
    %644 = arith.divf %642, %643 : vector<8x128xf32>
    %645 = vector.extract_strided_slice %634 {offsets = [0, 128], sizes = [8, 128], strides = [1, 1]} : vector<8x384xf32> to vector<8x128xf32>
    %646 = vector.extract_strided_slice %636 {offsets = [0, 128], sizes = [8, 128], strides = [1, 1]} : vector<8x384xf32> to vector<8x128xf32>
    %647 = arith.addf %645, %646 : vector<8x128xf32>
    %648 = arith.negf %647 : vector<8x128xf32>
    %649 = math.exp %648 : vector<8x128xf32>
    %cst_209 = arith.constant 1.000000e+00 : f32
    %650 = vector.broadcast %cst_209 : f32 to vector<8x128xf32>
    %651 = arith.addf %650, %649 : vector<8x128xf32>
    %652 = arith.divf %650, %651 : vector<8x128xf32>
    %653 = vector.extract_strided_slice %634 {offsets = [0, 256], sizes = [8, 128], strides = [1, 1]} : vector<8x384xf32> to vector<8x128xf32>
    %654 = vector.extract_strided_slice %636 {offsets = [0, 256], sizes = [8, 128], strides = [1, 1]} : vector<8x384xf32> to vector<8x128xf32>
    %655 = arith.mulf %644, %654 : vector<8x128xf32>
    %656 = arith.addf %653, %655 : vector<8x128xf32>
    %657 = math.tanh %656 : vector<8x128xf32>
    %cst_210 = arith.constant 1.000000e+00 : f32
    %658 = vector.broadcast %cst_210 : f32 to vector<8x128xf32>
    %659 = arith.subf %658, %652 : vector<8x128xf32>
    %660 = arith.mulf %659, %657 : vector<8x128xf32>
    %661 = arith.mulf %652, %629 : vector<8x128xf32>
    %662 = arith.addf %660, %661 : vector<8x128xf32>
    %c7_i32_211 = arith.constant 7 : i32
    %663 = arith.subi %c7_i32_211, %c0_i32_204 : i32
    %664 = arith.index_cast %663 : i32 to index
    %c0_212 = arith.constant 0 : index
    %c0_213 = arith.constant 0 : index
    %665 = vector.load %arg19[%664, %c0_212, %c0_213] : memref<8x8x384xf32, #tpu.memory_space<vmem>>, vector<1x8x384xf32>
    %666 = vector.shape_cast %665 : vector<1x8x384xf32> to vector<8x384xf32>
    %cst_214 = arith.constant dense<0.000000e+00> : vector<8x384xf32>
    %667 = tpu.matmul %631, %37, %cst_214 {dimension_numbers = #tpu.dot_dimension_numbers<[1], [0], [0], [1], [0, 0, 1, 1], [], []>} : vector<8x128xf32>, vector<128x384xf32>, vector<8x384xf32> -> vector<8x384xf32>
    %668 = arith.addf %667, %29 : vector<8x384xf32>
    %669 = vector.extract_strided_slice %666 {offsets = [0, 0], sizes = [8, 128], strides = [1, 1]} : vector<8x384xf32> to vector<8x128xf32>
    %670 = vector.extract_strided_slice %668 {offsets = [0, 0], sizes = [8, 128], strides = [1, 1]} : vector<8x384xf32> to vector<8x128xf32>
    %671 = arith.addf %669, %670 : vector<8x128xf32>
    %672 = arith.negf %671 : vector<8x128xf32>
    %673 = math.exp %672 : vector<8x128xf32>
    %cst_215 = arith.constant 1.000000e+00 : f32
    %674 = vector.broadcast %cst_215 : f32 to vector<8x128xf32>
    %675 = arith.addf %674, %673 : vector<8x128xf32>
    %676 = arith.divf %674, %675 : vector<8x128xf32>
    %677 = vector.extract_strided_slice %666 {offsets = [0, 128], sizes = [8, 128], strides = [1, 1]} : vector<8x384xf32> to vector<8x128xf32>
    %678 = vector.extract_strided_slice %668 {offsets = [0, 128], sizes = [8, 128], strides = [1, 1]} : vector<8x384xf32> to vector<8x128xf32>
    %679 = arith.addf %677, %678 : vector<8x128xf32>
    %680 = arith.negf %679 : vector<8x128xf32>
    %681 = math.exp %680 : vector<8x128xf32>
    %cst_216 = arith.constant 1.000000e+00 : f32
    %682 = vector.broadcast %cst_216 : f32 to vector<8x128xf32>
    %683 = arith.addf %682, %681 : vector<8x128xf32>
    %684 = arith.divf %682, %683 : vector<8x128xf32>
    %685 = vector.extract_strided_slice %666 {offsets = [0, 256], sizes = [8, 128], strides = [1, 1]} : vector<8x384xf32> to vector<8x128xf32>
    %686 = vector.extract_strided_slice %668 {offsets = [0, 256], sizes = [8, 128], strides = [1, 1]} : vector<8x384xf32> to vector<8x128xf32>
    %687 = arith.mulf %676, %686 : vector<8x128xf32>
    %688 = arith.addf %685, %687 : vector<8x128xf32>
    %689 = math.tanh %688 : vector<8x128xf32>
    %cst_217 = arith.constant 1.000000e+00 : f32
    %690 = vector.broadcast %cst_217 : f32 to vector<8x128xf32>
    %691 = arith.subf %690, %684 : vector<8x128xf32>
    %692 = arith.mulf %691, %689 : vector<8x128xf32>
    %693 = arith.mulf %684, %631 : vector<8x128xf32>
    %694 = arith.addf %692, %693 : vector<8x128xf32>
    %c1_i32_218 = arith.constant 1 : i32
    %695 = arith.index_cast %c1_i32_218 : i32 to index
    %c0_219 = arith.constant 0 : index
    %c0_220 = arith.constant 0 : index
    %696 = vector.load %arg18[%695, %c0_219, %c0_220] : memref<8x8x384xf32, #tpu.memory_space<vmem>>, vector<1x8x384xf32>
    %697 = vector.shape_cast %696 : vector<1x8x384xf32> to vector<8x384xf32>
    %cst_221 = arith.constant dense<0.000000e+00> : vector<8x384xf32>
    %698 = tpu.matmul %662, %35, %cst_221 {dimension_numbers = #tpu.dot_dimension_numbers<[1], [0], [0], [1], [0, 0, 1, 1], [], []>} : vector<8x128xf32>, vector<128x384xf32>, vector<8x384xf32> -> vector<8x384xf32>
    %699 = arith.addf %698, %26 : vector<8x384xf32>
    %700 = vector.extract_strided_slice %697 {offsets = [0, 0], sizes = [8, 128], strides = [1, 1]} : vector<8x384xf32> to vector<8x128xf32>
    %701 = vector.extract_strided_slice %699 {offsets = [0, 0], sizes = [8, 128], strides = [1, 1]} : vector<8x384xf32> to vector<8x128xf32>
    %702 = arith.addf %700, %701 : vector<8x128xf32>
    %703 = arith.negf %702 : vector<8x128xf32>
    %704 = math.exp %703 : vector<8x128xf32>
    %cst_222 = arith.constant 1.000000e+00 : f32
    %705 = vector.broadcast %cst_222 : f32 to vector<8x128xf32>
    %706 = arith.addf %705, %704 : vector<8x128xf32>
    %707 = arith.divf %705, %706 : vector<8x128xf32>
    %708 = vector.extract_strided_slice %697 {offsets = [0, 128], sizes = [8, 128], strides = [1, 1]} : vector<8x384xf32> to vector<8x128xf32>
    %709 = vector.extract_strided_slice %699 {offsets = [0, 128], sizes = [8, 128], strides = [1, 1]} : vector<8x384xf32> to vector<8x128xf32>
    %710 = arith.addf %708, %709 : vector<8x128xf32>
    %711 = arith.negf %710 : vector<8x128xf32>
    %712 = math.exp %711 : vector<8x128xf32>
    %cst_223 = arith.constant 1.000000e+00 : f32
    %713 = vector.broadcast %cst_223 : f32 to vector<8x128xf32>
    %714 = arith.addf %713, %712 : vector<8x128xf32>
    %715 = arith.divf %713, %714 : vector<8x128xf32>
    %716 = vector.extract_strided_slice %697 {offsets = [0, 256], sizes = [8, 128], strides = [1, 1]} : vector<8x384xf32> to vector<8x128xf32>
    %717 = vector.extract_strided_slice %699 {offsets = [0, 256], sizes = [8, 128], strides = [1, 1]} : vector<8x384xf32> to vector<8x128xf32>
    %718 = arith.mulf %707, %717 : vector<8x128xf32>
    %719 = arith.addf %716, %718 : vector<8x128xf32>
    %720 = math.tanh %719 : vector<8x128xf32>
    %cst_224 = arith.constant 1.000000e+00 : f32
    %721 = vector.broadcast %cst_224 : f32 to vector<8x128xf32>
    %722 = arith.subf %721, %715 : vector<8x128xf32>
    %723 = arith.mulf %722, %720 : vector<8x128xf32>
    %724 = arith.mulf %715, %662 : vector<8x128xf32>
    %725 = arith.addf %723, %724 : vector<8x128xf32>
    %c7_i32_225 = arith.constant 7 : i32
    %726 = arith.subi %c7_i32_225, %c1_i32_218 : i32
    %727 = arith.index_cast %726 : i32 to index
    %c0_226 = arith.constant 0 : index
    %c0_227 = arith.constant 0 : index
    %728 = vector.load %arg19[%727, %c0_226, %c0_227] : memref<8x8x384xf32, #tpu.memory_space<vmem>>, vector<1x8x384xf32>
    %729 = vector.shape_cast %728 : vector<1x8x384xf32> to vector<8x384xf32>
    %cst_228 = arith.constant dense<0.000000e+00> : vector<8x384xf32>
    %730 = tpu.matmul %694, %37, %cst_228 {dimension_numbers = #tpu.dot_dimension_numbers<[1], [0], [0], [1], [0, 0, 1, 1], [], []>} : vector<8x128xf32>, vector<128x384xf32>, vector<8x384xf32> -> vector<8x384xf32>
    %731 = arith.addf %730, %29 : vector<8x384xf32>
    %732 = vector.extract_strided_slice %729 {offsets = [0, 0], sizes = [8, 128], strides = [1, 1]} : vector<8x384xf32> to vector<8x128xf32>
    %733 = vector.extract_strided_slice %731 {offsets = [0, 0], sizes = [8, 128], strides = [1, 1]} : vector<8x384xf32> to vector<8x128xf32>
    %734 = arith.addf %732, %733 : vector<8x128xf32>
    %735 = arith.negf %734 : vector<8x128xf32>
    %736 = math.exp %735 : vector<8x128xf32>
    %cst_229 = arith.constant 1.000000e+00 : f32
    %737 = vector.broadcast %cst_229 : f32 to vector<8x128xf32>
    %738 = arith.addf %737, %736 : vector<8x128xf32>
    %739 = arith.divf %737, %738 : vector<8x128xf32>
    %740 = vector.extract_strided_slice %729 {offsets = [0, 128], sizes = [8, 128], strides = [1, 1]} : vector<8x384xf32> to vector<8x128xf32>
    %741 = vector.extract_strided_slice %731 {offsets = [0, 128], sizes = [8, 128], strides = [1, 1]} : vector<8x384xf32> to vector<8x128xf32>
    %742 = arith.addf %740, %741 : vector<8x128xf32>
    %743 = arith.negf %742 : vector<8x128xf32>
    %744 = math.exp %743 : vector<8x128xf32>
    %cst_230 = arith.constant 1.000000e+00 : f32
    %745 = vector.broadcast %cst_230 : f32 to vector<8x128xf32>
    %746 = arith.addf %745, %744 : vector<8x128xf32>
    %747 = arith.divf %745, %746 : vector<8x128xf32>
    %748 = vector.extract_strided_slice %729 {offsets = [0, 256], sizes = [8, 128], strides = [1, 1]} : vector<8x384xf32> to vector<8x128xf32>
    %749 = vector.extract_strided_slice %731 {offsets = [0, 256], sizes = [8, 128], strides = [1, 1]} : vector<8x384xf32> to vector<8x128xf32>
    %750 = arith.mulf %739, %749 : vector<8x128xf32>
    %751 = arith.addf %748, %750 : vector<8x128xf32>
    %752 = math.tanh %751 : vector<8x128xf32>
    %cst_231 = arith.constant 1.000000e+00 : f32
    %753 = vector.broadcast %cst_231 : f32 to vector<8x128xf32>
    %754 = arith.subf %753, %747 : vector<8x128xf32>
    %755 = arith.mulf %754, %752 : vector<8x128xf32>
    %756 = arith.mulf %747, %694 : vector<8x128xf32>
    %757 = arith.addf %755, %756 : vector<8x128xf32>
    %c2_i32_232 = arith.constant 2 : i32
    %758 = arith.index_cast %c2_i32_232 : i32 to index
    %c0_233 = arith.constant 0 : index
    %c0_234 = arith.constant 0 : index
    %759 = vector.load %arg18[%758, %c0_233, %c0_234] : memref<8x8x384xf32, #tpu.memory_space<vmem>>, vector<1x8x384xf32>
    %760 = vector.shape_cast %759 : vector<1x8x384xf32> to vector<8x384xf32>
    %cst_235 = arith.constant dense<0.000000e+00> : vector<8x384xf32>
    %761 = tpu.matmul %725, %35, %cst_235 {dimension_numbers = #tpu.dot_dimension_numbers<[1], [0], [0], [1], [0, 0, 1, 1], [], []>} : vector<8x128xf32>, vector<128x384xf32>, vector<8x384xf32> -> vector<8x384xf32>
    %762 = arith.addf %761, %26 : vector<8x384xf32>
    %763 = vector.extract_strided_slice %760 {offsets = [0, 0], sizes = [8, 128], strides = [1, 1]} : vector<8x384xf32> to vector<8x128xf32>
    %764 = vector.extract_strided_slice %762 {offsets = [0, 0], sizes = [8, 128], strides = [1, 1]} : vector<8x384xf32> to vector<8x128xf32>
    %765 = arith.addf %763, %764 : vector<8x128xf32>
    %766 = arith.negf %765 : vector<8x128xf32>
    %767 = math.exp %766 : vector<8x128xf32>
    %cst_236 = arith.constant 1.000000e+00 : f32
    %768 = vector.broadcast %cst_236 : f32 to vector<8x128xf32>
    %769 = arith.addf %768, %767 : vector<8x128xf32>
    %770 = arith.divf %768, %769 : vector<8x128xf32>
    %771 = vector.extract_strided_slice %760 {offsets = [0, 128], sizes = [8, 128], strides = [1, 1]} : vector<8x384xf32> to vector<8x128xf32>
    %772 = vector.extract_strided_slice %762 {offsets = [0, 128], sizes = [8, 128], strides = [1, 1]} : vector<8x384xf32> to vector<8x128xf32>
    %773 = arith.addf %771, %772 : vector<8x128xf32>
    %774 = arith.negf %773 : vector<8x128xf32>
    %775 = math.exp %774 : vector<8x128xf32>
    %cst_237 = arith.constant 1.000000e+00 : f32
    %776 = vector.broadcast %cst_237 : f32 to vector<8x128xf32>
    %777 = arith.addf %776, %775 : vector<8x128xf32>
    %778 = arith.divf %776, %777 : vector<8x128xf32>
    %779 = vector.extract_strided_slice %760 {offsets = [0, 256], sizes = [8, 128], strides = [1, 1]} : vector<8x384xf32> to vector<8x128xf32>
    %780 = vector.extract_strided_slice %762 {offsets = [0, 256], sizes = [8, 128], strides = [1, 1]} : vector<8x384xf32> to vector<8x128xf32>
    %781 = arith.mulf %770, %780 : vector<8x128xf32>
    %782 = arith.addf %779, %781 : vector<8x128xf32>
    %783 = math.tanh %782 : vector<8x128xf32>
    %cst_238 = arith.constant 1.000000e+00 : f32
    %784 = vector.broadcast %cst_238 : f32 to vector<8x128xf32>
    %785 = arith.subf %784, %778 : vector<8x128xf32>
    %786 = arith.mulf %785, %783 : vector<8x128xf32>
    %787 = arith.mulf %778, %725 : vector<8x128xf32>
    %788 = arith.addf %786, %787 : vector<8x128xf32>
    %c7_i32_239 = arith.constant 7 : i32
    %789 = arith.subi %c7_i32_239, %c2_i32_232 : i32
    %790 = arith.index_cast %789 : i32 to index
    %c0_240 = arith.constant 0 : index
    %c0_241 = arith.constant 0 : index
    %791 = vector.load %arg19[%790, %c0_240, %c0_241] : memref<8x8x384xf32, #tpu.memory_space<vmem>>, vector<1x8x384xf32>
    %792 = vector.shape_cast %791 : vector<1x8x384xf32> to vector<8x384xf32>
    %cst_242 = arith.constant dense<0.000000e+00> : vector<8x384xf32>
    %793 = tpu.matmul %757, %37, %cst_242 {dimension_numbers = #tpu.dot_dimension_numbers<[1], [0], [0], [1], [0, 0, 1, 1], [], []>} : vector<8x128xf32>, vector<128x384xf32>, vector<8x384xf32> -> vector<8x384xf32>
    %794 = arith.addf %793, %29 : vector<8x384xf32>
    %795 = vector.extract_strided_slice %792 {offsets = [0, 0], sizes = [8, 128], strides = [1, 1]} : vector<8x384xf32> to vector<8x128xf32>
    %796 = vector.extract_strided_slice %794 {offsets = [0, 0], sizes = [8, 128], strides = [1, 1]} : vector<8x384xf32> to vector<8x128xf32>
    %797 = arith.addf %795, %796 : vector<8x128xf32>
    %798 = arith.negf %797 : vector<8x128xf32>
    %799 = math.exp %798 : vector<8x128xf32>
    %cst_243 = arith.constant 1.000000e+00 : f32
    %800 = vector.broadcast %cst_243 : f32 to vector<8x128xf32>
    %801 = arith.addf %800, %799 : vector<8x128xf32>
    %802 = arith.divf %800, %801 : vector<8x128xf32>
    %803 = vector.extract_strided_slice %792 {offsets = [0, 128], sizes = [8, 128], strides = [1, 1]} : vector<8x384xf32> to vector<8x128xf32>
    %804 = vector.extract_strided_slice %794 {offsets = [0, 128], sizes = [8, 128], strides = [1, 1]} : vector<8x384xf32> to vector<8x128xf32>
    %805 = arith.addf %803, %804 : vector<8x128xf32>
    %806 = arith.negf %805 : vector<8x128xf32>
    %807 = math.exp %806 : vector<8x128xf32>
    %cst_244 = arith.constant 1.000000e+00 : f32
    %808 = vector.broadcast %cst_244 : f32 to vector<8x128xf32>
    %809 = arith.addf %808, %807 : vector<8x128xf32>
    %810 = arith.divf %808, %809 : vector<8x128xf32>
    %811 = vector.extract_strided_slice %792 {offsets = [0, 256], sizes = [8, 128], strides = [1, 1]} : vector<8x384xf32> to vector<8x128xf32>
    %812 = vector.extract_strided_slice %794 {offsets = [0, 256], sizes = [8, 128], strides = [1, 1]} : vector<8x384xf32> to vector<8x128xf32>
    %813 = arith.mulf %802, %812 : vector<8x128xf32>
    %814 = arith.addf %811, %813 : vector<8x128xf32>
    %815 = math.tanh %814 : vector<8x128xf32>
    %cst_245 = arith.constant 1.000000e+00 : f32
    %816 = vector.broadcast %cst_245 : f32 to vector<8x128xf32>
    %817 = arith.subf %816, %810 : vector<8x128xf32>
    %818 = arith.mulf %817, %815 : vector<8x128xf32>
    %819 = arith.mulf %810, %757 : vector<8x128xf32>
    %820 = arith.addf %818, %819 : vector<8x128xf32>
    %c3_i32_246 = arith.constant 3 : i32
    %821 = arith.index_cast %c3_i32_246 : i32 to index
    %c0_247 = arith.constant 0 : index
    %c0_248 = arith.constant 0 : index
    %822 = vector.load %arg18[%821, %c0_247, %c0_248] : memref<8x8x384xf32, #tpu.memory_space<vmem>>, vector<1x8x384xf32>
    %823 = vector.shape_cast %822 : vector<1x8x384xf32> to vector<8x384xf32>
    %cst_249 = arith.constant dense<0.000000e+00> : vector<8x384xf32>
    %824 = tpu.matmul %788, %35, %cst_249 {dimension_numbers = #tpu.dot_dimension_numbers<[1], [0], [0], [1], [0, 0, 1, 1], [], []>} : vector<8x128xf32>, vector<128x384xf32>, vector<8x384xf32> -> vector<8x384xf32>
    %825 = arith.addf %824, %26 : vector<8x384xf32>
    %826 = vector.extract_strided_slice %823 {offsets = [0, 0], sizes = [8, 128], strides = [1, 1]} : vector<8x384xf32> to vector<8x128xf32>
    %827 = vector.extract_strided_slice %825 {offsets = [0, 0], sizes = [8, 128], strides = [1, 1]} : vector<8x384xf32> to vector<8x128xf32>
    %828 = arith.addf %826, %827 : vector<8x128xf32>
    %829 = arith.negf %828 : vector<8x128xf32>
    %830 = math.exp %829 : vector<8x128xf32>
    %cst_250 = arith.constant 1.000000e+00 : f32
    %831 = vector.broadcast %cst_250 : f32 to vector<8x128xf32>
    %832 = arith.addf %831, %830 : vector<8x128xf32>
    %833 = arith.divf %831, %832 : vector<8x128xf32>
    %834 = vector.extract_strided_slice %823 {offsets = [0, 128], sizes = [8, 128], strides = [1, 1]} : vector<8x384xf32> to vector<8x128xf32>
    %835 = vector.extract_strided_slice %825 {offsets = [0, 128], sizes = [8, 128], strides = [1, 1]} : vector<8x384xf32> to vector<8x128xf32>
    %836 = arith.addf %834, %835 : vector<8x128xf32>
    %837 = arith.negf %836 : vector<8x128xf32>
    %838 = math.exp %837 : vector<8x128xf32>
    %cst_251 = arith.constant 1.000000e+00 : f32
    %839 = vector.broadcast %cst_251 : f32 to vector<8x128xf32>
    %840 = arith.addf %839, %838 : vector<8x128xf32>
    %841 = arith.divf %839, %840 : vector<8x128xf32>
    %842 = vector.extract_strided_slice %823 {offsets = [0, 256], sizes = [8, 128], strides = [1, 1]} : vector<8x384xf32> to vector<8x128xf32>
    %843 = vector.extract_strided_slice %825 {offsets = [0, 256], sizes = [8, 128], strides = [1, 1]} : vector<8x384xf32> to vector<8x128xf32>
    %844 = arith.mulf %833, %843 : vector<8x128xf32>
    %845 = arith.addf %842, %844 : vector<8x128xf32>
    %846 = math.tanh %845 : vector<8x128xf32>
    %cst_252 = arith.constant 1.000000e+00 : f32
    %847 = vector.broadcast %cst_252 : f32 to vector<8x128xf32>
    %848 = arith.subf %847, %841 : vector<8x128xf32>
    %849 = arith.mulf %848, %846 : vector<8x128xf32>
    %850 = arith.mulf %841, %788 : vector<8x128xf32>
    %851 = arith.addf %849, %850 : vector<8x128xf32>
    %c7_i32_253 = arith.constant 7 : i32
    %852 = arith.subi %c7_i32_253, %c3_i32_246 : i32
    %853 = arith.index_cast %852 : i32 to index
    %c0_254 = arith.constant 0 : index
    %c0_255 = arith.constant 0 : index
    %854 = vector.load %arg19[%853, %c0_254, %c0_255] : memref<8x8x384xf32, #tpu.memory_space<vmem>>, vector<1x8x384xf32>
    %855 = vector.shape_cast %854 : vector<1x8x384xf32> to vector<8x384xf32>
    %cst_256 = arith.constant dense<0.000000e+00> : vector<8x384xf32>
    %856 = tpu.matmul %820, %37, %cst_256 {dimension_numbers = #tpu.dot_dimension_numbers<[1], [0], [0], [1], [0, 0, 1, 1], [], []>} : vector<8x128xf32>, vector<128x384xf32>, vector<8x384xf32> -> vector<8x384xf32>
    %857 = arith.addf %856, %29 : vector<8x384xf32>
    %858 = vector.extract_strided_slice %855 {offsets = [0, 0], sizes = [8, 128], strides = [1, 1]} : vector<8x384xf32> to vector<8x128xf32>
    %859 = vector.extract_strided_slice %857 {offsets = [0, 0], sizes = [8, 128], strides = [1, 1]} : vector<8x384xf32> to vector<8x128xf32>
    %860 = arith.addf %858, %859 : vector<8x128xf32>
    %861 = arith.negf %860 : vector<8x128xf32>
    %862 = math.exp %861 : vector<8x128xf32>
    %cst_257 = arith.constant 1.000000e+00 : f32
    %863 = vector.broadcast %cst_257 : f32 to vector<8x128xf32>
    %864 = arith.addf %863, %862 : vector<8x128xf32>
    %865 = arith.divf %863, %864 : vector<8x128xf32>
    %866 = vector.extract_strided_slice %855 {offsets = [0, 128], sizes = [8, 128], strides = [1, 1]} : vector<8x384xf32> to vector<8x128xf32>
    %867 = vector.extract_strided_slice %857 {offsets = [0, 128], sizes = [8, 128], strides = [1, 1]} : vector<8x384xf32> to vector<8x128xf32>
    %868 = arith.addf %866, %867 : vector<8x128xf32>
    %869 = arith.negf %868 : vector<8x128xf32>
    %870 = math.exp %869 : vector<8x128xf32>
    %cst_258 = arith.constant 1.000000e+00 : f32
    %871 = vector.broadcast %cst_258 : f32 to vector<8x128xf32>
    %872 = arith.addf %871, %870 : vector<8x128xf32>
    %873 = arith.divf %871, %872 : vector<8x128xf32>
    %874 = vector.extract_strided_slice %855 {offsets = [0, 256], sizes = [8, 128], strides = [1, 1]} : vector<8x384xf32> to vector<8x128xf32>
    %875 = vector.extract_strided_slice %857 {offsets = [0, 256], sizes = [8, 128], strides = [1, 1]} : vector<8x384xf32> to vector<8x128xf32>
    %876 = arith.mulf %865, %875 : vector<8x128xf32>
    %877 = arith.addf %874, %876 : vector<8x128xf32>
    %878 = math.tanh %877 : vector<8x128xf32>
    %cst_259 = arith.constant 1.000000e+00 : f32
    %879 = vector.broadcast %cst_259 : f32 to vector<8x128xf32>
    %880 = arith.subf %879, %873 : vector<8x128xf32>
    %881 = arith.mulf %880, %878 : vector<8x128xf32>
    %882 = arith.mulf %873, %820 : vector<8x128xf32>
    %883 = arith.addf %881, %882 : vector<8x128xf32>
    %c4_i32_260 = arith.constant 4 : i32
    %884 = arith.index_cast %c4_i32_260 : i32 to index
    %c0_261 = arith.constant 0 : index
    %c0_262 = arith.constant 0 : index
    %885 = vector.load %arg18[%884, %c0_261, %c0_262] : memref<8x8x384xf32, #tpu.memory_space<vmem>>, vector<1x8x384xf32>
    %886 = vector.shape_cast %885 : vector<1x8x384xf32> to vector<8x384xf32>
    %cst_263 = arith.constant dense<0.000000e+00> : vector<8x384xf32>
    %887 = tpu.matmul %851, %35, %cst_263 {dimension_numbers = #tpu.dot_dimension_numbers<[1], [0], [0], [1], [0, 0, 1, 1], [], []>} : vector<8x128xf32>, vector<128x384xf32>, vector<8x384xf32> -> vector<8x384xf32>
    %888 = arith.addf %887, %26 : vector<8x384xf32>
    %889 = vector.extract_strided_slice %886 {offsets = [0, 0], sizes = [8, 128], strides = [1, 1]} : vector<8x384xf32> to vector<8x128xf32>
    %890 = vector.extract_strided_slice %888 {offsets = [0, 0], sizes = [8, 128], strides = [1, 1]} : vector<8x384xf32> to vector<8x128xf32>
    %891 = arith.addf %889, %890 : vector<8x128xf32>
    %892 = arith.negf %891 : vector<8x128xf32>
    %893 = math.exp %892 : vector<8x128xf32>
    %cst_264 = arith.constant 1.000000e+00 : f32
    %894 = vector.broadcast %cst_264 : f32 to vector<8x128xf32>
    %895 = arith.addf %894, %893 : vector<8x128xf32>
    %896 = arith.divf %894, %895 : vector<8x128xf32>
    %897 = vector.extract_strided_slice %886 {offsets = [0, 128], sizes = [8, 128], strides = [1, 1]} : vector<8x384xf32> to vector<8x128xf32>
    %898 = vector.extract_strided_slice %888 {offsets = [0, 128], sizes = [8, 128], strides = [1, 1]} : vector<8x384xf32> to vector<8x128xf32>
    %899 = arith.addf %897, %898 : vector<8x128xf32>
    %900 = arith.negf %899 : vector<8x128xf32>
    %901 = math.exp %900 : vector<8x128xf32>
    %cst_265 = arith.constant 1.000000e+00 : f32
    %902 = vector.broadcast %cst_265 : f32 to vector<8x128xf32>
    %903 = arith.addf %902, %901 : vector<8x128xf32>
    %904 = arith.divf %902, %903 : vector<8x128xf32>
    %905 = vector.extract_strided_slice %886 {offsets = [0, 256], sizes = [8, 128], strides = [1, 1]} : vector<8x384xf32> to vector<8x128xf32>
    %906 = vector.extract_strided_slice %888 {offsets = [0, 256], sizes = [8, 128], strides = [1, 1]} : vector<8x384xf32> to vector<8x128xf32>
    %907 = arith.mulf %896, %906 : vector<8x128xf32>
    %908 = arith.addf %905, %907 : vector<8x128xf32>
    %909 = math.tanh %908 : vector<8x128xf32>
    %cst_266 = arith.constant 1.000000e+00 : f32
    %910 = vector.broadcast %cst_266 : f32 to vector<8x128xf32>
    %911 = arith.subf %910, %904 : vector<8x128xf32>
    %912 = arith.mulf %911, %909 : vector<8x128xf32>
    %913 = arith.mulf %904, %851 : vector<8x128xf32>
    %914 = arith.addf %912, %913 : vector<8x128xf32>
    %c7_i32_267 = arith.constant 7 : i32
    %915 = arith.subi %c7_i32_267, %c4_i32_260 : i32
    %916 = arith.index_cast %915 : i32 to index
    %c0_268 = arith.constant 0 : index
    %c0_269 = arith.constant 0 : index
    %917 = vector.load %arg19[%916, %c0_268, %c0_269] : memref<8x8x384xf32, #tpu.memory_space<vmem>>, vector<1x8x384xf32>
    %918 = vector.shape_cast %917 : vector<1x8x384xf32> to vector<8x384xf32>
    %cst_270 = arith.constant dense<0.000000e+00> : vector<8x384xf32>
    %919 = tpu.matmul %883, %37, %cst_270 {dimension_numbers = #tpu.dot_dimension_numbers<[1], [0], [0], [1], [0, 0, 1, 1], [], []>} : vector<8x128xf32>, vector<128x384xf32>, vector<8x384xf32> -> vector<8x384xf32>
    %920 = arith.addf %919, %29 : vector<8x384xf32>
    %921 = vector.extract_strided_slice %918 {offsets = [0, 0], sizes = [8, 128], strides = [1, 1]} : vector<8x384xf32> to vector<8x128xf32>
    %922 = vector.extract_strided_slice %920 {offsets = [0, 0], sizes = [8, 128], strides = [1, 1]} : vector<8x384xf32> to vector<8x128xf32>
    %923 = arith.addf %921, %922 : vector<8x128xf32>
    %924 = arith.negf %923 : vector<8x128xf32>
    %925 = math.exp %924 : vector<8x128xf32>
    %cst_271 = arith.constant 1.000000e+00 : f32
    %926 = vector.broadcast %cst_271 : f32 to vector<8x128xf32>
    %927 = arith.addf %926, %925 : vector<8x128xf32>
    %928 = arith.divf %926, %927 : vector<8x128xf32>
    %929 = vector.extract_strided_slice %918 {offsets = [0, 128], sizes = [8, 128], strides = [1, 1]} : vector<8x384xf32> to vector<8x128xf32>
    %930 = vector.extract_strided_slice %920 {offsets = [0, 128], sizes = [8, 128], strides = [1, 1]} : vector<8x384xf32> to vector<8x128xf32>
    %931 = arith.addf %929, %930 : vector<8x128xf32>
    %932 = arith.negf %931 : vector<8x128xf32>
    %933 = math.exp %932 : vector<8x128xf32>
    %cst_272 = arith.constant 1.000000e+00 : f32
    %934 = vector.broadcast %cst_272 : f32 to vector<8x128xf32>
    %935 = arith.addf %934, %933 : vector<8x128xf32>
    %936 = arith.divf %934, %935 : vector<8x128xf32>
    %937 = vector.extract_strided_slice %918 {offsets = [0, 256], sizes = [8, 128], strides = [1, 1]} : vector<8x384xf32> to vector<8x128xf32>
    %938 = vector.extract_strided_slice %920 {offsets = [0, 256], sizes = [8, 128], strides = [1, 1]} : vector<8x384xf32> to vector<8x128xf32>
    %939 = arith.mulf %928, %938 : vector<8x128xf32>
    %940 = arith.addf %937, %939 : vector<8x128xf32>
    %941 = math.tanh %940 : vector<8x128xf32>
    %cst_273 = arith.constant 1.000000e+00 : f32
    %942 = vector.broadcast %cst_273 : f32 to vector<8x128xf32>
    %943 = arith.subf %942, %936 : vector<8x128xf32>
    %944 = arith.mulf %943, %941 : vector<8x128xf32>
    %945 = arith.mulf %936, %883 : vector<8x128xf32>
    %946 = arith.addf %944, %945 : vector<8x128xf32>
    %c5_i32_274 = arith.constant 5 : i32
    %947 = arith.index_cast %c5_i32_274 : i32 to index
    %c0_275 = arith.constant 0 : index
    %c0_276 = arith.constant 0 : index
    %948 = vector.load %arg18[%947, %c0_275, %c0_276] : memref<8x8x384xf32, #tpu.memory_space<vmem>>, vector<1x8x384xf32>
    %949 = vector.shape_cast %948 : vector<1x8x384xf32> to vector<8x384xf32>
    %cst_277 = arith.constant dense<0.000000e+00> : vector<8x384xf32>
    %950 = tpu.matmul %914, %35, %cst_277 {dimension_numbers = #tpu.dot_dimension_numbers<[1], [0], [0], [1], [0, 0, 1, 1], [], []>} : vector<8x128xf32>, vector<128x384xf32>, vector<8x384xf32> -> vector<8x384xf32>
    %951 = arith.addf %950, %26 : vector<8x384xf32>
    %952 = vector.extract_strided_slice %949 {offsets = [0, 0], sizes = [8, 128], strides = [1, 1]} : vector<8x384xf32> to vector<8x128xf32>
    %953 = vector.extract_strided_slice %951 {offsets = [0, 0], sizes = [8, 128], strides = [1, 1]} : vector<8x384xf32> to vector<8x128xf32>
    %954 = arith.addf %952, %953 : vector<8x128xf32>
    %955 = arith.negf %954 : vector<8x128xf32>
    %956 = math.exp %955 : vector<8x128xf32>
    %cst_278 = arith.constant 1.000000e+00 : f32
    %957 = vector.broadcast %cst_278 : f32 to vector<8x128xf32>
    %958 = arith.addf %957, %956 : vector<8x128xf32>
    %959 = arith.divf %957, %958 : vector<8x128xf32>
    %960 = vector.extract_strided_slice %949 {offsets = [0, 128], sizes = [8, 128], strides = [1, 1]} : vector<8x384xf32> to vector<8x128xf32>
    %961 = vector.extract_strided_slice %951 {offsets = [0, 128], sizes = [8, 128], strides = [1, 1]} : vector<8x384xf32> to vector<8x128xf32>
    %962 = arith.addf %960, %961 : vector<8x128xf32>
    %963 = arith.negf %962 : vector<8x128xf32>
    %964 = math.exp %963 : vector<8x128xf32>
    %cst_279 = arith.constant 1.000000e+00 : f32
    %965 = vector.broadcast %cst_279 : f32 to vector<8x128xf32>
    %966 = arith.addf %965, %964 : vector<8x128xf32>
    %967 = arith.divf %965, %966 : vector<8x128xf32>
    %968 = vector.extract_strided_slice %949 {offsets = [0, 256], sizes = [8, 128], strides = [1, 1]} : vector<8x384xf32> to vector<8x128xf32>
    %969 = vector.extract_strided_slice %951 {offsets = [0, 256], sizes = [8, 128], strides = [1, 1]} : vector<8x384xf32> to vector<8x128xf32>
    %970 = arith.mulf %959, %969 : vector<8x128xf32>
    %971 = arith.addf %968, %970 : vector<8x128xf32>
    %972 = math.tanh %971 : vector<8x128xf32>
    %cst_280 = arith.constant 1.000000e+00 : f32
    %973 = vector.broadcast %cst_280 : f32 to vector<8x128xf32>
    %974 = arith.subf %973, %967 : vector<8x128xf32>
    %975 = arith.mulf %974, %972 : vector<8x128xf32>
    %976 = arith.mulf %967, %914 : vector<8x128xf32>
    %977 = arith.addf %975, %976 : vector<8x128xf32>
    %c7_i32_281 = arith.constant 7 : i32
    %978 = arith.subi %c7_i32_281, %c5_i32_274 : i32
    %979 = arith.index_cast %978 : i32 to index
    %c0_282 = arith.constant 0 : index
    %c0_283 = arith.constant 0 : index
    %980 = vector.load %arg19[%979, %c0_282, %c0_283] : memref<8x8x384xf32, #tpu.memory_space<vmem>>, vector<1x8x384xf32>
    %981 = vector.shape_cast %980 : vector<1x8x384xf32> to vector<8x384xf32>
    %cst_284 = arith.constant dense<0.000000e+00> : vector<8x384xf32>
    %982 = tpu.matmul %946, %37, %cst_284 {dimension_numbers = #tpu.dot_dimension_numbers<[1], [0], [0], [1], [0, 0, 1, 1], [], []>} : vector<8x128xf32>, vector<128x384xf32>, vector<8x384xf32> -> vector<8x384xf32>
    %983 = arith.addf %982, %29 : vector<8x384xf32>
    %984 = vector.extract_strided_slice %981 {offsets = [0, 0], sizes = [8, 128], strides = [1, 1]} : vector<8x384xf32> to vector<8x128xf32>
    %985 = vector.extract_strided_slice %983 {offsets = [0, 0], sizes = [8, 128], strides = [1, 1]} : vector<8x384xf32> to vector<8x128xf32>
    %986 = arith.addf %984, %985 : vector<8x128xf32>
    %987 = arith.negf %986 : vector<8x128xf32>
    %988 = math.exp %987 : vector<8x128xf32>
    %cst_285 = arith.constant 1.000000e+00 : f32
    %989 = vector.broadcast %cst_285 : f32 to vector<8x128xf32>
    %990 = arith.addf %989, %988 : vector<8x128xf32>
    %991 = arith.divf %989, %990 : vector<8x128xf32>
    %992 = vector.extract_strided_slice %981 {offsets = [0, 128], sizes = [8, 128], strides = [1, 1]} : vector<8x384xf32> to vector<8x128xf32>
    %993 = vector.extract_strided_slice %983 {offsets = [0, 128], sizes = [8, 128], strides = [1, 1]} : vector<8x384xf32> to vector<8x128xf32>
    %994 = arith.addf %992, %993 : vector<8x128xf32>
    %995 = arith.negf %994 : vector<8x128xf32>
    %996 = math.exp %995 : vector<8x128xf32>
    %cst_286 = arith.constant 1.000000e+00 : f32
    %997 = vector.broadcast %cst_286 : f32 to vector<8x128xf32>
    %998 = arith.addf %997, %996 : vector<8x128xf32>
    %999 = arith.divf %997, %998 : vector<8x128xf32>
    %1000 = vector.extract_strided_slice %981 {offsets = [0, 256], sizes = [8, 128], strides = [1, 1]} : vector<8x384xf32> to vector<8x128xf32>
    %1001 = vector.extract_strided_slice %983 {offsets = [0, 256], sizes = [8, 128], strides = [1, 1]} : vector<8x384xf32> to vector<8x128xf32>
    %1002 = arith.mulf %991, %1001 : vector<8x128xf32>
    %1003 = arith.addf %1000, %1002 : vector<8x128xf32>
    %1004 = math.tanh %1003 : vector<8x128xf32>
    %cst_287 = arith.constant 1.000000e+00 : f32
    %1005 = vector.broadcast %cst_287 : f32 to vector<8x128xf32>
    %1006 = arith.subf %1005, %999 : vector<8x128xf32>
    %1007 = arith.mulf %1006, %1004 : vector<8x128xf32>
    %1008 = arith.mulf %999, %946 : vector<8x128xf32>
    %1009 = arith.addf %1007, %1008 : vector<8x128xf32>
    %c6_i32_288 = arith.constant 6 : i32
    %1010 = arith.index_cast %c6_i32_288 : i32 to index
    %c0_289 = arith.constant 0 : index
    %c0_290 = arith.constant 0 : index
    %1011 = vector.load %arg18[%1010, %c0_289, %c0_290] : memref<8x8x384xf32, #tpu.memory_space<vmem>>, vector<1x8x384xf32>
    %1012 = vector.shape_cast %1011 : vector<1x8x384xf32> to vector<8x384xf32>
    %cst_291 = arith.constant dense<0.000000e+00> : vector<8x384xf32>
    %1013 = tpu.matmul %977, %35, %cst_291 {dimension_numbers = #tpu.dot_dimension_numbers<[1], [0], [0], [1], [0, 0, 1, 1], [], []>} : vector<8x128xf32>, vector<128x384xf32>, vector<8x384xf32> -> vector<8x384xf32>
    %1014 = arith.addf %1013, %26 : vector<8x384xf32>
    %1015 = vector.extract_strided_slice %1012 {offsets = [0, 0], sizes = [8, 128], strides = [1, 1]} : vector<8x384xf32> to vector<8x128xf32>
    %1016 = vector.extract_strided_slice %1014 {offsets = [0, 0], sizes = [8, 128], strides = [1, 1]} : vector<8x384xf32> to vector<8x128xf32>
    %1017 = arith.addf %1015, %1016 : vector<8x128xf32>
    %1018 = arith.negf %1017 : vector<8x128xf32>
    %1019 = math.exp %1018 : vector<8x128xf32>
    %cst_292 = arith.constant 1.000000e+00 : f32
    %1020 = vector.broadcast %cst_292 : f32 to vector<8x128xf32>
    %1021 = arith.addf %1020, %1019 : vector<8x128xf32>
    %1022 = arith.divf %1020, %1021 : vector<8x128xf32>
    %1023 = vector.extract_strided_slice %1012 {offsets = [0, 128], sizes = [8, 128], strides = [1, 1]} : vector<8x384xf32> to vector<8x128xf32>
    %1024 = vector.extract_strided_slice %1014 {offsets = [0, 128], sizes = [8, 128], strides = [1, 1]} : vector<8x384xf32> to vector<8x128xf32>
    %1025 = arith.addf %1023, %1024 : vector<8x128xf32>
    %1026 = arith.negf %1025 : vector<8x128xf32>
    %1027 = math.exp %1026 : vector<8x128xf32>
    %cst_293 = arith.constant 1.000000e+00 : f32
    %1028 = vector.broadcast %cst_293 : f32 to vector<8x128xf32>
    %1029 = arith.addf %1028, %1027 : vector<8x128xf32>
    %1030 = arith.divf %1028, %1029 : vector<8x128xf32>
    %1031 = vector.extract_strided_slice %1012 {offsets = [0, 256], sizes = [8, 128], strides = [1, 1]} : vector<8x384xf32> to vector<8x128xf32>
    %1032 = vector.extract_strided_slice %1014 {offsets = [0, 256], sizes = [8, 128], strides = [1, 1]} : vector<8x384xf32> to vector<8x128xf32>
    %1033 = arith.mulf %1022, %1032 : vector<8x128xf32>
    %1034 = arith.addf %1031, %1033 : vector<8x128xf32>
    %1035 = math.tanh %1034 : vector<8x128xf32>
    %cst_294 = arith.constant 1.000000e+00 : f32
    %1036 = vector.broadcast %cst_294 : f32 to vector<8x128xf32>
    %1037 = arith.subf %1036, %1030 : vector<8x128xf32>
    %1038 = arith.mulf %1037, %1035 : vector<8x128xf32>
    %1039 = arith.mulf %1030, %977 : vector<8x128xf32>
    %1040 = arith.addf %1038, %1039 : vector<8x128xf32>
    %c7_i32_295 = arith.constant 7 : i32
    %1041 = arith.subi %c7_i32_295, %c6_i32_288 : i32
    %1042 = arith.index_cast %1041 : i32 to index
    %c0_296 = arith.constant 0 : index
    %c0_297 = arith.constant 0 : index
    %1043 = vector.load %arg19[%1042, %c0_296, %c0_297] : memref<8x8x384xf32, #tpu.memory_space<vmem>>, vector<1x8x384xf32>
    %1044 = vector.shape_cast %1043 : vector<1x8x384xf32> to vector<8x384xf32>
    %cst_298 = arith.constant dense<0.000000e+00> : vector<8x384xf32>
    %1045 = tpu.matmul %1009, %37, %cst_298 {dimension_numbers = #tpu.dot_dimension_numbers<[1], [0], [0], [1], [0, 0, 1, 1], [], []>} : vector<8x128xf32>, vector<128x384xf32>, vector<8x384xf32> -> vector<8x384xf32>
    %1046 = arith.addf %1045, %29 : vector<8x384xf32>
    %1047 = vector.extract_strided_slice %1044 {offsets = [0, 0], sizes = [8, 128], strides = [1, 1]} : vector<8x384xf32> to vector<8x128xf32>
    %1048 = vector.extract_strided_slice %1046 {offsets = [0, 0], sizes = [8, 128], strides = [1, 1]} : vector<8x384xf32> to vector<8x128xf32>
    %1049 = arith.addf %1047, %1048 : vector<8x128xf32>
    %1050 = arith.negf %1049 : vector<8x128xf32>
    %1051 = math.exp %1050 : vector<8x128xf32>
    %cst_299 = arith.constant 1.000000e+00 : f32
    %1052 = vector.broadcast %cst_299 : f32 to vector<8x128xf32>
    %1053 = arith.addf %1052, %1051 : vector<8x128xf32>
    %1054 = arith.divf %1052, %1053 : vector<8x128xf32>
    %1055 = vector.extract_strided_slice %1044 {offsets = [0, 128], sizes = [8, 128], strides = [1, 1]} : vector<8x384xf32> to vector<8x128xf32>
    %1056 = vector.extract_strided_slice %1046 {offsets = [0, 128], sizes = [8, 128], strides = [1, 1]} : vector<8x384xf32> to vector<8x128xf32>
    %1057 = arith.addf %1055, %1056 : vector<8x128xf32>
    %1058 = arith.negf %1057 : vector<8x128xf32>
    %1059 = math.exp %1058 : vector<8x128xf32>
    %cst_300 = arith.constant 1.000000e+00 : f32
    %1060 = vector.broadcast %cst_300 : f32 to vector<8x128xf32>
    %1061 = arith.addf %1060, %1059 : vector<8x128xf32>
    %1062 = arith.divf %1060, %1061 : vector<8x128xf32>
    %1063 = vector.extract_strided_slice %1044 {offsets = [0, 256], sizes = [8, 128], strides = [1, 1]} : vector<8x384xf32> to vector<8x128xf32>
    %1064 = vector.extract_strided_slice %1046 {offsets = [0, 256], sizes = [8, 128], strides = [1, 1]} : vector<8x384xf32> to vector<8x128xf32>
    %1065 = arith.mulf %1054, %1064 : vector<8x128xf32>
    %1066 = arith.addf %1063, %1065 : vector<8x128xf32>
    %1067 = math.tanh %1066 : vector<8x128xf32>
    %cst_301 = arith.constant 1.000000e+00 : f32
    %1068 = vector.broadcast %cst_301 : f32 to vector<8x128xf32>
    %1069 = arith.subf %1068, %1062 : vector<8x128xf32>
    %1070 = arith.mulf %1069, %1067 : vector<8x128xf32>
    %1071 = arith.mulf %1062, %1009 : vector<8x128xf32>
    %1072 = arith.addf %1070, %1071 : vector<8x128xf32>
    %c7_i32_302 = arith.constant 7 : i32
    %1073 = arith.index_cast %c7_i32_302 : i32 to index
    %c0_303 = arith.constant 0 : index
    %c0_304 = arith.constant 0 : index
    %1074 = vector.load %arg18[%1073, %c0_303, %c0_304] : memref<8x8x384xf32, #tpu.memory_space<vmem>>, vector<1x8x384xf32>
    %1075 = vector.shape_cast %1074 : vector<1x8x384xf32> to vector<8x384xf32>
    %cst_305 = arith.constant dense<0.000000e+00> : vector<8x384xf32>
    %1076 = tpu.matmul %1040, %35, %cst_305 {dimension_numbers = #tpu.dot_dimension_numbers<[1], [0], [0], [1], [0, 0, 1, 1], [], []>} : vector<8x128xf32>, vector<128x384xf32>, vector<8x384xf32> -> vector<8x384xf32>
    %1077 = arith.addf %1076, %26 : vector<8x384xf32>
    %1078 = vector.extract_strided_slice %1075 {offsets = [0, 0], sizes = [8, 128], strides = [1, 1]} : vector<8x384xf32> to vector<8x128xf32>
    %1079 = vector.extract_strided_slice %1077 {offsets = [0, 0], sizes = [8, 128], strides = [1, 1]} : vector<8x384xf32> to vector<8x128xf32>
    %1080 = arith.addf %1078, %1079 : vector<8x128xf32>
    %1081 = arith.negf %1080 : vector<8x128xf32>
    %1082 = math.exp %1081 : vector<8x128xf32>
    %cst_306 = arith.constant 1.000000e+00 : f32
    %1083 = vector.broadcast %cst_306 : f32 to vector<8x128xf32>
    %1084 = arith.addf %1083, %1082 : vector<8x128xf32>
    %1085 = arith.divf %1083, %1084 : vector<8x128xf32>
    %1086 = vector.extract_strided_slice %1075 {offsets = [0, 128], sizes = [8, 128], strides = [1, 1]} : vector<8x384xf32> to vector<8x128xf32>
    %1087 = vector.extract_strided_slice %1077 {offsets = [0, 128], sizes = [8, 128], strides = [1, 1]} : vector<8x384xf32> to vector<8x128xf32>
    %1088 = arith.addf %1086, %1087 : vector<8x128xf32>
    %1089 = arith.negf %1088 : vector<8x128xf32>
    %1090 = math.exp %1089 : vector<8x128xf32>
    %cst_307 = arith.constant 1.000000e+00 : f32
    %1091 = vector.broadcast %cst_307 : f32 to vector<8x128xf32>
    %1092 = arith.addf %1091, %1090 : vector<8x128xf32>
    %1093 = arith.divf %1091, %1092 : vector<8x128xf32>
    %1094 = vector.extract_strided_slice %1075 {offsets = [0, 256], sizes = [8, 128], strides = [1, 1]} : vector<8x384xf32> to vector<8x128xf32>
    %1095 = vector.extract_strided_slice %1077 {offsets = [0, 256], sizes = [8, 128], strides = [1, 1]} : vector<8x384xf32> to vector<8x128xf32>
    %1096 = arith.mulf %1085, %1095 : vector<8x128xf32>
    %1097 = arith.addf %1094, %1096 : vector<8x128xf32>
    %1098 = math.tanh %1097 : vector<8x128xf32>
    %cst_308 = arith.constant 1.000000e+00 : f32
    %1099 = vector.broadcast %cst_308 : f32 to vector<8x128xf32>
    %1100 = arith.subf %1099, %1093 : vector<8x128xf32>
    %1101 = arith.mulf %1100, %1098 : vector<8x128xf32>
    %1102 = arith.mulf %1093, %1040 : vector<8x128xf32>
    %1103 = arith.addf %1101, %1102 : vector<8x128xf32>
    %c7_i32_309 = arith.constant 7 : i32
    %1104 = arith.subi %c7_i32_309, %c7_i32_302 : i32
    %1105 = arith.index_cast %1104 : i32 to index
    %c0_310 = arith.constant 0 : index
    %c0_311 = arith.constant 0 : index
    %1106 = vector.load %arg19[%1105, %c0_310, %c0_311] : memref<8x8x384xf32, #tpu.memory_space<vmem>>, vector<1x8x384xf32>
    %1107 = vector.shape_cast %1106 : vector<1x8x384xf32> to vector<8x384xf32>
    %cst_312 = arith.constant dense<0.000000e+00> : vector<8x384xf32>
    %1108 = tpu.matmul %1072, %37, %cst_312 {dimension_numbers = #tpu.dot_dimension_numbers<[1], [0], [0], [1], [0, 0, 1, 1], [], []>} : vector<8x128xf32>, vector<128x384xf32>, vector<8x384xf32> -> vector<8x384xf32>
    %1109 = arith.addf %1108, %29 : vector<8x384xf32>
    %1110 = vector.extract_strided_slice %1107 {offsets = [0, 0], sizes = [8, 128], strides = [1, 1]} : vector<8x384xf32> to vector<8x128xf32>
    %1111 = vector.extract_strided_slice %1109 {offsets = [0, 0], sizes = [8, 128], strides = [1, 1]} : vector<8x384xf32> to vector<8x128xf32>
    %1112 = arith.addf %1110, %1111 : vector<8x128xf32>
    %1113 = arith.negf %1112 : vector<8x128xf32>
    %1114 = math.exp %1113 : vector<8x128xf32>
    %cst_313 = arith.constant 1.000000e+00 : f32
    %1115 = vector.broadcast %cst_313 : f32 to vector<8x128xf32>
    %1116 = arith.addf %1115, %1114 : vector<8x128xf32>
    %1117 = arith.divf %1115, %1116 : vector<8x128xf32>
    %1118 = vector.extract_strided_slice %1107 {offsets = [0, 128], sizes = [8, 128], strides = [1, 1]} : vector<8x384xf32> to vector<8x128xf32>
    %1119 = vector.extract_strided_slice %1109 {offsets = [0, 128], sizes = [8, 128], strides = [1, 1]} : vector<8x384xf32> to vector<8x128xf32>
    %1120 = arith.addf %1118, %1119 : vector<8x128xf32>
    %1121 = arith.negf %1120 : vector<8x128xf32>
    %1122 = math.exp %1121 : vector<8x128xf32>
    %cst_314 = arith.constant 1.000000e+00 : f32
    %1123 = vector.broadcast %cst_314 : f32 to vector<8x128xf32>
    %1124 = arith.addf %1123, %1122 : vector<8x128xf32>
    %1125 = arith.divf %1123, %1124 : vector<8x128xf32>
    %1126 = vector.extract_strided_slice %1107 {offsets = [0, 256], sizes = [8, 128], strides = [1, 1]} : vector<8x384xf32> to vector<8x128xf32>
    %1127 = vector.extract_strided_slice %1109 {offsets = [0, 256], sizes = [8, 128], strides = [1, 1]} : vector<8x384xf32> to vector<8x128xf32>
    %1128 = arith.mulf %1117, %1127 : vector<8x128xf32>
    %1129 = arith.addf %1126, %1128 : vector<8x128xf32>
    %1130 = math.tanh %1129 : vector<8x128xf32>
    %cst_315 = arith.constant 1.000000e+00 : f32
    %1131 = vector.broadcast %cst_315 : f32 to vector<8x128xf32>
    %1132 = arith.subf %1131, %1125 : vector<8x128xf32>
    %1133 = arith.mulf %1132, %1130 : vector<8x128xf32>
    %1134 = arith.mulf %1125, %1072 : vector<8x128xf32>
    %1135 = arith.addf %1133, %1134 : vector<8x128xf32>
    %c8_i32_316 = arith.constant 8 : i32
    %c0_317 = arith.constant 0 : index
    %c0_318 = arith.constant 0 : index
    %1136 = vector.load %arg10[%c0_317, %c0_318] : memref<512x128xf32, #tpu.memory_space<vmem>>, vector<128x128xf32>
    %cst_319 = arith.constant dense<0.000000e+00> : vector<8x128xf32>
    %1137 = tpu.matmul %569, %1136, %cst_319 {dimension_numbers = #tpu.dot_dimension_numbers<[1], [0], [0], [1], [0, 0, 1, 1], [], []>} : vector<8x128xf32>, vector<128x128xf32>, vector<8x128xf32> -> vector<8x128xf32>
    %c128_320 = arith.constant 128 : index
    %c0_321 = arith.constant 0 : index
    %1138 = vector.load %arg10[%c128_320, %c0_321] : memref<512x128xf32, #tpu.memory_space<vmem>>, vector<128x128xf32>
    %cst_322 = arith.constant dense<0.000000e+00> : vector<8x128xf32>
    %1139 = tpu.matmul %605, %1138, %cst_322 {dimension_numbers = #tpu.dot_dimension_numbers<[1], [0], [0], [1], [0, 0, 1, 1], [], []>} : vector<8x128xf32>, vector<128x128xf32>, vector<8x128xf32> -> vector<8x128xf32>
    %1140 = arith.addf %1137, %1139 : vector<8x128xf32>
    %c256 = arith.constant 256 : index
    %c0_323 = arith.constant 0 : index
    %1141 = vector.load %arg10[%c256, %c0_323] : memref<512x128xf32, #tpu.memory_space<vmem>>, vector<128x128xf32>
    %cst_324 = arith.constant dense<0.000000e+00> : vector<8x128xf32>
    %1142 = tpu.matmul %1103, %1141, %cst_324 {dimension_numbers = #tpu.dot_dimension_numbers<[1], [0], [0], [1], [0, 0, 1, 1], [], []>} : vector<8x128xf32>, vector<128x128xf32>, vector<8x128xf32> -> vector<8x128xf32>
    %1143 = arith.addf %1140, %1142 : vector<8x128xf32>
    %c384 = arith.constant 384 : index
    %c0_325 = arith.constant 0 : index
    %1144 = vector.load %arg10[%c384, %c0_325] : memref<512x128xf32, #tpu.memory_space<vmem>>, vector<128x128xf32>
    %cst_326 = arith.constant dense<0.000000e+00> : vector<8x128xf32>
    %1145 = tpu.matmul %1135, %1144, %cst_326 {dimension_numbers = #tpu.dot_dimension_numbers<[1], [0], [0], [1], [0, 0, 1, 1], [], []>} : vector<8x128xf32>, vector<128x128xf32>, vector<8x128xf32> -> vector<8x128xf32>
    %1146 = arith.addf %1143, %1145 : vector<8x128xf32>
    %c0_327 = arith.constant 0 : index
    %c0_328 = arith.constant 0 : index
    %1147 = vector.load %arg11[%c0_327, %c0_328] : memref<1x128xf32, #tpu.memory_space<vmem>>, vector<1x128xf32>
    %1148 = vector.broadcast %1147 : vector<1x128xf32> to vector<8x128xf32>
    %1149 = arith.addf %1146, %1148 : vector<8x128xf32>
    %1150 = math.tanh %1149 : vector<8x128xf32>
    %c0_329 = arith.constant 0 : index
    %c0_330 = arith.constant 0 : index
    %1151 = vector.load %arg12[%c0_329, %c0_330] : memref<128x1xf32, #tpu.memory_space<vmem>>, vector<128x1xf32>
    %cst_331 = arith.constant dense<0.000000e+00> : vector<8x1xf32>
    %1152 = tpu.matmul %1150, %1151, %cst_331 {dimension_numbers = #tpu.dot_dimension_numbers<[1], [0], [0], [1], [0, 0, 1, 1], [], []>} : vector<8x128xf32>, vector<128x1xf32>, vector<8x1xf32> -> vector<8x1xf32>
    %c0_332 = arith.constant 0 : index
    %c0_333 = arith.constant 0 : index
    %1153 = vector.load %arg13[%c0_332, %c0_333] : memref<1x1xf32, #tpu.memory_space<vmem>>, vector<1x1xf32>
    %1154 = vector.broadcast %1153 : vector<1x1xf32> to vector<8x1xf32>
    %1155 = arith.addf %1152, %1154 : vector<8x1xf32>
    %1156 = arith.negf %1155 : vector<8x1xf32>
    %1157 = math.exp %1156 : vector<8x1xf32>
    %cst_334 = arith.constant 1.000000e+00 : f32
    %1158 = vector.broadcast %cst_334 : f32 to vector<8x1xf32>
    %1159 = arith.addf %1158, %1157 : vector<8x1xf32>
    %1160 = arith.divf %1158, %1159 : vector<8x1xf32>
    %c0_335 = arith.constant 0 : index
    %c0_336 = arith.constant 0 : index
    %1161 = vector.load %arg14[%c0_335, %c0_336] : memref<8x1xf32, #tpu.memory_space<vmem>>, vector<8x1xf32>
    tpu.vector_store %arg14[%c0_335, %c0_336], %1160 {strides = array<i32>} : memref<8x1xf32, #tpu.memory_space<vmem>>, vector<8x1xf32>,
    return
  }
}

</mosaic_0001>

<bundles_post_ra>
// kernel: discriminator_forward.1
= control target key start
LH: loop header
LB: loop body
LE: loop exit
PB: predicated region body
PF: predicated region fallthrough
CT: control target
= control target key end

     0   :  { %vm71_vm0 = vcmask 130048   ;;  %s12939_s2 = inlined_call_operand.vmem [shape: f32[2,16,384], index: 2, kind: input, shape index: {}]   ;;  %s12940_s0 = inlined_call_operand.vmem [shape: f32[8,8,16], index: 0, kind: input, shape index: {}]   ;;  %s12941_s3 = inlined_call_operand.vmem [shape: f32[2,128,384], index: 3, kind: input, shape index: {}]   ;;  %s12942_s1 = inlined_call_operand.vmem [shape: f32[4,8,128], index: 1, kind: input, shape index: {}]   ;;  %s12943_s5 = inlined_call_operand.vmem [shape: f32[2,384], index: 5, kind: input, shape index: {}]   ;;  %s12944_s4 = inlined_call_operand.vmem [shape: f32[2,384], index: 4, kind: input, shape index: {}]   ;;  %s12945_s6 = inlined_call_operand.vmem [shape: f32[2,256,384], index: 6, kind: input, shape index: {}]   ;;  %s12946_s7 = inlined_call_operand.vmem [shape: f32[2,128,384], index: 7, kind: input, shape index: {}]   ;;  %s12947_s8 = inlined_call_operand.vmem [shape: f32[2,384], index: 8, kind: input, shape index: {}]   ;;  %s12948_s9 = inlined_call_operand.vmem [shape: f32[2,384], index: 9, kind: input, shape index: {}]   ;;  %s12949_s10 = inlined_call_operand.vmem [shape: f32[512,128], index: 10, kind: input, shape index: {}]   ;;  %s12950_s12 = inlined_call_operand.vmem [shape: f32[128,1], index: 12, kind: input, shape index: {}]   ;;  %s12951_s11 = inlined_call_operand.vmem [shape: f32[1,128], index: 11, kind: input, shape index: {}]   ;;  %s12952_s13 = inlined_call_operand.<no memory space> [shape: f32[1,1], index: 13, kind: input, shape index: {}]   ;;  %s12953_s14 = inlined_call_operand.vmem [shape: f32[8,1], index: 14, kind: output, shape index: {}]  }
   0x1   :  { %v60_v0 = vld [vmem:[%s12939_s2 + $0x18] sm:$0xff]  ;;  %v57_v1 = vld [vmem:[%s12939_s2] sm:$0xff]  ;;  %v6320_v3 = vld [vmem:[%s12940_s0 + $0x28] sm:$0xff] }
   0x2   :  { %110 = vmatpush.msra.mxu0 %v60_v0  ;;  %5513 = vmatpush.msra.mxu1 %v60_v0  ;;  %v6315_v2 = vld [vmem:[%s12940_s0] sm:$0xff]  ;;  %v6325_v4 = vld [vmem:[%s12940_s0 + $0x30] sm:$0xff]  ;;  %v6330_v5 = vld [vmem:[%s12940_s0 + $0x38] sm:$0xff] }
   0x3   :  { %5514 = vmatpush.msra.mxu2 %v60_v0  ;;  %5515 = vmatpush.msra.mxu3 %v60_v0  ;;  %v61_v6 = vld [vmem:[%s12939_s2 + $0x20] sm:$0xff]  ;;  %v62_v7 = vld [vmem:[%s12939_s2 + $0x28] sm:$0xff]  ;;  %v5223_v9 = vld [vmem:[%s12939_s2 + $0x50] sm:$0xff] }
   0x4   :  { %111 = vmatpush.msra.mxu0 %v57_v1  ;;  %5516 = vmatpush.msra.mxu1 %v57_v1  ;;  %v5222_v8 = vld [vmem:[%s12939_s2 + $0x48] sm:$0xff]  ;;  %v59_v11 = vld [vmem:[%s12939_s2 + $0x10] sm:$0xff]  ;;  %v5224_v13 = vld [vmem:[%s12939_s2 + $0x58] sm:$0xff] }
   0x5   :  { %5517 = vmatpush.msra.mxu2 %v57_v1  ;;  %5518 = vmatpush.msra.mxu3 %v57_v1  ;;  %v58_v10 = vld [vmem:[%s12939_s2 + $0x8] sm:$0xff]  ;;  %v5219_v12 = vld [vmem:[%s12939_s2 + $0x30] sm:$0xff]  ;;  %v5220_v15 = vld [vmem:[%s12939_s2 + $0x38] sm:$0xff] }
   0x6   :  { %5195 = vmatmul.msk.f32.vlgmr.msra.gmra.mxu0 %vm71_vm0, %v6315_v2  ;;  %5200 = vmatmul.msk.f32.vlgmr.msra.gmra.mxu1 %vm71_vm0, %v6320_v3  ;;  %v6367_v14 = vld [vmem:[%s12941_s3 + $0x170] sm:$0xff]  ;;  %v6375_v16 = vld [vmem:[%s12941_s3 + $0x168] sm:$0xff]  ;;  %v6386_v18 = vld [vmem:[%s12941_s3 + $0x158] sm:$0xff] }
   0x7   :  { %5201 = vmatmul.msk.f32.vlgmr.msra.gmra.mxu2 %vm71_vm0, %v6325_v4  ;;  %5202 = vmatmul.msk.f32.vlgmr.msra.gmra.mxu3 %vm71_vm0, %v6330_v5  ;;  %13452 = vst [vmem:[#allocation8_spill] sm:$0xff] %v6367_v14  ;;  %v6380_v17 = vld [vmem:[%s12940_s0 + $0x8] sm:$0xff]  ;;  %v6392_v19 = vld [vmem:[%s12941_s3 + $0x150] sm:$0xff]  ;;  %v6405_v20 = vld [vmem:[%s12941_s3 + $0x140] sm:$0xff] }
   0x8   :  { %151 = vmatpush.msrb.mxu1 %v61_v6  ;;  %192 = vmatpush.msrb.mxu2 %v62_v7  ;;  %v6410_v21 = vld [vmem:[%s12941_s3 + $0x138] sm:$0xff]  ;;  %v5221_v22 = vld [vmem:[%s12939_s2 + $0x40] sm:$0xff]  ;;  %v6420_v23 = vld [vmem:[%s12941_s3 + $0x128] sm:$0xff] }
   0x9   :  { %273 = vmatpush.msrb.mxu3 %v5222_v8  ;;  %314 = vmatpush.msrb.mxu0 %v5223_v9  ;;  %v6425_v24 = vld [vmem:[%s12941_s3 + $0x120] sm:$0xff]  ;;  %v6432_v25 = vld [vmem:[%s12940_s0 + $0x10] sm:$0xff]  ;;  %v6444_v27 = vld [vmem:[%s12941_s3 + $0x108] sm:$0xff] }
   0xa   :  { %152 = vmatpush.msrb.mxu1 %v58_v10  ;;  %193 = vmatpush.msrb.mxu2 %v59_v11  ;;  %v6439_v26 = vld [vmem:[%s12941_s3 + $0x110] sm:$0xff]  ;;  %v6457_v28 = vld [vmem:[%s12941_s3 + $0xf8] sm:$0xff]  ;;  %v6474_v31 = vld [vmem:[%s12941_s3 + $0xe0] sm:$0xff] }
   0xb   :  { %274 = vmatpush.msrb.mxu3 %v5219_v12  ;;  %315 = vmatpush.msrb.mxu0 %v5220_v15  ;;  %v6462_v29 = vld [vmem:[%s12941_s3 + $0xf0] sm:$0xff]  ;;  %v6480_v32 = vld [vmem:[%s12941_s3 + $0xd8] sm:$0xff]  ;;  %v6499_v35 = vld [vmem:[%s12941_s3 + $0xc8] sm:$0xff] }
   0xc   :  { %355 = vmatpush.msra.mxu1 %v5224_v13  ;;  %640 = vmatpush.msra.mxu2 %v6375_v16  ;;  %v6469_v30 = vld [vmem:[%s12941_s3 + $0x2f0] sm:$0xff]  ;;  %v6487_v33 = vld [vmem:[%s12940_s0 + $0x18] sm:$0xff]  ;;  %v6504_v36 = vld [vmem:[%s12941_s3 + $0xc0] sm:$0xff] }
   0xd   :  { %660 = vmatpush.msra.mxu3 %v6367_v14  ;;  %13453 = vst [vmem:[#allocation9_spill] sm:$0xff] %v6469_v30  ;;  %772 = vmatpush.msra.mxu0 %v6469_v30  ;;  %v6494_v34 = vld [vmem:[%s12941_s3 + $0x2d8] sm:$0xff]  ;;  %v6518_v37 = vld [vmem:[%s12941_s3 + $0xb0] sm:$0xff]  ;;  %v6523_v38 = vld [vmem:[%s12941_s3 + $0xa8] sm:$0xff] }
   0xe   :  { %5196 = vmatmul.msk.f32.gmra.mxu0 %vm71_vm0, %v6380_v17  ;;  %5203 = vmatmul.msk.f32.vlgmr.msrb.gmra.mxu1 %vm71_vm0, %v6315_v2  ;;  %13454 = vst [vmem:[#allocation10_spill] sm:$0xff] %v6494_v34  ;;  %v6530_v39 = vld [vmem:[%s12941_s3 + $0x98] sm:$0xff]  ;;  %v6535_v40 = vld [vmem:[%s12941_s3 + $0x90] sm:$0xff]  ;;  %v6542_v41 = vld [vmem:[%s12941_s3 + $0x2c0] sm:$0xff] }
   0xf   :  { %5211 = vmatmul.msk.f32.vlgmr.msrb.gmra.mxu2 %vm71_vm0, %v6315_v2  ;;  %5226 = vmatmul.msk.f32.vlgmr.msrb.gmra.mxu3 %vm71_vm0, %v6315_v2  ;;  %13455 = vst [vmem:[#allocation11_spill] sm:$0xff] %v6542_v41  ;;  %v6547_v42 = vld [vmem:[%s12940_s0 + $0x20] sm:$0xff]  ;;  %v6560_v44 = vld [vmem:[%s12941_s3 + $0x78] sm:$0xff]  ;;  %v6569_v45 = vld [vmem:[%s12941_s3 + $0x2a8] sm:$0xff] }
  0x10   :  { %661 = vmatpush.msra.mxu3 %v6386_v18  ;;  %641 = vmatpush.msra.mxu2 %v6392_v19  ;;  %v6555_v43 = vld [vmem:[%s12941_s3 + $0x80] sm:$0xff]  ;;  %13456 = vst [vmem:[#allocation12_spill] sm:$0xff] %v6569_v45  ;;  %v6578_v46 = vld [vmem:[%s12941_s3 + $0x68] sm:$0xff]  ;;  %v6590_v48 = vld [vmem:[%s12941_s3 + $0x50] sm:$0xff] }
  0x11   :  { %356 = vmatpush.msra.mxu1 %v5221_v22  ;;  %773 = vmatpush.msra.mxu0 %v6494_v34  ;;  %v6583_v47 = vld [vmem:[%s12941_s3 + $0x60] sm:$0xff]  ;;  %v6596_v49 = vld [vmem:[%s12941_s3 + $0x48] sm:$0xff]  ;;  %v6603_v50 = vld [vmem:[%s12941_s3 + $0x290] sm:$0xff] }
  0x12   :  { %662 = vmatpush.msra.mxu3 %v6405_v20  ;;  %642 = vmatpush.msra.mxu2 %v6410_v21  ;;  %13457 = vst [vmem:[#allocation13_spill] sm:$0xff] %v6603_v50  ;;  %v6611_v51 = vld [vmem:[%s12941_s3 + $0x38] sm:$0xff]  ;;  %v6616_v52 = vld [vmem:[%s12941_s3 + $0x30] sm:$0xff]  ;;  %v6634_v54 = vld [vmem:[%s12941_s3 + $0x20] sm:$0xff] }
  0x13   :  { %774 = vmatpush.msra.mxu0 %v6542_v41  ;;  %v6625_v53 = vld [vmem:[%s12941_s3 + $0x278] sm:$0xff]  ;;  %v6651_v57 = vld [vmem:[%s12941_s3 + $0x8] sm:$0xff]  ;;  %v6661_v59 = vld [vmem:[%s12941_s3] sm:$0xff] }
  0x14   :  { %663 = vmatpush.msra.mxu3 %v6420_v23  ;;  %643 = vmatpush.msra.mxu2 %v6425_v24  ;;  %13458 = vst [vmem:[#allocation14_spill] sm:$0xff] %v6625_v53  ;;  %v6639_v55 = vld [vmem:[%s12941_s3 + $0x18] sm:$0xff]  ;;  %v6656_v58 = vld [vmem:[%s12941_s3 + $0x2e8] sm:$0xff]  ;;  %v6675_v61 = vld [vmem:[%s12941_s3 + $0x260] sm:$0xff] }
  0x15   :  { %775 = vmatpush.msra.mxu0 %v6569_v45  ;;  %v6646_v56 = vld [vmem:[%s12941_s3 + $0x2f8] sm:$0xff]  ;;  %13460 = vst [vmem:[#allocation16_spill] sm:$0xff] %v6661_v59  ;;  %v6680_v62 = vld [vmem:[%s12941_s3 + $0x2e0] sm:$0xff]  ;;  %v6690_v63 = vld [vmem:[%s12941_s3 + $0x2d0] sm:$0xff] }
  0x16   :  { %5197 = vmatmul.msk.f32.gmra.mxu0 %vm71_vm0, %v6432_v25  ;;  %5204 = vmatmul.msk.f32.gmra.mxu1 %vm71_vm0, %v6380_v17  ;;  %13459 = vst [vmem:[#allocation15_spill] sm:$0xff] %v6646_v56  ;;  %v6670_v60 = vld [vmem:[%s12941_s3 + $0x178] sm:$0xff]  ;;  %v6696_v0 = vld [vmem:[%s12941_s3 + $0x160] sm:$0xff]  ;;  %v6705_v1 = vld [vmem:[%s12941_s3 + $0x248] sm:$0xff] }
  0x17   :  { %5212 = vmatmul.msk.f32.gmra.mxu2 %vm71_vm0, %v6380_v17  ;;  %5227 = vmatmul.msk.f32.gmra.mxu3 %vm71_vm0, %v6380_v17  ;;  %13461 = vst [vmem:[#allocation17_spill] sm:$0xff] %v6670_v60  ;;  %v6714_v6 = vld [vmem:[%s12941_s3 + $0x2b8] sm:$0xff]  ;;  %v6719_v7 = vld [vmem:[%s12941_s3 + $0x148] sm:$0xff]  ;;  %v6725_v8 = vld [vmem:[%s12941_s3 + $0x2a0] sm:$0xff] }
  0x18   :  { %664 = vmatpush.msra.mxu3 %v6439_v26  ;;  %644 = vmatpush.msra.mxu2 %v6444_v27  ;;  %13462 = vst [vmem:[#allocation18_spill] sm:$0xff] %v6675_v61  ;;  %v6731_v9 = vld [vmem:[%s12941_s3 + $0x2c8] sm:$0xff]  ;;  %v6736_v10 = vld [vmem:[%s12941_s3 + $0x130] sm:$0xff]  ;;  %v6755_v13 = vld [vmem:[%s12941_s3 + $0x218] sm:$0xff] }
  0x19   :  { %776 = vmatpush.msra.mxu0 %v6603_v50  ;;  %792 = vmatpush.msrb.mxu1 %v6646_v56  ;;  %13463 = vst [vmem:[#allocation19_spill] sm:$0xff] %v6680_v62  ;;  %v6743_v11 = vld [vmem:[%s12941_s3 + $0x230] sm:$0xff]  ;;  %v6764_v15 = vld [vmem:[%s12941_s3 + $0x288] sm:$0xff]  ;;  %v6769_v22 = vld [vmem:[%s12941_s3 + $0x118] sm:$0xff] }
  0x1a   :  { %665 = vmatpush.msra.mxu3 %v6457_v28  ;;  %645 = vmatpush.msra.mxu2 %v6462_v29  ;;  %13464 = vst [vmem:[#allocation20_spill] sm:$0xff] %v6696_v0  ;;  %v6748_v12 = vld [vmem:[%s12941_s3 + $0x2b0] sm:$0xff]  ;;  %v6811_v50 = vld [vmem:[%s12941_s3 + $0x200] sm:$0xff]  ;;  %v6837_v41 = vld [vmem:[%s12941_s3 + $0x228] sm:$0xff] }
  0x1b   :  { %777 = vmatpush.msra.mxu0 %v6625_v53  ;;  %793 = vmatpush.msrb.mxu1 %v6680_v62  ;;  %13465 = vst [vmem:[#allocation21_spill] sm:$0xff] %v6705_v1  ;;  %v6805_v53 = vld [vmem:[%s12941_s3 + $0xe8] sm:$0xff]  ;;  %v6816_v45 = vld [vmem:[%s12941_s3 + $0x280] sm:$0xff]  ;;  %v6960_v62 = vld [vmem:[%s12941_s3 + $0x198] sm:$0xff] }
  0x1c   :  { %666 = vmatpush.msra.mxu3 %v6474_v31  ;;  %646 = vmatpush.msra.mxu2 %v6480_v32  ;;  %13466 = vst [vmem:[#allocation22_spill] sm:$0xff] %v6731_v9  ;;  %v6896_v34 = vld [vmem:[%s12941_s3 + $0xa0] sm:$0xff]  ;;  %v6973_v30 = vld [vmem:[%s12941_s3 + $0x58] sm:$0xff] }
  0x1d   :  { %778 = vmatpush.msra.mxu0 %v6675_v61  ;;  %794 = vmatpush.msrb.mxu1 %v6731_v9  ;;  %13467 = vst [vmem:[#allocation23_spill] sm:$0xff] %v6743_v11  ;;  %v6800_v61 = vld [vmem:[%s12941_s3 + $0x298] sm:$0xff]  ;;  %v6890_v9 = vld [vmem:[%s12941_s3 + $0x250] sm:$0xff] }
  0x1e   :  { %5198 = vmatmul.msk.f32.gmra.mxu0 %vm71_vm0, %v6487_v33  ;;  %5205 = vmatmul.msk.f32.gmra.mxu1 %vm71_vm0, %v6432_v25  ;;  %13468 = vst [vmem:[#allocation24_spill] sm:$0xff] %v6748_v12 }
  0x1f   :  { %5213 = vmatmul.msk.f32.gmra.mxu2 %vm71_vm0, %v6432_v25  ;;  %5228 = vmatmul.msk.f32.gmra.mxu3 %vm71_vm0, %v6432_v25  ;;  %13469 = vst [vmem:[#allocation25_spill] sm:$0xff] %v6755_v13 }
  0x20   :  { %667 = vmatpush.msra.mxu3 %v6499_v35  ;;  %647 = vmatpush.msra.mxu2 %v6504_v36  ;;  %13470 = vst [vmem:[#allocation26_spill] sm:$0xff] %v6764_v15 }
  0x21   :  { %779 = vmatpush.msra.mxu0 %v6705_v1  ;;  %795 = vmatpush.msrb.mxu1 %v6748_v12  ;;  %v6794_v1 = vld [vmem:[%s12941_s3 + $0x258] sm:$0xff]  ;;  %13473 = vst [vmem:[#allocation29_spill] sm:$0xff] %v6800_v61  ;;  %v6823_v12 = vld [vmem:[%s12941_s3 + $0x1e8] sm:$0xff] }
  0x22   :  { %668 = vmatpush.msra.mxu3 %v6518_v37  ;;  %648 = vmatpush.msra.mxu2 %v6523_v38  ;;  %13472 = vst [vmem:[#allocation28_spill] sm:$0xff] %v6794_v1 }
  0x23   :  { %780 = vmatpush.msra.mxu0 %v6743_v11  ;;  %v6783_v11 = vld [vmem:[%s12941_s3 + $0x270] sm:$0xff]  ;;  %13474 = vst [vmem:[#allocation30_spill] sm:$0xff] %v6805_v53  ;;  %796 = vmatpush.msrb.mxu1 %v6800_v61  ;;  %v6828_v61 = vld [vmem:[%s12941_s3 + $0x240] sm:$0xff] }
  0x24   :  { %669 = vmatpush.msra.mxu3 %v6530_v39  ;;  %649 = vmatpush.msra.mxu2 %v6535_v40  ;;  %13471 = vst [vmem:[#allocation27_spill] sm:$0xff] %v6783_v11 }
  0x25   :  { %781 = vmatpush.msra.mxu0 %v6755_v13  ;;  %v6788_v13 = vld [vmem:[%s12941_s3 + $0x100] sm:$0xff]  ;;  %13475 = vst [vmem:[#allocation31_spill] sm:$0xff] %v6811_v50  ;;  %797 = vmatpush.msrb.mxu1 %v6816_v45 }
  0x26   :  { %5199 = vmatmul.msk.f32.gmra.mxu0 %vm71_vm0, %v6547_v42  ;;  %5206 = vmatmul.msk.f32.gmra.mxu1 %vm71_vm0, %v6487_v33  ;;  %13476 = vst [vmem:[#allocation32_spill] sm:$0xff] %v6816_v45  ;;  %v6863_v45 = vld [vmem:[%s12941_s3 + $0xb8] sm:$0xff] }
  0x27   :  { %5214 = vmatmul.msk.f32.gmra.mxu2 %vm71_vm0, %v6487_v33  ;;  %5229 = vmatmul.msk.f32.gmra.mxu3 %vm71_vm0, %v6487_v33  ;;  %13477 = vst [vmem:[#allocation33_spill] sm:$0xff] %v6823_v12 }
  0x28   :  { %670 = vmatpush.msra.mxu3 %v6555_v43  ;;  %650 = vmatpush.msra.mxu2 %v6560_v44  ;;  %13478 = vst [vmem:[#allocation34_spill] sm:$0xff] %v6828_v61 }
  0x29   :  { %782 = vmatpush.msra.mxu0 %v6811_v50  ;;  %13479 = vst [vmem:[#allocation35_spill] sm:$0xff] %v6837_v41  ;;  %v6846_v50 = vld [vmem:[%s12941_s3 + $0xd0] sm:$0xff] }
  0x2a   :  { %671 = vmatpush.msra.mxu3 %v6578_v46  ;;  %651 = vmatpush.msra.mxu2 %v6583_v47  ;;  %13480 = vst [vmem:[#allocation36_spill] sm:$0xff] %v6846_v50 }
  0x2b   :  { %783 = vmatpush.msra.mxu0 %v6823_v12  ;;  %v6855_v12 = vld [vmem:[%s12941_s3 + $0x210] sm:$0xff]  ;;  %13482 = vst [vmem:[#allocation38_spill] sm:$0xff] %v6863_v45 }
  0x2c   :  { %672 = vmatpush.msra.mxu3 %v6590_v48  ;;  %652 = vmatpush.msra.mxu2 %v6596_v49  ;;  %13481 = vst [vmem:[#allocation37_spill] sm:$0xff] %v6855_v12 }
  0x2d   :  { %13487 = vst [vmem:[#allocation43_spill] sm:$0xff] %v6890_v9 }
  0x2e   :  { %5207 = vmatmul.msk.f32.gmra.mxu1 %vm71_vm0, %v6547_v42  ;;  %5234 = vmatmul.msk.f32.vlgmr.msrb.gmra.mxu0 %vm71_vm0, %v6315_v2  ;;  %13488 = vst [vmem:[#allocation44_spill] sm:$0xff] %v6896_v34 }
  0x2f   :  { %5215 = vmatmul.msk.f32.gmra.mxu2 %vm71_vm0, %v6547_v42  ;;  %5230 = vmatmul.msk.f32.gmra.mxu3 %vm71_vm0, %v6547_v42  ;;  %13497 = vst [vmem:[#allocation53_spill] sm:$0xff] %v6960_v62 }
  0x30   :  { %673 = vmatpush.msra.mxu3 %v6611_v51  ;;  %653 = vmatpush.msra.mxu2 %v6616_v52  ;;  %13499 = vst [vmem:[#allocation55_spill] sm:$0xff] %v6973_v30 }
  0x32   :  { %674 = vmatpush.msra.mxu3 %v6634_v54  ;;  %654 = vmatpush.msra.mxu2 %v6639_v55 }
  0x34   :  { %675 = vmatpush.msra.mxu3 %v6651_v57  ;;  %655 = vmatpush.msra.mxu2 %v6661_v59  ;;  %v6979_v59 = vld [vmem:[%s12941_s3 + $0x180] sm:$0xff] }
  0x36   :  { %752 = vmatpush.msrb.mxu3 %v6656_v58  ;;  %680 = vmatpush.msrb.mxu2 %v6670_v60 }
  0x37   :  { %5208 = vmatmul.msk.f32.gmra.mxu1 %vm71_vm0, %v6320_v3  ;;  %5235 = vmatmul.msk.f32.gmra.mxu0 %vm71_vm0, %v6380_v17 }
  0x38   :  { %5216 = vmatmul.msk.f32.gmra.mxu2 %vm71_vm0, %v6320_v3  ;;  %5231 = vmatmul.msk.f32.gmra.mxu3 %vm71_vm0, %v6320_v3 }
  0x39   :  { %753 = vmatpush.msrb.mxu3 %v6690_v63  ;;  %681 = vmatpush.msrb.mxu2 %v6696_v0 }
  0x3b   :  { %754 = vmatpush.msrb.mxu3 %v6714_v6  ;;  %682 = vmatpush.msrb.mxu2 %v6719_v7 }
  0x3d   :  { %755 = vmatpush.msrb.mxu3 %v6725_v8  ;;  %683 = vmatpush.msrb.mxu2 %v6736_v10 }
  0x3f   :  { %5209 = vmatmul.msk.f32.gmra.mxu1 %vm71_vm0, %v6325_v4  ;;  %5236 = vmatmul.msk.f32.gmra.mxu0 %vm71_vm0, %v6432_v25 }
  0x40   :  { %5217 = vmatmul.msk.f32.gmra.mxu2 %vm71_vm0, %v6325_v4  ;;  %5232 = vmatmul.msk.f32.gmra.mxu3 %vm71_vm0, %v6325_v4 }
  0x41   :  { %756 = vmatpush.msrb.mxu3 %v6764_v15  ;;  %684 = vmatpush.msrb.mxu2 %v6769_v22  ;;  %v6955_v15 = vld [vmem:[%s12941_s3 + $0x238] sm:$0xff] }
  0x42   :  { %13496 = vst [vmem:[#allocation52_spill] sm:$0xff] %v6955_v15 }
  0x43   :  { %757 = vmatpush.msrb.mxu3 %v6783_v11  ;;  %685 = vmatpush.msrb.mxu2 %v6788_v13  ;;  %v6878_v11 = vld [vmem:[%s12941_s3 + $0x1f8] sm:$0xff] }
  0x44   :  { %13485 = vst [vmem:[#allocation41_spill] sm:$0xff] %v6878_v11 }
  0x45   :  { %758 = vmatpush.msrb.mxu3 %v6794_v1  ;;  %686 = vmatpush.msrb.mxu2 %v6805_v53  ;;  %v6873_v1 = vld [vmem:[%s12941_s3 + $0x1d0] sm:$0xff] }
  0x46   :  { %13484 = vst [vmem:[#allocation40_spill] sm:$0xff] %v6873_v1  ;;  %784 = vmatpush.msra.mxu0 %v6873_v1  ;;  %v6916_v1 = vld [vmem:[%s12941_s3 + $0x1c8] sm:$0xff] }
  0x47   :  { %759 = vmatpush.msrb.mxu3 %v6828_v61  ;;  %5210 = vmatmul.msk.f32.gmra.mxu1 %vm71_vm0, %v6330_v5  ;;  %v6868_v61 = vld [vmem:[%s12941_s3 + $0x268] sm:$0xff]  ;;  %13490 = vst [vmem:[#allocation46_spill] sm:$0xff] %v6916_v1 }
  0x48   :  { %5218 = vmatmul.msk.f32.gmra.mxu2 %vm71_vm0, %v6330_v5  ;;  %5233 = vmatmul.msk.f32.gmra.mxu3 %vm71_vm0, %v6330_v5  ;;  %13483 = vst [vmem:[#allocation39_spill] sm:$0xff] %v6868_v61 }
  0x49   :  { %5237 = vmatmul.msk.f32.gmra.mxu0 %vm71_vm0, %v6487_v33  ;;  %760 = vmatpush.msrb.mxu3 %v6837_v41  ;;  %v6885_v41 = vld [vmem:[%s12941_s3 + $0x1b8] sm:$0xff] }
  0x4a   :  { %687 = vmatpush.msrb.mxu2 %v6846_v50  ;;  %798 = vmatpush.msrb.mxu1 %v6868_v61  ;;  %13486 = vst [vmem:[#allocation42_spill] sm:$0xff] %v6885_v41  ;;  %v6902_v61 = vld [vmem:[%s12941_s3 + $0x1e0] sm:$0xff] }
  0x4b   :  { %761 = vmatpush.msrb.mxu3 %v6855_v12  ;;  %13489 = vst [vmem:[#allocation45_spill] sm:$0xff] %v6902_v61  ;;  %v6910_v12 = vld [vmem:[%s12942_s1] sm:$0xff]  ;;  %785 = vmatpush.msra.mxu0 %v6885_v41 }
  0x4c   :  { %688 = vmatpush.msrb.mxu2 %v6863_v45  ;;  %799 = vmatpush.msrb.mxu1 %v6890_v9  ;;  %v6930_v41 = vld [vmem:[%s12941_s3 + $0x1a0] sm:$0xff]  ;;  %v6950_v9 = vld [vmem:[%s12941_s3 + $0x188] sm:$0xff] }
  0x4d   :  { %762 = vmatpush.msrb.mxu3 %v6878_v11  ;;  %v6925_v11 = vld [vmem:[%s12941_s3 + $0x88] sm:$0xff]  ;;  %13492 = vst [vmem:[#allocation48_spill] sm:$0xff] %v6930_v41  ;;  %786 = vmatpush.msra.mxu0 %v6930_v41 }
  0x4e   :  { %689 = vmatpush.msrb.mxu2 %v6896_v34  ;;  %13491 = vst [vmem:[#allocation47_spill] sm:$0xff] %v6925_v11  ;;  %800 = vmatpush.msrb.mxu1 %v6955_v15  ;;  %v6987_v41 = vld [vmem:[%s12942_s1 + $0x8] sm:$0xff] }
  0x4f   :  { %763 = vmatpush.msrb.mxu3 %v6902_v61  ;;  %5242 = vmatmul.msk.f32.vlgmr.msra.gmra.mxu1 %vm71_vm0, %v6315_v2  ;;  %v6937_v61 = vld [vmem:[%s12941_s3 + $0x1b0] sm:$0xff]  ;;  %13495 = vst [vmem:[#allocation51_spill] sm:$0xff] %v6950_v9 }
  0x50   :  { %656 = vmatmul.f32.vlgmr.msra.gmra.mxu2 %v6910_v12  ;;  %676 = vmatmul.f32.vlgmr.msra.gmra.mxu3 %v6910_v12  ;;  %13493 = vst [vmem:[#allocation49_spill] sm:$0xff] %v6937_v61  ;;  %v6945_v2 = vld [vmem:[%s12941_s3 + $0x70] sm:$0xff] }
  0x51   :  { %5238 = vmatmul.msk.f32.gmra.mxu0 %vm71_vm0, %v6547_v42  ;;  %764 = vmatpush.msrb.mxu3 %v6916_v1  ;;  %13494 = vst [vmem:[#allocation50_spill] sm:$0xff] %v6945_v2  ;;  %v6967_v1 = vld [vmem:[%s12941_s3 + $0x220] sm:$0xff] }
  0x52   :  { %690 = vmatpush.msrb.mxu2 %v6925_v11  ;;  %13498 = vst [vmem:[#allocation54_spill] sm:$0xff] %v6967_v1  ;;  %787 = vmatpush.msra.mxu0 %v6950_v9  ;;  %v7003_v9 = vld [vmem:[%s12941_s3 + $0x28] sm:$0xff] }
  0x53   :  { %765 = vmatpush.msrb.mxu3 %v6937_v61  ;;  %v6992_v61 = vld [vmem:[%s12941_s3 + $0x40] sm:$0xff]  ;;  %801 = vmatpush.msrb.mxu1 %v6967_v1  ;;  %13501 = vst [vmem:[#allocation57_spill] sm:$0xff] %v7003_v9 }
  0x54   :  { %691 = vmatpush.msrb.mxu2 %v6945_v2  ;;  %13500 = vst [vmem:[#allocation56_spill] sm:$0xff] %v6992_v61  ;;  %905 = vmatpush.msrb.mxu0 %v6670_v60  ;;  %v7015_v60 = vld [vmem:[%s12941_s3 + $0x1f0] sm:$0xff] }
  0x55   :  { %766 = vmatpush.msrb.mxu3 %v6960_v62  ;;  %v7008_v62 = vld [vmem:[%s12941_s3 + $0x208] sm:$0xff]  ;;  %13503 = vst [vmem:[#allocation59_spill] sm:$0xff] %v7015_v60 }
  0x56   :  { %692 = vmatpush.msrb.mxu2 %v6973_v30  ;;  %13502 = vst [vmem:[#allocation58_spill] sm:$0xff] %v7008_v62  ;;  %802 = vmatpush.msrb.mxu1 %v7008_v62 }
  0x57   :  { %767 = vmatpush.msrb.mxu3 %v6979_v59  ;;  %5243 = vmatmul.msk.f32.gmra.mxu1 %vm71_vm0, %v6380_v17  ;;  %v7022_v17 = vld [vmem:[%s12941_s3 + $0x10] sm:$0xff] }
  0x58   :  { %768 = vmatmul.f32.vlgmr.msrb.gmra.mxu3 %v6987_v41  ;;  %693 = vmatpush.msrb.mxu2 %v6992_v61  ;;  %13504 = vst [vmem:[#allocation60_spill] sm:$0xff] %v7022_v17 }
  0x59   :  { %5239 = vmatmul.msk.f32.gmra.mxu0 %vm71_vm0, %v6320_v3  ;;  %885 = vmatpush.msra.mxu3 %v6367_v14  ;;  %v7040_v14 = vld [vmem:[%s12941_s3 + $0x1d8] sm:$0xff] }
  0x5a   :  { %694 = vmatpush.msrb.mxu2 %v7003_v9  ;;  %803 = vmatpush.msrb.mxu1 %v7015_v60 }
  0x5b   :  { %906 = vmatpush.msrb.mxu0 %v6696_v0  ;;  %886 = vmatpush.msra.mxu3 %v6386_v18  ;;  %v7045_v0 = vld [vmem:[%s12941_s3 + $0x1c0] sm:$0xff] }
  0x5c   :  { %695 = vmatpush.msrb.mxu2 %v7022_v17  ;;  %804 = vmatpush.msrb.mxu1 %v7040_v14 }
  0x5d   :  { %696 = vmatmul.f32.vlgmr.msrb.gmra.mxu2 %v6910_v12  ;;  %907 = vmatpush.msrb.mxu0 %v6719_v7 }
  0x5e   :  { %865 = vmatpush.msra.mxu2 %v6375_v16  ;;  %887 = vmatpush.msra.mxu3 %v6405_v20 }
  0x5f   :  { %5244 = vmatmul.msk.f32.gmra.mxu1 %vm71_vm0, %v6432_v25  ;;  %908 = vmatpush.msrb.mxu0 %v6736_v10  ;;  %v7066_v25 = vld [vmem:[%s12941_s3 + $0x1a8] sm:$0xff] }
  0x60   :  { %866 = vmatpush.msra.mxu2 %v6392_v19  ;;  %888 = vmatpush.msra.mxu3 %v6420_v23  ;;  %13505 = vst [vmem:[#allocation61_spill] sm:$0xff] %v7066_v25 }
  0x61   :  { %5240 = vmatmul.msk.f32.gmra.mxu0 %vm71_vm0, %v6325_v4  ;;  %805 = vmatpush.msrb.mxu1 %v7045_v0 }
  0x62   :  { %867 = vmatpush.msra.mxu2 %v6410_v21  ;;  %889 = vmatpush.msra.mxu3 %v6439_v26 }
  0x63   :  { %909 = vmatpush.msrb.mxu0 %v6769_v22  ;;  %806 = vmatpush.msrb.mxu1 %v7066_v25 }
  0x64   :  { %868 = vmatpush.msra.mxu2 %v6425_v24  ;;  %890 = vmatpush.msra.mxu3 %v6457_v28 }
  0x65   :  { %910 = vmatpush.msrb.mxu0 %v6788_v13 }
  0x66   :  { %869 = vmatpush.msra.mxu2 %v6444_v27  ;;  %891 = vmatpush.msra.mxu3 %v6474_v31 }
  0x67   :  { %5245 = vmatmul.msk.f32.gmra.mxu1 %vm71_vm0, %v6487_v33  ;;  %911 = vmatpush.msrb.mxu0 %v6805_v53  ;;  %v7080_v33 = vld [vmem:[%s12941_s3 + $0x190] sm:$0xff] }
  0x68   :  { %870 = vmatpush.msra.mxu2 %v6462_v29  ;;  %892 = vmatpush.msra.mxu3 %v6499_v35  ;;  %13506 = vst [vmem:[#allocation62_spill] sm:$0xff] %v7080_v33  ;;  %v13532_v53 = vld [vmem:[#allocation21_spill] sm:$0xff] }
  0x69   :  { %5241 = vmatmul.msk.f32.gmra.mxu0 %vm71_vm0, %v6330_v5  ;;  %807 = vmatpush.msrb.mxu1 %v7080_v33 }
  0x6a   :  { %871 = vmatpush.msra.mxu2 %v6480_v32  ;;  %893 = vmatpush.msra.mxu3 %v6518_v37 }
  0x6b   :  { %912 = vmatpush.msrb.mxu0 %v6846_v50  ;;  %978 = vmatpush.msra.mxu1 %v6656_v58  ;;  %v13521_v50 = vld [vmem:[#allocation13_spill] sm:$0xff] }
  0x6c   :  { %872 = vmatpush.msra.mxu2 %v6504_v36  ;;  %894 = vmatpush.msra.mxu3 %v6530_v39 }
  0x6d   :  { %913 = vmatpush.msrb.mxu0 %v6863_v45  ;;  %979 = vmatpush.msra.mxu1 %v6690_v63  ;;  %v13519_v45 = vld [vmem:[#allocation29_spill] sm:$0xff] }
  0x6e   :  { %873 = vmatpush.msra.mxu2 %v6523_v38  ;;  %895 = vmatpush.msra.mxu3 %v6555_v43 }
  0x6f   :  { %5246 = vmatmul.msk.f32.gmra.mxu1 %vm71_vm0, %v6547_v42  ;;  %914 = vmatpush.msrb.mxu0 %v6896_v34  ;;  %v13507_v42 = vld [vmem:[#allocation16_spill] sm:$0xff] }
  0x70   :  { %874 = vmatpush.msra.mxu2 %v6535_v40  ;;  %896 = vmatpush.msra.mxu3 %v6578_v46  ;;  %v13517_v34 = vld [vmem:[#allocation12_spill] sm:$0xff] }
  0x71   :  { %788 = vmatmul.f32.vlgmr.msra.gmra.mxu0 %v6987_v41  ;;  %980 = vmatpush.msra.mxu1 %v6714_v6 }
  0x72   :  { %875 = vmatpush.msra.mxu2 %v6560_v44  ;;  %915 = vmatpush.msrb.mxu0 %v6925_v11  ;;  %v13514_v11 = vld [vmem:[#allocation11_spill] sm:$0xff] }
  0x73   :  { %897 = vmatpush.msra.mxu3 %v6590_v48  ;;  %981 = vmatpush.msra.mxu1 %v6725_v8 }
  0x74   :  { %876 = vmatpush.msra.mxu2 %v6583_v47  ;;  %916 = vmatpush.msrb.mxu0 %v6945_v2  ;;  %v13513_v2 = vld [vmem:[#allocation27_spill] sm:$0xff] }
  0x75   :  { %898 = vmatpush.msra.mxu3 %v6611_v51 }
  0x76   :  { %877 = vmatpush.msra.mxu2 %v6596_v49  ;;  %917 = vmatpush.msrb.mxu0 %v6973_v30  ;;  %v13509_v30 = vld [vmem:[#allocation19_spill] sm:$0xff] }
  0x77   :  { %5247 = vmatmul.msk.f32.gmra.mxu1 %vm71_vm0, %v6320_v3  ;;  %899 = vmatpush.msra.mxu3 %v6634_v54  ;;  %v13508_v3 = vld [vmem:[#allocation9_spill] sm:$0xff] }
  0x78   :  { %878 = vmatpush.msra.mxu2 %v6616_v52  ;;  %918 = vmatpush.msrb.mxu0 %v6992_v61  ;;  %v13510_v61 = vld [vmem:[#allocation26_spill] sm:$0xff] }
  0x79   :  { %900 = vmatpush.msra.mxu3 %v6651_v57  ;;  %982 = vmatpush.msra.mxu1 %v13510_v61 }
  0x7a   :  { %879 = vmatpush.msra.mxu2 %v6639_v55  ;;  %919 = vmatpush.msrb.mxu0 %v7003_v9  ;;  %v13511_v9 = vld [vmem:[#allocation10_spill] sm:$0xff] }
  0x7b   :  { %1018 = vmatpush.msrb.mxu3 %v6646_v56  ;;  %v13512_v56 = vld [vmem:[#allocation22_spill] sm:$0xff]  ;;  %983 = vmatpush.msra.mxu1 %v13513_v2 }
  0x7c   :  { %880 = vmatpush.msra.mxu2 %v13507_v42  ;;  %920 = vmatpush.msrb.mxu0 %v7022_v17  ;;  %v13515_v17 = vld [vmem:[#allocation24_spill] sm:$0xff] }
  0x7d   :  { %1019 = vmatpush.msrb.mxu3 %v13509_v30  ;;  %v13516_v30 = vld [vmem:[#allocation28_spill] sm:$0xff] }
  0x7e   :  { %998 = vmatpush.msrb.mxu2 %v13508_v3  ;;  %1091 = vmatpush.msra.mxu0 %v6375_v16 }
  0x7f   :  { %5248 = vmatmul.msk.f32.gmra.mxu1 %vm71_vm0, %v6325_v4  ;;  %1020 = vmatpush.msrb.mxu3 %v13512_v56  ;;  %v13520_v56 = vld [vmem:[#allocation34_spill] sm:$0xff] }
  0x80   :  { %999 = vmatpush.msrb.mxu2 %v13511_v9  ;;  %1092 = vmatpush.msra.mxu0 %v6392_v19  ;;  %v13522_v19 = vld [vmem:[#allocation32_spill] sm:$0xff] }
  0x81   :  { %1021 = vmatpush.msrb.mxu3 %v13515_v17  ;;  %984 = vmatpush.msra.mxu1 %v13516_v30  ;;  %v13523_v17 = vld [vmem:[#allocation35_spill] sm:$0xff] }
  0x82   :  { %1000 = vmatpush.msrb.mxu2 %v13514_v11  ;;  %1093 = vmatpush.msra.mxu0 %v6410_v21  ;;  %v13524_v21 = vld [vmem:[#allocation14_spill] sm:$0xff]  ;;  %v13525_v30 = vld [vmem:[#allocation39_spill] sm:$0xff] }
  0x83   :  { %v7133_v16 = vpop.f32.mrf.mxu0  ;;  %v7135_v4 = vpop.f32.mrf.mxu1  ;;  %1022 = vmatpush.msrb.mxu3 %v13519_v45  ;;  %985 = vmatpush.msra.mxu1 %v13520_v56  ;;  %v13527_v45 = vld [vmem:[#allocation18_spill] sm:$0xff]  ;;  %v13528_v56 = vld [vmem:[#allocation43_spill] sm:$0xff] }
  0x84   :  { %1001 = vmatpush.msrb.mxu2 %v13517_v34  ;;  %13518 = vst [vmem:[#allocation16_spill] sm:$0xff] %v7135_v4  ;;  %1094 = vmatpush.msra.mxu0 %v6425_v24  ;;  %v13526_v4 = vld [vmem:[#allocation37_spill] sm:$0xff] }
  0x85   :  { %1023 = vmatpush.msrb.mxu3 %v13522_v19  ;;  %986 = vmatpush.msra.mxu1 %v13523_v17  ;;  %v13529_v24 = vld [vmem:[#allocation41_spill] sm:$0xff] }
  0x86   :  { %1002 = vmatpush.msrb.mxu2 %v13521_v50  ;;  %1095 = vmatpush.msra.mxu0 %v6444_v27  ;;  %v13535_v27 = vld [vmem:[#allocation23_spill] sm:$0xff] }
  0x87   :  { %5249 = vmatmul.msk.f32.gmra.mxu1 %vm71_vm0, %v6330_v5  ;;  %1024 = vmatpush.msrb.mxu3 %v13525_v30 }
  0x88   :  { %1003 = vmatpush.msrb.mxu2 %v13524_v21  ;;  %987 = vmatpush.msra.mxu1 %v13526_v4  ;;  %v13534_v4 = vld [vmem:[#allocation45_spill] sm:$0xff] }
  0x89   :  { %1025 = vmatpush.msrb.mxu3 %v13528_v56  ;;  %1096 = vmatpush.msra.mxu0 %v6462_v29  ;;  %v13538_v29 = vld [vmem:[#allocation49_spill] sm:$0xff] }
  0x8a   :  { %1004 = vmatpush.msrb.mxu2 %v13527_v45  ;;  %988 = vmatpush.msra.mxu1 %v13529_v24  ;;  %v7152_v19 = vpop.f32.mrf.mxu2  ;;  %v7154_v17 = vpop.f32.mrf.mxu3  ;;  %v13542_v56 = vld [vmem:[#allocation33_spill] sm:$0xff] }
  0x8b   :  { %13530 = vst [vmem:[#allocation9_spill] sm:$0xff] %v7152_v19  ;;  %v7158_v5 = vpop.f32.mrf.mxu0  ;;  %v7160_v30 = vpop.f32.mrf.mxu1  ;;  %1026 = vmatpush.msrb.mxu3 %v6955_v15  ;;  %1097 = vmatpush.msra.mxu0 %v6480_v32  ;;  %v13536_v19 = vld [vmem:[#allocation46_spill] sm:$0xff]  ;;  %v13540_v15 = vld [vmem:[#allocation53_spill] sm:$0xff] }
  0x8c   :  { %13531 = vst [vmem:[#allocation26_spill] sm:$0xff] %v7154_v17  ;;  %1005 = vmatpush.msrb.mxu2 %v13532_v53  ;;  %989 = vmatpush.msra.mxu1 %v13534_v4  ;;  %v13537_v17 = vld [vmem:[#allocation25_spill] sm:$0xff] }
  0x8d   :  { %13533 = vst [vmem:[#allocation10_spill] sm:$0xff] %v7158_v5  ;;  %1027 = vmatpush.msrb.mxu3 %v6967_v1  ;;  %v13539_v5 = vld [vmem:[#allocation31_spill] sm:$0xff]  ;;  %1098 = vmatpush.msra.mxu0 %v6504_v36  ;;  %v13545_v36 = vld [vmem:[#allocation40_spill] sm:$0xff] }
  0x8e   :  { %1006 = vmatpush.msrb.mxu2 %v13535_v27  ;;  %990 = vmatpush.msra.mxu1 %v13536_v19 }
  0x8f   :  { %808 = vmatmul.f32.vlgmr.msrb.gmra.mxu1 %v6987_v41  ;;  %1028 = vmatpush.msrb.mxu3 %v7008_v62 }
  0x90   :  { %1007 = vmatpush.msrb.mxu2 %v13537_v17  ;;  %991 = vmatpush.msra.mxu1 %v13538_v29 }
  0x91   :  { %1029 = vmatpush.msrb.mxu3 %v7015_v60  ;;  %1099 = vmatpush.msra.mxu0 %v6523_v38  ;;  %v13546_v60 = vld [vmem:[#allocation8_spill] sm:$0xff] }
  0x92   :  { %1008 = vmatpush.msrb.mxu2 %v13539_v5  ;;  %992 = vmatpush.msra.mxu1 %v13540_v15  ;;  %v7176_v32 = vpop.f32.mrf.mxu2  ;;  %v7178_v1 = vpop.f32.mrf.mxu3  ;;  %v13548_v38 = vld [vmem:[#allocation48_spill] sm:$0xff] }
  0x93   :  { %13541 = vst [vmem:[#allocation27_spill] sm:$0xff] %v7178_v1  ;;  %v7182_v19 = vpop.f32.mrf.mxu0  ;;  %v7184_v62 = vpop.f32.mrf.mxu1  ;;  %1030 = vmatpush.msrb.mxu3 %v7040_v14  ;;  %1100 = vmatpush.msra.mxu0 %v6535_v40  ;;  %v13547_v1 = vld [vmem:[#allocation42_spill] sm:$0xff]  ;;  %v13551_v40 = vld [vmem:[#allocation51_spill] sm:$0xff] }
  0x94   :  { %1009 = vmatpush.msrb.mxu2 %v13542_v56  ;;  %13543 = vst [vmem:[#allocation11_spill] sm:$0xff] %v7182_v19  ;;  %993 = vmatpush.msra.mxu1 %v6979_v59 }
  0x95   :  { %13544 = vst [vmem:[#allocation12_spill] sm:$0xff] %v7184_v62  ;;  %1031 = vmatpush.msrb.mxu3 %v7045_v0  ;;  %1101 = vmatpush.msra.mxu0 %v6560_v44 }
  0x96   :  { %1010 = vmatpush.msrb.mxu2 %v13545_v36  ;;  %1111 = vmatpush.msrb.mxu1 %v13546_v60 }
  0x97   :  { %1032 = vmatpush.msrb.mxu3 %v7066_v25  ;;  %1102 = vmatpush.msra.mxu0 %v6583_v47 }
  0x98   :  { %1011 = vmatpush.msrb.mxu2 %v13547_v1  ;;  %1112 = vmatpush.msrb.mxu1 %v6386_v18 }
  0x99   :  { %1033 = vmatpush.msrb.mxu3 %v7080_v33  ;;  %1103 = vmatpush.msra.mxu0 %v6596_v49 }
  0x9a   :  { %1012 = vmatpush.msrb.mxu2 %v13548_v38  ;;  %1113 = vmatpush.msrb.mxu1 %v6405_v20  ;;  %v7200_v60 = vpop.f32.mrf.mxu2  ;;  %v7202_v19 = vpop.f32.mrf.mxu3 }
  0x9b   :  { %13549 = vst [vmem:[#allocation13_spill] sm:$0xff] %v7200_v60  ;;  %v7206_v18 = vpop.f32.mrf.mxu0  ;;  %v7208_v62 = vpop.f32.mrf.mxu1  ;;  %1104 = vmatpush.msra.mxu0 %v6616_v52 }
  0x9c   :  { %13550 = vst [vmem:[#allocation14_spill] sm:$0xff] %v7202_v19  ;;  %1013 = vmatpush.msrb.mxu2 %v13551_v40  ;;  %1114 = vmatpush.msrb.mxu1 %v6420_v23 }
  0x9d   :  { %13552 = vst [vmem:[#allocation18_spill] sm:$0xff] %v7206_v18  ;;  %1105 = vmatpush.msra.mxu0 %v6639_v55 }
  0x9e   :  { %13553 = vst [vmem:[#allocation41_spill] sm:$0xff] %v7208_v62  ;;  %1115 = vmatpush.msrb.mxu1 %v6439_v26 }
  0x9f   :  { %1106 = vmatpush.msra.mxu0 %v13507_v42 }
  0xa0   :  { %1116 = vmatpush.msrb.mxu1 %v6457_v28 }
  0xa2   :  { %1117 = vmatpush.msrb.mxu1 %v6474_v31  ;;  %v7217_v20 = vpop.f32.mrf.mxu2  ;;  %v7219_v23 = vpop.f32.mrf.mxu3 }
  0xa3   :  { %13554 = vst [vmem:[#allocation21_spill] sm:$0xff] %v7217_v20  ;;  %v7222_v44 = vpop.f32.mrf.mxu0  ;;  %v7224_v47 = vpop.f32.mrf.mxu1 }
  0xa4   :  { %13555 = vst [vmem:[#allocation45_spill] sm:$0xff] %v7219_v23  ;;  %1118 = vmatpush.msrb.mxu1 %v6499_v35 }
  0xa5   :  { %13556 = vst [vmem:[#allocation23_spill] sm:$0xff] %v7222_v44 }
  0xa6   :  { %13557 = vst [vmem:[#allocation25_spill] sm:$0xff] %v7224_v47  ;;  %1119 = vmatpush.msrb.mxu1 %v6518_v37 }
  0xa8   :  { %1120 = vmatpush.msrb.mxu1 %v6530_v39 }
  0xaa   :  { %1121 = vmatpush.msrb.mxu1 %v6555_v43  ;;  %v7229_v26 = vpop.f32.mrf.mxu2  ;;  %v7231_v28 = vpop.f32.mrf.mxu3 }
  0xab   :  { %13558 = vst [vmem:[#allocation49_spill] sm:$0xff] %v7229_v26  ;;  %v7234_v31 = vpop.f32.mrf.mxu1  ;;  %v7236_v49 = vpop.f32.mrf.mxu0  ;;  %v7297_v26 = vld [vmem:[%s12944_s4 + $0x1] ss:$2 sm:$0x7] }
  0xac   :  { %13559 = vst [vmem:[#allocation31_spill] sm:$0xff] %v7231_v28  ;;  %1122 = vmatpush.msrb.mxu1 %v6578_v46 }
  0xad   :  { %13560 = vst [vmem:[#allocation53_spill] sm:$0xff] %v7234_v31 }
  0xae   :  { %13561 = vst [vmem:[#allocation33_spill] sm:$0xff] %v7236_v49  ;;  %1123 = vmatpush.msrb.mxu1 %v6590_v48 }
  0xb0   :  { %1124 = vmatpush.msrb.mxu1 %v6611_v51 }
  0xb2   :  { %1125 = vmatpush.msrb.mxu1 %v6634_v54  ;;  %v7241_v35 = vpop.f32.mrf.mxu2  ;;  %v7243_v37 = vpop.f32.mrf.mxu3 }
  0xb3   :  { %13562 = vst [vmem:[#allocation40_spill] sm:$0xff] %v7241_v35 }
  0xb4   :  { %13563 = vst [vmem:[#allocation8_spill] sm:$0xff] %v7243_v37  ;;  %1126 = vmatpush.msrb.mxu1 %v6651_v57  ;;  %v7246_v39 = vpop.f32.mrf.mxu1  ;;  %v7248_v43 = vpop.f32.mrf.mxu0 }
  0xb5   :  { %13564 = vst [vmem:[#allocation42_spill] sm:$0xff] %v7246_v39 }
  0xb6   :  { %13565 = vst [vmem:[#allocation48_spill] sm:$0xff] %v7248_v43 }
  0xbb   :  { %v7250_v46 = vpop.f32.mrf.mxu2  ;;  %v7252_v52 = vpop.f32.mrf.mxu3 }
  0xbc   :  { %13566 = vst [vmem:[#allocation51_spill] sm:$0xff] %v7250_v46  ;;  %v7254_v55 = vpop.f32.mrf.mxu1  ;;  %v7256_v48 = vpop.f32.mrf.mxu0  ;;  %v406_v46 = vld [vmem:[%s12943_s5] ss:$2 sm:$0x7] }
  0xbd   :  { %13567 = vst [vmem:[#allocation63_spill] sm:$0xff] %v7252_v52  ;;  %v7282_v23 = vperm.slane %v406_v46, 1 }
  0xbe   :  { %13568 = vst [vmem:[#allocation64_spill] sm:$0xff] %v7254_v55 }
  0xbf   :  { %13569 = vst [vmem:[#allocation65_spill] sm:$0xff] %v7256_v48 }
  0xc0   :  { %13579 = vst [vmem:[#allocation75_spill] sm:$0xff] %v7282_v23 }
  0xc3   :  { %v7258_v51 = vpop.f32.mrf.mxu2  ;;  %v7260_v54 = vpop.f32.mrf.mxu3 }
  0xc4   :  { %13570 = vst [vmem:[#allocation66_spill] sm:$0xff] %v7258_v51  ;;  %v7262_v42 = vpop.f32.mrf.mxu1  ;;  %v63_v51 = vld [vmem:[%s12944_s4] ss:$2 sm:$0x7] }
  0xc5   :  { %13571 = vst [vmem:[#allocation67_spill] sm:$0xff] %v7260_v54  ;;  %v7278_v48 = vperm.slane %v63_v51, 1  ;;  %v7334_v25 = vperm.slane %v63_v51, 2 }
  0xc6   :  { %13572 = vst [vmem:[#allocation68_spill] sm:$0xff] %v7262_v42  ;;  %v7264_v49 = vpop.f32.mrf.mxu0  ;;  %v7280_v42 = vperm.slane %v406_v46, 0 }
  0xc7   :  { %13573 = vst [vmem:[#allocation69_spill] sm:$0xff] %v7264_v49  ;;  %v155_v28 = vadd.f32 %v7160_v30, %v7278_v48  ;;  %v7307_v30 = vperm.slane %v7297_v26, 0 }
  0xc8   :  { %13577 = vst [vmem:[#allocation73_spill] sm:$0xff] %v7278_v48 }
  0xc9   :  { %13578 = vst [vmem:[#allocation74_spill] sm:$0xff] %v7280_v42 }
  0xca   :  { %13583 = vst [vmem:[#allocation79_spill] sm:$0xff] %v7307_v30 }
  0xcb   :  { %v7266_v57 = vpop.f32.mrf.mxu2  ;;  %v297_v19 = vpop.f32.mrf.mxu3 }
  0xcc   :  { %13574 = vst [vmem:[#allocation70_spill] sm:$0xff] %v7266_v57  ;;  %v7268_v43 = vpop.f32.mrf.mxu1  ;;  %v7284_v57 = vperm.slane %v63_v51, 0  ;;  %v298_v18 = vadd.f32 %v297_v19, %v7307_v30 }
  0xcd   :  { %13575 = vst [vmem:[#allocation71_spill] sm:$0xff] %v7268_v43 }
  0xce   :  { %v7273_v55 = vpop.f32.mrf.mxu0  ;;  %13580 = vst [vmem:[#allocation76_spill] sm:$0xff] %v7284_v57  ;;  %v114_v35 = vadd.f32 %v7133_v16, %v7284_v57 }
  0xcf   :  { %13576 = vst [vmem:[#allocation72_spill] sm:$0xff] %v7273_v55  ;;  %v7302_v55 = vld [vmem:[%s12943_s5 + $0x1] ss:$2 sm:$0x7] }
  0xd3   :  { %v657_v39 = vpop.f32.mrf.mxu2  ;;  %v677_v43 = vpop.f32.mrf.mxu3 }
  0xd4   :  { %v658_v49 = vadd.f32 %v657_v39, %v7280_v42  ;;  %v678_v31 = vadd.f32 %v677_v43, %v7282_v23  ;;  %v7292_v44 = vpop.f32.mrf.mxu1 }
  0xd5   :  { %13581 = vst [vmem:[#allocation77_spill] sm:$0xff] %v7292_v44  ;;  %v7310_v44 = vperm.slane %v7302_v55, 0 }
  0xd6   :  { %v700_v16 = vadd.f32 %v658_v49, %v114_v35  ;;  %v720_v37 = vadd.f32 %v678_v31, %v155_v28  ;;  %v7304_v47 = vpop.f32.mrf.mxu0 }
  0xd7   :  { %13582 = vst [vmem:[#allocation78_spill] sm:$0xff] %v7304_v47 }
  0xd8   :  { %v5349_v39 = vmul.f32 -1.442695, %v700_v16  ;;  %v5350_v43 = vmul.f32 -1.442695, %v720_v37  ;;  %13584 = vst [vmem:[#allocation80_spill] sm:$0xff] %v7310_v44 }
  0xda   :  { %5521 = vpow2.f32 %v5349_v39 }
  0xdb   :  { %5523 = vpow2.f32 %v5350_v43  ;;  %v769_v20 = vpop.f32.mrf.mxu3 }
  0xdc   :  { %v770_v52 = vadd.f32 %v769_v20, %v7310_v44  ;;  %v7314_v62 = vpop.f32.mrf.mxu1 }
  0xdd   :  { %13585 = vst [vmem:[#allocation81_spill] sm:$0xff] %v7314_v62  ;;  %v7321_v62 = vperm.slane %v7297_v26, 1 }
  0xde   :  { %v812_v28 = vadd.f32 %v770_v52, %v298_v18  ;;  %v7316_v31 = vpop.f32.mrf.mxu0  ;;  %v7324_v52 = vperm.slane %v7302_v55, 1 }
  0xdf   :  { %13586 = vst [vmem:[#allocation82_spill] sm:$0xff] %v7316_v31 }
  0xe0   :  { %v5522_v49 = vpop.eup %5521  ;;  %v5351_v16 = vmul.f32 -1.442695, %v812_v28  ;;  %13588 = vst [vmem:[#allocation84_spill] sm:$0xff] %v7321_v62  ;;  %v7328_v28 = vperm.slane %v406_v46, 2 }
  0xe1   :  { %v5524_v35 = vpop.eup %5523  ;;  %v704_v47 = vadd.f32 1.0, %v5522_v49  ;;  %13589 = vst [vmem:[#allocation85_spill] sm:$0xff] %v7324_v52 }
  0xe2   :  { %v724_v37 = vadd.f32 1.0, %v5524_v35 }
  0xe3   :  { %5525 = vrcp.f32 %v704_v47  ;;  %v716_v44 = vand.u32 2147483648, %v704_v47  ;;  %v714_v48 = vand.u32 2147483647, %v704_v47  ;;  %vm710_vm2 = vweird.f32 %v704_v47 }
  0xe4   :  { %5527 = vrcp.f32 %v724_v37  ;;  %v7318_v60 = vpop.f32.mrf.mxu1  ;;  %v736_v51 = vand.u32 2147483648, %v724_v37  ;;  %vm730_vm6 = vweird.f32 %v724_v37 }
  0xe5   :  { %13587 = vst [vmem:[#allocation83_spill] sm:$0xff] %v7318_v60  ;;  %5529 = vpow2.f32 %v5351_v16  ;;  %v697_v60 = vpop.f32.mrf.mxu2  ;;  %vm715_vm4 = vcmp.eq.f32.partialorder %v714_v48, 8.507059e+37 }
  0xe6   :  { %v338_v19 = vpop.f32.mrf.mxu0  ;;  %v698_v46 = vadd.f32 %v697_v60, %v7328_v28 }
  0xe7   :  { %v339_v16 = vadd.f32 %v338_v19, %v7321_v62  ;;  %v717_v19 = vor.u32 1.1754944e-38, %v716_v44 }
  0xe9   :  { %v5526_v39 = vpop.eup %5525 }
  0xea   :  { %v5528_v43 = vpop.eup %5527  ;;  %v706_v54 = vmul.f32 %v5526_v39, %v704_v47  ;;  %vm711_vm1 = vweird.f32 %v5526_v39 }
  0xeb   :  { %v5530_v20 = vpop.eup %5529  ;;  %v726_v18 = vmul.f32 %v5528_v43, %v724_v37  ;;  %vm712_vm3 = vmor %vm710_vm2, %vm711_vm1  ;;  %vm731_vm5 = vweird.f32 %v5528_v43 }
  0xec   :  { %v7326_v49 = vpop.f32.mrf.mxu1  ;;  %v707_v35 = vsub.f32 1.0, %v706_v54  ;;  %v7331_v30 = vadd.f32 1.0, %v5530_v20  ;;  %vm732_vm7 = vmor %vm730_vm6, %vm731_vm5 }
  0xed   :  { %13590 = vst [vmem:[#allocation86_spill] sm:$0xff] %v7326_v49  ;;  %v727_v31 = vsub.f32 1.0, %v726_v18 }
  0xee   :  { %v789_v23 = vpop.f32.mrf.mxu0  ;;  %v708_v42 = vmul.f32 %v5526_v39, %v707_v35  ;;  %5531 = vrcp.f32 %v7331_v30  ;;  %vm822_vm10 = vweird.f32 %v7331_v30 }
  0xef   :  { %v728_v57 = vmul.f32 %v5528_v43, %v727_v31  ;;  %v790_v33 = vadd.f32 %v789_v23, %v7324_v52  ;;  %v196_v23 = vadd.f32 %v7176_v32, %v7334_v25 }
  0xf0   :  { %v709_v49 = vadd.f32 %v5526_v39, %v708_v42  ;;  %v737_v42 = vor.u32 1.1754944e-38, %v736_v51 }
  0xf1   :  { %v832_v54 = vadd.f32 %v790_v33, %v339_v16  ;;  %v729_v62 = vadd.f32 %v5528_v43, %v728_v57  ;;  %v734_v33 = vand.u32 2147483647, %v724_v37 }
  0xf2   :  { %v713_v20 = vsel %vm712_vm3, %v5526_v39, %v709_v49 }
  0xf3   :  { %v5352_v18 = vmul.f32 -1.442695, %v832_v54  ;;  %v718_v35 = vsel %vm715_vm4, %v717_v19, %v713_v20  ;;  %v733_v44 = vsel %vm732_vm7, %v5528_v43, %v729_v62  ;;  %vm735_vm8 = vcmp.eq.f32.partialorder %v734_v33, 8.507059e+37 }
  0xf4   :  { %v740_v31 = vmul.f32 %v718_v35, %v698_v46  ;;  %v7340_v52 = vpop.f32.mrf.mxu1  ;;  %v5532_v47 = vpop.eup %5531  ;;  %v738_v48 = vsel %vm735_vm8, %v737_v42, %v733_v44  ;;  %v13593_v35 = vld [vmem:[#allocation17_spill] sm:$0xff]  ;;  %v828_v33 = vand.u32 2147483648, %v7331_v30  ;;  %v13597_v44 = vld [vmem:[#allocation36_spill] sm:$0xff] }
  0xf5   :  { %13591 = vst [vmem:[#allocation87_spill] sm:$0xff] %v7340_v52  ;;  %5533 = vpow2.f32 %v5352_v18  ;;  %v818_v57 = vmul.f32 %v5532_v47, %v7331_v30  ;;  %v743_v16 = vsub.f32 1.0, %v738_v48  ;;  %v745_v54 = vmul.f32 %v738_v48, %v6910_v12  ;;  %v13594_v12 = vld [vmem:[#allocation20_spill] sm:$0xff]  ;;  %v13600_v48 = vld [vmem:[#allocation35_spill] sm:$0xff] }
  0xf6   :  { %v741_v60 = vadd.f32 %v740_v31, %v196_v23  ;;  %vm823_vm9 = vweird.f32 %v5532_v47  ;;  %v13659_v52 = vld [vmem:[#allocation84_spill] sm:$0xff] }
  0xf7   :  { %v819_v62 = vsub.f32 1.0, %v818_v57  ;;  %vm824_vm11 = vmor %vm822_vm10, %vm823_vm9 }
  0xf8   :  { %5535 = vtanh.f32 %v741_v60  ;;  %v7364_v60 = vperm.slane %v7302_v55, 2  ;;  %v7375_v55 = vperm.slane %v7297_v26, 2  ;;  %v13595_v26 = vld [vmem:[#allocation30_spill] sm:$0xff] }
  0xf9   :  { %v820_v19 = vmul.f32 %v5532_v47, %v819_v62  ;;  %v13614_v62 = vld [vmem:[#allocation24_spill] sm:$0xff] }
  0xfb   :  { %v5534_v39 = vpop.eup %5533  ;;  %v821_v31 = vadd.f32 %v5532_v47, %v820_v19  ;;  %v7456_v19 = vld [vmem:[%s12941_s3 + $0x138] sm:$0xff] }
  0xfc   :  { %v7343_v49 = vadd.f32 1.0, %v5534_v39  ;;  %v7345_v32 = vpop.f32.mrf.mxu1  ;;  %v13601_v39 = vld [vmem:[#allocation44_spill] sm:$0xff] }
  0xfe   :  { %v5536_v46 = vpop.eup %5535  ;;  %5537 = vrcp.f32 %v7343_v49  ;;  %vm842_vm14 = vweird.f32 %v7343_v49 }
  0xff   :  { %v744_v37 = vmul.f32 %v5536_v46, %v743_v16 }
 0x101   :  { %v7349_v43 = vadd.f32 %v745_v54, %v744_v37  ;;  %v13604_v37 = vld [vmem:[#allocation50_spill] sm:$0xff] }
 0x102   :  { %v13607_v54 = vld [vmem:[#allocation46_spill] sm:$0xff] }
 0x103   :  { %13592 = vst [vmem:[#allocation88_spill] sm:$0xff] %v7349_v43  ;;  %881 = vmatmul.f32.vlgmr.msra.gmra.mxu2 %v7349_v43  ;;  %901 = vmatmul.f32.vlgmr.msra.gmra.mxu3 %v7349_v43 }
 0x104   :  { %v5538_v20 = vpop.eup %5537  ;;  %921 = vmatmul.f32.vlgmr.msrb.gmra.mxu0 %v7349_v43  ;;  %v379_v18 = vpop.f32.mrf.mxu1  ;;  %1131 = vmatpush.msra.mxu2 %v13593_v35  ;;  %v7469_v35 = vld [vmem:[%s12941_s3 + $0x120] sm:$0xff] }
 0x105   :  { %v838_v23 = vmul.f32 %v5538_v20, %v7343_v49  ;;  %1204 = vmatpush.msra.mxu3 %v6656_v58  ;;  %1224 = vmatpush.msrb.mxu0 %v13508_v3  ;;  %v826_v58 = vand.u32 2147483647, %v7331_v30  ;;  %vm843_vm13 = vweird.f32 %v5538_v20  ;;  %v13596_v30 = vld [vmem:[#allocation28_spill] sm:$0xff] }
 0x106   :  { %1132 = vmatpush.msra.mxu2 %v13594_v12  ;;  %vm844_vm15 = vmor %vm842_vm14, %vm843_vm13  ;;  %v13620_v12 = vld [vmem:[#allocation43_spill] sm:$0xff] }
 0x107   :  { %v839_v51 = vsub.f32 1.0, %v838_v23  ;;  %1205 = vmatpush.msra.mxu3 %v6690_v63  ;;  %1225 = vmatpush.msrb.mxu0 %v13511_v9  ;;  %v825_v63 = vsel %vm824_vm11, %v5532_v47, %v821_v31  ;;  %v829_v9 = vor.u32 1.1754944e-38, %v828_v33  ;;  %vm827_vm12 = vcmp.eq.f32.partialorder %v826_v58, 8.507059e+37  ;;  %v7475_v23 = vld [vmem:[%s12941_s3 + $0x128] sm:$0xff]  ;;  %v7488_v31 = vld [vmem:[%s12941_s3 + $0x110] sm:$0xff] }
 0x108   :  { %1133 = vmatpush.msra.mxu2 %v6719_v7  ;;  %13621 = vst [vmem:[#allocation28_spill] sm:$0xff] %v7488_v31  ;;  %v13622_v33 = vld [vmem:[#allocation52_spill] sm:$0xff]  ;;  %v7495_v58 = vld [vmem:[%s12941_s3 + $0xf0] sm:$0xff] }
 0x109   :  { %1206 = vmatpush.msra.mxu3 %v6714_v6  ;;  %1226 = vmatpush.msrb.mxu0 %v13514_v11  ;;  %v840_v3 = vmul.f32 %v5538_v20, %v839_v51  ;;  %v7482_v51 = vld [vmem:[%s12941_s3 + $0x108] sm:$0xff]  ;;  %13623 = vst [vmem:[#allocation36_spill] sm:$0xff] %v7495_v58 }
 0x10a   :  { %1134 = vmatpush.msra.mxu2 %v6736_v10  ;;  %v830_v10 = vsel %vm827_vm12, %v829_v9, %v825_v63  ;;  %v13625_v63 = vld [vmem:[#allocation54_spill] sm:$0xff]  ;;  %v7514_v9 = vld [vmem:[%s12941_s3 + $0xe0] sm:$0xff] }
 0x10b   :  { %1207 = vmatpush.msra.mxu3 %v6725_v8  ;;  %1227 = vmatpush.msrb.mxu0 %v13517_v34  ;;  %v841_v11 = vadd.f32 %v5538_v20, %v840_v3  ;;  %v848_v34 = vand.u32 2147483648, %v7343_v49  ;;  %v380_v8 = vadd.f32 %v379_v18, %v7375_v55  ;;  %v13619_v18 = vld [vmem:[#allocation39_spill] sm:$0xff]  ;;  %13627 = vst [vmem:[#allocation35_spill] sm:$0xff] %v7514_v9 }
 0x10c   :  { %v809_v7 = vpop.f32.mrf.mxu1  ;;  %1135 = vmatpush.msra.mxu2 %v6769_v22  ;;  %v7501_v3 = vld [vmem:[%s12941_s3 + $0xf8] sm:$0xff] }
 0x10d   :  { %v810_v6 = vadd.f32 %v809_v7, %v7364_v60  ;;  %1208 = vmatpush.msra.mxu3 %v13510_v61  ;;  %1228 = vmatpush.msrb.mxu0 %v13521_v50  ;;  %v846_v61 = vand.u32 2147483647, %v7343_v49  ;;  %v849_v47 = vor.u32 1.1754944e-38, %v848_v34  ;;  %v13603_v49 = vld [vmem:[#allocation47_spill] sm:$0xff] }
 0x10e   :  { %1136 = vmatpush.msra.mxu2 %v6788_v13  ;;  %v845_v13 = vsel %vm844_vm15, %v5538_v20, %v841_v11  ;;  %v7462_v20 = vld [vmem:[%s12941_s3 + $0x140] sm:$0xff]  ;;  %v7508_v7 = vld [vmem:[%s12941_s3 + $0xd8] sm:$0xff]  ;;  %v7527_v11 = vld [vmem:[%s12941_s3 + $0xc8] sm:$0xff] }
 0x10f   :  { %v852_v22 = vmul.f32 %v830_v10, %v810_v6  ;;  %1209 = vmatpush.msra.mxu3 %v13513_v2  ;;  %1229 = vmatpush.msrb.mxu0 %v13524_v21  ;;  %v13598_v2 = vld [vmem:[#allocation34_spill] sm:$0xff]  ;;  %vm847_vm0 = vcmp.eq.f32.partialorder %v846_v61, 8.507059e+37  ;;  %v7521_v10 = vld [vmem:[%s12941_s3 + $0xc0] sm:$0xff] }
 0x110   :  { %1137 = vmatpush.msra.mxu2 %v13595_v26  ;;  %v13599_v21 = vld [vmem:[#allocation38_spill] sm:$0xff]  ;;  %v850_v42 = vsel %vm847_vm0, %v849_v47, %v845_v13  ;;  %13624 = vst [vmem:[#allocation34_spill] sm:$0xff] %v7501_v3  ;;  %v13631_v34 = vld [vmem:[#allocation59_spill] sm:$0xff]  ;;  %v7579_v13 = vld [vmem:[%s12941_s3 + $0x68] sm:$0xff] }
 0x111   :  { %v853_v50 = vadd.f32 %v852_v22, %v380_v8  ;;  %1210 = vmatpush.msra.mxu3 %v13596_v30  ;;  %1230 = vmatpush.msrb.mxu0 %v13527_v45  ;;  %v13602_v45 = vld [vmem:[#allocation37_spill] sm:$0xff]  ;;  %v855_v57 = vsub.f32 1.0, %v850_v42  ;;  %v857_v46 = vmul.f32 %v6987_v41, %v850_v42  ;;  %v13608_v41 = vld [vmem:[#allocation15_spill] sm:$0xff]  ;;  %13626 = vst [vmem:[#allocation38_spill] sm:$0xff] %v7508_v7  ;;  %v13628_v6 = vld [vmem:[#allocation58_spill] sm:$0xff] }
 0x112   :  { %1138 = vmatpush.msra.mxu2 %v13597_v44  ;;  %13629 = vst [vmem:[#allocation44_spill] sm:$0xff] %v7521_v10  ;;  %v7534_v8 = vld [vmem:[%s12941_s3 + $0xa8] sm:$0xff]  ;;  %v7540_v22 = vld [vmem:[%s12941_s3 + $0xb0] sm:$0xff]  ;;  %v7553_v26 = vld [vmem:[%s12941_s3 + $0x98] sm:$0xff] }
 0x113   :  { %5539 = vtanh.f32 %v853_v50  ;;  %1211 = vmatpush.msra.mxu3 %v13598_v2  ;;  %1231 = vmatpush.msrb.mxu0 %v13532_v53  ;;  %13630 = vst [vmem:[#allocation37_spill] sm:$0xff] %v7527_v11  ;;  %v7547_v61 = vld [vmem:[%s12941_s3 + $0x90] sm:$0xff]  ;;  %v7566_v50 = vld [vmem:[%s12941_s3 + $0x80] sm:$0xff]  ;;  %v7586_v47 = vld [vmem:[%s12941_s3 + $0x48] sm:$0xff] }
 0x114   :  { %1139 = vmatpush.msra.mxu2 %v13599_v21  ;;  %13632 = vst [vmem:[#allocation47_spill] sm:$0xff] %v7534_v8  ;;  %v13638_v30 = vld [vmem:[#allocation61_spill] sm:$0xff]  ;;  %v13641_v44 = vld [vmem:[#allocation62_spill] sm:$0xff] }
 0x115   :  { %1212 = vmatpush.msra.mxu3 %v13600_v48  ;;  %1232 = vmatpush.msrb.mxu0 %v13535_v27  ;;  %13633 = vst [vmem:[#allocation50_spill] sm:$0xff] %v7540_v22  ;;  %v7592_v2 = vld [vmem:[%s12941_s3 + $0x50] sm:$0xff]  ;;  %v7604_v42 = vld [vmem:[%s12941_s3 + $0x38] sm:$0xff] }
 0x116   :  { %1140 = vmatpush.msra.mxu2 %v13601_v39  ;;  %13635 = vst [vmem:[#allocation46_spill] sm:$0xff] %v7553_v26  ;;  %v7598_v21 = vld [vmem:[%s12941_s3 + $0x30] sm:$0xff]  ;;  %v7610_v48 = vld [vmem:[%s12941_s3 + $0x18] sm:$0xff]  ;;  %v7616_v39 = vld [vmem:[%s12941_s3 + $0x20] sm:$0xff] }
 0x117   :  { %1213 = vmatpush.msra.mxu3 %v13602_v45  ;;  %1233 = vmatpush.msrb.mxu0 %v13537_v17  ;;  %v13606_v17 = vld [vmem:[#allocation55_spill] sm:$0xff]  ;;  %13644 = vst [vmem:[#allocation24_spill] sm:$0xff] %v7598_v21 }
 0x118   :  { %1141 = vmatpush.msra.mxu2 %v13603_v49  ;;  %13634 = vst [vmem:[#allocation55_spill] sm:$0xff] %v7547_v61  ;;  %v7622_v45 = vld [vmem:[%s12941_s3] sm:$0xff] }
 0x119   :  { %v5540_v16 = vpop.eup %5539  ;;  %1214 = vmatpush.msra.mxu3 %v13529_v24  ;;  %1234 = vmatpush.msrb.mxu0 %v13539_v5  ;;  %v13609_v24 = vld [vmem:[#allocation56_spill] sm:$0xff]  ;;  %v13612_v5 = vld [vmem:[#allocation22_spill] sm:$0xff]  ;;  %13647 = vst [vmem:[#allocation39_spill] sm:$0xff] %v7616_v39 }
 0x11a   :  { %v856_v53 = vmul.f32 %v5540_v16, %v855_v57  ;;  %1142 = vmatpush.msra.mxu2 %v13604_v37  ;;  %13637 = vst [vmem:[#allocation56_spill] sm:$0xff] %v7566_v50  ;;  %v7628_v57 = vld [vmem:[%s12941_s3 + $0x8] sm:$0xff] }
 0x11b   :  { %1215 = vmatpush.msra.mxu3 %v13534_v4  ;;  %1235 = vmatpush.msrb.mxu0 %v13542_v56  ;;  %v13610_v56 = vld [vmem:[#allocation19_spill] sm:$0xff]  ;;  %v13611_v4 = vld [vmem:[#allocation57_spill] sm:$0xff]  ;;  %13642 = vst [vmem:[#allocation22_spill] sm:$0xff] %v7586_v47 }
 0x11c   :  { %v7406_v27 = vadd.f32 %v857_v46, %v856_v53  ;;  %1143 = vmatpush.msra.mxu2 %v13606_v17  ;;  %13640 = vst [vmem:[#allocation57_spill] sm:$0xff] %v7579_v13  ;;  %v13650_v53 = vld [vmem:[#allocation76_spill] sm:$0xff]  ;;  %v13651_v46 = vld [vmem:[#allocation10_spill] sm:$0xff]  ;;  %v13652_v17 = vld [vmem:[#allocation73_spill] sm:$0xff] }
 0x11d   :  { %1216 = vmatpush.msra.mxu3 %v13607_v54  ;;  %1236 = vmatpush.msrb.mxu0 %v13545_v36  ;;  %v13613_v36 = vld [vmem:[#allocation60_spill] sm:$0xff]  ;;  %13648 = vst [vmem:[#allocation43_spill] sm:$0xff] %v7622_v45  ;;  %v117_v37 = vadd.f32 %v13651_v46, %v13650_v53 }
 0x11e   :  { %13605 = vst [vmem:[#allocation17_spill] sm:$0xff] %v7406_v27  ;;  %994 = vmatmul.f32.vlgmr.msra.gmra.mxu1 %v7406_v27  ;;  %1014 = vmatmul.f32.vlgmr.msrb.gmra.mxu2 %v7406_v27  ;;  %v13653_v54 = vld [vmem:[#allocation12_spill] sm:$0xff] }
 0x11f   :  { %1034 = vmatmul.f32.vlgmr.msrb.gmra.mxu3 %v7406_v27  ;;  %1244 = vmatpush.msra.mxu1 %v13608_v41  ;;  %13643 = vst [vmem:[#allocation60_spill] sm:$0xff] %v7592_v2  ;;  %v158_v41 = vadd.f32 %v13653_v54, %v13652_v17 }
 0x120   :  { %1144 = vmatpush.msra.mxu2 %v13609_v24  ;;  %1217 = vmatpush.msra.mxu3 %v13538_v29  ;;  %v13617_v29 = vld [vmem:[#allocation29_spill] sm:$0xff]  ;;  %13649 = vst [vmem:[#allocation52_spill] sm:$0xff] %v7628_v57  ;;  %v13654_v24 = vld [vmem:[#allocation74_spill] sm:$0xff] }
 0x121   :  { %1245 = vmatpush.msra.mxu1 %v13610_v56  ;;  %1237 = vmatpush.msrb.mxu0 %v13547_v1  ;;  %v7430_v1 = vld [vmem:[%s12941_s3 + $0x168] sm:$0xff]  ;;  %13645 = vst [vmem:[#allocation29_spill] sm:$0xff] %v7604_v42 }
 0x122   :  { %1145 = vmatpush.msra.mxu2 %v13611_v4  ;;  %1218 = vmatpush.msra.mxu3 %v13540_v15  ;;  %13615 = vst [vmem:[#allocation20_spill] sm:$0xff] %v7430_v1  ;;  %v7436_v15 = vld [vmem:[%s12941_s3 + $0x170] sm:$0xff]  ;;  %v13655_v4 = vld [vmem:[#allocation75_spill] sm:$0xff] }
 0x123   :  { %1246 = vmatpush.msra.mxu1 %v13612_v5  ;;  %1238 = vmatpush.msrb.mxu0 %v13548_v38  ;;  %13616 = vst [vmem:[#allocation30_spill] sm:$0xff] %v7436_v15  ;;  %v7449_v38 = vld [vmem:[%s12941_s3 + $0x158] sm:$0xff] }
 0x124   :  { %1146 = vmatpush.msra.mxu2 %v13613_v36  ;;  %1219 = vmatpush.msra.mxu3 %v6979_v59  ;;  %v7443_v59 = vld [vmem:[%s12941_s3 + $0x150] sm:$0xff] }
 0x125   :  { %1247 = vmatpush.msra.mxu1 %v13614_v62  ;;  %1239 = vmatpush.msrb.mxu0 %v13551_v40  ;;  %v13618_v40 = vld [vmem:[#allocation32_spill] sm:$0xff] }
 0x126   :  { %1317 = vmatpush.msrb.mxu2 %v7430_v1  ;;  %1337 = vmatpush.msrb.mxu3 %v7436_v15  ;;  %13646 = vst [vmem:[#allocation32_spill] sm:$0xff] %v7610_v48 }
 0x127   :  { %1248 = vmatpush.msra.mxu1 %v13617_v29 }
 0x128   :  { %1318 = vmatpush.msrb.mxu2 %v7443_v59  ;;  %1338 = vmatpush.msrb.mxu3 %v7449_v38 }
 0x129   :  { %1249 = vmatpush.msra.mxu1 %v13618_v40 }
 0x12a   :  { %1319 = vmatpush.msrb.mxu2 %v7456_v19  ;;  %1339 = vmatpush.msrb.mxu3 %v7462_v20 }
 0x12b   :  { %1250 = vmatpush.msra.mxu1 %v13619_v18 }
 0x12c   :  { %1320 = vmatpush.msrb.mxu2 %v7469_v35  ;;  %1340 = vmatpush.msrb.mxu3 %v7475_v23 }
 0x12d   :  { %1251 = vmatpush.msra.mxu1 %v13620_v12 }
 0x12e   :  { %1321 = vmatpush.msrb.mxu2 %v7482_v51  ;;  %1341 = vmatpush.msrb.mxu3 %v7488_v31 }
 0x12f   :  { %1252 = vmatpush.msra.mxu1 %v13622_v33 }
 0x130   :  { %1322 = vmatpush.msrb.mxu2 %v7495_v58  ;;  %1342 = vmatpush.msrb.mxu3 %v7501_v3 }
 0x131   :  { %1253 = vmatpush.msra.mxu1 %v13625_v63 }
 0x132   :  { %1323 = vmatpush.msrb.mxu2 %v7508_v7  ;;  %1343 = vmatpush.msrb.mxu3 %v7514_v9 }
 0x133   :  { %1254 = vmatpush.msra.mxu1 %v13628_v6 }
 0x134   :  { %1324 = vmatpush.msrb.mxu2 %v7521_v10  ;;  %1344 = vmatpush.msrb.mxu3 %v7527_v11 }
 0x135   :  { %1255 = vmatpush.msra.mxu1 %v13631_v34 }
 0x136   :  { %1325 = vmatpush.msrb.mxu2 %v7534_v8  ;;  %1345 = vmatpush.msrb.mxu3 %v7540_v22 }
 0x137   :  { %1256 = vmatpush.msra.mxu1 %v7040_v14  ;;  %v7560_v14 = vld [vmem:[%s12941_s3 + $0x78] sm:$0xff] }
 0x138   :  { %1326 = vmatpush.msrb.mxu2 %v7547_v61  ;;  %1346 = vmatpush.msrb.mxu3 %v7553_v26  ;;  %13636 = vst [vmem:[#allocation15_spill] sm:$0xff] %v7560_v14 }
 0x139   :  { %1257 = vmatpush.msra.mxu1 %v7045_v0  ;;  %v7573_v0 = vld [vmem:[%s12941_s3 + $0x60] sm:$0xff] }
 0x13a   :  { %1327 = vmatpush.msrb.mxu2 %v7560_v14  ;;  %1347 = vmatpush.msrb.mxu3 %v7566_v50  ;;  %13639 = vst [vmem:[#allocation19_spill] sm:$0xff] %v7573_v0 }
 0x13b   :  { %1258 = vmatpush.msra.mxu1 %v13638_v30  ;;  %v13656_v30 = vld [vmem:[#allocation79_spill] sm:$0xff] }
 0x13c   :  { %1328 = vmatpush.msrb.mxu2 %v7573_v0  ;;  %1348 = vmatpush.msrb.mxu3 %v7579_v13 }
 0x13d   :  { %1259 = vmatpush.msra.mxu1 %v13641_v44  ;;  %v13657_v44 = vld [vmem:[#allocation67_spill] sm:$0xff] }
 0x13e   :  { %1329 = vmatpush.msrb.mxu2 %v7586_v47  ;;  %1349 = vmatpush.msrb.mxu3 %v7592_v2  ;;  %v295_v46 = vadd.f32 %v13657_v44, %v13656_v30  ;;  %v13661_v44 = vld [vmem:[#allocation85_spill] sm:$0xff] }
 0x140   :  { %1330 = vmatpush.msrb.mxu2 %v7598_v21  ;;  %1350 = vmatpush.msrb.mxu3 %v7604_v42 }
 0x142   :  { %1331 = vmatpush.msrb.mxu2 %v7610_v48  ;;  %1351 = vmatpush.msrb.mxu3 %v7616_v39 }
 0x144   :  { %1332 = vmatpush.msrb.mxu2 %v7622_v45  ;;  %1352 = vmatpush.msrb.mxu3 %v7628_v57 }
 0x181   :  { %v922_v17 = vpop.f32.mrf.mxu0 }
 0x186   :  { %v882_v49 = vpop.f32.mrf.mxu2  ;;  %v902_v16 = vpop.f32.mrf.mxu3 }
 0x187   :  { %v883_v56 = vadd.f32 %v882_v49, %v13654_v24  ;;  %v903_v5 = vadd.f32 %v902_v16, %v13655_v4  ;;  %v13658_v49 = vld [vmem:[#allocation80_spill] sm:$0xff]  ;;  %v13660_v4 = vld [vmem:[#allocation82_spill] sm:$0xff] }
 0x188   :  { %v336_v24 = vadd.f32 %v13660_v4, %v13659_v52  ;;  %v13662_v4 = vld [vmem:[#allocation13_spill] sm:$0xff] }
 0x189   :  { %v925_v36 = vadd.f32 %v883_v56, %v117_v37  ;;  %v945_v62 = vadd.f32 %v903_v5, %v158_v41  ;;  %v199_v52 = vadd.f32 %v13662_v4, %v7334_v25 }
 0x18b   :  { %v5353_v29 = vmul.f32 -1.442695, %v925_v36  ;;  %v5354_v40 = vmul.f32 -1.442695, %v945_v62 }
 0x18d   :  { %5541 = vpow2.f32 %v5353_v29 }
 0x18e   :  { %5543 = vpow2.f32 %v5354_v40 }
 0x193   :  { %v5542_v18 = vpop.eup %5541 }
 0x194   :  { %v5544_v12 = vpop.eup %5543  ;;  %v929_v33 = vadd.f32 1.0, %v5542_v18 }
 0x195   :  { %v949_v63 = vadd.f32 1.0, %v5544_v12 }
 0x196   :  { %5545 = vrcp.f32 %v929_v33  ;;  %v941_v36 = vand.u32 2147483648, %v929_v33  ;;  %v939_v18 = vand.u32 2147483647, %v929_v33  ;;  %vm935_vm2 = vweird.f32 %v929_v33 }
 0x197   :  { %5547 = vrcp.f32 %v949_v63  ;;  %vm955_vm6 = vweird.f32 %v949_v63 }
 0x198   :  { %vm940_vm4 = vcmp.eq.f32.partialorder %v939_v18, 8.507059e+37 }
 0x19b   :  { %v995_v6 = vpop.f32.mrf.mxu1 }
 0x19c   :  { %v5546_v34 = vpop.eup %5545  ;;  %v996_v54 = vadd.f32 %v995_v6, %v13658_v49 }
 0x19d   :  { %v5548_v16 = vpop.eup %5547  ;;  %v931_v37 = vmul.f32 %v5546_v34, %v929_v33  ;;  %vm936_vm1 = vweird.f32 %v5546_v34 }
 0x19e   :  { %v951_v41 = vmul.f32 %v5548_v16, %v949_v63  ;;  %v1038_v56 = vadd.f32 %v996_v54, %v295_v46  ;;  %vm937_vm3 = vmor %vm935_vm2, %vm936_vm1  ;;  %v942_v46 = vor.u32 1.1754944e-38, %v941_v36  ;;  %vm956_vm5 = vweird.f32 %v5548_v16 }
 0x19f   :  { %v932_v5 = vsub.f32 1.0, %v931_v37  ;;  %v923_v37 = vadd.f32 %v922_v17, %v7328_v28  ;;  %vm957_vm7 = vmor %vm955_vm6, %vm956_vm5 }
 0x1a0   :  { %v952_v62 = vsub.f32 1.0, %v951_v41  ;;  %v5355_v29 = vmul.f32 -1.442695, %v1038_v56 }
 0x1a1   :  { %v933_v40 = vmul.f32 %v5546_v34, %v932_v5  ;;  %v1015_v12 = vpop.f32.mrf.mxu2 }
 0x1a2   :  { %v953_v53 = vmul.f32 %v5548_v16, %v952_v62  ;;  %5549 = vpow2.f32 %v5355_v29  ;;  %v1016_v6 = vadd.f32 %v1015_v12, %v13661_v44  ;;  %v961_v29 = vand.u32 2147483648, %v949_v63  ;;  %v1035_v4 = vpop.f32.mrf.mxu3 }
 0x1a3   :  { %v934_v49 = vadd.f32 %v5546_v34, %v933_v40  ;;  %v959_v40 = vand.u32 2147483647, %v949_v63 }
 0x1a4   :  { %v1058_v54 = vadd.f32 %v1016_v6, %v336_v24  ;;  %v954_v5 = vadd.f32 %v5548_v16, %v953_v53  ;;  %v962_v17 = vor.u32 1.1754944e-38, %v961_v29  ;;  %v7674_v29 = vld [vmem:[%s12941_s3 + $0x2f0] sm:$0xff] }
 0x1a5   :  { %v938_v41 = vsel %vm937_vm3, %v5546_v34, %v934_v49  ;;  %vm960_vm8 = vcmp.eq.f32.partialorder %v959_v40, 8.507059e+37 }
 0x1a6   :  { %v943_v56 = vsel %vm940_vm4, %v942_v46, %v938_v41  ;;  %v5356_v30 = vmul.f32 -1.442695, %v1058_v54  ;;  %v958_v36 = vsel %vm957_vm7, %v5548_v16, %v954_v5 }
 0x1a7   :  { %v965_v62 = vmul.f32 %v943_v56, %v923_v37  ;;  %v963_v53 = vsel %vm960_vm8, %v962_v17, %v958_v36  ;;  %v7660_v56 = vld [vmem:[%s12941_s3 + $0x178] sm:$0xff] }
 0x1a8   :  { %v5550_v57 = vpop.eup %5549  ;;  %5551 = vpow2.f32 %v5356_v30  ;;  %v968_v18 = vsub.f32 1.0, %v963_v53  ;;  %v970_v63 = vmul.f32 %v963_v53, %v7349_v43  ;;  %v7687_v53 = vld [vmem:[%s12941_s3 + $0x2d0] sm:$0xff]  ;;  %v7819_v43 = vld [vmem:[%s12941_s3 + $0x248] sm:$0xff] }
 0x1a9   :  { %v966_v33 = vadd.f32 %v965_v62, %v199_v52  ;;  %v1042_v24 = vadd.f32 1.0, %v5550_v57  ;;  %v7668_v62 = vld [vmem:[%s12941_s3 + $0x2e8] sm:$0xff]  ;;  %13671 = vst [vmem:[#allocation12_spill] sm:$0xff] %v7819_v43 }
 0x1ab   :  { %5553 = vtanh.f32 %v966_v33  ;;  %v1054_v16 = vand.u32 2147483648, %v1042_v24  ;;  %v1052_v41 = vand.u32 2147483647, %v1042_v24  ;;  %vm1048_vm10 = vweird.f32 %v1042_v24  ;;  %v7680_v33 = vld [vmem:[%s12941_s3 + $0x160] sm:$0xff] }
 0x1ac   :  { %5555 = vrcp.f32 %v1042_v24 }
 0x1ad   :  { %v1055_v17 = vor.u32 1.1754944e-38, %v1054_v16  ;;  %vm1053_vm12 = vcmp.eq.f32.partialorder %v1052_v41, 8.507059e+37  ;;  %v7723_v41 = vld [vmem:[%s12941_s3 + $0x130] sm:$0xff] }
 0x1ae   :  { %v5552_v34 = vpop.eup %5551 }
 0x1af   :  { %v7646_v49 = vadd.f32 1.0, %v5552_v34  ;;  %v1036_v34 = vadd.f32 %v1035_v4, %v7364_v60 }
 0x1b1   :  { %v5554_v12 = vpop.eup %5553  ;;  %5557 = vrcp.f32 %v7646_v49  ;;  %v1074_v16 = vand.u32 2147483648, %v7646_v49  ;;  %vm1068_vm14 = vweird.f32 %v7646_v49  ;;  %v1072_v4 = vand.u32 2147483647, %v7646_v49 }
 0x1b2   :  { %v5556_v6 = vpop.eup %5555  ;;  %v969_v46 = vmul.f32 %v5554_v12, %v968_v18  ;;  %v7700_v12 = vld [vmem:[%s12941_s3 + $0x148] sm:$0xff] }
 0x1b3   :  { %v1044_v52 = vmul.f32 %v5556_v6, %v1042_v24  ;;  %vm1049_vm9 = vweird.f32 %v5556_v6  ;;  %v7693_v24 = vld [vmem:[%s12941_s3 + $0x2d8] sm:$0xff]  ;;  %vm1073_vm0 = vcmp.eq.f32.partialorder %v1072_v4, 8.507059e+37 }
 0x1b4   :  { %v7650_v30 = vadd.f32 %v970_v63, %v969_v46  ;;  %vm1050_vm11 = vmor %vm1048_vm10, %vm1049_vm9  ;;  %v7795_v4 = vld [vmem:[%s12941_s3 + $0x258] sm:$0xff] }
 0x1b5   :  { %v1045_v57 = vsub.f32 1.0, %v1044_v52  ;;  %v7708_v52 = vld [vmem:[%s12941_s3 + $0x2b8] sm:$0xff]  ;;  %13667 = vst [vmem:[#allocation59_spill] sm:$0xff] %v7795_v4 }
 0x1b6   :  { %13663 = vst [vmem:[#allocation54_spill] sm:$0xff] %v7650_v30  ;;  %1107 = vmatmul.f32.vlgmr.msra.gmra.mxu0 %v7650_v30  ;;  %1127 = vmatmul.f32.vlgmr.msrb.gmra.mxu1 %v7650_v30 }
 0x1b7   :  { %v7654_v54 = vpop.eup %5557  ;;  %v1046_v37 = vmul.f32 %v5556_v6, %v1045_v57  ;;  %1147 = vmatmul.f32.vlgmr.msra.gmra.mxu2 %v7650_v30  ;;  %1357 = vmatpush.msra.mxu0 %v7660_v56  ;;  %v377_v57 = vadd.f32 %v7345_v32, %v7375_v55  ;;  %v7732_v32 = vld [vmem:[%s12941_s3 + $0x2a0] sm:$0xff] }
 0x1b8   :  { %v1064_v5 = vmul.f32 %v7654_v54, %v7646_v49  ;;  %1430 = vmatpush.msrb.mxu1 %v7668_v62  ;;  %1450 = vmatpush.msra.mxu2 %v7674_v29  ;;  %vm1069_vm13 = vweird.f32 %v7654_v54 }
 0x1b9   :  { %v1047_v40 = vadd.f32 %v5556_v6, %v1046_v37  ;;  %1358 = vmatpush.msra.mxu0 %v7680_v33  ;;  %vm7743_vm15 = vmor %vm1068_vm14, %vm1069_vm13 }
 0x1ba   :  { %v1065_v36 = vsub.f32 1.0, %v1064_v5  ;;  %1431 = vmatpush.msrb.mxu1 %v7687_v53  ;;  %1451 = vmatpush.msra.mxu2 %v7693_v24 }
 0x1bb   :  { %v1051_v18 = vsel %vm1050_vm11, %v5556_v6, %v1047_v40  ;;  %1359 = vmatpush.msra.mxu0 %v7700_v12  ;;  %v7714_v6 = vld [vmem:[%s12941_s3 + $0x2c0] sm:$0xff]  ;;  %v7738_v40 = vld [vmem:[%s12941_s3 + $0x2a8] sm:$0xff] }
 0x1bc   :  { %v1066_v46 = vmul.f32 %v7654_v54, %v1065_v36  ;;  %v1056_v63 = vsel %vm1053_vm12, %v1055_v17, %v1051_v18  ;;  %1432 = vmatpush.msrb.mxu1 %v7708_v52  ;;  %1452 = vmatpush.msra.mxu2 %v7714_v6  ;;  %v7750_v17 = vld [vmem:[%s12941_s3 + $0x118] sm:$0xff]  ;;  %v7759_v18 = vld [vmem:[%s12941_s3 + $0x288] sm:$0xff]  ;;  %v7801_v36 = vld [vmem:[%s12941_s3 + $0x260] sm:$0xff] }
 0x1bd   :  { %v1078_v37 = vmul.f32 %v1056_v63, %v1036_v34  ;;  %1360 = vmatpush.msra.mxu0 %v7723_v41  ;;  %v1075_v63 = vor.u32 1.1754944e-38, %v1074_v16  ;;  %v7783_v16 = vld [vmem:[%s12941_s3 + $0x278] sm:$0xff]  ;;  %13668 = vst [vmem:[#allocation61_spill] sm:$0xff] %v7801_v36 }
 0x1be   :  { %v1067_v5 = vadd.f32 %v7654_v54, %v1066_v46  ;;  %1433 = vmatpush.msrb.mxu1 %v7732_v32  ;;  %1453 = vmatpush.msra.mxu2 %v7738_v40  ;;  %v7765_v46 = vld [vmem:[%s12941_s3 + $0x290] sm:$0xff] }
 0x1bf   :  { %v1079_v49 = vadd.f32 %v1078_v37, %v377_v57  ;;  %1361 = vmatpush.msra.mxu0 %v7750_v17  ;;  %v7777_v57 = vld [vmem:[%s12941_s3 + $0x270] sm:$0xff] }
 0x1c0   :  { %v1071_v34 = vsel %vm7743_vm15, %v7654_v54, %v1067_v5  ;;  %1434 = vmatpush.msrb.mxu1 %v7759_v18  ;;  %1454 = vmatpush.msra.mxu2 %v7765_v46  ;;  %v7771_v54 = vld [vmem:[%s12941_s3 + $0x100] sm:$0xff]  ;;  %v7789_v5 = vld [vmem:[%s12941_s3 + $0xe8] sm:$0xff] }
 0x1c1   :  { %5559 = vtanh.f32 %v1079_v49  ;;  %1362 = vmatpush.msra.mxu0 %v7771_v54  ;;  %v1076_v37 = vsel %vm1073_vm0, %v1075_v63, %v1071_v34  ;;  %13666 = vst [vmem:[#allocation58_spill] sm:$0xff] %v7789_v5  ;;  %v7807_v49 = vld [vmem:[%s12941_s3 + $0xd0] sm:$0xff]  ;;  %v7813_v63 = vld [vmem:[%s12941_s3 + $0x240] sm:$0xff] }
 0x1c2   :  { %1435 = vmatpush.msrb.mxu1 %v7777_v57  ;;  %1455 = vmatpush.msra.mxu2 %v7783_v16  ;;  %13669 = vst [vmem:[#allocation62_spill] sm:$0xff] %v7807_v49  ;;  %v1081_v34 = vsub.f32 1.0, %v1076_v37 }
 0x1c3   :  { %1363 = vmatpush.msra.mxu0 %v7789_v5  ;;  %13670 = vst [vmem:[#allocation10_spill] sm:$0xff] %v7813_v63  ;;  %v1083_v5 = vmul.f32 %v1076_v37, %v7406_v27  ;;  %v7858_v27 = vld [vmem:[%s12941_s3 + $0x218] sm:$0xff] }
 0x1c4   :  { %1436 = vmatpush.msrb.mxu1 %v7795_v4  ;;  %1456 = vmatpush.msra.mxu2 %v7801_v36 }
 0x1c5   :  { %1364 = vmatpush.msra.mxu0 %v7807_v49  ;;  %v7825_v49 = vld [vmem:[%s12941_s3 + $0xb8] sm:$0xff] }
 0x1c6   :  { %1437 = vmatpush.msrb.mxu1 %v7813_v63  ;;  %1457 = vmatpush.msra.mxu2 %v7819_v43  ;;  %v7832_v63 = vld [vmem:[%s12941_s3 + $0x228] sm:$0xff]  ;;  %v7838_v43 = vld [vmem:[%s12941_s3 + $0x230] sm:$0xff] }
 0x1c7   :  { %v5560_v36 = vpop.eup %5559  ;;  %1365 = vmatpush.msra.mxu0 %v7825_v49 }
 0x1c8   :  { %v1082_v4 = vmul.f32 %v5560_v36, %v1081_v34  ;;  %1438 = vmatpush.msrb.mxu1 %v7832_v63  ;;  %1458 = vmatpush.msra.mxu2 %v7838_v43  ;;  %v7844_v36 = vld [vmem:[%s12941_s3 + $0xa0] sm:$0xff]  ;;  %v7852_v34 = vld [vmem:[%s12941_s3 + $0x210] sm:$0xff] }
 0x1c9   :  { %13672 = vst [vmem:[#allocation67_spill] sm:$0xff] %v7844_v36  ;;  %1366 = vmatpush.msra.mxu0 %v7844_v36  ;;  %v7864_v36 = vld [vmem:[%s12941_s3 + $0x88] sm:$0xff] }
 0x1ca   :  { %v7847_v37 = vadd.f32 %v1083_v5, %v1082_v4  ;;  %1439 = vmatpush.msrb.mxu1 %v7852_v34  ;;  %1459 = vmatpush.msra.mxu2 %v7858_v27  ;;  %13674 = vst [vmem:[#allocation13_spill] sm:$0xff] %v7864_v36  ;;  %v7873_v5 = vld [vmem:[%s12941_s3 + $0x70] sm:$0xff]  ;;  %v7879_v4 = vld [vmem:[%s12941_s3 + $0x2f8] sm:$0xff] }
 0x1cb   :  { %1367 = vmatpush.msra.mxu0 %v7864_v36  ;;  %13675 = vst [vmem:[#allocation89_spill] sm:$0xff] %v7873_v5  ;;  %v7885_v36 = vld [vmem:[%s12941_s3 + $0x1f8] sm:$0xff] }
 0x1cc   :  { %13673 = vst [vmem:[#allocation82_spill] sm:$0xff] %v7847_v37  ;;  %1220 = vmatmul.f32.vlgmr.msra.gmra.mxu3 %v7847_v37  ;;  %1240 = vmatmul.f32.vlgmr.msrb.gmra.mxu0 %v7847_v37 }
 0x1cd   :  { %1260 = vmatmul.f32.vlgmr.msra.gmra.mxu1 %v7847_v37  ;;  %1368 = vmatpush.msra.mxu0 %v7873_v5  ;;  %13676 = vst [vmem:[#allocation90_spill] sm:$0xff] %v7879_v4  ;;  %v7891_v37 = vld [vmem:[%s12941_s3 + $0x58] sm:$0xff]  ;;  %v7897_v5 = vld [vmem:[%s12941_s3 + $0x200] sm:$0xff] }
 0x1ce   :  { %1470 = vmatpush.msra.mxu3 %v7879_v4  ;;  %13677 = vst [vmem:[#allocation91_spill] sm:$0xff] %v7885_v36  ;;  %1440 = vmatpush.msrb.mxu1 %v7885_v36  ;;  %v7903_v4 = vld [vmem:[%s12941_s3 + $0x2e0] sm:$0xff] }
 0x1cf   :  { %13678 = vst [vmem:[#allocation92_spill] sm:$0xff] %v7891_v37  ;;  %1369 = vmatpush.msra.mxu0 %v7891_v37  ;;  %1460 = vmatpush.msra.mxu2 %v7897_v5  ;;  %v7909_v36 = vld [vmem:[%s12941_s3 + $0x1e0] sm:$0xff] }
 0x1d0   :  { %13679 = vst [vmem:[#allocation93_spill] sm:$0xff] %v7897_v5  ;;  %1471 = vmatpush.msra.mxu3 %v7903_v4  ;;  %1441 = vmatpush.msrb.mxu1 %v7909_v36  ;;  %v7915_v37 = vld [vmem:[%s12941_s3 + $0x40] sm:$0xff]  ;;  %v7921_v5 = vld [vmem:[%s12941_s3 + $0x1e8] sm:$0xff] }
 0x1d1   :  { %13680 = vst [vmem:[#allocation94_spill] sm:$0xff] %v7903_v4  ;;  %1370 = vmatpush.msra.mxu0 %v7915_v37  ;;  %1461 = vmatpush.msra.mxu2 %v7921_v5  ;;  %v7927_v4 = vld [vmem:[%s12941_s3 + $0x2c8] sm:$0xff] }
 0x1d2   :  { %13681 = vst [vmem:[#allocation95_spill] sm:$0xff] %v7909_v36  ;;  %1472 = vmatpush.msra.mxu3 %v7927_v4  ;;  %v7933_v36 = vld [vmem:[%s12941_s3 + $0x1c8] sm:$0xff] }
 0x1d3   :  { %13682 = vst [vmem:[#allocation96_spill] sm:$0xff] %v7915_v37  ;;  %1442 = vmatpush.msrb.mxu1 %v7933_v36  ;;  %v7939_v37 = vld [vmem:[%s12941_s3 + $0x28] sm:$0xff] }
 0x1d4   :  { %13683 = vst [vmem:[#allocation97_spill] sm:$0xff] %v7921_v5  ;;  %1371 = vmatpush.msra.mxu0 %v7939_v37  ;;  %v7945_v5 = vld [vmem:[%s12941_s3 + $0x1d0] sm:$0xff] }
 0x1d5   :  { %13684 = vst [vmem:[#allocation98_spill] sm:$0xff] %v7927_v4  ;;  %1462 = vmatpush.msra.mxu2 %v7945_v5  ;;  %v7951_v4 = vld [vmem:[%s12941_s3 + $0x2b0] sm:$0xff] }
 0x1d6   :  { %13685 = vst [vmem:[#allocation99_spill] sm:$0xff] %v7933_v36  ;;  %1473 = vmatpush.msra.mxu3 %v7951_v4  ;;  %v7957_v36 = vld [vmem:[%s12941_s3 + $0x1b0] sm:$0xff] }
 0x1d7   :  { %13686 = vst [vmem:[#allocation100_spill] sm:$0xff] %v7939_v37  ;;  %1443 = vmatpush.msrb.mxu1 %v7957_v36  ;;  %v7963_v37 = vld [vmem:[%s12941_s3 + $0x10] sm:$0xff] }
 0x1d8   :  { %13687 = vst [vmem:[#allocation101_spill] sm:$0xff] %v7945_v5  ;;  %1372 = vmatpush.msra.mxu0 %v7963_v37  ;;  %v7969_v5 = vld [vmem:[%s12941_s3 + $0x1b8] sm:$0xff] }
 0x1d9   :  { %13688 = vst [vmem:[#allocation102_spill] sm:$0xff] %v7951_v4  ;;  %1463 = vmatpush.msra.mxu2 %v7969_v5  ;;  %v7975_v4 = vld [vmem:[%s12941_s3 + $0x298] sm:$0xff] }
 0x1da   :  { %13689 = vst [vmem:[#allocation103_spill] sm:$0xff] %v7957_v36  ;;  %1474 = vmatpush.msra.mxu3 %v7975_v4  ;;  %v7981_v36 = vld [vmem:[%s12941_s3 + $0x198] sm:$0xff]  ;;  %1543 = vmatpush.msrb.mxu0 %v7430_v1  ;;  %v8021_v1 = vld [vmem:[%s12941_s3 + $0x250] sm:$0xff] }
 0x1db   :  { %13690 = vst [vmem:[#allocation104_spill] sm:$0xff] %v7963_v37  ;;  %1444 = vmatpush.msrb.mxu1 %v7981_v36  ;;  %v7987_v37 = vld [vmem:[%s12941_s3 + $0x1a0] sm:$0xff] }
 0x1dc   :  { %13691 = vst [vmem:[#allocation105_spill] sm:$0xff] %v7969_v5  ;;  %1464 = vmatpush.msra.mxu2 %v7987_v37  ;;  %1544 = vmatpush.msrb.mxu0 %v7443_v59 }
 0x1dd   :  { %13692 = vst [vmem:[#allocation106_spill] sm:$0xff] %v7975_v4  ;;  %v7994_v4 = vld [vmem:[%s12941_s3 + $0x280] sm:$0xff] }
 0x1de   :  { %13693 = vst [vmem:[#allocation107_spill] sm:$0xff] %v7981_v36  ;;  %1475 = vmatpush.msra.mxu3 %v7994_v4  ;;  %v8000_v36 = vld [vmem:[%s12941_s3 + $0x180] sm:$0xff]  ;;  %1545 = vmatpush.msrb.mxu0 %v7456_v19 }
 0x1df   :  { %13694 = vst [vmem:[#allocation108_spill] sm:$0xff] %v7987_v37  ;;  %1445 = vmatpush.msrb.mxu1 %v8000_v36  ;;  %v8006_v37 = vld [vmem:[%s12941_s3 + $0x188] sm:$0xff] }
 0x1e0   :  { %13695 = vst [vmem:[#allocation109_spill] sm:$0xff] %v7994_v4  ;;  %1465 = vmatpush.msra.mxu2 %v8006_v37  ;;  %v8013_v4 = vld [vmem:[%s12941_s3 + $0x268] sm:$0xff]  ;;  %1546 = vmatpush.msrb.mxu0 %v7469_v35 }
 0x1e1   :  { %13696 = vst [vmem:[#allocation110_spill] sm:$0xff] %v8000_v36  ;;  %1563 = vmatpush.msra.mxu1 %v7436_v15  ;;  %1476 = vmatpush.msra.mxu3 %v8013_v4  ;;  %v8029_v15 = vld [vmem:[%s12941_s3 + $0x238] sm:$0xff] }
 0x1e2   :  { %13697 = vst [vmem:[#allocation111_spill] sm:$0xff] %v8006_v37  ;;  %1547 = vmatpush.msrb.mxu0 %v7482_v51 }
 0x1e3   :  { %13698 = vst [vmem:[#allocation112_spill] sm:$0xff] %v8013_v4  ;;  %1564 = vmatpush.msra.mxu1 %v7449_v38  ;;  %1477 = vmatpush.msra.mxu3 %v8021_v1  ;;  %v8037_v4 = vld [vmem:[%s12941_s3 + $0x220] sm:$0xff] }
 0x1e4   :  { %13699 = vst [vmem:[#allocation113_spill] sm:$0xff] %v8021_v1  ;;  %v8045_v1 = vld [vmem:[%s12941_s3 + $0x208] sm:$0xff]  ;;  %1548 = vmatpush.msrb.mxu0 %v7495_v58 }
 0x1e5   :  { %1565 = vmatpush.msra.mxu1 %v7462_v20  ;;  %13700 = vst [vmem:[#allocation114_spill] sm:$0xff] %v8029_v15  ;;  %1478 = vmatpush.msra.mxu3 %v8029_v15  ;;  %v8053_v15 = vld [vmem:[%s12941_s3 + $0x1f0] sm:$0xff] }
 0x1e6   :  { %13701 = vst [vmem:[#allocation115_spill] sm:$0xff] %v8037_v4  ;;  %1549 = vmatpush.msrb.mxu0 %v7508_v7 }
 0x1e7   :  { %1566 = vmatpush.msra.mxu1 %v7475_v23  ;;  %1479 = vmatpush.msra.mxu3 %v8037_v4  ;;  %13702 = vst [vmem:[#allocation116_spill] sm:$0xff] %v8045_v1  ;;  %v8061_v4 = vld [vmem:[%s12941_s3 + $0x1d8] sm:$0xff] }
 0x1e8   :  { %13703 = vst [vmem:[#allocation117_spill] sm:$0xff] %v8053_v15  ;;  %1550 = vmatpush.msrb.mxu0 %v7521_v10 }
 0x1e9   :  { %1567 = vmatpush.msra.mxu1 %v7488_v31  ;;  %1480 = vmatpush.msra.mxu3 %v8045_v1  ;;  %13704 = vst [vmem:[#allocation118_spill] sm:$0xff] %v8061_v4  ;;  %v8069_v1 = vld [vmem:[%s12941_s3 + $0x1c0] sm:$0xff] }
 0x1ea   :  { %13705 = vst [vmem:[#allocation119_spill] sm:$0xff] %v8069_v1  ;;  %1551 = vmatpush.msrb.mxu0 %v7534_v8 }
 0x1eb   :  { %1568 = vmatpush.msra.mxu1 %v7501_v3  ;;  %1481 = vmatpush.msra.mxu3 %v8053_v15  ;;  %v8077_v15 = vld [vmem:[%s12941_s3 + $0x1a8] sm:$0xff] }
 0x1ec   :  { %13706 = vst [vmem:[#allocation120_spill] sm:$0xff] %v8077_v15  ;;  %1552 = vmatpush.msrb.mxu0 %v7547_v61  ;;  %v13714_v61 = vld [vmem:[#allocation75_spill] sm:$0xff] }
 0x1ed   :  { %1569 = vmatpush.msra.mxu1 %v7514_v9  ;;  %1482 = vmatpush.msra.mxu3 %v8061_v4  ;;  %v8085_v4 = vld [vmem:[%s12941_s3 + $0x190] sm:$0xff] }
 0x1ee   :  { %13707 = vst [vmem:[#allocation121_spill] sm:$0xff] %v8085_v4  ;;  %1553 = vmatpush.msrb.mxu0 %v7560_v14  ;;  %v13712_v14 = vld [vmem:[#allocation41_spill] sm:$0xff] }
 0x1ef   :  { %1570 = vmatpush.msra.mxu1 %v7527_v11  ;;  %1483 = vmatpush.msra.mxu3 %v8069_v1 }
 0x1f0   :  { %1554 = vmatpush.msrb.mxu0 %v7573_v0 }
 0x1f1   :  { %1571 = vmatpush.msra.mxu1 %v7540_v22  ;;  %1484 = vmatpush.msra.mxu3 %v8077_v15 }
 0x1f2   :  { %1555 = vmatpush.msrb.mxu0 %v7586_v47  ;;  %v13711_v47 = vld [vmem:[#allocation73_spill] sm:$0xff] }
 0x1f3   :  { %1572 = vmatpush.msra.mxu1 %v7553_v26  ;;  %1485 = vmatpush.msra.mxu3 %v8085_v4  ;;  %v13708_v4 = vld [vmem:[#allocation52_spill] sm:$0xff]  ;;  %v13713_v26 = vld [vmem:[#allocation74_spill] sm:$0xff] }
 0x1f4   :  { %1556 = vmatpush.msrb.mxu0 %v7598_v21 }
 0x1f5   :  { %1573 = vmatpush.msra.mxu1 %v7566_v50  ;;  %v13709_v50 = vld [vmem:[#allocation76_spill] sm:$0xff] }
 0x1f6   :  { %1557 = vmatpush.msrb.mxu0 %v7610_v48 }
 0x1f7   :  { %1574 = vmatpush.msra.mxu1 %v7579_v13  ;;  %v13710_v13 = vld [vmem:[#allocation11_spill] sm:$0xff] }
 0x1f8   :  { %1558 = vmatpush.msrb.mxu0 %v7622_v45  ;;  %v120_v1 = vadd.f32 %v13710_v13, %v13709_v50 }
 0x1f9   :  { %1575 = vmatpush.msra.mxu1 %v7592_v2  ;;  %v161_v2 = vadd.f32 %v13712_v14, %v13711_v47  ;;  %v13715_v14 = vld [vmem:[#allocation84_spill] sm:$0xff]  ;;  %v13716_v47 = vld [vmem:[#allocation78_spill] sm:$0xff] }
 0x1fb   :  { %1576 = vmatpush.msra.mxu1 %v7604_v42 }
 0x1fd   :  { %1577 = vmatpush.msra.mxu1 %v7616_v39 }
 0x1ff   :  { %1578 = vmatpush.msra.mxu1 %v13708_v4 }
 0x233   :  { %v1108_v15 = vpop.f32.mrf.mxu0  ;;  %v1128_v0 = vpop.f32.mrf.mxu1 }
 0x234   :  { %v1109_v21 = vadd.f32 %v1108_v15, %v13713_v26  ;;  %v1129_v42 = vadd.f32 %v1128_v0, %v13714_v61  ;;  %v333_v15 = vadd.f32 %v13716_v47, %v13715_v14  ;;  %v13719_v47 = vld [vmem:[#allocation80_spill] sm:$0xff] }
 0x236   :  { %v1151_v22 = vadd.f32 %v1109_v21, %v120_v1  ;;  %v1171_v48 = vadd.f32 %v1129_v42, %v161_v2 }
 0x238   :  { %v5357_v8 = vmul.f32 -1.442695, %v1151_v22  ;;  %v5358_v39 = vmul.f32 -1.442695, %v1171_v48 }
 0x23a   :  { %5561 = vpow2.f32 %v5357_v8  ;;  %v1148_v3 = vpop.f32.mrf.mxu2 }
 0x23b   :  { %5563 = vpow2.f32 %v5358_v39 }
 0x240   :  { %v5562_v45 = vpop.eup %5561 }
 0x241   :  { %v5564_v4 = vpop.eup %5563  ;;  %v1155_v11 = vadd.f32 1.0, %v5562_v45  ;;  %v13717_v45 = vld [vmem:[#allocation79_spill] sm:$0xff] }
 0x242   :  { %v1175_v10 = vadd.f32 1.0, %v5564_v4  ;;  %v13718_v4 = vld [vmem:[#allocation63_spill] sm:$0xff] }
 0x243   :  { %5565 = vrcp.f32 %v1155_v11  ;;  %v1167_v21 = vand.u32 2147483648, %v1155_v11  ;;  %v1165_v48 = vand.u32 2147483647, %v1155_v11  ;;  %v292_v61 = vadd.f32 %v13718_v4, %v13717_v45  ;;  %v13720_v4 = vld [vmem:[#allocation21_spill] sm:$0xff] }
 0x244   :  { %5567 = vrcp.f32 %v1175_v10  ;;  %vm1161_vm2 = vweird.f32 %v1155_v11  ;;  %vm1181_vm6 = vweird.f32 %v1175_v10 }
 0x245   :  { %vm1166_vm4 = vcmp.eq.f32.partialorder %v1165_v48, 8.507059e+37 }
 0x249   :  { %v5566_v13 = vpop.eup %5565  ;;  %v1241_v50 = vpop.f32.mrf.mxu0 }
 0x24a   :  { %v5568_v9 = vpop.eup %5567  ;;  %v1157_v26 = vmul.f32 %v5566_v13, %v1155_v11  ;;  %v1242_v1 = vadd.f32 %v1241_v50, %v13661_v44  ;;  %vm1162_vm1 = vweird.f32 %v5566_v13  ;;  %v1187_v44 = vand.u32 2147483648, %v1175_v10 }
 0x24b   :  { %v1177_v0 = vmul.f32 %v5568_v9, %v1175_v10  ;;  %vm1163_vm3 = vmor %vm1161_vm2, %vm1162_vm1  ;;  %vm1182_vm5 = vweird.f32 %v5568_v9  ;;  %v1185_v11 = vand.u32 2147483647, %v1175_v10 }
 0x24c   :  { %v1158_v22 = vsub.f32 1.0, %v1157_v26  ;;  %v1284_v2 = vadd.f32 %v1242_v1, %v333_v15  ;;  %v1168_v26 = vor.u32 1.1754944e-38, %v1167_v21  ;;  %v1149_v15 = vadd.f32 %v1148_v3, %v7328_v28  ;;  %vm1183_vm7 = vmor %vm1181_vm6, %vm1182_vm5 }
 0x24d   :  { %v1178_v8 = vsub.f32 1.0, %v1177_v0  ;;  %vm1186_vm8 = vcmp.eq.f32.partialorder %v1185_v11, 8.507059e+37  ;;  %v1261_v11 = vpop.f32.mrf.mxu1 }
 0x24e   :  { %v1159_v42 = vmul.f32 %v5566_v13, %v1158_v22  ;;  %v5360_v39 = vmul.f32 -1.442695, %v1284_v2 }
 0x24f   :  { %v1179_v7 = vmul.f32 %v5568_v9, %v1178_v8  ;;  %v1221_v58 = vpop.f32.mrf.mxu3  ;;  %v202_v8 = vadd.f32 %v13720_v4, %v7334_v25 }
 0x250   :  { %v1160_v31 = vadd.f32 %v5566_v13, %v1159_v42  ;;  %5569 = vpow2.f32 %v5360_v39  ;;  %v1222_v50 = vadd.f32 %v1221_v58, %v13719_v47 }
 0x251   :  { %v1180_v2 = vadd.f32 %v5568_v9, %v1179_v7 }
 0x252   :  { %v1164_v1 = vsel %vm1163_vm3, %v5566_v13, %v1160_v31  ;;  %v1264_v0 = vadd.f32 %v1222_v50, %v292_v61  ;;  %v1188_v31 = vor.u32 1.1754944e-38, %v1187_v44 }
 0x253   :  { %v1169_v22 = vsel %vm1166_vm4, %v1168_v26, %v1164_v1  ;;  %v1184_v21 = vsel %vm1183_vm7, %v5568_v9, %v1180_v2 }
 0x254   :  { %v1191_v14 = vmul.f32 %v1169_v22, %v1149_v15  ;;  %v5359_v42 = vmul.f32 -1.442695, %v1264_v0  ;;  %v1189_v61 = vsel %vm1186_vm8, %v1188_v31, %v1184_v21  ;;  %v1262_v21 = vadd.f32 %v1261_v11, %v7364_v60  ;;  %v13729_v11 = vld [vmem:[#allocation67_spill] sm:$0xff] }
 0x255   :  { %v1194_v13 = vsub.f32 1.0, %v1189_v61  ;;  %v1196_v10 = vmul.f32 %v1189_v61, %v7650_v30  ;;  %v13741_v30 = vld [vmem:[#allocation96_spill] sm:$0xff] }
 0x256   :  { %v5570_v39 = vpop.eup %5569  ;;  %v1192_v58 = vadd.f32 %v1191_v14, %v202_v8  ;;  %5571 = vpow2.f32 %v5359_v42 }
 0x257   :  { %v8115_v3 = vadd.f32 1.0, %v5570_v39 }
 0x258   :  { %5573 = vtanh.f32 %v1192_v58 }
 0x259   :  { %5575 = vrcp.f32 %v8115_v3  ;;  %vm1294_vm14 = vweird.f32 %v8115_v3 }
 0x25c   :  { %v5572_v7 = vpop.eup %5571 }
 0x25d   :  { %v1268_v48 = vadd.f32 1.0, %v5572_v7 }
 0x25e   :  { %v5574_v50 = vpop.eup %5573 }
 0x25f   :  { %v1195_v26 = vmul.f32 %v5574_v50, %v1194_v13  ;;  %5577 = vrcp.f32 %v1268_v48  ;;  %v8119_v15 = vpop.eup %5575  ;;  %v1280_v2 = vand.u32 2147483648, %v1268_v48  ;;  %v1278_v8 = vand.u32 2147483647, %v1268_v48  ;;  %v13722_v13 = vld [vmem:[#allocation87_spill] sm:$0xff] }
 0x260   :  { %v1290_v9 = vmul.f32 %v8119_v15, %v8115_v3  ;;  %vm1274_vm10 = vweird.f32 %v1268_v48  ;;  %vm1295_vm13 = vweird.f32 %v8119_v15  ;;  %v1300_v50 = vand.u32 2147483648, %v8115_v3 }
 0x261   :  { %v8121_v14 = vadd.f32 %v1196_v10, %v1195_v26  ;;  %v1281_v58 = vor.u32 1.1754944e-38, %v1280_v2  ;;  %vm1279_vm12 = vcmp.eq.f32.partialorder %v1278_v8, 8.507059e+37  ;;  %v13723_v10 = vld [vmem:[#allocation58_spill] sm:$0xff]  ;;  %vm1296_vm15 = vmor %vm1294_vm14, %vm1295_vm13  ;;  %v13728_v8 = vld [vmem:[#allocation12_spill] sm:$0xff] }
 0x262   :  { %v1291_v0 = vsub.f32 1.0, %v1290_v9  ;;  %v1298_v9 = vand.u32 2147483647, %v8115_v3 }
 0x263   :  { %13721 = vst [vmem:[#allocation11_spill] sm:$0xff] %v8121_v14  ;;  %1333 = vmatmul.f32.vlgmr.msrb.gmra.mxu2 %v8121_v14  ;;  %1353 = vmatmul.f32.vlgmr.msrb.gmra.mxu3 %v8121_v14 }
 0x264   :  { %1373 = vmatmul.f32.vlgmr.msra.gmra.mxu0 %v8121_v14  ;;  %1583 = vmatpush.msrb.mxu2 %v7660_v56  ;;  %v1292_v42 = vmul.f32 %v8119_v15, %v1291_v0  ;;  %vm1299_vm0 = vcmp.eq.f32.partialorder %v1298_v9, 8.507059e+37  ;;  %v13737_v9 = vld [vmem:[#allocation92_spill] sm:$0xff] }
 0x265   :  { %v5578_v44 = vpop.eup %5577  ;;  %1655 = vmatpush.msrb.mxu3 %v7668_v62  ;;  %1675 = vmatpush.msra.mxu0 %v7674_v29 }
 0x266   :  { %v1270_v1 = vmul.f32 %v5578_v44, %v1268_v48  ;;  %1584 = vmatpush.msrb.mxu2 %v7680_v33  ;;  %vm1275_vm9 = vweird.f32 %v5578_v44  ;;  %v1293_v61 = vadd.f32 %v8119_v15, %v1292_v42  ;;  %v374_v48 = vadd.f32 %v13722_v13, %v7375_v55 }
 0x267   :  { %1656 = vmatpush.msrb.mxu3 %v7687_v53  ;;  %1676 = vmatpush.msra.mxu0 %v7693_v24  ;;  %vm1276_vm11 = vmor %vm1274_vm10, %vm1275_vm9  ;;  %v1301_v42 = vor.u32 1.1754944e-38, %v1300_v50  ;;  %v13735_v50 = vld [vmem:[#allocation95_spill] sm:$0xff] }
 0x268   :  { %v1271_v22 = vsub.f32 1.0, %v1270_v1  ;;  %1585 = vmatpush.msrb.mxu2 %v7700_v12  ;;  %v13725_v1 = vld [vmem:[#allocation61_spill] sm:$0xff]  ;;  %v1297_v2 = vsel %vm1296_vm15, %v8119_v15, %v1293_v61 }
 0x269   :  { %1657 = vmatpush.msrb.mxu3 %v7708_v52  ;;  %1677 = vmatpush.msra.mxu0 %v7714_v6  ;;  %v1302_v3 = vsel %vm1299_vm0, %v1301_v42, %v1297_v2  ;;  %v13730_v15 = vld [vmem:[#allocation13_spill] sm:$0xff]  ;;  %v13739_v2 = vld [vmem:[#allocation99_spill] sm:$0xff] }
 0x26a   :  { %v1272_v4 = vmul.f32 %v5578_v44, %v1271_v22  ;;  %1586 = vmatpush.msrb.mxu2 %v7723_v41  ;;  %v13726_v22 = vld [vmem:[#allocation62_spill] sm:$0xff]  ;;  %v13733_v61 = vld [vmem:[#allocation89_spill] sm:$0xff] }
 0x26b   :  { %1658 = vmatpush.msrb.mxu3 %v7732_v32  ;;  %1678 = vmatpush.msra.mxu0 %v7738_v40  ;;  %v13740_v42 = vld [vmem:[#allocation101_spill] sm:$0xff] }
 0x26c   :  { %v1273_v39 = vadd.f32 %v5578_v44, %v1272_v4  ;;  %1587 = vmatpush.msrb.mxu2 %v7750_v17  ;;  %v13727_v4 = vld [vmem:[#allocation10_spill] sm:$0xff] }
 0x26d   :  { %1659 = vmatpush.msrb.mxu3 %v7759_v18  ;;  %1679 = vmatpush.msra.mxu0 %v7765_v46 }
 0x26e   :  { %v1277_v31 = vsel %vm1276_vm11, %v5578_v44, %v1273_v39  ;;  %1588 = vmatpush.msrb.mxu2 %v7771_v54  ;;  %v13724_v44 = vld [vmem:[#allocation59_spill] sm:$0xff]  ;;  %v1307_v39 = vsub.f32 1.0, %v1302_v3 }
 0x26f   :  { %v1282_v7 = vsel %vm1279_vm12, %v1281_v58, %v1277_v31  ;;  %1660 = vmatpush.msrb.mxu3 %v7777_v57  ;;  %1680 = vmatpush.msra.mxu0 %v7783_v16  ;;  %v13731_v58 = vld [vmem:[#allocation91_spill] sm:$0xff] }
 0x270   :  { %v1304_v26 = vmul.f32 %v1282_v7, %v1262_v21  ;;  %1589 = vmatpush.msrb.mxu2 %v13723_v10  ;;  %v13732_v21 = vld [vmem:[#allocation93_spill] sm:$0xff]  ;;  %v13734_v7 = vld [vmem:[#allocation82_spill] sm:$0xff] }
 0x271   :  { %1661 = vmatpush.msrb.mxu3 %v13724_v44  ;;  %1681 = vmatpush.msra.mxu0 %v13725_v1  ;;  %v1309_v13 = vmul.f32 %v1302_v3, %v13734_v7  ;;  %v13742_v3 = vld [vmem:[#allocation90_spill] sm:$0xff]  ;;  %v13747_v7 = vld [vmem:[#allocation107_spill] sm:$0xff] }
 0x272   :  { %v1305_v0 = vadd.f32 %v1304_v26, %v374_v48  ;;  %1590 = vmatpush.msrb.mxu2 %v13726_v22  ;;  %v13736_v26 = vld [vmem:[#allocation97_spill] sm:$0xff] }
 0x273   :  { %1662 = vmatpush.msrb.mxu3 %v13727_v4  ;;  %1682 = vmatpush.msra.mxu0 %v13728_v8 }
 0x274   :  { %5579 = vtanh.f32 %v1305_v0  ;;  %1591 = vmatpush.msrb.mxu2 %v7825_v49 }
 0x275   :  { %1663 = vmatpush.msrb.mxu3 %v7832_v63  ;;  %1683 = vmatpush.msra.mxu0 %v7838_v43 }
 0x276   :  { %1592 = vmatpush.msrb.mxu2 %v13729_v11 }
 0x277   :  { %1664 = vmatpush.msrb.mxu3 %v7852_v34  ;;  %1684 = vmatpush.msra.mxu0 %v7858_v27 }
 0x278   :  { %1593 = vmatpush.msrb.mxu2 %v13730_v15 }
 0x279   :  { %1665 = vmatpush.msrb.mxu3 %v13731_v58  ;;  %1685 = vmatpush.msra.mxu0 %v13732_v21 }
 0x27a   :  { %v5580_v31 = vpop.eup %5579  ;;  %1594 = vmatpush.msrb.mxu2 %v13733_v61 }
 0x27b   :  { %v1308_v48 = vmul.f32 %v5580_v31, %v1307_v39  ;;  %1666 = vmatpush.msrb.mxu3 %v13735_v50  ;;  %1686 = vmatpush.msra.mxu0 %v13736_v26  ;;  %v13743_v39 = vld [vmem:[#allocation100_spill] sm:$0xff]  ;;  %v13744_v31 = vld [vmem:[#allocation103_spill] sm:$0xff] }
 0x27c   :  { %1595 = vmatpush.msrb.mxu2 %v13737_v9  ;;  %v13750_v26 = vld [vmem:[#allocation20_spill] sm:$0xff] }
 0x27d   :  { %v8176_v0 = vadd.f32 %v1309_v13, %v1308_v48  ;;  %1667 = vmatpush.msrb.mxu3 %v13739_v2  ;;  %1687 = vmatpush.msra.mxu0 %v13740_v42  ;;  %v13745_v13 = vld [vmem:[#allocation94_spill] sm:$0xff]  ;;  %v13746_v48 = vld [vmem:[#allocation104_spill] sm:$0xff] }
 0x27e   :  { %1596 = vmatpush.msrb.mxu2 %v13741_v30  ;;  %v13748_v42 = vld [vmem:[#allocation98_spill] sm:$0xff]  ;;  %v13749_v2 = vld [vmem:[#allocation108_spill] sm:$0xff] }
 0x27f   :  { %13738 = vst [vmem:[#allocation41_spill] sm:$0xff] %v8176_v0  ;;  %1446 = vmatmul.f32.vlgmr.msrb.gmra.mxu1 %v8176_v0  ;;  %1466 = vmatmul.f32.vlgmr.msra.gmra.mxu2 %v8176_v0  ;;  %v13751_v30 = vld [vmem:[#allocation102_spill] sm:$0xff] }
 0x280   :  { %1486 = vmatmul.f32.vlgmr.msra.gmra.mxu3 %v8176_v0  ;;  %1695 = vmatpush.msrb.mxu1 %v13742_v3 }
 0x281   :  { %1597 = vmatpush.msrb.mxu2 %v13743_v39  ;;  %1668 = vmatpush.msrb.mxu3 %v13744_v31  ;;  %v13752_v31 = vld [vmem:[#allocation30_spill] sm:$0xff] }
 0x282   :  { %1696 = vmatpush.msrb.mxu1 %v13745_v13  ;;  %1688 = vmatpush.msra.mxu0 %v7969_v5  ;;  %v13753_v5 = vld [vmem:[#allocation106_spill] sm:$0xff] }
 0x283   :  { %1598 = vmatpush.msrb.mxu2 %v13746_v48  ;;  %1669 = vmatpush.msrb.mxu3 %v13747_v7  ;;  %v13754_v7 = vld [vmem:[#allocation109_spill] sm:$0xff]  ;;  %v13792_v48 = vld [vmem:[#allocation74_spill] sm:$0xff] }
 0x284   :  { %1697 = vmatpush.msrb.mxu1 %v13748_v42  ;;  %1689 = vmatpush.msra.mxu0 %v13749_v2 }
 0x285   :  { %1670 = vmatpush.msrb.mxu3 %v8000_v36  ;;  %1767 = vmatpush.msra.mxu2 %v13750_v26  ;;  %v13755_v26 = vld [vmem:[#allocation112_spill] sm:$0xff]  ;;  %v13761_v36 = vld [vmem:[#allocation38_spill] sm:$0xff] }
 0x286   :  { %1698 = vmatpush.msrb.mxu1 %v13751_v30  ;;  %1690 = vmatpush.msra.mxu0 %v8006_v37  ;;  %v13758_v37 = vld [vmem:[#allocation36_spill] sm:$0xff]  ;;  %v13793_v30 = vld [vmem:[#allocation75_spill] sm:$0xff] }
 0x287   :  { %1787 = vmatpush.msra.mxu3 %v13752_v31  ;;  %1768 = vmatpush.msra.mxu2 %v7443_v59  ;;  %v13756_v31 = vld [vmem:[#allocation113_spill] sm:$0xff]  ;;  %v13757_v59 = vld [vmem:[#allocation28_spill] sm:$0xff] }
 0x288   :  { %1699 = vmatpush.msrb.mxu1 %v13753_v5  ;;  %v13791_v5 = vld [vmem:[#allocation25_spill] sm:$0xff] }
 0x289   :  { %1788 = vmatpush.msra.mxu3 %v7449_v38  ;;  %1769 = vmatpush.msra.mxu2 %v7456_v19  ;;  %v13759_v38 = vld [vmem:[#allocation114_spill] sm:$0xff] }
 0x28a   :  { %1700 = vmatpush.msrb.mxu1 %v13754_v7  ;;  %v13760_v19 = vld [vmem:[#allocation34_spill] sm:$0xff]  ;;  %v13788_v7 = vld [vmem:[#allocation76_spill] sm:$0xff] }
 0x28b   :  { %1789 = vmatpush.msra.mxu3 %v7462_v20  ;;  %1770 = vmatpush.msra.mxu2 %v7469_v35  ;;  %v13762_v20 = vld [vmem:[#allocation115_spill] sm:$0xff] }
 0x28c   :  { %1701 = vmatpush.msrb.mxu1 %v13755_v26  ;;  %v13763_v35 = vld [vmem:[#allocation35_spill] sm:$0xff]  ;;  %v13764_v26 = vld [vmem:[#allocation44_spill] sm:$0xff] }
 0x28d   :  { %1790 = vmatpush.msra.mxu3 %v7475_v23  ;;  %1771 = vmatpush.msra.mxu2 %v7482_v51  ;;  %v13765_v23 = vld [vmem:[#allocation116_spill] sm:$0xff]  ;;  %v13766_v51 = vld [vmem:[#allocation37_spill] sm:$0xff] }
 0x28e   :  { %1702 = vmatpush.msrb.mxu1 %v13756_v31  ;;  %v13767_v31 = vld [vmem:[#allocation47_spill] sm:$0xff] }
 0x28f   :  { %1791 = vmatpush.msra.mxu3 %v13757_v59  ;;  %1772 = vmatpush.msra.mxu2 %v13758_v37  ;;  %v13768_v59 = vld [vmem:[#allocation117_spill] sm:$0xff]  ;;  %v13769_v37 = vld [vmem:[#allocation50_spill] sm:$0xff] }
 0x290   :  { %1703 = vmatpush.msrb.mxu1 %v13759_v38  ;;  %v13770_v38 = vld [vmem:[#allocation55_spill] sm:$0xff] }
 0x291   :  { %1792 = vmatpush.msra.mxu3 %v13760_v19  ;;  %1773 = vmatpush.msra.mxu2 %v13761_v36  ;;  %v13771_v19 = vld [vmem:[#allocation118_spill] sm:$0xff] }
 0x292   :  { %1704 = vmatpush.msrb.mxu1 %v13762_v20  ;;  %v13772_v36 = vld [vmem:[#allocation46_spill] sm:$0xff]  ;;  %v13773_v20 = vld [vmem:[#allocation15_spill] sm:$0xff] }
 0x293   :  { %1793 = vmatpush.msra.mxu3 %v13763_v35  ;;  %1774 = vmatpush.msra.mxu2 %v13764_v26  ;;  %v13774_v35 = vld [vmem:[#allocation119_spill] sm:$0xff]  ;;  %v13775_v26 = vld [vmem:[#allocation56_spill] sm:$0xff] }
 0x294   :  { %1705 = vmatpush.msrb.mxu1 %v13765_v23  ;;  %v13776_v23 = vld [vmem:[#allocation19_spill] sm:$0xff] }
 0x295   :  { %1794 = vmatpush.msra.mxu3 %v13766_v51  ;;  %1775 = vmatpush.msra.mxu2 %v13767_v31  ;;  %v13777_v51 = vld [vmem:[#allocation120_spill] sm:$0xff]  ;;  %v13778_v31 = vld [vmem:[#allocation57_spill] sm:$0xff] }
 0x296   :  { %1706 = vmatpush.msrb.mxu1 %v13768_v59  ;;  %v13779_v59 = vld [vmem:[#allocation22_spill] sm:$0xff] }
 0x297   :  { %1795 = vmatpush.msra.mxu3 %v13769_v37  ;;  %1776 = vmatpush.msra.mxu2 %v13770_v38  ;;  %v13780_v37 = vld [vmem:[#allocation121_spill] sm:$0xff]  ;;  %v13781_v38 = vld [vmem:[#allocation60_spill] sm:$0xff] }
 0x298   :  { %1707 = vmatpush.msrb.mxu1 %v13771_v19  ;;  %v13782_v19 = vld [vmem:[#allocation24_spill] sm:$0xff] }
 0x299   :  { %1796 = vmatpush.msra.mxu3 %v13772_v36  ;;  %1777 = vmatpush.msra.mxu2 %v13773_v20  ;;  %v13783_v36 = vld [vmem:[#allocation29_spill] sm:$0xff]  ;;  %v13784_v20 = vld [vmem:[#allocation32_spill] sm:$0xff] }
 0x29a   :  { %1708 = vmatpush.msrb.mxu1 %v13774_v35  ;;  %v13785_v35 = vld [vmem:[#allocation39_spill] sm:$0xff] }
 0x29b   :  { %1797 = vmatpush.msra.mxu3 %v13775_v26  ;;  %1778 = vmatpush.msra.mxu2 %v13776_v23  ;;  %v13786_v26 = vld [vmem:[#allocation43_spill] sm:$0xff]  ;;  %v13787_v23 = vld [vmem:[#allocation52_spill] sm:$0xff] }
 0x29c   :  { %1709 = vmatpush.msrb.mxu1 %v13777_v51 }
 0x29d   :  { %1798 = vmatpush.msra.mxu3 %v13778_v31  ;;  %1779 = vmatpush.msra.mxu2 %v13779_v59  ;;  %v13789_v59 = vld [vmem:[#allocation18_spill] sm:$0xff] }
 0x29e   :  { %1710 = vmatpush.msrb.mxu1 %v13780_v37  ;;  %v123_v2 = vadd.f32 %v13789_v59, %v13788_v7  ;;  %v13790_v37 = vld [vmem:[#allocation73_spill] sm:$0xff] }
 0x29f   :  { %1799 = vmatpush.msra.mxu3 %v13781_v38  ;;  %1780 = vmatpush.msra.mxu2 %v13782_v19  ;;  %v164_v38 = vadd.f32 %v13791_v5, %v13790_v37  ;;  %v13794_v5 = vld [vmem:[#allocation8_spill] sm:$0xff] }
 0x2a1   :  { %1800 = vmatpush.msra.mxu3 %v13783_v36  ;;  %1781 = vmatpush.msra.mxu2 %v13784_v20 }
 0x2a3   :  { %1801 = vmatpush.msra.mxu3 %v13785_v35  ;;  %1782 = vmatpush.msra.mxu2 %v13786_v26 }
 0x2a5   :  { %1802 = vmatpush.msra.mxu3 %v13787_v23 }
 0x2e1   :  { %v1374_v37 = vpop.f32.mrf.mxu0 }
 0x2e6   :  { %v1334_v51 = vpop.f32.mrf.mxu2  ;;  %v1354_v31 = vpop.f32.mrf.mxu3 }
 0x2e7   :  { %v1335_v19 = vadd.f32 %v1334_v51, %v13792_v48  ;;  %v1355_v36 = vadd.f32 %v1354_v31, %v13793_v30  ;;  %v289_v51 = vadd.f32 %v13794_v5, %v13717_v45  ;;  %v13797_v5 = vld [vmem:[#allocation85_spill] sm:$0xff] }
 0x2e9   :  { %v1377_v39 = vadd.f32 %v1335_v19, %v123_v2  ;;  %v1397_v20 = vadd.f32 %v1355_v36, %v164_v38 }
 0x2eb   :  { %v5361_v42 = vmul.f32 -1.442695, %v1377_v39  ;;  %v5362_v35 = vmul.f32 -1.442695, %v1397_v20 }
 0x2ed   :  { %5581 = vpow2.f32 %v5361_v42 }
 0x2ee   :  { %5583 = vpow2.f32 %v5362_v35 }
 0x2f3   :  { %v5582_v26 = vpop.eup %5581 }
 0x2f4   :  { %v5584_v23 = vpop.eup %5583  ;;  %v1381_v50 = vadd.f32 1.0, %v5582_v26  ;;  %v13795_v26 = vld [vmem:[#allocation84_spill] sm:$0xff] }
 0x2f5   :  { %v1401_v13 = vadd.f32 1.0, %v5584_v23  ;;  %v13796_v23 = vld [vmem:[#allocation72_spill] sm:$0xff] }
 0x2f6   :  { %5585 = vrcp.f32 %v1381_v50  ;;  %v1393_v42 = vand.u32 2147483648, %v1381_v50  ;;  %v1391_v20 = vand.u32 2147483647, %v1381_v50  ;;  %v330_v30 = vadd.f32 %v13796_v23, %v13795_v26  ;;  %v13798_v23 = vld [vmem:[#allocation49_spill] sm:$0xff] }
 0x2f7   :  { %5587 = vrcp.f32 %v1401_v13  ;;  %vm1387_vm2 = vweird.f32 %v1381_v50  ;;  %v1413_v45 = vand.u32 2147483648, %v1401_v13  ;;  %vm1407_vm6 = vweird.f32 %v1401_v13 }
 0x2f8   :  { %vm1392_vm4 = vcmp.eq.f32.partialorder %v1391_v20, 8.507059e+37 }
 0x2fc   :  { %v5586_v59 = vpop.eup %5585  ;;  %v1447_v7 = vpop.f32.mrf.mxu1 }
 0x2fd   :  { %v5588_v21 = vpop.eup %5587  ;;  %v1383_v48 = vmul.f32 %v5586_v59, %v1381_v50  ;;  %v1448_v2 = vadd.f32 %v1447_v7, %v13719_v47  ;;  %vm1388_vm1 = vweird.f32 %v5586_v59  ;;  %v205_v47 = vadd.f32 %v13798_v23, %v7334_v25 }
 0x2fe   :  { %v1403_v31 = vmul.f32 %v5588_v21, %v1401_v13  ;;  %vm1389_vm3 = vmor %vm1387_vm2, %vm1388_vm1  ;;  %vm1408_vm5 = vweird.f32 %v5588_v21  ;;  %v1411_v50 = vand.u32 2147483647, %v1401_v13 }
 0x2ff   :  { %v1384_v39 = vsub.f32 1.0, %v1383_v48  ;;  %v1490_v38 = vadd.f32 %v1448_v2, %v289_v51  ;;  %v1394_v48 = vor.u32 1.1754944e-38, %v1393_v42  ;;  %v1375_v51 = vadd.f32 %v1374_v37, %v7328_v28  ;;  %vm1409_vm7 = vmor %vm1407_vm6, %vm1408_vm5 }
 0x300   :  { %v1404_v19 = vsub.f32 1.0, %v1403_v31  ;;  %vm1412_vm8 = vcmp.eq.f32.partialorder %v1411_v50, 8.507059e+37 }
 0x301   :  { %v1385_v36 = vmul.f32 %v5586_v59, %v1384_v39  ;;  %v5363_v35 = vmul.f32 -1.442695, %v1490_v38 }
 0x302   :  { %v1405_v9 = vmul.f32 %v5588_v21, %v1404_v19  ;;  %v1467_v58 = vpop.f32.mrf.mxu2 }
 0x303   :  { %v1386_v3 = vadd.f32 %v5586_v59, %v1385_v36  ;;  %5589 = vpow2.f32 %v5363_v35  ;;  %v1468_v7 = vadd.f32 %v1467_v58, %v13797_v5  ;;  %v1487_v23 = vpop.f32.mrf.mxu3 }
 0x304   :  { %v1406_v38 = vadd.f32 %v5588_v21, %v1405_v9 }
 0x305   :  { %v1390_v2 = vsel %vm1389_vm3, %v5586_v59, %v1386_v3  ;;  %v1510_v31 = vadd.f32 %v1468_v7, %v330_v30  ;;  %v1414_v3 = vor.u32 1.1754944e-38, %v1413_v45 }
 0x306   :  { %v1395_v39 = vsel %vm1392_vm4, %v1394_v48, %v1390_v2  ;;  %v1410_v42 = vsel %vm1409_vm7, %v5588_v21, %v1406_v38 }
 0x307   :  { %v1417_v19 = vmul.f32 %v1395_v39, %v1375_v51  ;;  %v5364_v36 = vmul.f32 -1.442695, %v1510_v31  ;;  %v1415_v30 = vsel %vm1412_vm8, %v1414_v3, %v1410_v42 }
 0x308   :  { %v1420_v59 = vsub.f32 1.0, %v1415_v30  ;;  %v1422_v2 = vmul.f32 %v1415_v30, %v8121_v14  ;;  %v13819_v30 = vld [vmem:[#allocation107_spill] sm:$0xff] }
 0x309   :  { %v5590_v35 = vpop.eup %5589  ;;  %v1418_v58 = vadd.f32 %v1417_v19, %v205_v47  ;;  %5591 = vpow2.f32 %v5364_v36 }
 0x30a   :  { %v1494_v37 = vadd.f32 1.0, %v5590_v35 }
 0x30b   :  { %5593 = vtanh.f32 %v1418_v58 }
 0x30c   :  { %5595 = vrcp.f32 %v1494_v37  ;;  %v1506_v21 = vand.u32 2147483648, %v1494_v37  ;;  %v1504_v39 = vand.u32 2147483647, %v1494_v37  ;;  %vm1500_vm10 = vweird.f32 %v1494_v37 }
 0x30e   :  { %v1507_v50 = vor.u32 1.1754944e-38, %v1506_v21  ;;  %vm1505_vm12 = vcmp.eq.f32.partialorder %v1504_v39, 8.507059e+37  ;;  %v13825_v21 = vld [vmem:[#allocation113_spill] sm:$0xff]  ;;  %v8359_v39 = vld [vmem:[%s12941_s3 + $0x140] sm:$0xff] }
 0x30f   :  { %v5592_v9 = vpop.eup %5591 }
 0x310   :  { %v1514_v20 = vadd.f32 1.0, %v5592_v9  ;;  %v13820_v9 = vld [vmem:[#allocation108_spill] sm:$0xff] }
 0x311   :  { %v5594_v7 = vpop.eup %5593 }
 0x312   :  { %v5596_v48 = vpop.eup %5595  ;;  %v1421_v51 = vmul.f32 %v5594_v7, %v1420_v59  ;;  %5597 = vrcp.f32 %v1514_v20  ;;  %vm1520_vm14 = vweird.f32 %v1514_v20  ;;  %v8324_v59 = vld [vmem:[%s12941_s3 + $0x168] sm:$0xff]  ;;  %v13822_v7 = vld [vmem:[#allocation110_spill] sm:$0xff] }
 0x313   :  { %v1496_v13 = vmul.f32 %v5596_v48, %v1494_v37  ;;  %vm1501_vm9 = vweird.f32 %v5596_v48 }
 0x314   :  { %v8256_v47 = vadd.f32 %v1422_v2, %v1421_v51  ;;  %vm1502_vm11 = vmor %vm1500_vm10, %vm1501_vm9  ;;  %v8333_v51 = vld [vmem:[%s12941_s3 + $0x170] sm:$0xff]  ;;  %v13824_v2 = vld [vmem:[#allocation112_spill] sm:$0xff] }
 0x315   :  { %v1497_v31 = vsub.f32 1.0, %v1496_v13  ;;  %v8340_v13 = vld [vmem:[%s12941_s3 + $0x150] sm:$0xff] }
 0x316   :  { %13799 = vst [vmem:[#allocation78_spill] sm:$0xff] %v8256_v47  ;;  %1559 = vmatmul.f32.vlgmr.msrb.gmra.mxu0 %v8256_v47  ;;  %1579 = vmatmul.f32.vlgmr.msra.gmra.mxu1 %v8256_v47 }
 0x317   :  { %v1498_v45 = vmul.f32 %v5596_v48, %v1497_v31  ;;  %1599 = vmatmul.f32.vlgmr.msrb.gmra.mxu2 %v8256_v47  ;;  %1807 = vmatpush.msrb.mxu0 %v7660_v56  ;;  %v1488_v56 = vadd.f32 %v1487_v23, %v7364_v60  ;;  %v8346_v31 = vld [vmem:[%s12941_s3 + $0x158] sm:$0xff]  ;;  %v8366_v23 = vld [vmem:[%s12941_s3 + $0x120] sm:$0xff] }
 0x318   :  { %v5598_v38 = vpop.eup %5597  ;;  %1879 = vmatpush.msra.mxu1 %v7668_v62  ;;  %1899 = vmatpush.msrb.mxu2 %v7674_v29  ;;  %v13800_v62 = vld [vmem:[#allocation86_spill] sm:$0xff] }
 0x319   :  { %v1516_v19 = vmul.f32 %v5598_v38, %v1514_v20  ;;  %v1499_v36 = vadd.f32 %v5596_v48, %v1498_v45  ;;  %1808 = vmatpush.msrb.mxu0 %v7680_v33  ;;  %v371_v29 = vadd.f32 %v13800_v62, %v7375_v55  ;;  %vm1521_vm13 = vweird.f32 %v5598_v38  ;;  %v8353_v45 = vld [vmem:[%s12941_s3 + $0x138] sm:$0xff] }
 0x31a   :  { %1880 = vmatpush.msra.mxu1 %v7687_v53  ;;  %1900 = vmatpush.msrb.mxu2 %v7693_v24  ;;  %v1526_v53 = vand.u32 2147483648, %v1514_v20  ;;  %v1524_v24 = vand.u32 2147483647, %v1514_v20  ;;  %vm1522_vm15 = vmor %vm1520_vm14, %vm1521_vm13  ;;  %v13821_v20 = vld [vmem:[#allocation109_spill] sm:$0xff]  ;;  %v8398_v62 = vld [vmem:[%s12941_s3 + $0xf8] sm:$0xff] }
 0x31b   :  { %v1517_v35 = vsub.f32 1.0, %v1516_v19  ;;  %v1503_v58 = vsel %vm1502_vm11, %v5596_v48, %v1499_v36  ;;  %1809 = vmatpush.msrb.mxu0 %v7700_v12  ;;  %v13823_v48 = vld [vmem:[#allocation111_spill] sm:$0xff]  ;;  %v8372_v19 = vld [vmem:[%s12941_s3 + $0x128] sm:$0xff] }
 0x31c   :  { %v1508_v42 = vsel %vm1505_vm12, %v1507_v50, %v1503_v58  ;;  %1881 = vmatpush.msra.mxu1 %v7708_v52  ;;  %1901 = vmatpush.msrb.mxu2 %v7714_v6  ;;  %v1527_v52 = vor.u32 1.1754944e-38, %v1526_v53  ;;  %vm1525_vm0 = vcmp.eq.f32.partialorder %v1524_v24, 8.507059e+37  ;;  %v13827_v36 = vld [vmem:[#allocation115_spill] sm:$0xff]  ;;  %v8379_v50 = vld [vmem:[%s12941_s3 + $0x108] sm:$0xff]  ;;  %v8392_v58 = vld [vmem:[%s12941_s3 + $0xf0] sm:$0xff] }
 0x31d   :  { %v1518_v33 = vmul.f32 %v5598_v38, %v1517_v35  ;;  %v1530_v37 = vmul.f32 %v1508_v42, %v1488_v56  ;;  %1810 = vmatpush.msrb.mxu0 %v7723_v41  ;;  %v8385_v35 = vld [vmem:[%s12941_s3 + $0x110] sm:$0xff]  ;;  %v13828_v56 = vld [vmem:[#allocation116_spill] sm:$0xff]  ;;  %v8405_v42 = vld [vmem:[%s12941_s3 + $0xd8] sm:$0xff] }
 0x31e   :  { %1882 = vmatpush.msra.mxu1 %v7732_v32  ;;  %1902 = vmatpush.msrb.mxu2 %v7738_v40  ;;  %v13830_v53 = vld [vmem:[#allocation118_spill] sm:$0xff]  ;;  %v8424_v24 = vld [vmem:[%s12941_s3 + $0xc8] sm:$0xff] }
 0x31f   :  { %v1519_v12 = vadd.f32 %v5598_v38, %v1518_v33  ;;  %v1531_v3 = vadd.f32 %v1530_v37, %v371_v29  ;;  %1811 = vmatpush.msrb.mxu0 %v7750_v17  ;;  %v13829_v29 = vld [vmem:[#allocation117_spill] sm:$0xff]  ;;  %v8411_v33 = vld [vmem:[%s12941_s3 + $0xe0] sm:$0xff] }
 0x320   :  { %1883 = vmatpush.msra.mxu1 %v7759_v18  ;;  %1903 = vmatpush.msrb.mxu2 %v7765_v46  ;;  %v8418_v37 = vld [vmem:[%s12941_s3 + $0xc0] sm:$0xff] }
 0x321   :  { %v1523_v6 = vsel %vm1522_vm15, %v5598_v38, %v1519_v12  ;;  %5599 = vtanh.f32 %v1531_v3  ;;  %1812 = vmatpush.msrb.mxu0 %v7771_v54  ;;  %v13802_v54 = vld [vmem:[#allocation90_spill] sm:$0xff]  ;;  %v13831_v12 = vld [vmem:[#allocation119_spill] sm:$0xff]  ;;  %v8431_v3 = vld [vmem:[%s12941_s3 + $0xa8] sm:$0xff] }
 0x322   :  { %1884 = vmatpush.msra.mxu1 %v7777_v57  ;;  %1904 = vmatpush.msrb.mxu2 %v7783_v16  ;;  %v1528_v41 = vsel %vm1525_vm0, %v1527_v52, %v1523_v6  ;;  %v13804_v57 = vld [vmem:[#allocation92_spill] sm:$0xff]  ;;  %v13805_v16 = vld [vmem:[#allocation93_spill] sm:$0xff]  ;;  %v13826_v38 = vld [vmem:[#allocation114_spill] sm:$0xff] }
 0x323   :  { %1813 = vmatpush.msrb.mxu0 %v13723_v10  ;;  %v1533_v32 = vsub.f32 1.0, %v1528_v41  ;;  %v1535_v18 = vmul.f32 %v1528_v41, %v8176_v0  ;;  %v13810_v10 = vld [vmem:[#allocation98_spill] sm:$0xff]  ;;  %v13832_v6 = vld [vmem:[#allocation120_spill] sm:$0xff] }
 0x324   :  { %1885 = vmatpush.msra.mxu1 %v13724_v44  ;;  %1905 = vmatpush.msrb.mxu2 %v13725_v1  ;;  %v13811_v44 = vld [vmem:[#allocation99_spill] sm:$0xff]  ;;  %v13812_v1 = vld [vmem:[#allocation100_spill] sm:$0xff]  ;;  %v8437_v52 = vld [vmem:[%s12941_s3 + $0xb0] sm:$0xff] }
 0x325   :  { %1814 = vmatpush.msrb.mxu0 %v13726_v22  ;;  %v13813_v22 = vld [vmem:[#allocation101_spill] sm:$0xff] }
 0x326   :  { %1886 = vmatpush.msra.mxu1 %v13727_v4  ;;  %1906 = vmatpush.msrb.mxu2 %v13728_v8  ;;  %v13814_v4 = vld [vmem:[#allocation102_spill] sm:$0xff]  ;;  %v13815_v8 = vld [vmem:[#allocation103_spill] sm:$0xff] }
 0x327   :  { %v5600_v40 = vpop.eup %5599  ;;  %1815 = vmatpush.msrb.mxu0 %v7825_v49  ;;  %v13806_v49 = vld [vmem:[#allocation94_spill] sm:$0xff] }
 0x328   :  { %v1534_v17 = vmul.f32 %v5600_v40, %v1533_v32  ;;  %1887 = vmatpush.msra.mxu1 %v7832_v63  ;;  %1907 = vmatpush.msrb.mxu2 %v7838_v43  ;;  %v13803_v43 = vld [vmem:[#allocation91_spill] sm:$0xff]  ;;  %v13808_v63 = vld [vmem:[#allocation96_spill] sm:$0xff]  ;;  %v8444_v41 = vld [vmem:[%s12941_s3 + $0x90] sm:$0xff] }
 0x329   :  { %1816 = vmatpush.msrb.mxu0 %v13729_v11  ;;  %v13816_v11 = vld [vmem:[#allocation104_spill] sm:$0xff]  ;;  %v8450_v32 = vld [vmem:[%s12941_s3 + $0x98] sm:$0xff]  ;;  %v13833_v40 = vld [vmem:[#allocation121_spill] sm:$0xff] }
 0x32a   :  { %v8293_v46 = vadd.f32 %v1535_v18, %v1534_v17  ;;  %1888 = vmatpush.msra.mxu1 %v7852_v34  ;;  %1908 = vmatpush.msrb.mxu2 %v7858_v27  ;;  %v13807_v27 = vld [vmem:[#allocation95_spill] sm:$0xff]  ;;  %v13809_v34 = vld [vmem:[#allocation97_spill] sm:$0xff] }
 0x32b   :  { %1817 = vmatpush.msrb.mxu0 %v13730_v15  ;;  %v13817_v15 = vld [vmem:[#allocation105_spill] sm:$0xff]  ;;  %v8457_v17 = vld [vmem:[%s12941_s3 + $0x78] sm:$0xff]  ;;  %v8463_v18 = vld [vmem:[%s12941_s3 + $0x80] sm:$0xff] }
 0x32c   :  { %13801 = vst [vmem:[#allocation63_spill] sm:$0xff] %v8293_v46  ;;  %1671 = vmatmul.f32.vlgmr.msrb.gmra.mxu3 %v8293_v46  ;;  %1691 = vmatmul.f32.vlgmr.msra.gmra.mxu0 %v8293_v46 }
 0x32d   :  { %1711 = vmatmul.f32.vlgmr.msrb.gmra.mxu1 %v8293_v46  ;;  %1818 = vmatpush.msrb.mxu0 %v13733_v61  ;;  %v13818_v61 = vld [vmem:[#allocation106_spill] sm:$0xff] }
 0x32e   :  { %1919 = vmatpush.msrb.mxu3 %v13802_v54  ;;  %1889 = vmatpush.msra.mxu1 %v13803_v43  ;;  %v8469_v54 = vld [vmem:[%s12941_s3 + $0x60] sm:$0xff]  ;;  %v8475_v43 = vld [vmem:[%s12941_s3 + $0x68] sm:$0xff] }
 0x32f   :  { %1819 = vmatpush.msrb.mxu0 %v13804_v57  ;;  %1909 = vmatpush.msrb.mxu2 %v13805_v16  ;;  %v8481_v57 = vld [vmem:[%s12941_s3 + $0x48] sm:$0xff]  ;;  %v8487_v16 = vld [vmem:[%s12941_s3 + $0x50] sm:$0xff] }
 0x330   :  { %1920 = vmatpush.msrb.mxu3 %v13806_v49  ;;  %1890 = vmatpush.msra.mxu1 %v13807_v27  ;;  %v8493_v49 = vld [vmem:[%s12941_s3 + $0x30] sm:$0xff]  ;;  %v8499_v27 = vld [vmem:[%s12941_s3 + $0x38] sm:$0xff] }
 0x331   :  { %1820 = vmatpush.msrb.mxu0 %v13808_v63  ;;  %1910 = vmatpush.msrb.mxu2 %v13809_v34  ;;  %v8505_v63 = vld [vmem:[%s12941_s3 + $0x18] sm:$0xff]  ;;  %v8511_v34 = vld [vmem:[%s12941_s3 + $0x20] sm:$0xff] }
 0x332   :  { %1921 = vmatpush.msrb.mxu3 %v13810_v10  ;;  %1891 = vmatpush.msra.mxu1 %v13811_v44  ;;  %v8517_v10 = vld [vmem:[%s12941_s3] sm:$0xff]  ;;  %v8523_v44 = vld [vmem:[%s12941_s3 + $0x8] sm:$0xff] }
 0x333   :  { %1821 = vmatpush.msrb.mxu0 %v13812_v1  ;;  %1911 = vmatpush.msrb.mxu2 %v13813_v22 }
 0x334   :  { %1922 = vmatpush.msrb.mxu3 %v13814_v4  ;;  %1892 = vmatpush.msra.mxu1 %v13815_v8  ;;  %v13834_v4 = vld [vmem:[#allocation76_spill] sm:$0xff]  ;;  %v13835_v8 = vld [vmem:[#allocation23_spill] sm:$0xff] }
 0x335   :  { %1822 = vmatpush.msrb.mxu0 %v13816_v11  ;;  %1912 = vmatpush.msrb.mxu2 %v13817_v15  ;;  %v126_v11 = vadd.f32 %v13835_v8, %v13834_v4  ;;  %v13836_v15 = vld [vmem:[#allocation73_spill] sm:$0xff] }
 0x336   :  { %1923 = vmatpush.msrb.mxu3 %v13818_v61  ;;  %1893 = vmatpush.msra.mxu1 %v13819_v30  ;;  %v13837_v61 = vld [vmem:[#allocation53_spill] sm:$0xff] }
 0x337   :  { %1913 = vmatpush.msrb.mxu2 %v13820_v9  ;;  %1991 = vmatpush.msra.mxu0 %v8324_v59  ;;  %v167_v30 = vadd.f32 %v13837_v61, %v13836_v15  ;;  %v13838_v9 = vld [vmem:[#allocation74_spill] sm:$0xff]  ;;  %v13840_v61 = vld [vmem:[#allocation69_spill] sm:$0xff] }
 0x338   :  { %1924 = vmatpush.msrb.mxu3 %v13821_v20  ;;  %1894 = vmatpush.msra.mxu1 %v13822_v7  ;;  %v13839_v7 = vld [vmem:[#allocation75_spill] sm:$0xff] }
 0x339   :  { %1914 = vmatpush.msrb.mxu2 %v13823_v48  ;;  %1992 = vmatpush.msra.mxu0 %v8340_v13 }
 0x33a   :  { %2011 = vmatpush.msrb.mxu1 %v8333_v51  ;;  %1925 = vmatpush.msrb.mxu3 %v13824_v2 }
 0x33b   :  { %1993 = vmatpush.msra.mxu0 %v8353_v45 }
 0x33c   :  { %2012 = vmatpush.msrb.mxu1 %v8346_v31  ;;  %1926 = vmatpush.msrb.mxu3 %v13825_v21 }
 0x33d   :  { %1994 = vmatpush.msra.mxu0 %v8366_v23 }
 0x33e   :  { %2013 = vmatpush.msrb.mxu1 %v8359_v39  ;;  %1927 = vmatpush.msrb.mxu3 %v13826_v38 }
 0x33f   :  { %1995 = vmatpush.msra.mxu0 %v8379_v50 }
 0x340   :  { %2014 = vmatpush.msrb.mxu1 %v8372_v19  ;;  %1928 = vmatpush.msrb.mxu3 %v13827_v36 }
 0x341   :  { %1996 = vmatpush.msra.mxu0 %v8392_v58 }
 0x342   :  { %2015 = vmatpush.msrb.mxu1 %v8385_v35  ;;  %1929 = vmatpush.msrb.mxu3 %v13828_v56 }
 0x343   :  { %1997 = vmatpush.msra.mxu0 %v8405_v42 }
 0x344   :  { %2016 = vmatpush.msrb.mxu1 %v8398_v62  ;;  %1930 = vmatpush.msrb.mxu3 %v13829_v29 }
 0x345   :  { %1998 = vmatpush.msra.mxu0 %v8418_v37 }
 0x346   :  { %2017 = vmatpush.msrb.mxu1 %v8411_v33  ;;  %1931 = vmatpush.msrb.mxu3 %v13830_v53 }
 0x347   :  { %1999 = vmatpush.msra.mxu0 %v8431_v3 }
 0x348   :  { %2018 = vmatpush.msrb.mxu1 %v8424_v24  ;;  %1932 = vmatpush.msrb.mxu3 %v13831_v12 }
 0x349   :  { %2000 = vmatpush.msra.mxu0 %v8444_v41 }
 0x34a   :  { %2019 = vmatpush.msrb.mxu1 %v8437_v52  ;;  %1933 = vmatpush.msrb.mxu3 %v13832_v6 }
 0x34b   :  { %2001 = vmatpush.msra.mxu0 %v8457_v17 }
 0x34c   :  { %2020 = vmatpush.msrb.mxu1 %v8450_v32  ;;  %1934 = vmatpush.msrb.mxu3 %v13833_v40 }
 0x34d   :  { %2002 = vmatpush.msra.mxu0 %v8469_v54 }
 0x34e   :  { %2021 = vmatpush.msrb.mxu1 %v8463_v18 }
 0x34f   :  { %2003 = vmatpush.msra.mxu0 %v8481_v57 }
 0x350   :  { %2022 = vmatpush.msrb.mxu1 %v8475_v43 }
 0x351   :  { %2004 = vmatpush.msra.mxu0 %v8493_v49 }
 0x352   :  { %2023 = vmatpush.msrb.mxu1 %v8487_v16 }
 0x353   :  { %2005 = vmatpush.msra.mxu0 %v8505_v63 }
 0x354   :  { %2024 = vmatpush.msrb.mxu1 %v8499_v27 }
 0x355   :  { %2006 = vmatpush.msra.mxu0 %v8517_v10 }
 0x356   :  { %2025 = vmatpush.msrb.mxu1 %v8511_v34 }
 0x358   :  { %2026 = vmatpush.msrb.mxu1 %v8523_v44 }
 0x393   :  { %v1560_v1 = vpop.f32.mrf.mxu0  ;;  %v1580_v22 = vpop.f32.mrf.mxu1 }
 0x394   :  { %v1561_v20 = vadd.f32 %v1560_v1, %v13838_v9  ;;  %v1581_v48 = vadd.f32 %v1580_v22, %v13839_v7  ;;  %v327_v1 = vadd.f32 %v13840_v61, %v13795_v26  ;;  %v13843_v61 = vld [vmem:[#allocation80_spill] sm:$0xff] }
 0x396   :  { %v1603_v2 = vadd.f32 %v1561_v20, %v126_v11  ;;  %v1623_v21 = vadd.f32 %v1581_v48, %v167_v30 }
 0x398   :  { %v5365_v38 = vmul.f32 -1.442695, %v1603_v2  ;;  %v5366_v36 = vmul.f32 -1.442695, %v1623_v21 }
 0x39a   :  { %5601 = vpow2.f32 %v5365_v38  ;;  %v1600_v9 = vpop.f32.mrf.mxu2 }
 0x39b   :  { %5603 = vpow2.f32 %v5366_v36 }
 0x3a0   :  { %v5602_v56 = vpop.eup %5601 }
 0x3a1   :  { %v5604_v29 = vpop.eup %5603  ;;  %v1607_v53 = vadd.f32 1.0, %v5602_v56  ;;  %v13841_v56 = vld [vmem:[#allocation79_spill] sm:$0xff] }
 0x3a2   :  { %v1627_v12 = vadd.f32 1.0, %v5604_v29  ;;  %v13842_v29 = vld [vmem:[#allocation31_spill] sm:$0xff] }
 0x3a3   :  { %5605 = vrcp.f32 %v1607_v53  ;;  %v1619_v2 = vand.u32 2147483648, %v1607_v53  ;;  %v1617_v38 = vand.u32 2147483647, %v1607_v53  ;;  %v286_v14 = vadd.f32 %v13842_v29, %v13841_v56  ;;  %v13844_v29 = vld [vmem:[#allocation40_spill] sm:$0xff] }
 0x3a4   :  { %5607 = vrcp.f32 %v1627_v12  ;;  %vm1613_vm2 = vweird.f32 %v1607_v53  ;;  %vm1633_vm6 = vweird.f32 %v1627_v12 }
 0x3a5   :  { %vm1618_vm4 = vcmp.eq.f32.partialorder %v1617_v38, 8.507059e+37 }
 0x3a9   :  { %v5606_v6 = vpop.eup %5605  ;;  %v1692_v40 = vpop.f32.mrf.mxu0 }
 0x3aa   :  { %v5608_v8 = vpop.eup %5607  ;;  %v1609_v0 = vmul.f32 %v5606_v6, %v1607_v53  ;;  %v1693_v22 = vadd.f32 %v1692_v40, %v13797_v5  ;;  %vm1614_vm1 = vweird.f32 %v5606_v6  ;;  %v1639_v5 = vand.u32 2147483648, %v1627_v12 }
 0x3ab   :  { %v1629_v11 = vmul.f32 %v5608_v8, %v1627_v12  ;;  %vm1615_vm3 = vmor %vm1613_vm2, %vm1614_vm1  ;;  %vm1634_vm5 = vweird.f32 %v5608_v8  ;;  %v1637_v53 = vand.u32 2147483647, %v1627_v12 }
 0x3ac   :  { %v1610_v30 = vsub.f32 1.0, %v1609_v0  ;;  %v1735_v20 = vadd.f32 %v1693_v22, %v327_v1  ;;  %v1620_v0 = vor.u32 1.1754944e-38, %v1619_v2  ;;  %v1601_v1 = vadd.f32 %v1600_v9, %v7328_v28  ;;  %vm1635_vm7 = vmor %vm1633_vm6, %vm1634_vm5 }
 0x3ad   :  { %v1630_v48 = vsub.f32 1.0, %v1629_v11  ;;  %vm1638_vm8 = vcmp.eq.f32.partialorder %v1637_v53, 8.507059e+37  ;;  %v8587_v53 = vld [vmem:[%s12941_s3 + $0x2d8] sm:$0xff] }
 0x3ae   :  { %v1611_v21 = vmul.f32 %v5606_v6, %v1610_v30  ;;  %v5368_v36 = vmul.f32 -1.442695, %v1735_v20 }
 0x3af   :  { %v1631_v7 = vmul.f32 %v5608_v8, %v1630_v48  ;;  %v1672_v15 = vpop.f32.mrf.mxu3  ;;  %v208_v48 = vadd.f32 %v13844_v29, %v7334_v25  ;;  %v8575_v29 = vld [vmem:[%s12941_s3 + $0x160] sm:$0xff] }
 0x3b0   :  { %v1612_v4 = vadd.f32 %v5606_v6, %v1611_v21  ;;  %5609 = vpow2.f32 %v5368_v36  ;;  %v1673_v40 = vadd.f32 %v1672_v15, %v13843_v61 }
 0x3b1   :  { %v1632_v20 = vadd.f32 %v5608_v8, %v1631_v7 }
 0x3b2   :  { %v1616_v22 = vsel %vm1615_vm3, %v5606_v6, %v1612_v4  ;;  %v1715_v11 = vadd.f32 %v1673_v40, %v286_v14  ;;  %v1640_v4 = vor.u32 1.1754944e-38, %v1639_v5 }
 0x3b3   :  { %v1621_v30 = vsel %vm1618_vm4, %v1620_v0, %v1616_v22  ;;  %v1636_v2 = vsel %vm1635_vm7, %v5608_v8, %v1632_v20  ;;  %v8557_v8 = vld [vmem:[%s12941_s3 + $0x178] sm:$0xff] }
 0x3b4   :  { %v1643_v26 = vmul.f32 %v1621_v30, %v1601_v1  ;;  %v5367_v21 = vmul.f32 -1.442695, %v1715_v11  ;;  %v1641_v14 = vsel %vm1638_vm8, %v1640_v4, %v1636_v2  ;;  %v8563_v11 = vld [vmem:[%s12941_s3 + $0x2e8] sm:$0xff]  ;;  %v8569_v30 = vld [vmem:[%s12941_s3 + $0x2f0] sm:$0xff]  ;;  %v8599_v4 = vld [vmem:[%s12941_s3 + $0x2b8] sm:$0xff] }
 0x3b5   :  { %v1646_v6 = vsub.f32 1.0, %v1641_v14  ;;  %v1648_v12 = vmul.f32 %v1641_v14, %v8256_v47  ;;  %v8605_v14 = vld [vmem:[%s12941_s3 + $0x2c0] sm:$0xff] }
 0x3b6   :  { %v5610_v36 = vpop.eup %5609  ;;  %v1644_v15 = vadd.f32 %v1643_v26, %v208_v48  ;;  %5611 = vpow2.f32 %v5367_v21  ;;  %v8581_v21 = vld [vmem:[%s12941_s3 + $0x2d0] sm:$0xff] }
 0x3b7   :  { %v8541_v9 = vadd.f32 1.0, %v5610_v36 }
 0x3b8   :  { %5613 = vtanh.f32 %v1644_v15  ;;  %v8593_v15 = vld [vmem:[%s12941_s3 + $0x148] sm:$0xff] }
 0x3b9   :  { %5615 = vrcp.f32 %v8541_v9  ;;  %vm1745_vm14 = vweird.f32 %v8541_v9 }
 0x3bc   :  { %v5612_v7 = vpop.eup %5611 }
 0x3bd   :  { %v1719_v38 = vadd.f32 1.0, %v5612_v7 }
 0x3be   :  { %v5614_v40 = vpop.eup %5613 }
 0x3bf   :  { %v1647_v0 = vmul.f32 %v5614_v40, %v1646_v6  ;;  %5617 = vrcp.f32 %v1719_v38  ;;  %v8545_v1 = vpop.eup %5615  ;;  %v1731_v2 = vand.u32 2147483648, %v1719_v38  ;;  %v1729_v6 = vand.u32 2147483647, %v1719_v38  ;;  %v8611_v40 = vld [vmem:[%s12941_s3 + $0x130] sm:$0xff] }
 0x3c0   :  { %v1741_v5 = vmul.f32 %v8545_v1, %v8541_v9  ;;  %vm1725_vm10 = vweird.f32 %v1719_v38  ;;  %vm1746_vm13 = vweird.f32 %v8545_v1 }
 0x3c1   :  { %v8547_v26 = vadd.f32 %v1648_v12, %v1647_v0  ;;  %v1712_v12 = vpop.f32.mrf.mxu1  ;;  %v1732_v47 = vor.u32 1.1754944e-38, %v1731_v2  ;;  %vm1730_vm12 = vcmp.eq.f32.partialorder %v1729_v6, 8.507059e+37  ;;  %v8649_v2 = vld [vmem:[%s12941_s3 + $0x100] sm:$0xff]  ;;  %vm8691_vm15 = vmor %vm1745_vm14, %vm1746_vm13 }
 0x3c2   :  { %v1742_v48 = vsub.f32 1.0, %v1741_v5  ;;  %v8618_v5 = vld [vmem:[%s12941_s3 + $0x2a0] sm:$0xff] }
 0x3c3   :  { %1783 = vmatmul.f32.vlgmr.msra.gmra.mxu2 %v8547_v26  ;;  %1803 = vmatmul.f32.vlgmr.msra.gmra.mxu3 %v8547_v26  ;;  %13845 = vst [vmem:[#allocation21_spill] sm:$0xff] %v8618_v5  ;;  %v13851_v6 = vld [vmem:[#allocation83_spill] sm:$0xff] }
 0x3c4   :  { %1823 = vmatmul.f32.vlgmr.msrb.gmra.mxu0 %v8547_v26  ;;  %2031 = vmatpush.msra.mxu2 %v8557_v8  ;;  %v1743_v0 = vmul.f32 %v8545_v1, %v1742_v48  ;;  %v8630_v48 = vld [vmem:[%s12941_s3 + $0x118] sm:$0xff] }
 0x3c5   :  { %v5618_v22 = vpop.eup %5617  ;;  %2103 = vmatpush.msra.mxu3 %v8563_v11  ;;  %2123 = vmatpush.msrb.mxu0 %v8569_v30  ;;  %13847 = vst [vmem:[#allocation58_spill] sm:$0xff] %v8630_v48 }
 0x3c6   :  { %v1721_v20 = vmul.f32 %v5618_v22, %v1719_v38  ;;  %2032 = vmatpush.msra.mxu2 %v8575_v29  ;;  %vm1726_vm9 = vweird.f32 %v5618_v22  ;;  %v8642_v38 = vld [vmem:[%s12941_s3 + $0x290] sm:$0xff] }
 0x3c7   :  { %2104 = vmatpush.msra.mxu3 %v8581_v21  ;;  %2124 = vmatpush.msrb.mxu0 %v8587_v53  ;;  %vm1727_vm11 = vmor %vm1725_vm10, %vm1726_vm9  ;;  %13849 = vst [vmem:[#allocation61_spill] sm:$0xff] %v8642_v38 }
 0x3c8   :  { %v1722_v36 = vsub.f32 1.0, %v1721_v20  ;;  %2033 = vmatpush.msra.mxu2 %v8593_v15  ;;  %v8624_v20 = vld [vmem:[%s12941_s3 + $0x2a8] sm:$0xff] }
 0x3c9   :  { %2105 = vmatpush.msra.mxu3 %v8599_v4  ;;  %2125 = vmatpush.msrb.mxu0 %v8605_v14  ;;  %13846 = vst [vmem:[#allocation87_spill] sm:$0xff] %v8624_v20 }
 0x3ca   :  { %v1723_v7 = vmul.f32 %v5618_v22, %v1722_v36  ;;  %2034 = vmatpush.msra.mxu2 %v8611_v40 }
 0x3cb   :  { %2106 = vmatpush.msra.mxu3 %v8618_v5  ;;  %2126 = vmatpush.msrb.mxu0 %v8624_v20  ;;  %v8636_v5 = vld [vmem:[%s12941_s3 + $0x288] sm:$0xff] }
 0x3cc   :  { %v1724_v36 = vadd.f32 %v5618_v22, %v1723_v7  ;;  %2035 = vmatpush.msra.mxu2 %v8630_v48  ;;  %13848 = vst [vmem:[#allocation59_spill] sm:$0xff] %v8636_v5  ;;  %v1713_v7 = vadd.f32 %v1712_v12, %v7364_v60  ;;  %v1751_v12 = vand.u32 2147483648, %v8541_v9 }
 0x3cd   :  { %2107 = vmatpush.msra.mxu3 %v8636_v5  ;;  %2127 = vmatpush.msrb.mxu0 %v8642_v38  ;;  %v1744_v5 = vadd.f32 %v8545_v1, %v1743_v0  ;;  %v8657_v38 = vld [vmem:[%s12941_s3 + $0x270] sm:$0xff]  ;;  %v368_v0 = vadd.f32 %v13851_v6, %v7375_v55 }
 0x3ce   :  { %v1728_v20 = vsel %vm1727_vm11, %v5618_v22, %v1724_v36  ;;  %2036 = vmatpush.msra.mxu2 %v8649_v2  ;;  %13850 = vst [vmem:[#allocation62_spill] sm:$0xff] %v8657_v38  ;;  %v8663_v22 = vld [vmem:[%s12941_s3 + $0x278] sm:$0xff]  ;;  %v1749_v36 = vand.u32 2147483647, %v8541_v9  ;;  %v8698_v6 = vld [vmem:[%s12941_s3 + $0xd0] sm:$0xff] }
 0x3cf   :  { %v1733_v48 = vsel %vm1730_vm12, %v1732_v47, %v1728_v20  ;;  %2108 = vmatpush.msra.mxu3 %v8657_v38  ;;  %2128 = vmatpush.msrb.mxu0 %v8663_v22  ;;  %v8672_v20 = vld [vmem:[%s12941_s3 + $0xe8] sm:$0xff]  ;;  %v8680_v38 = vld [vmem:[%s12941_s3 + $0x258] sm:$0xff] }
 0x3d0   :  { %v1755_v47 = vmul.f32 %v1733_v48, %v1713_v7  ;;  %2037 = vmatpush.msra.mxu2 %v8672_v20  ;;  %13852 = vst [vmem:[#allocation10_spill] sm:$0xff] %v8680_v38  ;;  %v8686_v48 = vld [vmem:[%s12941_s3 + $0x260] sm:$0xff]  ;;  %vm1750_vm0 = vcmp.eq.f32.partialorder %v1749_v36, 8.507059e+37  ;;  %v8743_v36 = vld [vmem:[%s12941_s3 + $0x210] sm:$0xff] }
 0x3d1   :  { %2109 = vmatpush.msra.mxu3 %v8680_v38  ;;  %13853 = vst [vmem:[#allocation12_spill] sm:$0xff] %v8686_v48  ;;  %2129 = vmatpush.msrb.mxu0 %v8686_v48  ;;  %v1748_v38 = vsel %vm8691_vm15, %v8545_v1, %v1744_v5  ;;  %v8707_v48 = vld [vmem:[%s12941_s3 + $0x240] sm:$0xff]  ;;  %v8719_v1 = vld [vmem:[%s12941_s3 + $0xb8] sm:$0xff]  ;;  %v8725_v5 = vld [vmem:[%s12941_s3 + $0x228] sm:$0xff] }
 0x3d2   :  { %v1756_v9 = vadd.f32 %v1755_v47, %v368_v0  ;;  %2038 = vmatpush.msra.mxu2 %v8698_v6  ;;  %v8713_v0 = vld [vmem:[%s12941_s3 + $0x248] sm:$0xff]  ;;  %v1752_v47 = vor.u32 1.1754944e-38, %v1751_v12  ;;  %13856 = vst [vmem:[#allocation67_spill] sm:$0xff] %v8719_v1  ;;  %v8731_v12 = vld [vmem:[%s12941_s3 + $0x230] sm:$0xff] }
 0x3d3   :  { %2110 = vmatpush.msra.mxu3 %v8707_v48  ;;  %2130 = vmatpush.msrb.mxu0 %v8713_v0  ;;  %13857 = vst [vmem:[#allocation13_spill] sm:$0xff] %v8725_v5 }
 0x3d4   :  { %5619 = vtanh.f32 %v1756_v9  ;;  %2039 = vmatpush.msra.mxu2 %v8719_v1  ;;  %13858 = vst [vmem:[#allocation89_spill] sm:$0xff] %v8731_v12  ;;  %v1753_v7 = vsel %vm1750_vm0, %v1752_v47, %v1748_v38  ;;  %v8737_v9 = vld [vmem:[%s12941_s3 + $0xa0] sm:$0xff]  ;;  %v8755_v38 = vld [vmem:[%s12941_s3 + $0x88] sm:$0xff] }
 0x3d5   :  { %2111 = vmatpush.msra.mxu3 %v8725_v5  ;;  %2131 = vmatpush.msrb.mxu0 %v8731_v12  ;;  %13859 = vst [vmem:[#allocation20_spill] sm:$0xff] %v8737_v9  ;;  %v8749_v5 = vld [vmem:[%s12941_s3 + $0x218] sm:$0xff]  ;;  %v1758_v47 = vsub.f32 1.0, %v1753_v7  ;;  %v1760_v12 = vmul.f32 %v1753_v7, %v8293_v46  ;;  %v8800_v7 = vld [vmem:[%s12941_s3 + $0x1c8] sm:$0xff]  ;;  %v8812_v46 = vld [vmem:[%s12941_s3 + $0x40] sm:$0xff] }
 0x3d6   :  { %2040 = vmatpush.msra.mxu2 %v8737_v9  ;;  %13860 = vst [vmem:[#allocation30_spill] sm:$0xff] %v8743_v36  ;;  %v8761_v9 = vld [vmem:[%s12941_s3 + $0x1f8] sm:$0xff] }
 0x3d7   :  { %2112 = vmatpush.msra.mxu3 %v8743_v36  ;;  %13861 = vst [vmem:[#allocation28_spill] sm:$0xff] %v8749_v5  ;;  %2132 = vmatpush.msrb.mxu0 %v8749_v5  ;;  %v8767_v36 = vld [vmem:[%s12941_s3 + $0x200] sm:$0xff] }
 0x3d8   :  { %13862 = vst [vmem:[#allocation36_spill] sm:$0xff] %v8755_v38  ;;  %2041 = vmatpush.msra.mxu2 %v8755_v38  ;;  %v8773_v38 = vld [vmem:[%s12941_s3 + $0x70] sm:$0xff] }
 0x3d9   :  { %13863 = vst [vmem:[#allocation34_spill] sm:$0xff] %v8761_v9  ;;  %2113 = vmatpush.msra.mxu3 %v8761_v9  ;;  %2133 = vmatpush.msrb.mxu0 %v8767_v36  ;;  %v8780_v9 = vld [vmem:[%s12941_s3 + $0x1e0] sm:$0xff] }
 0x3da   :  { %13864 = vst [vmem:[#allocation38_spill] sm:$0xff] %v8767_v36  ;;  %v5620_v5 = vpop.eup %5619  ;;  %2042 = vmatpush.msra.mxu2 %v8773_v38  ;;  %v8786_v36 = vld [vmem:[%s12941_s3 + $0x1e8] sm:$0xff] }
 0x3db   :  { %13865 = vst [vmem:[#allocation35_spill] sm:$0xff] %v8773_v38  ;;  %v1759_v1 = vmul.f32 %v5620_v5, %v1758_v47  ;;  %2114 = vmatpush.msra.mxu3 %v8780_v9  ;;  %2134 = vmatpush.msrb.mxu0 %v8786_v36  ;;  %v8792_v38 = vld [vmem:[%s12941_s3 + $0x58] sm:$0xff]  ;;  %v8806_v47 = vld [vmem:[%s12941_s3 + $0x1d0] sm:$0xff] }
 0x3dc   :  { %13866 = vst [vmem:[#allocation44_spill] sm:$0xff] %v8780_v9  ;;  %2043 = vmatpush.msra.mxu2 %v8792_v38  ;;  %v8845_v9 = vld [vmem:[%s12941_s3 + $0x1b8] sm:$0xff] }
 0x3dd   :  { %v8795_v5 = vadd.f32 %v1760_v12, %v1759_v1  ;;  %13867 = vst [vmem:[#allocation37_spill] sm:$0xff] %v8800_v7  ;;  %2115 = vmatpush.msra.mxu3 %v8800_v7  ;;  %2135 = vmatpush.msrb.mxu0 %v8806_v47  ;;  %v8821_v1 = vld [vmem:[%s12941_s3 + $0x2f8] sm:$0xff]  ;;  %v8827_v12 = vld [vmem:[%s12941_s3 + $0x28] sm:$0xff]  ;;  %v8833_v7 = vld [vmem:[%s12941_s3 + $0x1b0] sm:$0xff] }
 0x3de   :  { %13868 = vst [vmem:[#allocation47_spill] sm:$0xff] %v8806_v47  ;;  %2044 = vmatpush.msra.mxu2 %v8812_v46  ;;  %v8839_v47 = vld [vmem:[%s12941_s3 + $0x2e0] sm:$0xff] }
 0x3df   :  { %13869 = vst [vmem:[#allocation50_spill] sm:$0xff] %v8812_v46  ;;  %1895 = vmatmul.f32.vlgmr.msra.gmra.mxu1 %v8795_v5  ;;  %1915 = vmatmul.f32.vlgmr.msrb.gmra.mxu2 %v8795_v5  ;;  %v8863_v46 = vld [vmem:[%s12941_s3 + $0x2c8] sm:$0xff] }
 0x3e0   :  { %1935 = vmatmul.f32.vlgmr.msrb.gmra.mxu3 %v8795_v5  ;;  %2143 = vmatpush.msra.mxu1 %v8821_v1  ;;  %13870 = vst [vmem:[#allocation55_spill] sm:$0xff] %v8827_v12 }
 0x3e1   :  { %2045 = vmatpush.msra.mxu2 %v8827_v12  ;;  %13871 = vst [vmem:[#allocation46_spill] sm:$0xff] %v8833_v7  ;;  %2116 = vmatpush.msra.mxu3 %v8833_v7  ;;  %v8851_v12 = vld [vmem:[%s12941_s3 + $0x10] sm:$0xff]  ;;  %v8857_v7 = vld [vmem:[%s12941_s3 + $0x198] sm:$0xff] }
 0x3e2   :  { %2144 = vmatpush.msra.mxu1 %v8839_v47  ;;  %13872 = vst [vmem:[#allocation15_spill] sm:$0xff] %v8845_v9  ;;  %2136 = vmatpush.msrb.mxu0 %v8845_v9  ;;  %v8869_v9 = vld [vmem:[%s12941_s3 + $0x1a0] sm:$0xff] }
 0x3e3   :  { %13873 = vst [vmem:[#allocation56_spill] sm:$0xff] %v8851_v12  ;;  %2046 = vmatpush.msra.mxu2 %v8851_v12  ;;  %2117 = vmatpush.msra.mxu3 %v8857_v7  ;;  %v8875_v12 = vld [vmem:[%s12941_s3 + $0x180] sm:$0xff] }
 0x3e4   :  { %13874 = vst [vmem:[#allocation19_spill] sm:$0xff] %v8857_v7  ;;  %2145 = vmatpush.msra.mxu1 %v8863_v46  ;;  %2137 = vmatpush.msrb.mxu0 %v8869_v9  ;;  %v8882_v7 = vld [vmem:[%s12941_s3 + $0x2b0] sm:$0xff] }
 0x3e5   :  { %13875 = vst [vmem:[#allocation57_spill] sm:$0xff] %v8869_v9  ;;  %2118 = vmatpush.msra.mxu3 %v8875_v12  ;;  %2215 = vmatpush.msrb.mxu2 %v8324_v59  ;;  %v8888_v9 = vld [vmem:[%s12941_s3 + $0x188] sm:$0xff]  ;;  %v8896_v59 = vld [vmem:[%s12941_s3 + $0x298] sm:$0xff] }
 0x3e6   :  { %13876 = vst [vmem:[#allocation22_spill] sm:$0xff] %v8875_v12  ;;  %2146 = vmatpush.msra.mxu1 %v8882_v7  ;;  %2138 = vmatpush.msrb.mxu0 %v8888_v9  ;;  %v8904_v12 = vld [vmem:[%s12941_s3 + $0x280] sm:$0xff] }
 0x3e7   :  { %2216 = vmatpush.msrb.mxu2 %v8340_v13  ;;  %2235 = vmatpush.msrb.mxu3 %v8333_v51  ;;  %v8912_v51 = vld [vmem:[%s12941_s3 + $0x268] sm:$0xff]  ;;  %v8920_v13 = vld [vmem:[%s12941_s3 + $0x250] sm:$0xff] }
 0x3e8   :  { %2147 = vmatpush.msra.mxu1 %v8896_v59 }
 0x3e9   :  { %2217 = vmatpush.msrb.mxu2 %v8353_v45  ;;  %2236 = vmatpush.msrb.mxu3 %v8346_v31  ;;  %v8928_v31 = vld [vmem:[%s12941_s3 + $0x238] sm:$0xff]  ;;  %v8936_v45 = vld [vmem:[%s12941_s3 + $0x220] sm:$0xff] }
 0x3ea   :  { %2148 = vmatpush.msra.mxu1 %v8904_v12 }
 0x3eb   :  { %2218 = vmatpush.msrb.mxu2 %v8366_v23  ;;  %2237 = vmatpush.msrb.mxu3 %v8359_v39  ;;  %v8944_v39 = vld [vmem:[%s12941_s3 + $0x208] sm:$0xff]  ;;  %v8952_v23 = vld [vmem:[%s12941_s3 + $0x1f0] sm:$0xff] }
 0x3ec   :  { %2149 = vmatpush.msra.mxu1 %v8912_v51 }
 0x3ed   :  { %2219 = vmatpush.msrb.mxu2 %v8379_v50  ;;  %2238 = vmatpush.msrb.mxu3 %v8372_v19  ;;  %v8960_v19 = vld [vmem:[%s12941_s3 + $0x1d8] sm:$0xff]  ;;  %v8968_v50 = vld [vmem:[%s12941_s3 + $0x1c0] sm:$0xff] }
 0x3ee   :  { %2150 = vmatpush.msra.mxu1 %v8920_v13  ;;  %13877 = vst [vmem:[#allocation60_spill] sm:$0xff] %v8968_v50 }
 0x3ef   :  { %2220 = vmatpush.msrb.mxu2 %v8392_v58  ;;  %2239 = vmatpush.msrb.mxu3 %v8385_v35  ;;  %v8976_v35 = vld [vmem:[%s12941_s3 + $0x1a8] sm:$0xff]  ;;  %v8984_v58 = vld [vmem:[%s12941_s3 + $0x190] sm:$0xff] }
 0x3f0   :  { %2151 = vmatpush.msra.mxu1 %v8928_v31  ;;  %13878 = vst [vmem:[#allocation24_spill] sm:$0xff] %v8976_v35 }
 0x3f1   :  { %2221 = vmatpush.msrb.mxu2 %v8405_v42  ;;  %2240 = vmatpush.msrb.mxu3 %v8398_v62  ;;  %13879 = vst [vmem:[#allocation29_spill] sm:$0xff] %v8984_v58 }
 0x3f2   :  { %2152 = vmatpush.msra.mxu1 %v8936_v45 }
 0x3f3   :  { %2222 = vmatpush.msrb.mxu2 %v8418_v37  ;;  %2241 = vmatpush.msrb.mxu3 %v8411_v33  ;;  %v13880_v33 = vld [vmem:[#allocation76_spill] sm:$0xff] }
 0x3f4   :  { %2153 = vmatpush.msra.mxu1 %v8944_v39  ;;  %v13881_v37 = vld [vmem:[#allocation16_spill] sm:$0xff] }
 0x3f5   :  { %2223 = vmatpush.msrb.mxu2 %v8431_v3  ;;  %2242 = vmatpush.msrb.mxu3 %v8424_v24  ;;  %v129_v24 = vadd.f32 %v13881_v37, %v13880_v33  ;;  %v13882_v3 = vld [vmem:[#allocation73_spill] sm:$0xff] }
 0x3f6   :  { %2154 = vmatpush.msra.mxu1 %v8952_v23 }
 0x3f7   :  { %2224 = vmatpush.msrb.mxu2 %v8444_v41  ;;  %2243 = vmatpush.msrb.mxu3 %v8437_v52  ;;  %v13883_v52 = vld [vmem:[#allocation42_spill] sm:$0xff] }
 0x3f8   :  { %2155 = vmatpush.msra.mxu1 %v8960_v19  ;;  %v170_v41 = vadd.f32 %v13883_v52, %v13882_v3  ;;  %v13886_v52 = vld [vmem:[#allocation45_spill] sm:$0xff] }
 0x3f9   :  { %2225 = vmatpush.msrb.mxu2 %v8457_v17  ;;  %2244 = vmatpush.msrb.mxu3 %v8450_v32  ;;  %v13884_v32 = vld [vmem:[#allocation74_spill] sm:$0xff] }
 0x3fa   :  { %2156 = vmatpush.msra.mxu1 %v8968_v50 }
 0x3fb   :  { %2226 = vmatpush.msrb.mxu2 %v8469_v54  ;;  %2245 = vmatpush.msrb.mxu3 %v8463_v18  ;;  %v13885_v18 = vld [vmem:[#allocation75_spill] sm:$0xff] }
 0x3fc   :  { %2157 = vmatpush.msra.mxu1 %v8976_v35 }
 0x3fd   :  { %2227 = vmatpush.msrb.mxu2 %v8481_v57  ;;  %2246 = vmatpush.msrb.mxu3 %v8475_v43 }
 0x3fe   :  { %2158 = vmatpush.msra.mxu1 %v8984_v58 }
 0x3ff   :  { %2228 = vmatpush.msrb.mxu2 %v8493_v49  ;;  %2247 = vmatpush.msrb.mxu3 %v8487_v16 }
 0x401   :  { %2229 = vmatpush.msrb.mxu2 %v8505_v63  ;;  %2248 = vmatpush.msrb.mxu3 %v8499_v27 }
 0x403   :  { %2230 = vmatpush.msrb.mxu2 %v8517_v10  ;;  %2249 = vmatpush.msrb.mxu3 %v8511_v34 }
 0x405   :  { %2250 = vmatpush.msrb.mxu3 %v8523_v44 }
 0x441   :  { %v1824_v3 = vpop.f32.mrf.mxu0 }
 0x446   :  { %v1784_v62 = vpop.f32.mrf.mxu2  ;;  %v1804_v42 = vpop.f32.mrf.mxu3 }
 0x447   :  { %v1785_v17 = vadd.f32 %v1784_v62, %v13884_v32  ;;  %v1805_v54 = vadd.f32 %v1804_v42, %v13885_v18  ;;  %v283_v62 = vadd.f32 %v13886_v52, %v13841_v56  ;;  %v13889_v52 = vld [vmem:[#allocation85_spill] sm:$0xff] }
 0x449   :  { %v1827_v43 = vadd.f32 %v1785_v17, %v129_v24  ;;  %v1847_v57 = vadd.f32 %v1805_v54, %v170_v41 }
 0x44b   :  { %v5369_v16 = vmul.f32 -1.442695, %v1827_v43  ;;  %v5370_v49 = vmul.f32 -1.442695, %v1847_v57 }
 0x44d   :  { %5621 = vpow2.f32 %v5369_v16 }
 0x44e   :  { %5623 = vpow2.f32 %v5370_v49 }
 0x453   :  { %v5622_v27 = vpop.eup %5621 }
 0x454   :  { %v5624_v63 = vpop.eup %5623  ;;  %v1831_v34 = vadd.f32 1.0, %v5622_v27  ;;  %v13887_v27 = vld [vmem:[#allocation84_spill] sm:$0xff] }
 0x455   :  { %v1851_v10 = vadd.f32 1.0, %v5624_v63  ;;  %v13888_v63 = vld [vmem:[#allocation65_spill] sm:$0xff] }
 0x456   :  { %5625 = vrcp.f32 %v1831_v34  ;;  %v1843_v54 = vand.u32 2147483648, %v1831_v34  ;;  %v1841_v16 = vand.u32 2147483647, %v1831_v34  ;;  %v324_v18 = vadd.f32 %v13888_v63, %v13887_v27  ;;  %v13890_v63 = vld [vmem:[#allocation51_spill] sm:$0xff] }
 0x457   :  { %5627 = vrcp.f32 %v1851_v10  ;;  %vm1837_vm2 = vweird.f32 %v1831_v34  ;;  %v1863_v56 = vand.u32 2147483648, %v1851_v10  ;;  %vm1857_vm6 = vweird.f32 %v1851_v10 }
 0x458   :  { %vm1842_vm4 = vcmp.eq.f32.partialorder %v1841_v16, 8.507059e+37 }
 0x45c   :  { %v5626_v44 = vpop.eup %5625  ;;  %v1896_v37 = vpop.f32.mrf.mxu1 }
 0x45d   :  { %v5628_v33 = vpop.eup %5627  ;;  %v1833_v32 = vmul.f32 %v5626_v44, %v1831_v34  ;;  %v1897_v42 = vadd.f32 %v1896_v37, %v13843_v61  ;;  %vm1838_vm1 = vweird.f32 %v5626_v44  ;;  %v211_v61 = vadd.f32 %v13890_v63, %v7334_v25 }
 0x45e   :  { %v1853_v24 = vmul.f32 %v5628_v33, %v1851_v10  ;;  %vm1839_vm3 = vmor %vm1837_vm2, %vm1838_vm1  ;;  %vm1858_vm5 = vweird.f32 %v5628_v33  ;;  %v1861_v34 = vand.u32 2147483647, %v1851_v10 }
 0x45f   :  { %v1834_v41 = vsub.f32 1.0, %v1833_v32  ;;  %v1939_v17 = vadd.f32 %v1897_v42, %v283_v62  ;;  %v1844_v32 = vor.u32 1.1754944e-38, %v1843_v54  ;;  %v1825_v62 = vadd.f32 %v1824_v3, %v7328_v28  ;;  %vm1859_vm7 = vmor %vm1857_vm6, %vm1858_vm5 }
 0x460   :  { %v1854_v43 = vsub.f32 1.0, %v1853_v24  ;;  %vm1862_vm8 = vcmp.eq.f32.partialorder %v1861_v34, 8.507059e+37 }
 0x461   :  { %v1835_v57 = vmul.f32 %v5626_v44, %v1834_v41  ;;  %v5371_v49 = vmul.f32 -1.442695, %v1939_v17 }
 0x462   :  { %v1855_v58 = vmul.f32 %v5628_v33, %v1854_v43  ;;  %v1916_v35 = vpop.f32.mrf.mxu2 }
 0x463   :  { %v1836_v50 = vadd.f32 %v5626_v44, %v1835_v57  ;;  %5629 = vpow2.f32 %v5371_v49  ;;  %v1917_v37 = vadd.f32 %v1916_v35, %v13889_v52  ;;  %v1936_v63 = vpop.f32.mrf.mxu3 }
 0x464   :  { %v1856_v17 = vadd.f32 %v5628_v33, %v1855_v58 }
 0x465   :  { %v1840_v42 = vsel %vm1839_vm3, %v5626_v44, %v1836_v50  ;;  %v1959_v24 = vadd.f32 %v1917_v37, %v324_v18  ;;  %v1864_v50 = vor.u32 1.1754944e-38, %v1863_v56 }
 0x466   :  { %v1845_v41 = vsel %vm1842_vm4, %v1844_v32, %v1840_v42  ;;  %v1860_v54 = vsel %vm1859_vm7, %v5628_v33, %v1856_v17 }
 0x467   :  { %v1867_v43 = vmul.f32 %v1845_v41, %v1825_v62  ;;  %v5372_v57 = vmul.f32 -1.442695, %v1959_v24  ;;  %v1865_v58 = vsel %vm1862_vm8, %v1864_v50, %v1860_v54  ;;  %v13892_v50 = vld [vmem:[#allocation87_spill] sm:$0xff] }
 0x468   :  { %v1870_v44 = vsub.f32 1.0, %v1865_v58  ;;  %v1872_v42 = vmul.f32 %v1865_v58, %v8547_v26  ;;  %v13893_v58 = vld [vmem:[#allocation21_spill] sm:$0xff] }
 0x469   :  { %v5630_v49 = vpop.eup %5629  ;;  %v1868_v35 = vadd.f32 %v1867_v43, %v211_v61  ;;  %5631 = vpow2.f32 %v5372_v57 }
 0x46a   :  { %v1943_v3 = vadd.f32 1.0, %v5630_v49 }
 0x46b   :  { %5633 = vtanh.f32 %v1868_v35 }
 0x46c   :  { %5635 = vrcp.f32 %v1943_v3  ;;  %v1955_v33 = vand.u32 2147483648, %v1943_v3  ;;  %v1953_v41 = vand.u32 2147483647, %v1943_v3  ;;  %vm1949_vm10 = vweird.f32 %v1943_v3 }
 0x46e   :  { %v1956_v34 = vor.u32 1.1754944e-38, %v1955_v33  ;;  %vm1954_vm12 = vcmp.eq.f32.partialorder %v1953_v41, 8.507059e+37  ;;  %v13903_v41 = vld [vmem:[#allocation20_spill] sm:$0xff] }
 0x46f   :  { %v5632_v18 = vpop.eup %5631 }
 0x470   :  { %v1963_v16 = vadd.f32 1.0, %v5632_v18 }
 0x471   :  { %v5634_v37 = vpop.eup %5633 }
 0x472   :  { %v5636_v32 = vpop.eup %5635  ;;  %v1871_v62 = vmul.f32 %v5634_v37, %v1870_v44  ;;  %5637 = vrcp.f32 %v1963_v16  ;;  %vm1969_vm14 = vweird.f32 %v1963_v16  ;;  %v13894_v44 = vld [vmem:[#allocation58_spill] sm:$0xff] }
 0x473   :  { %v1945_v10 = vmul.f32 %v5636_v32, %v1943_v3  ;;  %vm1950_vm9 = vweird.f32 %v5636_v32 }
 0x474   :  { %v9010_v61 = vadd.f32 %v1872_v42, %v1871_v62  ;;  %vm1951_vm11 = vmor %vm1949_vm10, %vm1950_vm9  ;;  %v13898_v62 = vld [vmem:[#allocation12_spill] sm:$0xff]  ;;  %v13899_v42 = vld [vmem:[#allocation10_spill] sm:$0xff] }
 0x475   :  { %v1946_v24 = vsub.f32 1.0, %v1945_v10 }
 0x476   :  { %2007 = vmatmul.f32.vlgmr.msra.gmra.mxu0 %v9010_v61  ;;  %2027 = vmatmul.f32.vlgmr.msrb.gmra.mxu1 %v9010_v61 }
 0x477   :  { %v1947_v56 = vmul.f32 %v5636_v32, %v1946_v24  ;;  %2047 = vmatmul.f32.vlgmr.msra.gmra.mxu2 %v9010_v61  ;;  %2255 = vmatpush.msra.mxu0 %v8557_v8  ;;  %v1937_v8 = vadd.f32 %v1936_v63, %v7364_v60  ;;  %v13900_v24 = vld [vmem:[#allocation67_spill] sm:$0xff]  ;;  %v13905_v63 = vld [vmem:[#allocation30_spill] sm:$0xff] }
 0x478   :  { %v5638_v17 = vpop.eup %5637  ;;  %2346 = vmatpush.msra.mxu2 %v8569_v30  ;;  %2326 = vmatpush.msrb.mxu1 %v8563_v11  ;;  %v13891_v11 = vld [vmem:[#allocation81_spill] sm:$0xff] }
 0x479   :  { %v1965_v43 = vmul.f32 %v5638_v17, %v1963_v16  ;;  %v1948_v57 = vadd.f32 %v5636_v32, %v1947_v56  ;;  %2256 = vmatpush.msra.mxu0 %v8575_v29  ;;  %v365_v30 = vadd.f32 %v13891_v11, %v7375_v55  ;;  %vm1970_vm13 = vweird.f32 %v5638_v17  ;;  %v13901_v56 = vld [vmem:[#allocation89_spill] sm:$0xff] }
 0x47a   :  { %2347 = vmatpush.msra.mxu2 %v8587_v53  ;;  %2327 = vmatpush.msrb.mxu1 %v8581_v21  ;;  %v1975_v53 = vand.u32 2147483648, %v1963_v16  ;;  %v1973_v21 = vand.u32 2147483647, %v1963_v16  ;;  %vm1971_vm15 = vmor %vm1969_vm14, %vm1970_vm13  ;;  %v13914_v11 = vld [vmem:[#allocation37_spill] sm:$0xff] }
 0x47b   :  { %v1966_v49 = vsub.f32 1.0, %v1965_v43  ;;  %v1952_v35 = vsel %vm1951_vm11, %v5636_v32, %v1948_v57  ;;  %2257 = vmatpush.msra.mxu0 %v8593_v15  ;;  %v13908_v43 = vld [vmem:[#allocation38_spill] sm:$0xff] }
 0x47c   :  { %v1957_v54 = vsel %vm1954_vm12, %v1956_v34, %v1952_v35  ;;  %2348 = vmatpush.msra.mxu2 %v8605_v14  ;;  %2328 = vmatpush.msrb.mxu1 %v8599_v4  ;;  %v13895_v14 = vld [vmem:[#allocation61_spill] sm:$0xff]  ;;  %v13896_v4 = vld [vmem:[#allocation59_spill] sm:$0xff]  ;;  %v1976_v37 = vor.u32 1.1754944e-38, %v1975_v53  ;;  %vm1974_vm0 = vcmp.eq.f32.partialorder %v1973_v21, 8.507059e+37  ;;  %v13909_v57 = vld [vmem:[#allocation34_spill] sm:$0xff] }
 0x47d   :  { %v1967_v29 = vmul.f32 %v5638_v17, %v1966_v49  ;;  %v1979_v3 = vmul.f32 %v1957_v54, %v1937_v8  ;;  %2258 = vmatpush.msra.mxu0 %v8611_v40  ;;  %v13897_v40 = vld [vmem:[#allocation62_spill] sm:$0xff]  ;;  %v13911_v49 = vld [vmem:[#allocation44_spill] sm:$0xff]  ;;  %v13912_v8 = vld [vmem:[#allocation47_spill] sm:$0xff] }
 0x47e   :  { %2349 = vmatpush.msra.mxu2 %v13892_v50  ;;  %2329 = vmatpush.msrb.mxu1 %v13893_v58  ;;  %v13910_v34 = vld [vmem:[#allocation50_spill] sm:$0xff]  ;;  %v13913_v35 = vld [vmem:[#allocation55_spill] sm:$0xff]  ;;  %v13927_v53 = vld [vmem:[#allocation64_spill] sm:$0xff] }
 0x47f   :  { %v1968_v15 = vadd.f32 %v5638_v17, %v1967_v29  ;;  %v1980_v18 = vadd.f32 %v1979_v3, %v365_v30  ;;  %2259 = vmatpush.msra.mxu0 %v13894_v44  ;;  %v13919_v30 = vld [vmem:[#allocation19_spill] sm:$0xff]  ;;  %v13926_v29 = vld [vmem:[#allocation73_spill] sm:$0xff]  ;;  %v13928_v21 = vld [vmem:[#allocation74_spill] sm:$0xff] }
 0x480   :  { %2350 = vmatpush.msra.mxu2 %v13895_v14  ;;  %2330 = vmatpush.msrb.mxu1 %v13896_v4  ;;  %v173_v3 = vadd.f32 %v13927_v53, %v13926_v29  ;;  %v13929_v58 = vld [vmem:[#allocation75_spill] sm:$0xff]  ;;  %v2480_v4 = vld [vmem:[%s12945_s6 + $0xf0] sm:$0xff] }
 0x481   :  { %v1972_v32 = vsel %vm1971_vm15, %v5638_v17, %v1968_v15  ;;  %5639 = vtanh.f32 %v1980_v18  ;;  %2260 = vmatpush.msra.mxu0 %v8649_v2  ;;  %v2483_v18 = vld [vmem:[%s12945_s6 + $0x108] sm:$0xff] }
 0x482   :  { %2351 = vmatpush.msra.mxu2 %v8663_v22  ;;  %2331 = vmatpush.msrb.mxu1 %v13897_v40  ;;  %v1977_v16 = vsel %vm1974_vm0, %v1976_v37, %v1972_v32  ;;  %v2477_v40 = vld [vmem:[%s12945_s6 + $0xd8] sm:$0xff] }
 0x483   :  { %2261 = vmatpush.msra.mxu0 %v8672_v20  ;;  %v1982_v10 = vsub.f32 1.0, %v1977_v16  ;;  %v1984_v33 = vmul.f32 %v1977_v16, %v8795_v5  ;;  %v13902_v20 = vld [vmem:[#allocation13_spill] sm:$0xff]  ;;  %v2474_v16 = vld [vmem:[%s12945_s6 + $0xc0] sm:$0xff] }
 0x484   :  { %2352 = vmatpush.msra.mxu2 %v13898_v62  ;;  %2332 = vmatpush.msrb.mxu1 %v13899_v42  ;;  %v2471_v62 = vld [vmem:[%s12945_s6 + $0xa8] sm:$0xff]  ;;  %v2468_v42 = vld [vmem:[%s12945_s6 + $0x90] sm:$0xff] }
 0x485   :  { %2262 = vmatpush.msra.mxu0 %v8698_v6  ;;  %v13904_v6 = vld [vmem:[#allocation28_spill] sm:$0xff] }
 0x486   :  { %2353 = vmatpush.msra.mxu2 %v8713_v0  ;;  %2333 = vmatpush.msrb.mxu1 %v8707_v48  ;;  %v13906_v0 = vld [vmem:[#allocation36_spill] sm:$0xff]  ;;  %v13907_v48 = vld [vmem:[#allocation35_spill] sm:$0xff] }
 0x487   :  { %v5640_v2 = vpop.eup %5639  ;;  %2263 = vmatpush.msra.mxu0 %v13900_v24 }
 0x488   :  { %v1983_v22 = vmul.f32 %v5640_v2, %v1982_v10  ;;  %2354 = vmatpush.msra.mxu2 %v13901_v56  ;;  %2334 = vmatpush.msrb.mxu1 %v13902_v20  ;;  %v2465_v2 = vld [vmem:[%s12945_s6 + $0x78] sm:$0xff]  ;;  %v2462_v56 = vld [vmem:[%s12945_s6 + $0x60] sm:$0xff]  ;;  %v2459_v20 = vld [vmem:[%s12945_s6 + $0x48] sm:$0xff] }
 0x489   :  { %2264 = vmatpush.msra.mxu0 %v13903_v41  ;;  %v2456_v41 = vld [vmem:[%s12945_s6 + $0x30] sm:$0xff] }
 0x48a   :  { %v9047_v17 = vadd.f32 %v1984_v33, %v1983_v22  ;;  %2355 = vmatpush.msra.mxu2 %v13904_v6  ;;  %2335 = vmatpush.msrb.mxu1 %v13905_v63  ;;  %v2453_v6 = vld [vmem:[%s12945_s6 + $0x18] sm:$0xff] }
 0x48b   :  { %2265 = vmatpush.msra.mxu0 %v13906_v0 }
 0x48c   :  { %2119 = vmatmul.f32.vlgmr.msra.gmra.mxu3 %v9047_v17  ;;  %2139 = vmatmul.f32.vlgmr.msrb.gmra.mxu0 %v9047_v17 }
 0x48d   :  { %2159 = vmatmul.f32.vlgmr.msra.gmra.mxu1 %v9047_v17  ;;  %2266 = vmatpush.msra.mxu0 %v13907_v48 }
 0x48e   :  { %2356 = vmatpush.msra.mxu2 %v13908_v43  ;;  %2366 = vmatpush.msra.mxu3 %v8821_v1  ;;  %v13915_v1 = vld [vmem:[#allocation15_spill] sm:$0xff]  ;;  %v13930_v43 = vld [vmem:[#allocation48_spill] sm:$0xff] }
 0x48f   :  { %2267 = vmatpush.msra.mxu0 %v8792_v38  ;;  %2336 = vmatpush.msrb.mxu1 %v13909_v57  ;;  %v13916_v38 = vld [vmem:[#allocation56_spill] sm:$0xff]  ;;  %v321_v57 = vadd.f32 %v13930_v43, %v13887_v27  ;;  %v2493_v43 = vld [vmem:[%s12945_s6 + $0x158] sm:$0xff] }
 0x490   :  { %2357 = vmatpush.msra.mxu2 %v8786_v36  ;;  %2367 = vmatpush.msra.mxu3 %v8839_v47  ;;  %v13917_v36 = vld [vmem:[#allocation46_spill] sm:$0xff]  ;;  %v13918_v47 = vld [vmem:[#allocation57_spill] sm:$0xff] }
 0x491   :  { %2268 = vmatpush.msra.mxu0 %v13910_v34  ;;  %2337 = vmatpush.msrb.mxu1 %v13911_v49 }
 0x492   :  { %2358 = vmatpush.msra.mxu2 %v13912_v8  ;;  %2368 = vmatpush.msra.mxu3 %v8863_v46  ;;  %v13920_v46 = vld [vmem:[#allocation22_spill] sm:$0xff]  ;;  %v2450_v8 = vld [vmem:[%s12945_s6] sm:$0xff] }
 0x493   :  { %2269 = vmatpush.msra.mxu0 %v13913_v35  ;;  %2338 = vmatpush.msrb.mxu1 %v13914_v11 }
 0x494   :  { %2359 = vmatpush.msra.mxu2 %v13915_v1  ;;  %2369 = vmatpush.msra.mxu3 %v8882_v7  ;;  %v13921_v7 = vld [vmem:[#allocation60_spill] sm:$0xff] }
 0x495   :  { %2270 = vmatpush.msra.mxu0 %v13916_v38  ;;  %2339 = vmatpush.msrb.mxu1 %v13917_v36 }
 0x496   :  { %2360 = vmatpush.msra.mxu2 %v13918_v47  ;;  %2370 = vmatpush.msra.mxu3 %v8896_v59  ;;  %v2495_v59 = vld [vmem:[%s12945_s6 + $0x168] sm:$0xff] }
 0x497   :  { %2340 = vmatpush.msrb.mxu1 %v13919_v30  ;;  %2554 = vmatpush.msrb.mxu0 %v2495_v59 }
 0x498   :  { %2361 = vmatpush.msra.mxu2 %v8888_v9  ;;  %2371 = vmatpush.msra.mxu3 %v8904_v12  ;;  %v13922_v9 = vld [vmem:[#allocation24_spill] sm:$0xff]  ;;  %v13923_v12 = vld [vmem:[#allocation29_spill] sm:$0xff] }
 0x499   :  { %2341 = vmatpush.msrb.mxu1 %v13920_v46 }
 0x49a   :  { %2372 = vmatpush.msra.mxu3 %v8912_v51  ;;  %v2492_v51 = vld [vmem:[%s12945_s6 + $0x150] sm:$0xff] }
 0x49b   :  { %2555 = vmatpush.msrb.mxu0 %v2492_v51 }
 0x49c   :  { %2373 = vmatpush.msra.mxu3 %v8920_v13  ;;  %v2489_v13 = vld [vmem:[%s12945_s6 + $0x138] sm:$0xff] }
 0x49d   :  { %2556 = vmatpush.msrb.mxu0 %v2489_v13 }
 0x49e   :  { %2374 = vmatpush.msra.mxu3 %v8928_v31  ;;  %v2486_v31 = vld [vmem:[%s12945_s6 + $0x120] sm:$0xff] }
 0x49f   :  { %2557 = vmatpush.msrb.mxu0 %v2486_v31 }
 0x4a0   :  { %2375 = vmatpush.msra.mxu3 %v8936_v45 }
 0x4a1   :  { %2558 = vmatpush.msrb.mxu0 %v2483_v18  ;;  %v13934_v18 = vld [vmem:[#allocation66_spill] sm:$0xff] }
 0x4a2   :  { %2376 = vmatpush.msra.mxu3 %v8944_v39 }
 0x4a3   :  { %2559 = vmatpush.msrb.mxu0 %v2480_v4 }
 0x4a4   :  { %2377 = vmatpush.msra.mxu3 %v8952_v23  ;;  %v13924_v23 = vld [vmem:[#allocation76_spill] sm:$0xff] }
 0x4a5   :  { %2560 = vmatpush.msrb.mxu0 %v2477_v40 }
 0x4a6   :  { %2378 = vmatpush.msra.mxu3 %v8960_v19  ;;  %v13925_v19 = vld [vmem:[#allocation9_spill] sm:$0xff] }
 0x4a7   :  { %v132_v54 = vadd.f32 %v13925_v19, %v13924_v23  ;;  %2561 = vmatpush.msrb.mxu0 %v2474_v16 }
 0x4a8   :  { %2379 = vmatpush.msra.mxu3 %v13921_v7  ;;  %v13931_v7 = vld [vmem:[#allocation79_spill] sm:$0xff] }
 0x4a9   :  { %2562 = vmatpush.msrb.mxu0 %v2471_v62 }
 0x4aa   :  { %2380 = vmatpush.msra.mxu3 %v13922_v9  ;;  %v13932_v9 = vld [vmem:[#allocation14_spill] sm:$0xff] }
 0x4ab   :  { %2563 = vmatpush.msrb.mxu0 %v2468_v42 }
 0x4ac   :  { %2381 = vmatpush.msra.mxu3 %v13923_v12  ;;  %v280_v12 = vadd.f32 %v13932_v9, %v13931_v7  ;;  %v2481_v9 = vld [vmem:[%s12945_s6 + $0xf8] sm:$0xff] }
 0x4ad   :  { %2564 = vmatpush.msrb.mxu0 %v2465_v2 }
 0x4af   :  { %2565 = vmatpush.msrb.mxu0 %v2462_v56 }
 0x4b1   :  { %2566 = vmatpush.msrb.mxu0 %v2459_v20 }
 0x4b3   :  { %2567 = vmatpush.msrb.mxu0 %v2456_v41 }
 0x4b5   :  { %2568 = vmatpush.msrb.mxu0 %v2453_v6 }
 0x4b7   :  { %2569 = vmatpush.msrb.mxu0 %v2450_v8 }
 0x4f3   :  { %v2008_v45 = vpop.f32.mrf.mxu0  ;;  %v2028_v39 = vpop.f32.mrf.mxu1 }
 0x4f4   :  { %v2009_v50 = vadd.f32 %v2008_v45, %v13928_v21  ;;  %v2029_v15 = vadd.f32 %v2028_v39, %v13929_v58  ;;  %v13933_v45 = vld [vmem:[#allocation80_spill] sm:$0xff] }
 0x4f6   :  { %v2051_v44 = vadd.f32 %v2009_v50, %v132_v54  ;;  %v2071_v14 = vadd.f32 %v2029_v15, %v173_v3 }
 0x4f8   :  { %v5373_v37 = vmul.f32 -1.442695, %v2051_v44  ;;  %v5374_v32 = vmul.f32 -1.442695, %v2071_v14  ;;  %v214_v44 = vadd.f32 %v13934_v18, %v7334_v25 }
 0x4fa   :  { %5641 = vpow2.f32 %v5373_v37  ;;  %v2048_v51 = vpop.f32.mrf.mxu2 }
 0x4fb   :  { %5643 = vpow2.f32 %v5374_v32  ;;  %v2049_v54 = vadd.f32 %v2048_v51, %v7328_v28 }
 0x500   :  { %v5642_v10 = vpop.eup %5641 }
 0x501   :  { %v5644_v24 = vpop.eup %5643  ;;  %v2055_v22 = vadd.f32 1.0, %v5642_v10 }
 0x502   :  { %v2075_v33 = vadd.f32 1.0, %v5644_v24 }
 0x503   :  { %5645 = vrcp.f32 %v2055_v22  ;;  %v2067_v36 = vand.u32 2147483648, %v2055_v22  ;;  %v2065_v30 = vand.u32 2147483647, %v2055_v22  ;;  %vm2061_vm2 = vweird.f32 %v2055_v22 }
 0x504   :  { %5647 = vrcp.f32 %v2075_v33  ;;  %v2087_v14 = vand.u32 2147483648, %v2075_v33  ;;  %vm2081_vm6 = vweird.f32 %v2075_v33  ;;  %v2085_v32 = vand.u32 2147483647, %v2075_v33 }
 0x505   :  { %v2068_v19 = vor.u32 1.1754944e-38, %v2067_v36  ;;  %vm2066_vm4 = vcmp.eq.f32.partialorder %v2065_v30, 8.507059e+37 }
 0x506   :  { %v2088_v10 = vor.u32 1.1754944e-38, %v2087_v14  ;;  %vm2086_vm8 = vcmp.eq.f32.partialorder %v2085_v32, 8.507059e+37  ;;  %v2472_v14 = vld [vmem:[%s12945_s6 + $0xb0] sm:$0xff]  ;;  %v2469_v32 = vld [vmem:[%s12945_s6 + $0x98] sm:$0xff] }
 0x509   :  { %v5646_v63 = vpop.eup %5645  ;;  %v2140_v0 = vpop.f32.mrf.mxu0 }
 0x50a   :  { %v5648_v48 = vpop.eup %5647  ;;  %v2057_v34 = vmul.f32 %v5646_v63, %v2055_v22  ;;  %v2141_v49 = vadd.f32 %v2140_v0, %v13889_v52  ;;  %vm2062_vm1 = vweird.f32 %v5646_v63  ;;  %v2496_v0 = vld [vmem:[%s12945_s6 + $0x170] sm:$0xff] }
 0x50b   :  { %v2077_v35 = vmul.f32 %v5648_v48, %v2075_v33  ;;  %vm2063_vm3 = vmor %vm2061_vm2, %vm2062_vm1  ;;  %vm2082_vm5 = vweird.f32 %v5648_v48 }
 0x50c   :  { %v2058_v11 = vsub.f32 1.0, %v2057_v34  ;;  %v2183_v1 = vadd.f32 %v2141_v49, %v321_v57  ;;  %vm2083_vm7 = vmor %vm2081_vm6, %vm2082_vm5  ;;  %v2490_v34 = vld [vmem:[%s12945_s6 + $0x140] sm:$0xff] }
 0x50d   :  { %v2078_v38 = vsub.f32 1.0, %v2077_v35  ;;  %v2487_v35 = vld [vmem:[%s12945_s6 + $0x128] sm:$0xff] }
 0x50e   :  { %v2059_v47 = vmul.f32 %v5646_v63, %v2058_v11  ;;  %v5376_v46 = vmul.f32 -1.442695, %v2183_v1 }
 0x50f   :  { %v2079_v59 = vmul.f32 %v5648_v48, %v2078_v38  ;;  %v2120_v13 = vpop.f32.mrf.mxu3  ;;  %v2484_v38 = vld [vmem:[%s12945_s6 + $0x110] sm:$0xff] }
 0x510   :  { %v2060_v31 = vadd.f32 %v5646_v63, %v2059_v47  ;;  %5649 = vpow2.f32 %v5376_v46  ;;  %v2121_v39 = vadd.f32 %v2120_v13, %v13933_v45  ;;  %v2160_v46 = vpop.f32.mrf.mxu1  ;;  %v2478_v13 = vld [vmem:[%s12945_s6 + $0xe0] sm:$0xff] }
 0x511   :  { %v2080_v15 = vadd.f32 %v5648_v48, %v2079_v59  ;;  %v13935_v59 = vld [vmem:[#allocation88_spill] sm:$0xff] }
 0x512   :  { %v2064_v53 = vsel %vm2063_vm3, %v5646_v63, %v2060_v31  ;;  %v2163_v3 = vadd.f32 %v2121_v39, %v280_v12  ;;  %v2161_v31 = vadd.f32 %v2160_v46, %v7364_v60 }
 0x513   :  { %v2069_v50 = vsel %vm2066_vm4, %v2068_v19, %v2064_v53  ;;  %v2084_v62 = vsel %vm2083_vm7, %v5648_v48, %v2080_v15  ;;  %v2475_v53 = vld [vmem:[%s12945_s6 + $0xc8] sm:$0xff] }
 0x514   :  { %v2091_v4 = vmul.f32 %v2069_v50, %v2049_v54  ;;  %v5375_v37 = vmul.f32 -1.442695, %v2163_v3  ;;  %v2089_v2 = vsel %vm2086_vm8, %v2088_v10, %v2084_v62  ;;  %v13936_v3 = vld [vmem:[#allocation77_spill] sm:$0xff]  ;;  %v2466_v62 = vld [vmem:[%s12945_s6 + $0x80] sm:$0xff] }
 0x515   :  { %v2094_v22 = vsub.f32 1.0, %v2089_v2  ;;  %v2096_v33 = vmul.f32 %v2089_v2, %v9010_v61  ;;  %v362_v50 = vadd.f32 %v13936_v3, %v7375_v55  ;;  %v2463_v10 = vld [vmem:[%s12945_s6 + $0x68] sm:$0xff]  ;;  %v5408_v3 = vld [vmem:[%s12945_s6 + $0x3d8] sm:$0xff] }
 0x516   :  { %v5650_v40 = vpop.eup %5649  ;;  %v2092_v16 = vadd.f32 %v2091_v4, %v214_v44  ;;  %5651 = vpow2.f32 %v5375_v37 }
 0x517   :  { %v9151_v42 = vadd.f32 1.0, %v5650_v40 }
 0x518   :  { %5653 = vtanh.f32 %v2092_v16  ;;  %v13937_v16 = vld [vmem:[#allocation54_spill] sm:$0xff] }
 0x519   :  { %5655 = vrcp.f32 %v9151_v42  ;;  %v2199_v15 = vand.u32 2147483648, %v9151_v42  ;;  %vm2193_vm14 = vweird.f32 %v9151_v42  ;;  %v2197_v44 = vand.u32 2147483647, %v9151_v42 }
 0x51b   :  { %v2200_v40 = vor.u32 1.1754944e-38, %v2199_v15  ;;  %vm2198_vm0 = vcmp.eq.f32.partialorder %v2197_v44, 8.507059e+37  ;;  %v2544_v15 = vld [vmem:[%s12945_s6 + $0x2f0] sm:$0xff]  ;;  %v5405_v44 = vld [vmem:[%s12945_s6 + $0x3c0] sm:$0xff] }
 0x51c   :  { %v5652_v24 = vpop.eup %5651 }
 0x51d   :  { %v2167_v56 = vadd.f32 1.0, %v5652_v24  ;;  %v2460_v24 = vld [vmem:[%s12945_s6 + $0x50] sm:$0xff] }
 0x51e   :  { %v5654_v20 = vpop.eup %5653 }
 0x51f   :  { %v2095_v41 = vmul.f32 %v5654_v20, %v2094_v22  ;;  %5657 = vrcp.f32 %v2167_v56  ;;  %v5656_v6 = vpop.eup %5655  ;;  %v2179_v1 = vand.u32 2147483648, %v2167_v56  ;;  %v2177_v47 = vand.u32 2147483647, %v2167_v56 }
 0x520   :  { %v2189_v48 = vmul.f32 %v5656_v6, %v9151_v42  ;;  %vm2173_vm10 = vweird.f32 %v2167_v56  ;;  %vm2194_vm13 = vweird.f32 %v5656_v6 }
 0x521   :  { %v9155_v63 = vadd.f32 %v2096_v33, %v2095_v41  ;;  %v2180_v51 = vor.u32 1.1754944e-38, %v2179_v1  ;;  %vm2178_vm12 = vcmp.eq.f32.partialorder %v2177_v47, 8.507059e+37  ;;  %vm2195_vm15 = vmor %vm2193_vm14, %vm2194_vm13  ;;  %v2457_v41 = vld [vmem:[%s12945_s6 + $0x38] sm:$0xff]  ;;  %v2488_v1 = vld [vmem:[%s12945_s6 + $0x130] sm:$0xff] }
 0x522   :  { %v2190_v8 = vsub.f32 1.0, %v2189_v48  ;;  %v13938_v33 = vld [vmem:[#allocation11_spill] sm:$0xff]  ;;  %v2451_v48 = vld [vmem:[%s12945_s6 + $0x8] sm:$0xff] }
 0x523   :  { %2231 = vmatmul.f32.vlgmr.msrb.gmra.mxu2 %v9155_v63  ;;  %2251 = vmatmul.f32.vlgmr.msrb.gmra.mxu3 %v9155_v63 }
 0x524   :  { %2271 = vmatmul.f32.vlgmr.msra.gmra.mxu0 %v9155_v63  ;;  %2636 = vmatpush.msrb.mxu2 %v2496_v0  ;;  %v2191_v30 = vmul.f32 %v5656_v6, %v2190_v8  ;;  %v2454_v0 = vld [vmem:[%s12945_s6 + $0x20] sm:$0xff]  ;;  %v5423_v8 = vld [vmem:[%s12945_s6 + $0x450] sm:$0xff] }
 0x525   :  { %v5658_v57 = vpop.eup %5657  ;;  %2677 = vmatpush.msrb.mxu3 %v2544_v15  ;;  %v5381_v15 = vld [vmem:[%s12945_s6 + $0x300] sm:$0xff] }
 0x526   :  { %v2169_v49 = vmul.f32 %v5658_v57, %v2167_v56  ;;  %2637 = vmatpush.msrb.mxu2 %v2493_v43  ;;  %vm2174_vm9 = vweird.f32 %v5658_v57  ;;  %v2192_v19 = vadd.f32 %v5656_v6, %v2191_v30  ;;  %v13939_v43 = vld [vmem:[#allocation78_spill] sm:$0xff] }
 0x527   :  { %vm2175_vm11 = vmor %vm2173_vm10, %vm2174_vm9  ;;  %v13940_v30 = vld [vmem:[#allocation26_spill] sm:$0xff] }
 0x528   :  { %v2170_v11 = vsub.f32 1.0, %v2169_v49  ;;  %2638 = vmatpush.msrb.mxu2 %v2490_v34  ;;  %v2196_v37 = vsel %vm2195_vm15, %v5656_v6, %v2192_v19  ;;  %v5426_v34 = vld [vmem:[%s12945_s6 + $0x468] sm:$0xff]  ;;  %v2494_v49 = vld [vmem:[%s12945_s6 + $0x160] sm:$0xff]  ;;  %v135_v46 = vadd.f32 %v13940_v30, %v13924_v23 }
 0x529   :  { %v2201_v42 = vsel %vm2198_vm0, %v2200_v40, %v2196_v37  ;;  %v2482_v23 = vld [vmem:[%s12945_s6 + $0x100] sm:$0xff]  ;;  %v2473_v37 = vld [vmem:[%s12945_s6 + $0xb8] sm:$0xff] }
 0x52a   :  { %v2171_v36 = vmul.f32 %v5658_v57, %v2170_v11  ;;  %2639 = vmatpush.msrb.mxu2 %v2487_v35  ;;  %v2206_v2 = vsub.f32 1.0, %v2201_v42  ;;  %v2208_v56 = vmul.f32 %v2201_v42, %v9047_v17  ;;  %v2491_v35 = vld [vmem:[%s12945_s6 + $0x148] sm:$0xff]  ;;  %v5420_v11 = vld [vmem:[%s12945_s6 + $0x438] sm:$0xff]  ;;  %v2470_v42 = vld [vmem:[%s12945_s6 + $0xa0] sm:$0xff] }
 0x52b   :  { %v2537_v40 = vld [vmem:[%s12945_s6 + $0x2b8] sm:$0xff]  ;;  %v2458_v30 = vld [vmem:[%s12945_s6 + $0x40] sm:$0xff] }
 0x52c   :  { %v2172_v12 = vadd.f32 %v5658_v57, %v2171_v36  ;;  %2570 = vmatmul.f32.vlgmr.msrb.gmra.mxu0 %v13935_v59  ;;  %2640 = vmatpush.msrb.mxu2 %v2484_v38  ;;  %v5417_v38 = vld [vmem:[%s12945_s6 + $0x420] sm:$0xff] }
 0x52e   :  { %v2176_v39 = vsel %vm2175_vm11, %v5658_v57, %v2172_v12  ;;  %2641 = vmatpush.msrb.mxu2 %v2481_v9  ;;  %v2497_v57 = vld [vmem:[%s12945_s6 + $0x178] sm:$0xff]  ;;  %v13941_v9 = vld [vmem:[#allocation68_spill] sm:$0xff] }
 0x52f   :  { %v2181_v54 = vsel %vm2178_vm12, %v2180_v51, %v2176_v39  ;;  %2718 = vmatpush.msra.mxu0 %v2497_v57  ;;  %v176_v12 = vadd.f32 %v13941_v9, %v13926_v29  ;;  %v5414_v39 = vld [vmem:[%s12945_s6 + $0x408] sm:$0xff]  ;;  %v5411_v29 = vld [vmem:[%s12945_s6 + $0x3f0] sm:$0xff] }
 0x530   :  { %v2203_v18 = vmul.f32 %v2181_v54, %v2161_v31  ;;  %2642 = vmatpush.msrb.mxu2 %v2478_v13  ;;  %v2485_v31 = vld [vmem:[%s12945_s6 + $0x118] sm:$0xff]  ;;  %v2531_v57 = vld [vmem:[%s12945_s6 + $0x288] sm:$0xff] }
 0x531   :  { %2719 = vmatpush.msra.mxu0 %v2494_v49  ;;  %v2464_v49 = vld [vmem:[%s12945_s6 + $0x70] sm:$0xff] }
 0x532   :  { %v2204_v4 = vadd.f32 %v2203_v18, %v362_v50  ;;  %2643 = vmatpush.msrb.mxu2 %v2475_v53  ;;  %v2479_v53 = vld [vmem:[%s12945_s6 + $0xe8] sm:$0xff]  ;;  %v2476_v18 = vld [vmem:[%s12945_s6 + $0xd0] sm:$0xff] }
 0x533   :  { %2720 = vmatpush.msra.mxu0 %v2491_v35  ;;  %v2543_v50 = vld [vmem:[%s12945_s6 + $0x2e8] sm:$0xff]  ;;  %v2528_v35 = vld [vmem:[%s12945_s6 + $0x270] sm:$0xff] }
 0x534   :  { %5659 = vtanh.f32 %v2204_v4  ;;  %2573 = vmatmul.f32.gmra.mxu0 %v13937_v16  ;;  %2644 = vmatpush.msrb.mxu2 %v2472_v14  ;;  %v2540_v14 = vld [vmem:[%s12945_s6 + $0x2d0] sm:$0xff]  ;;  %v2541_v4 = vld [vmem:[%s12945_s6 + $0x2d8] sm:$0xff] }
 0x535   :  { %2721 = vmatpush.msra.mxu0 %v2488_v1  ;;  %2595 = vmatpush.msra.mxu1 %v2543_v50  ;;  %v2461_v1 = vld [vmem:[%s12945_s6 + $0x58] sm:$0xff]  ;;  %v2452_v50 = vld [vmem:[%s12945_s6 + $0x10] sm:$0xff] }
 0x536   :  { %2645 = vmatpush.msrb.mxu2 %v2469_v32  ;;  %2678 = vmatpush.msrb.mxu3 %v2541_v4  ;;  %v5402_v32 = vld [vmem:[%s12945_s6 + $0x3a8] sm:$0xff]  ;;  %v2517_v4 = vld [vmem:[%s12945_s6 + $0x218] sm:$0xff] }
 0x537   :  { %2722 = vmatpush.msra.mxu0 %v2485_v31  ;;  %2596 = vmatpush.msra.mxu1 %v2540_v14  ;;  %v2455_v31 = vld [vmem:[%s12945_s6 + $0x28] sm:$0xff]  ;;  %v2516_v14 = vld [vmem:[%s12945_s6 + $0x210] sm:$0xff] }
 0x538   :  { %2646 = vmatpush.msrb.mxu2 %v2466_v62  ;;  %v2538_v62 = vld [vmem:[%s12945_s6 + $0x2c0] sm:$0xff] }
 0x539   :  { %2723 = vmatpush.msra.mxu0 %v2482_v23  ;;  %2597 = vmatpush.msra.mxu1 %v2537_v40 }
 0x53a   :  { %v5660_v22 = vpop.eup %5659  ;;  %2647 = vmatpush.msrb.mxu2 %v2463_v10  ;;  %2679 = vmatpush.msrb.mxu3 %v2538_v62  ;;  %v13943_v62 = vld [vmem:[#allocation33_spill] sm:$0xff] }
 0x53b   :  { %v2207_v20 = vmul.f32 %v5660_v22, %v2206_v2  ;;  %2724 = vmatpush.msra.mxu0 %v2479_v53  ;;  %v5399_v2 = vld [vmem:[%s12945_s6 + $0x390] sm:$0xff]  ;;  %v2519_v53 = vld [vmem:[%s12945_s6 + $0x228] sm:$0xff] }
 0x53c   :  { %2576 = vmatmul.f32.gmra.mxu0 %v13938_v33  ;;  %2648 = vmatpush.msrb.mxu2 %v2460_v24 }
 0x53d   :  { %v9213_v6 = vadd.f32 %v2208_v56, %v2207_v20  ;;  %2725 = vmatpush.msra.mxu0 %v2476_v18  ;;  %v2534_v56 = vld [vmem:[%s12945_s6 + $0x2a0] sm:$0xff]  ;;  %v2535_v20 = vld [vmem:[%s12945_s6 + $0x2a8] sm:$0xff] }
 0x53e   :  { %2649 = vmatpush.msrb.mxu2 %v2457_v41  ;;  %v2467_v41 = vld [vmem:[%s12945_s6 + $0x88] sm:$0xff]  ;;  %2598 = vmatpush.msra.mxu1 %v2534_v56  ;;  %v2513_v56 = vld [vmem:[%s12945_s6 + $0x1f8] sm:$0xff] }
 0x53f   :  { %2342 = vmatmul.f32.vlgmr.msrb.gmra.mxu1 %v9213_v6  ;;  %2362 = vmatmul.f32.vlgmr.msra.gmra.mxu2 %v9213_v6 }
 0x540   :  { %2382 = vmatmul.f32.vlgmr.msra.gmra.mxu3 %v9213_v6  ;;  %2650 = vmatpush.msrb.mxu2 %v2454_v0 }
 0x541   :  { %2726 = vmatpush.msra.mxu0 %v2473_v37  ;;  %2680 = vmatpush.msrb.mxu3 %v2535_v20  ;;  %v2514_v20 = vld [vmem:[%s12945_s6 + $0x200] sm:$0xff] }
 0x542   :  { %2651 = vmatpush.msrb.mxu2 %v2451_v48  ;;  %v5396_v48 = vld [vmem:[%s12945_s6 + $0x378] sm:$0xff]  ;;  %2599 = vmatpush.msra.mxu1 %v2531_v57  ;;  %v2510_v57 = vld [vmem:[%s12945_s6 + $0x1e0] sm:$0xff] }
 0x543   :  { %2727 = vmatpush.msra.mxu0 %v2470_v42  ;;  %v318_v42 = vadd.f32 %v13943_v62, %v13887_v27 }
 0x544   :  { %2579 = vmatmul.f32.gmra.mxu0 %v13939_v43  ;;  %2930 = vmatpush.msra.mxu2 %v5426_v34  ;;  %v2532_v34 = vld [vmem:[%s12945_s6 + $0x290] sm:$0xff] }
 0x545   :  { %2728 = vmatpush.msra.mxu0 %v2467_v41  ;;  %2681 = vmatpush.msrb.mxu3 %v2532_v34  ;;  %v2511_v34 = vld [vmem:[%s12945_s6 + $0x1e8] sm:$0xff] }
 0x546   :  { %2931 = vmatpush.msra.mxu2 %v5423_v8  ;;  %v5393_v8 = vld [vmem:[%s12945_s6 + $0x360] sm:$0xff]  ;;  %2600 = vmatpush.msra.mxu1 %v2528_v35 }
 0x547   :  { %2652 = vmatmul.f32.vlgmr.msrb.gmra.mxu2 %v13935_v59  ;;  %2729 = vmatpush.msra.mxu0 %v2464_v49 }
 0x548   :  { %2932 = vmatpush.msra.mxu2 %v5420_v11  ;;  %v2529_v11 = vld [vmem:[%s12945_s6 + $0x278] sm:$0xff] }
 0x549   :  { %2682 = vmatpush.msrb.mxu3 %v2529_v11  ;;  %2730 = vmatpush.msra.mxu0 %v2461_v1  ;;  %v2507_v11 = vld [vmem:[%s12945_s6 + $0x1c8] sm:$0xff]  ;;  %v2508_v1 = vld [vmem:[%s12945_s6 + $0x1d0] sm:$0xff] }
 0x54a   :  { %2933 = vmatpush.msra.mxu2 %v5417_v38  ;;  %v5390_v38 = vld [vmem:[%s12945_s6 + $0x348] sm:$0xff] }
 0x54b   :  { %2731 = vmatpush.msra.mxu0 %v2458_v30 }
 0x54c   :  { %2582 = vmatmul.f32.gmra.mxu0 %v8547_v26  ;;  %2934 = vmatpush.msra.mxu2 %v5414_v39 }
 0x54d   :  { %2732 = vmatpush.msra.mxu0 %v2455_v31 }
 0x54e   :  { %2935 = vmatpush.msra.mxu2 %v5411_v29 }
 0x54f   :  { %2655 = vmatmul.f32.gmra.mxu2 %v13937_v16  ;;  %2733 = vmatpush.msra.mxu0 %v2452_v50 }
 0x550   :  { %2936 = vmatpush.msra.mxu2 %v5408_v3 }
 0x552   :  { %2937 = vmatpush.msra.mxu2 %v5405_v44 }
 0x554   :  { %2585 = vmatmul.f32.gmra.mxu0 %v9010_v61  ;;  %2938 = vmatpush.msra.mxu2 %v5402_v32 }
 0x556   :  { %2939 = vmatpush.msra.mxu2 %v5399_v2 }
 0x557   :  { %2658 = vmatmul.f32.gmra.mxu2 %v13938_v33 }
 0x558   :  { %2940 = vmatpush.msra.mxu2 %v5396_v48 }
 0x55a   :  { %2941 = vmatpush.msra.mxu2 %v5393_v8 }
 0x55c   :  { %2588 = vmatmul.f32.gmra.mxu0 %v9155_v63  ;;  %2942 = vmatpush.msra.mxu2 %v5390_v38 }
 0x55f   :  { %2661 = vmatmul.f32.gmra.mxu2 %v13939_v43 }
 0x567   :  { %2664 = vmatmul.f32.gmra.mxu2 %v8547_v26 }
 0x56f   :  { %2667 = vmatmul.f32.gmra.mxu2 %v9010_v61 }
 0x577   :  { %2670 = vmatmul.f32.gmra.mxu2 %v9155_v63 }
 0x5a6   :  { %v2232_v36 = vpop.f32.mrf.mxu2  ;;  %v2252_v47 = vpop.f32.mrf.mxu3 }
 0x5a7   :  { %v2233_v51 = vadd.f32 %v2232_v36, %v13928_v21  ;;  %v2253_v13 = vadd.f32 %v2252_v47, %v13929_v58  ;;  %v2525_v36 = vld [vmem:[%s12945_s6 + $0x258] sm:$0xff]  ;;  %v2526_v47 = vld [vmem:[%s12945_s6 + $0x260] sm:$0xff] }
 0x5a8   :  { %2601 = vmatpush.msra.mxu1 %v2525_v36  ;;  %2683 = vmatpush.msrb.mxu3 %v2526_v47 }
 0x5a9   :  { %v2275_v19 = vadd.f32 %v2233_v51, %v135_v46  ;;  %v2295_v54 = vadd.f32 %v2253_v13, %v176_v12  ;;  %v5387_v46 = vld [vmem:[%s12945_s6 + $0x330] sm:$0xff]  ;;  %v2522_v51 = vld [vmem:[%s12945_s6 + $0x240] sm:$0xff]  ;;  %v2523_v13 = vld [vmem:[%s12945_s6 + $0x248] sm:$0xff] }
 0x5aa   :  { %2943 = vmatpush.msra.mxu2 %v5387_v46  ;;  %2602 = vmatpush.msra.mxu1 %v2522_v51 }
 0x5ab   :  { %v5377_v21 = vmul.f32 -1.442695, %v2275_v19  ;;  %v5378_v58 = vmul.f32 -1.442695, %v2295_v54  ;;  %v13942_v19 = vld [vmem:[#allocation27_spill] sm:$0xff]  ;;  %2684 = vmatpush.msrb.mxu3 %v2523_v13 }
 0x5ac   :  { %v277_v54 = vadd.f32 %v13942_v19, %v13931_v7  ;;  %v2520_v7 = vld [vmem:[%s12945_s6 + $0x230] sm:$0xff]  ;;  %2603 = vmatpush.msra.mxu1 %v2519_v53  ;;  %v2501_v19 = vld [vmem:[%s12945_s6 + $0x198] sm:$0xff]  ;;  %v5421_v13 = vld [vmem:[%s12945_s6 + $0x440] sm:$0xff] }
 0x5ad   :  { %5661 = vpow2.f32 %v5377_v21  ;;  %v5384_v21 = vld [vmem:[%s12945_s6 + $0x318] sm:$0xff]  ;;  %2685 = vmatpush.msrb.mxu3 %v2520_v7  ;;  %v5471_v53 = vld [vmem:[%s12945_s6 + $0x5d0] sm:$0xff] }
 0x5ae   :  { %5663 = vpow2.f32 %v5378_v58  ;;  %2944 = vmatpush.msra.mxu2 %v5384_v21  ;;  %2604 = vmatpush.msra.mxu1 %v2516_v14  ;;  %v5474_v21 = vld [vmem:[%s12945_s6 + $0x5e8] sm:$0xff] }
 0x5af   :  { %2686 = vmatpush.msrb.mxu3 %v2517_v4  ;;  %v2545_v4 = vld [vmem:[%s12945_s6 + $0x2f8] sm:$0xff] }
 0x5b0   :  { %2945 = vmatpush.msra.mxu2 %v5381_v15  ;;  %2605 = vmatpush.msra.mxu1 %v2513_v56 }
 0x5b1   :  { %2687 = vmatpush.msrb.mxu3 %v2514_v20 }
 0x5b2   :  { %2606 = vmatpush.msra.mxu1 %v2510_v57 }
 0x5b3   :  { %v5662_v10 = vpop.eup %5661  ;;  %2688 = vmatpush.msrb.mxu3 %v2511_v34 }
 0x5b4   :  { %v5664_v24 = vpop.eup %5663  ;;  %v9319_v22 = vadd.f32 1.0, %v5662_v10  ;;  %v2272_v10 = vpop.f32.mrf.mxu0  ;;  %2607 = vmatpush.msra.mxu1 %v2507_v11  ;;  %v5462_v11 = vld [vmem:[%s12945_s6 + $0x588] sm:$0xff] }
 0x5b5   :  { %v9330_v0 = vadd.f32 1.0, %v5664_v24  ;;  %v2273_v49 = vadd.f32 %v2272_v10, %v7328_v28  ;;  %v13944_v28 = vld [vmem:[#allocation70_spill] sm:$0xff]  ;;  %2689 = vmatpush.msrb.mxu3 %v2508_v1  ;;  %v5465_v10 = vld [vmem:[%s12945_s6 + $0x5a0] sm:$0xff] }
 0x5b6   :  { %5665 = vrcp.f32 %v9319_v22  ;;  %v2291_v18 = vand.u32 2147483648, %v9319_v22  ;;  %v2289_v32 = vand.u32 2147483647, %v9319_v22  ;;  %vm2285_vm2 = vweird.f32 %v9319_v22 }
 0x5b7   :  { %5667 = vrcp.f32 %v9330_v0  ;;  %v217_v38 = vadd.f32 %v13944_v28, %v7334_v25  ;;  %v2311_v47 = vand.u32 2147483648, %v9330_v0  ;;  %vm2305_vm6 = vweird.f32 %v9330_v0 }
 0x5b8   :  { %v2292_v27 = vor.u32 1.1754944e-38, %v2291_v18  ;;  %vm2290_vm4 = vcmp.eq.f32.partialorder %v2289_v32, 8.507059e+37  ;;  %v2309_v46 = vand.u32 2147483647, %v9330_v0  ;;  %v5468_v32 = vld [vmem:[%s12945_s6 + $0x5b8] sm:$0xff] }
 0x5ba   :  { %vm2310_vm8 = vcmp.eq.f32.partialorder %v2309_v46, 8.507059e+37 }
 0x5bc   :  { %v5666_v9 = vpop.eup %5665  ;;  %v2343_v12 = vpop.f32.mrf.mxu1 }
 0x5bd   :  { %v9382_v39 = vpop.eup %5667  ;;  %v2281_v23 = vmul.f32 %v5666_v9, %v9319_v22  ;;  %v2344_v29 = vadd.f32 %v2343_v12, %v13933_v45  ;;  %vm2286_vm1 = vweird.f32 %v5666_v9  ;;  %v2505_v12 = vld [vmem:[%s12945_s6 + $0x1b8] sm:$0xff] }
 0x5be   :  { %v2301_v58 = vmul.f32 %v9382_v39, %v9330_v0  ;;  %vm2287_vm3 = vmor %vm2285_vm2, %vm2286_vm1  ;;  %vm2306_vm5 = vweird.f32 %v9382_v39  ;;  %2690 = vmatpush.msrb.mxu3 %v2505_v12  ;;  %v5424_v12 = vld [vmem:[%s12945_s6 + $0x458] sm:$0xff] }
 0x5bf   :  { %v2282_v45 = vsub.f32 1.0, %v2281_v23  ;;  %v2386_v3 = vadd.f32 %v2344_v29, %v277_v54  ;;  %vm9453_vm7 = vmor %vm2305_vm6, %vm2306_vm5  ;;  %v2502_v54 = vld [vmem:[%s12945_s6 + $0x1a0] sm:$0xff]  ;;  %v2312_v23 = vor.u32 1.1754944e-38, %v2311_v47  ;;  %v5428_v47 = vld [vmem:[%s12945_s6 + $0x478] sm:$0xff] }
 0x5c0   :  { %v2302_v44 = vsub.f32 1.0, %v2301_v58  ;;  %2691 = vmatpush.msrb.mxu3 %v2502_v54  ;;  %v2498_v29 = vld [vmem:[%s12945_s6 + $0x180] sm:$0xff]  ;;  %3094 = vmatpush.msrb.mxu2 %v5428_v47  ;;  %v5438_v47 = vld [vmem:[%s12945_s6 + $0x4c8] sm:$0xff] }
 0x5c1   :  { %v2283_v37 = vmul.f32 %v5666_v9, %v2282_v45  ;;  %v5379_v40 = vmul.f32 -1.442695, %v2386_v3 }
 0x5c2   :  { %v2303_v2 = vmul.f32 %v9382_v39, %v2302_v44  ;;  %v2363_v24 = vpop.f32.mrf.mxu2 }
 0x5c3   :  { %v2284_v41 = vadd.f32 %v5666_v9, %v2283_v37  ;;  %5669 = vpow2.f32 %v5379_v40  ;;  %v2364_v48 = vadd.f32 %v2363_v24, %v13889_v52  ;;  %v2383_v20 = vpop.f32.mrf.mxu3 }
 0x5c4   :  { %v2304_v35 = vadd.f32 %v9382_v39, %v2303_v2  ;;  %v2384_v34 = vadd.f32 %v2383_v20, %v7364_v60  ;;  %v5447_v20 = vld [vmem:[%s12945_s6 + $0x510] sm:$0xff] }
 0x5c5   :  { %v2288_v8 = vsel %vm2287_vm3, %v5666_v9, %v2284_v41  ;;  %v2406_v22 = vadd.f32 %v2364_v48, %v318_v42  ;;  %v2504_v9 = vld [vmem:[%s12945_s6 + $0x1b0] sm:$0xff]  ;;  %v2542_v42 = vld [vmem:[%s12945_s6 + $0x2e0] sm:$0xff] }
 0x5c6   :  { %v2293_v52 = vsel %vm2290_vm4, %v2292_v27, %v2288_v8  ;;  %2608 = vmatpush.msra.mxu1 %v2504_v9  ;;  %v2308_v0 = vsel %vm9453_vm7, %v9382_v39, %v2304_v35  ;;  %v2499_v39 = vld [vmem:[%s12945_s6 + $0x188] sm:$0xff]  ;;  %v5459_v9 = vld [vmem:[%s12945_s6 + $0x570] sm:$0xff] }
 0x5c7   :  { %v2315_v36 = vmul.f32 %v2293_v52, %v2273_v49  ;;  %v5380_v30 = vmul.f32 -1.442695, %v2406_v22  ;;  %v2313_v58 = vsel %vm2310_vm8, %v2312_v23, %v2308_v0  ;;  %2692 = vmatpush.msrb.mxu3 %v2499_v39  ;;  %v2539_v8 = vld [vmem:[%s12945_s6 + $0x2c8] sm:$0xff]  ;;  %v13948_v22 = vld [vmem:[#allocation71_spill] sm:$0xff]  ;;  %v5419_v39 = vld [vmem:[%s12945_s6 + $0x430] sm:$0xff] }
 0x5c8   :  { %2609 = vmatpush.msra.mxu1 %v2501_v19  ;;  %v2318_v45 = vsub.f32 1.0, %v2313_v58  ;;  %v2320_v44 = vmul.f32 %v2313_v58, %v9155_v63  ;;  %v359_v52 = vadd.f32 %v13948_v22, %v7375_v55  ;;  %v2536_v55 = vld [vmem:[%s12945_s6 + $0x2b0] sm:$0xff]  ;;  %v5422_v19 = vld [vmem:[%s12945_s6 + $0x448] sm:$0xff]  ;;  %v5456_v23 = vld [vmem:[%s12945_s6 + $0x558] sm:$0xff] }
 0x5c9   :  { %v5670_v51 = vpop.eup %5669  ;;  %v2316_v25 = vadd.f32 %v2315_v36, %v217_v38  ;;  %5671 = vpow2.f32 %v5380_v30  ;;  %2971 = vmatpush.msra.mxu3 %v5474_v21  ;;  %v5427_v36 = vld [vmem:[%s12945_s6 + $0x470] sm:$0xff]  ;;  %v2530_v58 = vld [vmem:[%s12945_s6 + $0x280] sm:$0xff] }
 0x5ca   :  { %v2390_v31 = vadd.f32 1.0, %v5670_v51  ;;  %2610 = vmatpush.msra.mxu1 %v2498_v29  ;;  %3012 = vmatpush.msrb.mxu0 %v5427_v36  ;;  %v5425_v51 = vld [vmem:[%s12945_s6 + $0x460] sm:$0xff]  ;;  %v5418_v29 = vld [vmem:[%s12945_s6 + $0x428] sm:$0xff]  ;;  %v5395_v22 = vld [vmem:[%s12945_s6 + $0x370] sm:$0xff] }
 0x5cb   :  { %5673 = vtanh.f32 %v2316_v25  ;;  %2972 = vmatpush.msra.mxu3 %v5471_v53  ;;  %v2533_v25 = vld [vmem:[%s12945_s6 + $0x298] sm:$0xff]  ;;  %3095 = vmatpush.msrb.mxu2 %v5425_v51  ;;  %v5415_v53 = vld [vmem:[%s12945_s6 + $0x410] sm:$0xff]  ;;  %v5386_v36 = vld [vmem:[%s12945_s6 + $0x328] sm:$0xff] }
 0x5cc   :  { %5675 = vrcp.f32 %v2390_v31  ;;  %2759 = vmatpush.msrb.mxu1 %v2545_v4  ;;  %v2402_v62 = vand.u32 2147483648, %v2390_v31  ;;  %v2400_v24 = vand.u32 2147483647, %v2390_v31  ;;  %vm2396_vm10 = vweird.f32 %v2390_v31  ;;  %3013 = vmatpush.msrb.mxu0 %v5424_v12  ;;  %v5435_v12 = vld [vmem:[%s12945_s6 + $0x4b0] sm:$0xff]  ;;  %v2509_v51 = vld [vmem:[%s12945_s6 + $0x1d8] sm:$0xff] }
 0x5cd   :  { %2973 = vmatpush.msra.mxu3 %v5468_v32  ;;  %3096 = vmatpush.msrb.mxu2 %v5422_v19  ;;  %v5409_v32 = vld [vmem:[%s12945_s6 + $0x3e0] sm:$0xff]  ;;  %v2500_v19 = vld [vmem:[%s12945_s6 + $0x190] sm:$0xff] }
 0x5ce   :  { %2760 = vmatpush.msrb.mxu1 %v2542_v42  ;;  %v2403_v27 = vor.u32 1.1754944e-38, %v2402_v62  ;;  %vm2401_vm12 = vcmp.eq.f32.partialorder %v2400_v24, 8.507059e+37  ;;  %3014 = vmatpush.msrb.mxu0 %v5421_v13  ;;  %v5450_v62 = vld [vmem:[%s12945_s6 + $0x528] sm:$0xff]  ;;  %v5403_v24 = vld [vmem:[%s12945_s6 + $0x3b0] sm:$0xff]  ;;  %v2506_v13 = vld [vmem:[%s12945_s6 + $0x1c0] sm:$0xff] }
 0x5cf   :  { %v5672_v7 = vpop.eup %5671  ;;  %2974 = vmatpush.msra.mxu3 %v5465_v10  ;;  %3097 = vmatpush.msrb.mxu2 %v5419_v39  ;;  %v5406_v42 = vld [vmem:[%s12945_s6 + $0x3c8] sm:$0xff]  ;;  %v5407_v10 = vld [vmem:[%s12945_s6 + $0x3d0] sm:$0xff] }
 0x5d0   :  { %v9478_v3 = vadd.f32 1.0, %v5672_v7  ;;  %2761 = vmatpush.msrb.mxu1 %v2539_v8  ;;  %3015 = vmatpush.msrb.mxu0 %v5418_v29  ;;  %v5416_v7 = vld [vmem:[%s12945_s6 + $0x418] sm:$0xff]  ;;  %v5394_v8 = vld [vmem:[%s12945_s6 + $0x368] sm:$0xff]  ;;  %v5473_v29 = vld [vmem:[%s12945_s6 + $0x5e0] sm:$0xff] }
 0x5d1   :  { %v5674_v50 = vpop.eup %5673  ;;  %2975 = vmatpush.msra.mxu3 %v5462_v11  ;;  %3098 = vmatpush.msrb.mxu2 %v5416_v7  ;;  %v5441_v11 = vld [vmem:[%s12945_s6 + $0x4e0] sm:$0xff]  ;;  %v5475_v39 = vld [vmem:[%s12945_s6 + $0x5f0] sm:$0xff]  ;;  %v9723_v7 = vpop.f32.mrf.mxu2 }
 0x5d2   :  { %v5676_v15 = vpop.eup %5675  ;;  %v2319_v18 = vmul.f32 %v5674_v50, %v2318_v45  ;;  %5677 = vrcp.f32 %v9478_v3  ;;  %v2422_v28 = vand.u32 2147483648, %v9478_v3  ;;  %v2420_v38 = vand.u32 2147483647, %v9478_v3  ;;  %2762 = vmatpush.msrb.mxu1 %v2536_v55  ;;  %v5412_v50 = vld [vmem:[%s12945_s6 + $0x3f8] sm:$0xff]  ;;  %3016 = vmatpush.msrb.mxu0 %v5415_v53  ;;  %v5385_v55 = vld [vmem:[%s12945_s6 + $0x320] sm:$0xff]  ;;  %v5470_v53 = vld [vmem:[%s12945_s6 + $0x5c8] sm:$0xff] }
 0x5d3   :  { %v2392_v14 = vmul.f32 %v5676_v15, %v2390_v31  ;;  %vm2397_vm9 = vweird.f32 %v5676_v15  ;;  %vm2416_vm14 = vweird.f32 %v9478_v3  ;;  %2976 = vmatpush.msra.mxu3 %v5459_v9  ;;  %v2512_v9 = vld [vmem:[%s12945_s6 + $0x1f0] sm:$0xff]  ;;  %13953 = vst [vmem:[#allocation52_spill] sm:$0xff] %v9723_v7 }
 0x5d4   :  { %v9485_v37 = vadd.f32 %v2320_v44, %v2319_v18  ;;  %vm2398_vm11 = vmor %vm2396_vm10, %vm2397_vm9  ;;  %v2423_v0 = vor.u32 1.1754944e-38, %v2422_v28  ;;  %2763 = vmatpush.msrb.mxu1 %v2533_v25  ;;  %vm2421_vm0 = vcmp.eq.f32.partialorder %v2420_v38, 8.507059e+37  ;;  %v5413_v44 = vld [vmem:[%s12945_s6 + $0x400] sm:$0xff]  ;;  %3017 = vmatpush.msrb.mxu0 %v5412_v50  ;;  %v2515_v28 = vld [vmem:[%s12945_s6 + $0x208] sm:$0xff] }
 0x5d5   :  { %v2393_v40 = vsub.f32 1.0, %v2392_v14  ;;  %2977 = vmatpush.msra.mxu3 %v5456_v23  ;;  %v2527_v14 = vld [vmem:[%s12945_s6 + $0x268] sm:$0xff]  ;;  %3099 = vmatpush.msrb.mxu2 %v5413_v44  ;;  %v5389_v38 = vld [vmem:[%s12945_s6 + $0x340] sm:$0xff]  ;;  %v5432_v25 = vld [vmem:[%s12945_s6 + $0x498] sm:$0xff] }
 0x5d6   :  { %13947 = vst [vmem:[#allocation32_spill] sm:$0xff] %v9485_v37  ;;  %2591 = vmatmul.f32.gmra.mxu0 %v9485_v37  ;;  %2673 = vmatmul.f32.gmra.mxu2 %v9485_v37  ;;  %v5476_v23 = vld [vmem:[%s12945_s6 + $0x5f8] sm:$0xff]  ;;  %v5469_v50 = vld [vmem:[%s12945_s6 + $0x5c0] sm:$0xff] }
 0x5d7   :  { %v2394_v2 = vmul.f32 %v5676_v15, %v2393_v40  ;;  %2764 = vmatpush.msrb.mxu1 %v2530_v58  ;;  %v5410_v40 = vld [vmem:[%s12945_s6 + $0x3e8] sm:$0xff]  ;;  %3018 = vmatpush.msrb.mxu0 %v5409_v32  ;;  %v5464_v44 = vld [vmem:[%s12945_s6 + $0x598] sm:$0xff] }
 0x5d8   :  { %v5678_v56 = vpop.eup %5677  ;;  %3100 = vmatpush.msrb.mxu2 %v5410_v40  ;;  %v13952_v58 = vld [vmem:[#allocation41_spill] sm:$0xff]  ;;  %v5461_v40 = vld [vmem:[%s12945_s6 + $0x580] sm:$0xff] }
 0x5d9   :  { %v2412_v41 = vmul.f32 %v5678_v56, %v9478_v3  ;;  %v2395_v48 = vadd.f32 %v5676_v15, %v2394_v2  ;;  %vm2417_vm13 = vweird.f32 %v5678_v56  ;;  %v5453_v3 = vld [vmem:[%s12945_s6 + $0x540] sm:$0xff]  ;;  %2765 = vmatpush.msrb.mxu1 %v2527_v14  ;;  %v2524_v2 = vld [vmem:[%s12945_s6 + $0x250] sm:$0xff]  ;;  %3019 = vmatpush.msrb.mxu0 %v5406_v42  ;;  %v5466_v14 = vld [vmem:[%s12945_s6 + $0x5a8] sm:$0xff] }
 0x5da   :  { %vm2418_vm15 = vmor %vm2416_vm14, %vm2417_vm13  ;;  %2978 = vmatpush.msra.mxu3 %v5453_v3  ;;  %3101 = vmatpush.msrb.mxu2 %v5407_v10  ;;  %v5467_v3 = vld [vmem:[%s12945_s6 + $0x5b0] sm:$0xff]  ;;  %v9751_v32 = vld [vmem:[%s12946_s7 + $0x168] sm:$0xff] }
 0x5db   :  { %v2413_v57 = vsub.f32 1.0, %v2412_v41  ;;  %v2399_v49 = vsel %vm2398_vm11, %v5676_v15, %v2395_v48  ;;  %2766 = vmatpush.msrb.mxu1 %v2524_v2  ;;  %v5400_v41 = vld [vmem:[%s12945_s6 + $0x398] sm:$0xff]  ;;  %3020 = vmatpush.msrb.mxu0 %v5403_v24  ;;  %v5463_v42 = vld [vmem:[%s12945_s6 + $0x590] sm:$0xff] }
 0x5dc   :  { %v2404_v35 = vsel %vm2401_vm12, %v2403_v27, %v2399_v49  ;;  %2979 = vmatpush.msra.mxu3 %v5450_v62  ;;  %v2521_v48 = vld [vmem:[%s12945_s6 + $0x238] sm:$0xff]  ;;  %v5401_v27 = vld [vmem:[%s12945_s6 + $0x3a0] sm:$0xff]  ;;  %v9756_v62 = vpop.f32.mrf.mxu2  ;;  %v13958_v24 = vld [vmem:[#allocation17_spill] sm:$0xff] }
 0x5dd   :  { %v2414_v1 = vmul.f32 %v5678_v56, %v2413_v57  ;;  %v2426_v60 = vmul.f32 %v2404_v35, %v2384_v34  ;;  %2767 = vmatpush.msrb.mxu1 %v2521_v48  ;;  %v5397_v57 = vld [vmem:[%s12945_s6 + $0x380] sm:$0xff]  ;;  %3021 = vmatpush.msrb.mxu0 %v5400_v41  ;;  %v5398_v34 = vld [vmem:[%s12945_s6 + $0x388] sm:$0xff]  ;;  %v5444_v49 = vld [vmem:[%s12945_s6 + $0x4f8] sm:$0xff]  ;;  %13956 = vst [vmem:[#allocation25_spill] sm:$0xff] %v9756_v62 }
 0x5de   :  { %2734 = vmatmul.f32.vlgmr.msra.gmra.mxu0 %v13935_v59  ;;  %2946 = vmatmul.f32.vlgmr.msra.gmra.mxu2 %v13935_v59  ;;  %v5391_v35 = vld [vmem:[%s12945_s6 + $0x350] sm:$0xff]  ;;  %v9770_v10 = vld [vmem:[%s12946_s7 + $0x138] sm:$0xff]  ;;  %v9795_v48 = vld [vmem:[%s12946_s7 + $0x108] sm:$0xff] }
 0x5df   :  { %v2415_v30 = vadd.f32 %v5678_v56, %v2414_v1  ;;  %v2427_v46 = vadd.f32 %v2426_v60, %v359_v52  ;;  %2980 = vmatpush.msra.mxu3 %v5447_v20  ;;  %3022 = vmatpush.msrb.mxu0 %v5397_v57  ;;  %v2518_v52 = vld [vmem:[%s12945_s6 + $0x220] sm:$0xff]  ;;  %v5392_v1 = vld [vmem:[%s12945_s6 + $0x358] sm:$0xff]  ;;  %13960 = vst [vmem:[#allocation49_spill] sm:$0xff] %v9795_v48 }
 0x5e0   :  { %2768 = vmatpush.msrb.mxu1 %v2518_v52  ;;  %v5388_v60 = vld [vmem:[%s12945_s6 + $0x338] sm:$0xff]  ;;  %v9784_v20 = vld [vmem:[%s12946_s7 + $0x120] sm:$0xff] }
 0x5e1   :  { %v2419_v31 = vsel %vm2418_vm15, %v5678_v56, %v2415_v30  ;;  %5679 = vtanh.f32 %v2427_v46  ;;  %v5404_v56 = vld [vmem:[%s12945_s6 + $0x3b8] sm:$0xff]  ;;  %2981 = vmatpush.msra.mxu3 %v5444_v49  ;;  %3023 = vmatpush.msrb.mxu0 %v5394_v8  ;;  %v5382_v30 = vld [vmem:[%s12945_s6 + $0x308] sm:$0xff]  ;;  %v5383_v46 = vld [vmem:[%s12945_s6 + $0x310] sm:$0xff]  ;;  %13959 = vst [vmem:[#allocation72_spill] sm:$0xff] %v9784_v20 }
 0x5e2   :  { %v2424_v54 = vsel %vm2421_vm0, %v2423_v0, %v2419_v31  ;;  %3102 = vmatpush.msrb.mxu2 %v5404_v56  ;;  %2769 = vmatpush.msrb.mxu1 %v2515_v28  ;;  %v5429_v0 = vld [vmem:[%s12945_s6 + $0x480] sm:$0xff]  ;;  %v2503_v31 = vld [vmem:[%s12945_s6 + $0x1a8] sm:$0xff]  ;;  %v5460_v41 = vld [vmem:[%s12945_s6 + $0x578] sm:$0xff] }
 0x5e3   :  { %v2429_v21 = vsub.f32 1.0, %v2424_v54  ;;  %v2431_v18 = vmul.f32 %v2424_v54, %v9213_v6  ;;  %2982 = vmatpush.msra.mxu3 %v5441_v11  ;;  %3024 = vmatpush.msrb.mxu0 %v5391_v35  ;;  %v13950_v54 = vld [vmem:[#allocation63_spill] sm:$0xff]  ;;  %v5458_v56 = vld [vmem:[%s12945_s6 + $0x568] sm:$0xff] }
 0x5e4   :  { %3103 = vmatpush.msrb.mxu2 %v5401_v27  ;;  %2770 = vmatpush.msrb.mxu1 %v2512_v9  ;;  %v5455_v27 = vld [vmem:[%s12945_s6 + $0x550] sm:$0xff]  ;;  %v5457_v57 = vld [vmem:[%s12945_s6 + $0x560] sm:$0xff]  ;;  %v9814_v49 = vpop.f32.mrf.mxu2  ;;  %v5452_v8 = vld [vmem:[%s12945_s6 + $0x538] sm:$0xff] }
 0x5e5   :  { %3025 = vmatpush.msrb.mxu0 %v5388_v60  ;;  %2983 = vmatpush.msra.mxu3 %v5438_v47  ;;  %13963 = vst [vmem:[#allocation91_spill] sm:$0xff] %v9814_v49  ;;  %v5454_v35 = vld [vmem:[%s12945_s6 + $0x548] sm:$0xff]  ;;  %v5451_v60 = vld [vmem:[%s12945_s6 + $0x530] sm:$0xff]  ;;  %v5448_v47 = vld [vmem:[%s12945_s6 + $0x518] sm:$0xff] }
 0x5e6   :  { %2737 = vmatmul.f32.gmra.mxu0 %v13937_v16  ;;  %2949 = vmatmul.f32.gmra.mxu2 %v13937_v16  ;;  %v9839_v11 = vld [vmem:[%s12946_s7 + $0xa8] sm:$0xff]  ;;  %v10175_v49 = vld [vmem:[%s12946_s7 + $0x240] sm:$0xff] }
 0x5e7   :  { %v5680_v45 = vpop.eup %5679  ;;  %3104 = vmatpush.msrb.mxu2 %v5398_v34  ;;  %3026 = vmatpush.msrb.mxu0 %v5385_v55  ;;  %v9812_v34 = vld [vmem:[%s12946_s7 + $0xd8] sm:$0xff]  ;;  %13966 = vst [vmem:[#allocation94_spill] sm:$0xff] %v9839_v11  ;;  %v5446_v55 = vld [vmem:[%s12945_s6 + $0x508] sm:$0xff]  ;;  %v10188_v62 = vld [vmem:[%s12946_s7 + $0x2c0] sm:$0xff] }
 0x5e8   :  { %v2430_v15 = vmul.f32 %v5680_v45, %v2429_v21  ;;  %2984 = vmatpush.msra.mxu3 %v5435_v12  ;;  %2771 = vmatpush.msrb.mxu1 %v2509_v51  ;;  %v9716_v21 = vpop.f32.mrf.mxu0  ;;  %v5472_v45 = vld [vmem:[%s12945_s6 + $0x5d8] sm:$0xff]  ;;  %13962 = vst [vmem:[#allocation90_spill] sm:$0xff] %v9812_v34  ;;  %v9898_v12 = vld [vmem:[%s12946_s7 + $0x30] sm:$0xff]  ;;  %v9903_v51 = vld [vmem:[%s12946_s7 + $0x160] sm:$0xff] }
 0x5e9   :  { %3105 = vmatpush.msrb.mxu2 %v5395_v22  ;;  %3027 = vmatpush.msrb.mxu0 %v5382_v30  ;;  %13951 = vst [vmem:[#allocation43_spill] sm:$0xff] %v9716_v21  ;;  %v9826_v22 = vld [vmem:[%s12946_s7 + $0xc0] sm:$0xff]  ;;  %v9880_v30 = vld [vmem:[%s12946_s7 + $0x48] sm:$0xff]  ;;  %v10231_v21 = vld [vmem:[%s12946_s7 + $0x278] sm:$0xff] }
 0x5ea   :  { %v9574_v4 = vadd.f32 %v2431_v18, %v2430_v15  ;;  %2985 = vmatpush.msra.mxu3 %v5432_v25  ;;  %2772 = vmatpush.msrb.mxu1 %v2506_v13  ;;  %v13955_v18 = vld [vmem:[#allocation82_spill] sm:$0xff]  ;;  %13964 = vst [vmem:[#allocation92_spill] sm:$0xff] %v9826_v22  ;;  %v5445_v25 = vld [vmem:[%s12945_s6 + $0x500] sm:$0xff] }
 0x5eb   :  { %3106 = vmatpush.msrb.mxu2 %v5392_v1  ;;  %3207 = vmatpush.msra.mxu0 %v9751_v32  ;;  %v5449_v1 = vld [vmem:[%s12945_s6 + $0x520] sm:$0xff]  ;;  %13971 = vst [vmem:[#allocation99_spill] sm:$0xff] %v9880_v30  ;;  %v9915_v13 = vld [vmem:[%s12946_s7 + $0x18] sm:$0xff] }
 0x5ec   :  { %13949 = vst [vmem:[#allocation39_spill] sm:$0xff] %v9574_v4  ;;  %2611 = vmatmul.f32.vlgmr.msra.gmra.mxu1 %v9574_v4  ;;  %2693 = vmatmul.f32.vlgmr.msrb.gmra.mxu3 %v9574_v4  ;;  %v9851_v28 = vpop.f32.mrf.mxu2 }
 0x5ed   :  { %3107 = vmatpush.msrb.mxu2 %v5389_v38  ;;  %2986 = vmatpush.msra.mxu3 %v5429_v0  ;;  %13968 = vst [vmem:[#allocation96_spill] sm:$0xff] %v9851_v28  ;;  %v9861_v38 = vld [vmem:[%s12946_s7 + $0x78] sm:$0xff]  ;;  %v9920_v0 = vld [vmem:[%s12946_s7 + $0x148] sm:$0xff] }
 0x5ee   :  { %2740 = vmatmul.f32.gmra.mxu0 %v13938_v33  ;;  %2952 = vmatmul.f32.gmra.mxu2 %v13938_v33  ;;  %13969 = vst [vmem:[#allocation97_spill] sm:$0xff] %v9861_v38  ;;  %v10165_v28 = vld [vmem:[%s12946_s7 + $0xf8] sm:$0xff] }
 0x5ef   :  { %3108 = vmatpush.msrb.mxu2 %v5386_v36  ;;  %2773 = vmatpush.msrb.mxu1 %v2503_v31  ;;  %v9870_v36 = vld [vmem:[%s12946_s7 + $0x60] sm:$0xff]  ;;  %13973 = vst [vmem:[#allocation101_spill] sm:$0xff] %v9898_v12 }
 0x5f0   :  { %3135 = vmatpush.msrb.mxu3 %v5476_v23  ;;  %v9736_v15 = vpop.f32.mrf.mxu0  ;;  %13970 = vst [vmem:[#allocation98_spill] sm:$0xff] %v9870_v36  ;;  %v9931_v23 = vld [vmem:[%s12946_s7] sm:$0xff] }
 0x5f1   :  { %3109 = vmatpush.msrb.mxu2 %v5383_v46  ;;  %2774 = vmatpush.msrb.mxu1 %v2500_v19  ;;  %13954 = vst [vmem:[#allocation18_spill] sm:$0xff] %v9736_v15  ;;  %v9885_v46 = vld [vmem:[%s12946_s7 + $0x178] sm:$0xff] }
 0x5f2   :  { %3136 = vmatpush.msrb.mxu3 %v5473_v29  ;;  %13974 = vst [vmem:[#allocation102_spill] sm:$0xff] %v9915_v13  ;;  %v5440_v19 = vld [vmem:[%s12945_s6 + $0x4d8] sm:$0xff]  ;;  %v9938_v29 = vld [vmem:[%s12946_s7 + $0x130] sm:$0xff] }
 0x5f3   :  { %3053 = vmatpush.msra.mxu1 %v5475_v39  ;;  %3247 = vmatpush.msra.mxu2 %v9885_v46  ;;  %13976 = vst [vmem:[#allocation104_spill] sm:$0xff] %v9931_v23  ;;  %v5442_v39 = vld [vmem:[%s12945_s6 + $0x4e8] sm:$0xff] }
 0x5f4   :  { %2614 = vmatmul.f32.gmra.mxu1 %v9213_v6  ;;  %2696 = vmatmul.f32.gmra.mxu3 %v9213_v6  ;;  %v9922_v31 = vpop.f32.mrf.mxu2  ;;  %13993 = vst [vmem:[#allocation121_spill] sm:$0xff] %v10175_v49 }
 0x5f5   :  { %3137 = vmatpush.msrb.mxu3 %v5470_v53  ;;  %3054 = vmatpush.msra.mxu1 %v5472_v45  ;;  %13975 = vst [vmem:[#allocation103_spill] sm:$0xff] %v9922_v31  ;;  %v5437_v53 = vld [vmem:[%s12945_s6 + $0x4c0] sm:$0xff]  ;;  %v10146_v31 = vld [vmem:[%s12946_s7 + $0x110] sm:$0xff] }
 0x5f6   :  { %2743 = vmatmul.f32.gmra.mxu0 %v13939_v43  ;;  %2955 = vmatmul.f32.gmra.mxu2 %v13939_v43  ;;  %13999 = vst [vmem:[#allocation83_spill] sm:$0xff] %v10231_v21 }
 0x5f7   :  { %3138 = vmatpush.msrb.mxu3 %v5467_v3  ;;  %3055 = vmatpush.msra.mxu1 %v5469_v50  ;;  %v9959_v3 = vld [vmem:[%s12946_s7 + $0x100] sm:$0xff]  ;;  %v5439_v50 = vld [vmem:[%s12945_s6 + $0x4d0] sm:$0xff] }
 0x5f8   :  { %v9773_v2 = vpop.f32.mrf.mxu0  ;;  %3248 = vmatpush.msra.mxu2 %v9903_v51 }
 0x5f9   :  { %3139 = vmatpush.msrb.mxu3 %v5464_v44  ;;  %3056 = vmatpush.msra.mxu1 %v5466_v14  ;;  %13957 = vst [vmem:[#allocation8_spill] sm:$0xff] %v9773_v2  ;;  %v9970_v44 = vld [vmem:[%s12946_s7 + $0xe8] sm:$0xff] }
 0x5fa   :  { %3249 = vmatpush.msra.mxu2 %v9920_v0  ;;  %v5434_v14 = vld [vmem:[%s12945_s6 + $0x4a8] sm:$0xff] }
 0x5fb   :  { %3140 = vmatpush.msrb.mxu3 %v5461_v40  ;;  %3057 = vmatpush.msra.mxu1 %v5463_v42  ;;  %v5436_v40 = vld [vmem:[%s12945_s6 + $0x4b8] sm:$0xff]  ;;  %v9984_v42 = vld [vmem:[%s12946_s7 + $0xd0] sm:$0xff] }
 0x5fc   :  { %2617 = vmatmul.f32.gmra.mxu1 %v9047_v17  ;;  %2699 = vmatmul.f32.gmra.mxu3 %v9047_v17 }
 0x5fd   :  { %3141 = vmatpush.msrb.mxu3 %v5458_v56  ;;  %3058 = vmatpush.msra.mxu1 %v5460_v41  ;;  %v5431_v56 = vld [vmem:[%s12945_s6 + $0x490] sm:$0xff]  ;;  %v9989_v41 = vpop.f32.mrf.mxu2 }
 0x5fe   :  { %2746 = vmatmul.f32.gmra.mxu0 %v8547_v26  ;;  %2958 = vmatmul.f32.gmra.mxu2 %v8547_v26  ;;  %13978 = vst [vmem:[#allocation106_spill] sm:$0xff] %v9989_v41 }
 0x5ff   :  { %3142 = vmatpush.msrb.mxu3 %v5455_v27  ;;  %3059 = vmatpush.msra.mxu1 %v5457_v57  ;;  %v9995_v27 = vld [vmem:[%s12946_s7 + $0xb8] sm:$0xff]  ;;  %v10004_v57 = vld [vmem:[%s12946_s7 + $0xa0] sm:$0xff] }
 0x600   :  { %v9828_v52 = vpop.f32.mrf.mxu0  ;;  %3250 = vmatpush.msra.mxu2 %v9938_v29 }
 0x601   :  { %13965 = vst [vmem:[#allocation93_spill] sm:$0xff] %v9828_v52  ;;  %3143 = vmatpush.msrb.mxu3 %v5452_v8  ;;  %3060 = vmatpush.msra.mxu1 %v5454_v35  ;;  %v5430_v35 = vld [vmem:[%s12945_s6 + $0x488] sm:$0xff]  ;;  %v10170_v52 = vld [vmem:[%s12946_s7 + $0x2d8] sm:$0xff] }
 0x602   :  { %13992 = vst [vmem:[#allocation120_spill] sm:$0xff] %v10170_v52 }
 0x603   :  { %3144 = vmatpush.msrb.mxu3 %v5449_v1  ;;  %3061 = vmatpush.msra.mxu1 %v5451_v60  ;;  %v10017_v1 = vld [vmem:[%s12946_s7 + $0x88] sm:$0xff] }
 0x604   :  { %2620 = vmatmul.f32.gmra.mxu1 %v8795_v5  ;;  %2702 = vmatmul.f32.gmra.mxu3 %v8795_v5  ;;  %v10022_v60 = vld [vmem:[%s12946_s7 + $0x2e8] sm:$0xff] }
 0x605   :  { %3145 = vmatpush.msrb.mxu3 %v5446_v55  ;;  %3062 = vmatpush.msra.mxu1 %v5448_v47  ;;  %v10030_v55 = vld [vmem:[%s12946_s7 + $0x70] sm:$0xff]  ;;  %v10037_v47 = vld [vmem:[%s12946_s7 + $0x58] sm:$0xff] }
 0x606   :  { %2749 = vmatmul.f32.gmra.mxu0 %v9010_v61  ;;  %2961 = vmatmul.f32.gmra.mxu2 %v9010_v61 }
 0x607   :  { %3063 = vmatpush.msra.mxu1 %v5445_v25  ;;  %v10051_v25 = vld [vmem:[%s12946_s7 + $0x40] sm:$0xff] }
 0x608   :  { %v9887_v9 = vpop.f32.mrf.mxu0 }
 0x609   :  { %13972 = vst [vmem:[#allocation100_spill] sm:$0xff] %v9887_v9  ;;  %3064 = vmatpush.msra.mxu1 %v5442_v39  ;;  %v10061_v39 = vld [vmem:[%s12946_s7 + $0x170] sm:$0xff] }
 0x60a   :  { %v10156_v9 = vld [vmem:[%s12946_s7 + $0x2f0] sm:$0xff] }
 0x60b   :  { %3065 = vmatpush.msra.mxu1 %v5439_v50  ;;  %v10071_v50 = vld [vmem:[%s12946_s7 + $0x2b8] sm:$0xff]  ;;  %13991 = vst [vmem:[#allocation119_spill] sm:$0xff] %v10156_v9 }
 0x60c   :  { %2623 = vmatmul.f32.gmra.mxu1 %v13950_v54  ;;  %2705 = vmatmul.f32.gmra.mxu3 %v13950_v54  ;;  %13982 = vst [vmem:[#allocation110_spill] sm:$0xff] %v10071_v50 }
 0x60d   :  { %3066 = vmatpush.msra.mxu1 %v5436_v40  ;;  %v10087_v40 = vld [vmem:[%s12946_s7 + $0x158] sm:$0xff] }
 0x60e   :  { %2752 = vmatmul.f32.gmra.mxu0 %v9155_v63  ;;  %2964 = vmatmul.f32.gmra.mxu2 %v9155_v63 }
 0x610   :  { %v9953_v45 = vpop.f32.mrf.mxu0 }
 0x611   :  { %13977 = vst [vmem:[#allocation105_spill] sm:$0xff] %v9953_v45 }
 0x614   :  { %2626 = vmatmul.f32.gmra.mxu1 %v13952_v58  ;;  %2708 = vmatmul.f32.gmra.mxu3 %v13952_v58 }
 0x616   :  { %2755 = vmatmul.f32.gmra.mxu0 %v9485_v37  ;;  %2967 = vmatmul.f32.gmra.mxu2 %v9485_v37 }
 0x618   :  { %v10006_v8 = vpop.f32.mrf.mxu0 }
 0x619   :  { %13979 = vst [vmem:[#allocation107_spill] sm:$0xff] %v10006_v8  ;;  %v10132_v8 = vld [vmem:[%s12946_s7 + $0x270] sm:$0xff] }
 0x61a   :  { %13987 = vst [vmem:[#allocation115_spill] sm:$0xff] %v10132_v8 }
 0x61c   :  { %2629 = vmatmul.f32.gmra.mxu1 %v13955_v18  ;;  %2711 = vmatmul.f32.gmra.mxu3 %v13955_v18 }
 0x61e   :  { %3028 = vmatmul.f32.vlgmr.msrb.gmra.mxu0 %v13935_v59  ;;  %3110 = vmatmul.f32.vlgmr.msrb.gmra.mxu2 %v13935_v59  ;;  %v9762_v59 = vld [vmem:[%s12946_s7 + $0x150] sm:$0xff] }
 0x61f   :  { %3208 = vmatpush.msra.mxu0 %v9762_v59 }
 0x621   :  { %3209 = vmatpush.msra.mxu0 %v9770_v10 }
 0x623   :  { %3210 = vmatpush.msra.mxu0 %v9784_v20 }
 0x624   :  { %2632 = vmatmul.f32.gmra.mxu1 %v13958_v24  ;;  %2714 = vmatmul.f32.gmra.mxu3 %v13958_v24 }
 0x625   :  { %3211 = vmatpush.msra.mxu0 %v9795_v48 }
 0x626   :  { %3031 = vmatmul.f32.gmra.mxu0 %v13937_v16  ;;  %3113 = vmatmul.f32.gmra.mxu2 %v13937_v16  ;;  %v9804_v16 = vld [vmem:[%s12946_s7 + $0xf0] sm:$0xff] }
 0x627   :  { %13961 = vst [vmem:[#allocation86_spill] sm:$0xff] %v9804_v16  ;;  %3212 = vmatpush.msra.mxu0 %v9804_v16 }
 0x629   :  { %3213 = vmatpush.msra.mxu0 %v9812_v34 }
 0x62b   :  { %3214 = vmatpush.msra.mxu0 %v9826_v22 }
 0x62c   :  { %2775 = vmatmul.f32.vlgmr.msrb.gmra.mxu1 %v9574_v4  ;;  %2987 = vmatmul.f32.vlgmr.msra.gmra.mxu3 %v9574_v4 }
 0x62d   :  { %3215 = vmatpush.msra.mxu0 %v9839_v11 }
 0x62e   :  { %3034 = vmatmul.f32.gmra.mxu0 %v13938_v33  ;;  %3116 = vmatmul.f32.gmra.mxu2 %v13938_v33  ;;  %v9848_v33 = vld [vmem:[%s12946_s7 + $0x90] sm:$0xff] }
 0x62f   :  { %13967 = vst [vmem:[#allocation95_spill] sm:$0xff] %v9848_v33  ;;  %3216 = vmatpush.msra.mxu0 %v9848_v33 }
 0x631   :  { %3217 = vmatpush.msra.mxu0 %v9861_v38 }
 0x633   :  { %3218 = vmatpush.msra.mxu0 %v9870_v36 }
 0x634   :  { %2778 = vmatmul.f32.gmra.mxu1 %v9213_v6  ;;  %2990 = vmatmul.f32.gmra.mxu3 %v9213_v6 }
 0x635   :  { %3219 = vmatpush.msra.mxu0 %v9880_v30 }
 0x636   :  { %3037 = vmatmul.f32.gmra.mxu0 %v13939_v43  ;;  %3119 = vmatmul.f32.gmra.mxu2 %v13939_v43  ;;  %v5443_v43 = vld [vmem:[%s12945_s6 + $0x4f0] sm:$0xff] }
 0x637   :  { %3146 = vmatpush.msrb.mxu3 %v5443_v43  ;;  %3220 = vmatpush.msra.mxu0 %v9898_v12  ;;  %v10042_v43 = vld [vmem:[%s12946_s7 + $0x2d0] sm:$0xff] }
 0x639   :  { %3221 = vmatpush.msra.mxu0 %v9915_v13  ;;  %3147 = vmatpush.msrb.mxu3 %v5440_v19 }
 0x63b   :  { %3222 = vmatpush.msra.mxu0 %v9931_v23  ;;  %3148 = vmatpush.msrb.mxu3 %v5437_v53  ;;  %v10066_v53 = vld [vmem:[%s12946_s7 + $0x28] sm:$0xff] }
 0x63c   :  { %2781 = vmatmul.f32.gmra.mxu1 %v9047_v17  ;;  %2993 = vmatmul.f32.gmra.mxu3 %v9047_v17 }
 0x63d   :  { %3149 = vmatpush.msrb.mxu3 %v5434_v14  ;;  %v10080_v14 = vld [vmem:[%s12946_s7 + $0x10] sm:$0xff]  ;;  %3338 = vmatpush.msrb.mxu0 %v10156_v9 }
 0x63e   :  { %3040 = vmatmul.f32.gmra.mxu0 %v8547_v26  ;;  %3122 = vmatmul.f32.gmra.mxu2 %v8547_v26  ;;  %v9951_v26 = vld [vmem:[%s12946_s7 + $0x118] sm:$0xff] }
 0x63f   :  { %3251 = vmatpush.msra.mxu2 %v9951_v26  ;;  %3150 = vmatpush.msrb.mxu3 %v5431_v56  ;;  %v10092_v56 = vld [vmem:[%s12946_s7 + $0x2a0] sm:$0xff] }
 0x640   :  { %13983 = vst [vmem:[#allocation111_spill] sm:$0xff] %v10092_v56  ;;  %3339 = vmatpush.msrb.mxu0 %v10170_v52 }
 0x641   :  { %3252 = vmatpush.msra.mxu2 %v9959_v3  ;;  %3318 = vmatpush.msra.mxu3 %v10022_v60 }
 0x642   :  { %3340 = vmatpush.msrb.mxu0 %v10188_v62 }
 0x643   :  { %3253 = vmatpush.msra.mxu2 %v9970_v44  ;;  %3319 = vmatpush.msra.mxu3 %v10042_v43 }
 0x644   :  { %2784 = vmatmul.f32.gmra.mxu1 %v8795_v5  ;;  %2996 = vmatmul.f32.gmra.mxu3 %v8795_v5 }
 0x645   :  { %3254 = vmatpush.msra.mxu2 %v9984_v42  ;;  %3320 = vmatpush.msra.mxu3 %v10071_v50 }
 0x646   :  { %3043 = vmatmul.f32.gmra.mxu0 %v9010_v61  ;;  %3125 = vmatmul.f32.gmra.mxu2 %v9010_v61  ;;  %v5433_v61 = vld [vmem:[%s12945_s6 + $0x4a0] sm:$0xff] }
 0x647   :  { %3255 = vmatpush.msra.mxu2 %v9995_v27  ;;  %3067 = vmatpush.msra.mxu1 %v5433_v61 }
 0x648   :  { %3321 = vmatpush.msra.mxu3 %v10092_v56  ;;  %v10418_v56 = vld [vmem:[%s12946_s7 + $0x38] sm:$0xff] }
 0x649   :  { %3256 = vmatpush.msra.mxu2 %v10004_v57  ;;  %3068 = vmatpush.msra.mxu1 %v5430_v35 }
 0x64b   :  { %3257 = vmatpush.msra.mxu2 %v10017_v1  ;;  %3227 = vmatpush.msrb.mxu1 %v10061_v39 }
 0x64c   :  { %2787 = vmatmul.f32.gmra.mxu1 %v13950_v54  ;;  %2999 = vmatmul.f32.gmra.mxu3 %v13950_v54 }
 0x64d   :  { %3258 = vmatpush.msra.mxu2 %v10030_v55  ;;  %3228 = vmatpush.msrb.mxu1 %v10087_v40 }
 0x64e   :  { %3046 = vmatmul.f32.gmra.mxu0 %v9155_v63  ;;  %3128 = vmatmul.f32.gmra.mxu2 %v9155_v63  ;;  %v10044_v63 = vpop.f32.mrf.mxu2 }
 0x64f   :  { %13980 = vst [vmem:[#allocation108_spill] sm:$0xff] %v10044_v63  ;;  %3259 = vmatpush.msra.mxu2 %v10037_v47  ;;  %v10127_v63 = vld [vmem:[%s12946_s7 + $0x128] sm:$0xff] }
 0x651   :  { %3260 = vmatpush.msra.mxu2 %v10051_v25 }
 0x653   :  { %v10053_v19 = vpop.f32.mrf.mxu0  ;;  %3261 = vmatpush.msra.mxu2 %v10066_v53 }
 0x654   :  { %13981 = vst [vmem:[#allocation109_spill] sm:$0xff] %v10053_v19  ;;  %2790 = vmatmul.f32.gmra.mxu1 %v13952_v58  ;;  %3002 = vmatmul.f32.gmra.mxu3 %v13952_v58  ;;  %v10105_v19 = vld [vmem:[%s12942_s1 + $0x10] sm:$0xff] }
 0x655   :  { %3262 = vmatpush.msra.mxu2 %v10080_v14 }
 0x656   :  { %3049 = vmatmul.f32.gmra.mxu0 %v9485_v37  ;;  %3131 = vmatmul.f32.gmra.mxu2 %v9485_v37  ;;  %v10117_v37 = vld [vmem:[%s12946_s7 + $0x288] sm:$0xff] }
 0x657   :  { %3429 = vmatpush.msrb.mxu2 %v9751_v32  ;;  %13986 = vst [vmem:[#allocation114_spill] sm:$0xff] %v10117_v37  ;;  %3322 = vmatpush.msra.mxu3 %v10117_v37  ;;  %v10371_v37 = vld [vmem:[%s12946_s7 + $0x1a0] sm:$0xff] }
 0x658   :  { %14023 = vst [vmem:[#allocation35_spill] sm:$0xff] %v10371_v37 }
 0x659   :  { %v10094_v61 = vpop.f32.mrf.mxu2  ;;  %3430 = vmatpush.msrb.mxu2 %v9762_v59  ;;  %3323 = vmatpush.msra.mxu3 %v10132_v8  ;;  %v10310_v8 = vld [vmem:[%s12946_s7 + $0x200] sm:$0xff] }
 0x65a   :  { %13984 = vst [vmem:[#allocation112_spill] sm:$0xff] %v10094_v61  ;;  %v10112_v61 = vld [vmem:[%s12946_s7 + $0x140] sm:$0xff] }
 0x65b   :  { %v10100_v35 = vpop.f32.mrf.mxu0  ;;  %3229 = vmatpush.msrb.mxu1 %v10112_v61  ;;  %3431 = vmatpush.msrb.mxu2 %v9770_v10  ;;  %14013 = vst [vmem:[#allocation62_spill] sm:$0xff] %v10310_v8 }
 0x65c   :  { %13985 = vst [vmem:[#allocation113_spill] sm:$0xff] %v10100_v35  ;;  %2793 = vmatmul.f32.gmra.mxu1 %v13955_v18  ;;  %3005 = vmatmul.f32.gmra.mxu3 %v13955_v18  ;;  %v10204_v35 = vld [vmem:[%s12946_s7 + $0x2a8] sm:$0xff] }
 0x65d   :  { %3230 = vmatpush.msrb.mxu1 %v10127_v63  ;;  %3432 = vmatpush.msrb.mxu2 %v9784_v20 }
 0x65e   :  { %3223 = vmatmul.f32.vlgmr.msra.gmra.mxu0 %v10105_v19  ;;  %3263 = vmatmul.f32.vlgmr.msra.gmra.mxu2 %v10105_v19 }
 0x65f   :  { %3231 = vmatpush.msrb.mxu1 %v10146_v31  ;;  %3433 = vmatpush.msrb.mxu2 %v9795_v48 }
 0x660   :  { %3341 = vmatpush.msrb.mxu0 %v10204_v35 }
 0x661   :  { %v10134_v41 = vpop.f32.mrf.mxu2  ;;  %3232 = vmatpush.msrb.mxu1 %v10165_v28  ;;  %3434 = vmatpush.msrb.mxu2 %v9804_v16 }
 0x662   :  { %13988 = vst [vmem:[#allocation116_spill] sm:$0xff] %v10134_v41  ;;  %v10151_v41 = vld [vmem:[%s12946_s7 + $0x258] sm:$0xff] }
 0x663   :  { %v10139_v45 = vpop.f32.mrf.mxu0  ;;  %13990 = vst [vmem:[#allocation118_spill] sm:$0xff] %v10151_v41  ;;  %3324 = vmatpush.msra.mxu3 %v10151_v41  ;;  %3435 = vmatpush.msrb.mxu2 %v9812_v34  ;;  %v10249_v41 = vld [vmem:[%s12946_s7 + $0x260] sm:$0xff] }
 0x664   :  { %13989 = vst [vmem:[#allocation117_spill] sm:$0xff] %v10139_v45  ;;  %2796 = vmatmul.f32.gmra.mxu1 %v13958_v24  ;;  %3008 = vmatmul.f32.gmra.mxu3 %v13958_v24 }
 0x665   :  { %3325 = vmatpush.msra.mxu3 %v10175_v49  ;;  %3436 = vmatpush.msrb.mxu2 %v9826_v22  ;;  %14003 = vst [vmem:[#allocation84_spill] sm:$0xff] %v10249_v41  ;;  %v10292_v22 = vld [vmem:[%s12946_s7 + $0x218] sm:$0xff] }
 0x666   :  { %14009 = vst [vmem:[#allocation21_spill] sm:$0xff] %v10292_v22 }
 0x667   :  { %3437 = vmatpush.msrb.mxu2 %v9839_v11  ;;  %v10287_v11 = vld [vmem:[%s12946_s7 + $0x98] sm:$0xff] }
 0x669   :  { %v10178_v2 = vpop.f32.mrf.mxu1  ;;  %v10180_v45 = vpop.f32.mrf.mxu2  ;;  %3438 = vmatpush.msrb.mxu2 %v9848_v33 }
 0x66a   :  { %13994 = vst [vmem:[#allocation23_spill] sm:$0xff] %v10178_v2  ;;  %v10226_v2 = vld [vmem:[%s12946_s7 + $0xc8] sm:$0xff] }
 0x66b   :  { %13995 = vst [vmem:[#allocation53_spill] sm:$0xff] %v10180_v45  ;;  %v10191_v15 = vpop.f32.mrf.mxu0  ;;  %v10199_v45 = vld [vmem:[%s12946_s7 + $0xe0] sm:$0xff]  ;;  %3439 = vmatpush.msrb.mxu2 %v9861_v38  ;;  %v10353_v38 = vld [vmem:[%s12946_s7 + $0x1b8] sm:$0xff] }
 0x66c   :  { %13996 = vst [vmem:[#allocation69_spill] sm:$0xff] %v10191_v15  ;;  %3069 = vmatmul.f32.vlgmr.msra.gmra.mxu1 %v9574_v4  ;;  %3151 = vmatmul.f32.vlgmr.msrb.gmra.mxu3 %v9574_v4  ;;  %v10209_v15 = vld [vmem:[%s12946_s7 + $0x228] sm:$0xff]  ;;  %v10216_v4 = vld [vmem:[%s12946_s7 + $0x290] sm:$0xff] }
 0x66d   :  { %13997 = vst [vmem:[#allocation31_spill] sm:$0xff] %v10209_v15  ;;  %3233 = vmatpush.msrb.mxu1 %v10199_v45  ;;  %3326 = vmatpush.msra.mxu3 %v10209_v15  ;;  %v10236_v15 = vld [vmem:[%s12946_s7 + $0x210] sm:$0xff] }
 0x66e   :  { %3342 = vmatpush.msrb.mxu0 %v10216_v4  ;;  %14000 = vst [vmem:[#allocation16_spill] sm:$0xff] %v10236_v15  ;;  %3440 = vmatpush.msrb.mxu2 %v9870_v36  ;;  %v10348_v36 = vld [vmem:[%s12946_s7 + $0x68] sm:$0xff] }
 0x66f   :  { %v10220_v7 = vpop.f32.mrf.mxu3  ;;  %3234 = vmatpush.msrb.mxu1 %v10226_v2  ;;  %3327 = vmatpush.msra.mxu3 %v10236_v15  ;;  %14019 = vst [vmem:[#allocation20_spill] sm:$0xff] %v10353_v38 }
 0x670   :  { %13998 = vst [vmem:[#allocation40_spill] sm:$0xff] %v10220_v7  ;;  %3343 = vmatpush.msrb.mxu0 %v10231_v21  ;;  %3441 = vmatpush.msrb.mxu2 %v9880_v30 }
 0x671   :  { %v10239_v7 = vpop.f32.mrf.mxu1  ;;  %v10241_v49 = vpop.f32.mrf.mxu2 }
 0x672   :  { %14001 = vst [vmem:[#allocation42_spill] sm:$0xff] %v10239_v7  ;;  %3344 = vmatpush.msrb.mxu0 %v10249_v41  ;;  %v10265_v7 = vld [vmem:[%s12946_s7 + $0x248] sm:$0xff]  ;;  %3442 = vmatpush.msrb.mxu2 %v9898_v12 }
 0x673   :  { %14002 = vst [vmem:[#allocation45_spill] sm:$0xff] %v10241_v49  ;;  %v10252_v34 = vpop.f32.mrf.mxu0  ;;  %v10260_v49 = vld [vmem:[%s12946_s7 + $0xb0] sm:$0xff] }
 0x674   :  { %14004 = vst [vmem:[#allocation65_spill] sm:$0xff] %v10252_v34  ;;  %3072 = vmatmul.f32.gmra.mxu1 %v9213_v6  ;;  %3154 = vmatmul.f32.gmra.mxu3 %v9213_v6  ;;  %v10270_v34 = vld [vmem:[%s12946_s7 + $0x1f8] sm:$0xff]  ;;  %v10277_v6 = vld [vmem:[%s12946_s7 + $0x230] sm:$0xff] }
 0x675   :  { %14005 = vst [vmem:[#allocation85_spill] sm:$0xff] %v10265_v7  ;;  %3235 = vmatpush.msrb.mxu1 %v10260_v49  ;;  %3345 = vmatpush.msrb.mxu0 %v10265_v7 }
 0x676   :  { %14006 = vst [vmem:[#allocation51_spill] sm:$0xff] %v10270_v34  ;;  %3328 = vmatpush.msra.mxu3 %v10270_v34  ;;  %v10297_v34 = vld [vmem:[%s12946_s7 + $0x1e0] sm:$0xff]  ;;  %3443 = vmatpush.msrb.mxu2 %v9915_v13 }
 0x677   :  { %14007 = vst [vmem:[#allocation81_spill] sm:$0xff] %v10277_v6  ;;  %v10281_v15 = vpop.f32.mrf.mxu3  ;;  %3346 = vmatpush.msrb.mxu0 %v10277_v6  ;;  %3236 = vmatpush.msrb.mxu1 %v10287_v11  ;;  %v10397_v13 = vld [vmem:[%s12947_s8 + $0x1] ss:$2 sm:$0x7] }
 0x678   :  { %14008 = vst [vmem:[#allocation87_spill] sm:$0xff] %v10281_v15  ;;  %3329 = vmatpush.msra.mxu3 %v10297_v34  ;;  %3444 = vmatpush.msrb.mxu2 %v9931_v23  ;;  %v10413_v12 = vperm.slane %v10397_v13, 0 }
 0x679   :  { %14010 = vst [vmem:[#allocation58_spill] sm:$0xff] %v10297_v34  ;;  %v10300_v15 = vpop.f32.mrf.mxu1  ;;  %v10302_v33 = vpop.f32.mrf.mxu2  ;;  %3347 = vmatpush.msrb.mxu0 %v10292_v22 }
 0x67a   :  { %14011 = vst [vmem:[#allocation61_spill] sm:$0xff] %v10300_v15  ;;  %v10326_v15 = vld [vmem:[%s12946_s7 + $0x1e8] sm:$0xff]  ;;  %3560 = vmatpush.msra.mxu2 %v10156_v9  ;;  %v10444_v9 = vld [vmem:[%s12946_s7 + $0x20] sm:$0xff] }
 0x67b   :  { %14012 = vst [vmem:[#allocation59_spill] sm:$0xff] %v10302_v33  ;;  %v10313_v16 = vpop.f32.mrf.mxu0  ;;  %3348 = vmatpush.msrb.mxu0 %v10310_v8  ;;  %v10321_v33 = vld [vmem:[%s12946_s7 + $0x80] sm:$0xff] }
 0x67c   :  { %14014 = vst [vmem:[#allocation12_spill] sm:$0xff] %v10313_v16  ;;  %3075 = vmatmul.f32.gmra.mxu1 %v9047_v17  ;;  %3157 = vmatmul.f32.gmra.mxu3 %v9047_v17  ;;  %v10331_v16 = vld [vmem:[%s12946_s7 + $0x1c8] sm:$0xff]  ;;  %v10338_v17 = vld [vmem:[%s12946_s7 + $0x1d0] sm:$0xff] }
 0x67d   :  { %14015 = vst [vmem:[#allocation10_spill] sm:$0xff] %v10326_v15  ;;  %3237 = vmatpush.msrb.mxu1 %v10321_v33  ;;  %3349 = vmatpush.msrb.mxu0 %v10326_v15 }
 0x67e   :  { %14016 = vst [vmem:[#allocation67_spill] sm:$0xff] %v10331_v16  ;;  %3330 = vmatpush.msra.mxu3 %v10331_v16  ;;  %v10358_v16 = vld [vmem:[%s12946_s7 + $0x1b0] sm:$0xff]  ;;  %3561 = vmatpush.msra.mxu2 %v10170_v52 }
 0x67f   :  { %14017 = vst [vmem:[#allocation89_spill] sm:$0xff] %v10338_v17  ;;  %v10342_v34 = vpop.f32.mrf.mxu3  ;;  %3350 = vmatpush.msrb.mxu0 %v10338_v17  ;;  %3238 = vmatpush.msrb.mxu1 %v10348_v36 }
 0x680   :  { %14018 = vst [vmem:[#allocation13_spill] sm:$0xff] %v10342_v34  ;;  %3331 = vmatpush.msra.mxu3 %v10358_v16  ;;  %3562 = vmatpush.msra.mxu2 %v10188_v62 }
 0x681   :  { %14020 = vst [vmem:[#allocation28_spill] sm:$0xff] %v10358_v16  ;;  %v10361_v34 = vpop.f32.mrf.mxu1  ;;  %v10363_v30 = vpop.f32.mrf.mxu2  ;;  %3351 = vmatpush.msrb.mxu0 %v10353_v38 }
 0x682   :  { %14021 = vst [vmem:[#allocation30_spill] sm:$0xff] %v10361_v34  ;;  %v10387_v34 = vld [vmem:[%s12946_s7 + $0x188] sm:$0xff]  ;;  %3563 = vmatpush.msra.mxu2 %v10204_v35 }
 0x683   :  { %14022 = vst [vmem:[#allocation36_spill] sm:$0xff] %v10363_v30  ;;  %v10374_v48 = vpop.f32.mrf.mxu0  ;;  %3352 = vmatpush.msrb.mxu0 %v10371_v37  ;;  %v10382_v30 = vld [vmem:[%s12946_s7 + $0x50] sm:$0xff] }
 0x684   :  { %14024 = vst [vmem:[#allocation38_spill] sm:$0xff] %v10374_v48  ;;  %3078 = vmatmul.f32.gmra.mxu1 %v8795_v5  ;;  %3160 = vmatmul.f32.gmra.mxu3 %v8795_v5  ;;  %v10392_v48 = vld [vmem:[%s12946_s7 + $0x198] sm:$0xff] }
 0x685   :  { %14025 = vst [vmem:[#allocation34_spill] sm:$0xff] %v10387_v34  ;;  %3239 = vmatpush.msrb.mxu1 %v10382_v30  ;;  %3353 = vmatpush.msrb.mxu0 %v10387_v34  ;;  %v10404_v5 = vld [vmem:[%s12942_s1 + $0x18] sm:$0xff] }
 0x686   :  { %14026 = vst [vmem:[#allocation50_spill] sm:$0xff] %v10392_v48  ;;  %3332 = vmatpush.msra.mxu3 %v10392_v48  ;;  %3354 = vmatmul.f32.vlgmr.msrb.gmra.mxu0 %v10404_v5  ;;  %v10423_v48 = vld [vmem:[%s12946_s7 + $0x180] sm:$0xff] }
 0x687   :  { %v10408_v16 = vpop.f32.mrf.mxu3  ;;  %3469 = vmatpush.msra.mxu0 %v9885_v46  ;;  %14028 = vst [vmem:[#allocation47_spill] sm:$0xff] %v10413_v12  ;;  %v10429_v46 = vld [vmem:[%s12947_s8] ss:$2 sm:$0x7]  ;;  %3240 = vmatpush.msrb.mxu1 %v10418_v56 }
 0x688   :  { %14027 = vst [vmem:[#allocation44_spill] sm:$0xff] %v10408_v16  ;;  %3333 = vmatpush.msra.mxu3 %v10423_v48  ;;  %v10436_v20 = vperm.slane %v10429_v46, 2  ;;  %3564 = vmatpush.msra.mxu2 %v10216_v4 }
 0x689   :  { %14029 = vst [vmem:[#allocation55_spill] sm:$0xff] %v10429_v46  ;;  %v10431_v16 = vpop.f32.mrf.mxu1  ;;  %v2962_v23 = vpop.f32.mrf.mxu2  ;;  %3470 = vmatpush.msra.mxu0 %v9903_v51  ;;  %3241 = vmatpush.msrb.mxu1 %v10444_v9 }
 0x68a   :  { %14030 = vst [vmem:[#allocation37_spill] sm:$0xff] %v10431_v16  ;;  %v10439_v50 = vadd.f32 %v2962_v23, %v10413_v12  ;;  %3449 = vmatpush.msrb.mxu3 %v10061_v39  ;;  %v10458_v23 = vld [vmem:[%s12946_s7 + $0x8] sm:$0xff]  ;;  %3565 = vmatpush.msra.mxu2 %v10231_v21 }
 0x68b   :  { %14031 = vst [vmem:[#allocation15_spill] sm:$0xff] %v10436_v20  ;;  %v2753_v16 = vpop.f32.mrf.mxu0  ;;  %3242 = vmatpush.msrb.mxu1 %v10458_v23  ;;  %3471 = vmatpush.msra.mxu0 %v9920_v0  ;;  %v10478_v0 = vld [vmem:[%s12946_s7 + $0x2f8] sm:$0xff] }
 0x68c   :  { %v10451_v46 = vadd.f32 %v2753_v16, %v10436_v20  ;;  %3081 = vmatmul.f32.gmra.mxu1 %v13950_v54  ;;  %3163 = vmatmul.f32.gmra.mxu3 %v13950_v54 }
 0x68d   :  { %3450 = vmatpush.msrb.mxu3 %v10087_v40  ;;  %3472 = vmatpush.msra.mxu0 %v9938_v29 }
 0x68e   :  { %3358 = vmatpush.msra.mxu1 %v10478_v0  ;;  %3566 = vmatpush.msra.mxu2 %v10249_v41  ;;  %v10540_v41 = vld [vmem:[%s12946_s7 + $0x280] sm:$0xff] }
 0x68f   :  { %v10464_v51 = vpop.f32.mrf.mxu3  ;;  %3451 = vmatpush.msrb.mxu3 %v10112_v61  ;;  %3473 = vmatpush.msra.mxu0 %v9951_v26  ;;  %v10497_v26 = vld [vmem:[%s12946_s7 + $0x2c8] sm:$0xff]  ;;  %14036 = vst [vmem:[#allocation22_spill] sm:$0xff] %v10540_v41 }
 0x690   :  { %14032 = vst [vmem:[#allocation56_spill] sm:$0xff] %v10464_v51  ;;  %v10513_v51 = vld [vmem:[%s12946_s7 + $0x2b0] sm:$0xff]  ;;  %3567 = vmatpush.msra.mxu2 %v10265_v7 }
 0x691   :  { %v10469_v54 = vpop.f32.mrf.mxu1  ;;  %v2965_v16 = vpop.f32.mrf.mxu2  ;;  %3452 = vmatpush.msrb.mxu3 %v10127_v63  ;;  %3474 = vmatpush.msra.mxu0 %v9959_v3  ;;  %v10561_v7 = vld [vmem:[%s12946_s7 + $0x250] sm:$0xff] }
 0x692   :  { %14033 = vst [vmem:[#allocation46_spill] sm:$0xff] %v10469_v54  ;;  %v10473_v52 = vadd.f32 %v2965_v16, %v10413_v12  ;;  %v10492_v16 = vld [vmem:[%s12946_s7 + $0x2e0] sm:$0xff]  ;;  %3568 = vmatpush.msra.mxu2 %v10277_v6  ;;  %v10575_v6 = vld [vmem:[%s12946_s7 + $0x238] sm:$0xff] }
 0x693   :  { %v2756_v29 = vpop.f32.mrf.mxu0  ;;  %3453 = vmatpush.msrb.mxu3 %v10146_v31  ;;  %3359 = vmatpush.msra.mxu1 %v10492_v16  ;;  %14039 = vst [vmem:[#allocation29_spill] sm:$0xff] %v10561_v7 }
 0x694   :  { %v10485_v54 = vadd.f32 %v2756_v29, %v10436_v20  ;;  %3084 = vmatmul.f32.gmra.mxu1 %v13952_v58  ;;  %3166 = vmatmul.f32.gmra.mxu3 %v13952_v58  ;;  %v10508_v58 = vperm.slane %v10397_v13, 1  ;;  %14041 = vst [vmem:[#allocation9_spill] sm:$0xff] %v10575_v6 }
 0x695   :  { %3454 = vmatpush.msrb.mxu3 %v10165_v28  ;;  %3360 = vmatpush.msra.mxu1 %v10497_v26 }
 0x696   :  { %3475 = vmatpush.msra.mxu0 %v9970_v44  ;;  %3569 = vmatpush.msra.mxu2 %v10292_v22 }
 0x697   :  { %v10503_v29 = vpop.f32.mrf.mxu3  ;;  %3455 = vmatpush.msrb.mxu3 %v10199_v45  ;;  %3361 = vmatpush.msra.mxu1 %v10513_v51 }
 0x698   :  { %14034 = vst [vmem:[#allocation57_spill] sm:$0xff] %v10503_v29  ;;  %v10526_v29 = vld [vmem:[%s12946_s7 + $0x298] sm:$0xff]  ;;  %3476 = vmatpush.msra.mxu0 %v9984_v42  ;;  %v10545_v42 = vld [vmem:[%s12946_s7 + $0x268] sm:$0xff]  ;;  %3570 = vmatpush.msra.mxu2 %v10310_v8 }
 0x699   :  { %v10517_v3 = vpop.f32.mrf.mxu1  ;;  %v10519_v21 = vpop.f32.mrf.mxu2  ;;  %3456 = vmatpush.msrb.mxu3 %v10226_v2  ;;  %3362 = vmatpush.msra.mxu1 %v10526_v29  ;;  %14037 = vst [vmem:[#allocation60_spill] sm:$0xff] %v10545_v42 }
 0x69a   :  { %14035 = vst [vmem:[#allocation19_spill] sm:$0xff] %v10517_v3  ;;  %3477 = vmatpush.msra.mxu0 %v9995_v27  ;;  %3571 = vmatpush.msra.mxu2 %v10326_v15  ;;  %v10621_v15 = vld [vmem:[%s12946_s7 + $0x1d8] sm:$0xff] }
 0x69b   :  { %v3029_v44 = vpop.f32.mrf.mxu0  ;;  %3457 = vmatpush.msrb.mxu3 %v10260_v49  ;;  %3363 = vmatpush.msra.mxu1 %v10540_v41  ;;  %14046 = vst [vmem:[#allocation48_spill] sm:$0xff] %v10621_v15 }
 0x69c   :  { %v10533_v3 = vadd.f32 %v3029_v44, %v10508_v58  ;;  %3087 = vmatmul.f32.gmra.mxu1 %v13955_v18  ;;  %3169 = vmatmul.f32.gmra.mxu3 %v13955_v18  ;;  %v10550_v44 = vperm.slane %v10397_v13, 2 }
 0x69d   :  { %3458 = vmatpush.msrb.mxu3 %v10287_v11  ;;  %3364 = vmatpush.msra.mxu1 %v10545_v42 }
 0x69e   :  { %3478 = vmatpush.msra.mxu0 %v10004_v57  ;;  %3572 = vmatpush.msra.mxu2 %v10338_v17 }
 0x69f   :  { %v10554_v18 = vpop.f32.mrf.mxu3  ;;  %3459 = vmatpush.msrb.mxu3 %v10321_v33  ;;  %3365 = vmatpush.msra.mxu1 %v10561_v7 }
 0x6a0   :  { %14038 = vst [vmem:[#allocation24_spill] sm:$0xff] %v10554_v18  ;;  %3479 = vmatpush.msra.mxu0 %v10017_v1  ;;  %v10594_v1 = vld [vmem:[%s12946_s7 + $0x208] sm:$0xff]  ;;  %3573 = vmatpush.msra.mxu2 %v10353_v38  ;;  %v10652_v38 = vld [vmem:[%s12946_s7 + $0x190] sm:$0xff] }
 0x6a1   :  { %v10565_v13 = vpop.f32.mrf.mxu1  ;;  %v3111_v27 = vpop.f32.mrf.mxu2  ;;  %3460 = vmatpush.msrb.mxu3 %v10348_v36  ;;  %3366 = vmatpush.msra.mxu1 %v10575_v6  ;;  %14043 = vst [vmem:[#allocation64_spill] sm:$0xff] %v10594_v1 }
 0x6a2   :  { %14040 = vst [vmem:[#allocation76_spill] sm:$0xff] %v10565_v13  ;;  %v10570_v18 = vadd.f32 %v3111_v27, %v10550_v44  ;;  %v10589_v27 = vld [vmem:[%s12946_s7 + $0x220] sm:$0xff]  ;;  %3480 = vmatpush.msra.mxu0 %v10030_v55  ;;  %3574 = vmatpush.msra.mxu2 %v10371_v37 }
 0x6a3   :  { %v3032_v57 = vpop.f32.mrf.mxu0  ;;  %3461 = vmatpush.msrb.mxu3 %v10382_v30  ;;  %14042 = vst [vmem:[#allocation73_spill] sm:$0xff] %v10589_v27  ;;  %3367 = vmatpush.msra.mxu1 %v10589_v27 }
 0x6a4   :  { %v10582_v13 = vadd.f32 %v3032_v57, %v10508_v58  ;;  %3090 = vmatmul.f32.gmra.mxu1 %v13958_v24  ;;  %3172 = vmatmul.f32.gmra.mxu3 %v13958_v24  ;;  %v10607_v24 = vld [vmem:[%s12946_s7 + $0x1f0] sm:$0xff]  ;;  %14050 = vst [vmem:[#allocation66_spill] sm:$0xff] %v10652_v38 }
 0x6a5   :  { %3462 = vmatpush.msrb.mxu3 %v10418_v56  ;;  %3368 = vmatpush.msra.mxu1 %v10594_v1  ;;  %14045 = vst [vmem:[#allocation75_spill] sm:$0xff] %v10607_v24 }
 0x6a6   :  { %3481 = vmatpush.msra.mxu0 %v10037_v47  ;;  %3575 = vmatpush.msra.mxu2 %v10387_v34  ;;  %v14056_v34 = vld [vmem:[#allocation111_spill] sm:$0xff] }
 0x6a7   :  { %v10600_v57 = vpop.f32.mrf.mxu3  ;;  %3463 = vmatpush.msrb.mxu3 %v10444_v9  ;;  %3369 = vmatpush.msra.mxu1 %v10607_v24 }
 0x6a8   :  { %14044 = vst [vmem:[#allocation74_spill] sm:$0xff] %v10600_v57  ;;  %3482 = vmatpush.msra.mxu0 %v10051_v25  ;;  %v10639_v25 = vld [vmem:[%s12946_s7 + $0x1a8] sm:$0xff] }
 0x6a9   :  { %v10611_v8 = vpop.f32.mrf.mxu1  ;;  %v3114_v55 = vpop.f32.mrf.mxu2  ;;  %3464 = vmatpush.msrb.mxu3 %v10458_v23  ;;  %3370 = vmatpush.msra.mxu1 %v10621_v15  ;;  %14048 = vst [vmem:[#allocation14_spill] sm:$0xff] %v10639_v25 }
 0x6aa   :  { %v10616_v57 = vadd.f32 %v3114_v55, %v10550_v44  ;;  %v10634_v55 = vld [vmem:[%s12946_s7 + $0x1c0] sm:$0xff]  ;;  %3483 = vmatpush.msra.mxu0 %v10066_v53 }
 0x6ab   :  { %v3035_v47 = vpop.f32.mrf.mxu0  ;;  %14047 = vst [vmem:[#allocation79_spill] sm:$0xff] %v10634_v55  ;;  %3371 = vmatpush.msra.mxu1 %v10634_v55 }
 0x6ac   :  { %v10627_v17 = vadd.f32 %v3035_v47, %v10508_v58  ;;  %3243 = vmatmul.f32.vlgmr.msrb.gmra.mxu1 %v10105_v19  ;;  %3334 = vmatmul.f32.vlgmr.msra.gmra.mxu3 %v10404_v5 }
 0x6ad   :  { %3580 = vmatpush.msra.mxu3 %v10478_v0  ;;  %3372 = vmatpush.msra.mxu1 %v10639_v25 }
 0x6ae   :  { %3484 = vmatpush.msra.mxu0 %v10080_v14 }
 0x6af   :  { %v10645_v47 = vpop.f32.mrf.mxu3  ;;  %3581 = vmatpush.msra.mxu3 %v10492_v16  ;;  %3373 = vmatpush.msra.mxu1 %v10652_v38 }
 0x6b0   :  { %14049 = vst [vmem:[#allocation80_spill] sm:$0xff] %v10645_v47  ;;  %3651 = vmatpush.msrb.mxu0 %v9751_v32  ;;  %v14054_v32 = vld [vmem:[#allocation72_spill] sm:$0xff] }
 0x6b1   :  { %v10656_v22 = vpop.f32.mrf.mxu1  ;;  %v3117_v53 = vpop.f32.mrf.mxu2  ;;  %3582 = vmatpush.msra.mxu3 %v10497_v26  ;;  %3540 = vmatpush.msrb.mxu1 %v10022_v60  ;;  %v14053_v60 = vld [vmem:[#allocation110_spill] sm:$0xff] }
 0x6b2   :  { %14051 = vst [vmem:[#allocation88_spill] sm:$0xff] %v10656_v22  ;;  %v10661_v47 = vadd.f32 %v3117_v53, %v10550_v44  ;;  %3652 = vmatpush.msrb.mxu0 %v9762_v59 }
 0x6b3   :  { %v3038_v37 = vpop.f32.mrf.mxu0  ;;  %3583 = vmatpush.msra.mxu3 %v10513_v51  ;;  %3541 = vmatpush.msrb.mxu1 %v10042_v43  ;;  %v14057_v43 = vld [vmem:[#allocation49_spill] sm:$0xff] }
 0x6b4   :  { %v10667_v14 = vadd.f32 %v3038_v37, %v10508_v58  ;;  %3374 = vmatmul.f32.vlgmr.msra.gmra.mxu1 %v10404_v5  ;;  %3653 = vmatpush.msrb.mxu0 %v9770_v10 }
 0x6b5   :  { %3584 = vmatpush.msra.mxu3 %v10526_v29  ;;  %3542 = vmatpush.msrb.mxu1 %v14053_v60 }
 0x6b6   :  { %3654 = vmatpush.msrb.mxu0 %v14054_v32  ;;  %v14059_v32 = vld [vmem:[#allocation86_spill] sm:$0xff] }
 0x6b7   :  { %v10674_v53 = vpop.f32.mrf.mxu3  ;;  %3585 = vmatpush.msra.mxu3 %v10540_v41  ;;  %3543 = vmatpush.msrb.mxu1 %v14056_v34  ;;  %v14061_v34 = vld [vmem:[#allocation90_spill] sm:$0xff]  ;;  %v14085_v41 = vld [vmem:[#allocation104_spill] sm:$0xff] }
 0x6b8   :  { %14052 = vst [vmem:[#allocation77_spill] sm:$0xff] %v10674_v53  ;;  %3655 = vmatpush.msrb.mxu0 %v14057_v43  ;;  %v14058_v53 = vld [vmem:[#allocation114_spill] sm:$0xff] }
 0x6b9   :  { %v10679_v37 = vpop.f32.mrf.mxu1  ;;  %v3120_v22 = vpop.f32.mrf.mxu2  ;;  %3586 = vmatpush.msra.mxu3 %v10545_v42  ;;  %3544 = vmatpush.msrb.mxu1 %v14058_v53  ;;  %v14063_v42 = vld [vmem:[#allocation118_spill] sm:$0xff]  ;;  %v14064_v53 = vld [vmem:[#allocation92_spill] sm:$0xff] }
 0x6ba   :  { %14055 = vst [vmem:[#allocation54_spill] sm:$0xff] %v10679_v37  ;;  %v10684_v59 = vadd.f32 %v3120_v22, %v10550_v44  ;;  %3656 = vmatpush.msrb.mxu0 %v14059_v32  ;;  %v14060_v37 = vld [vmem:[#allocation115_spill] sm:$0xff]  ;;  %v14067_v32 = vld [vmem:[#allocation94_spill] sm:$0xff] }
 0x6bb   :  { %v3041_v10 = vpop.f32.mrf.mxu0  ;;  %3587 = vmatpush.msra.mxu3 %v10561_v7  ;;  %3545 = vmatpush.msrb.mxu1 %v14060_v37  ;;  %v14066_v7 = vld [vmem:[#allocation121_spill] sm:$0xff] }
 0x6bc   :  { %v10690_v60 = vadd.f32 %v3041_v10, %v10508_v58  ;;  %3657 = vmatpush.msrb.mxu0 %v14061_v34 }
 0x6bd   :  { %3588 = vmatpush.msra.mxu3 %v10575_v6  ;;  %3546 = vmatpush.msrb.mxu1 %v14063_v42 }
 0x6be   :  { %3658 = vmatpush.msrb.mxu0 %v14064_v53  ;;  %v14069_v53 = vld [vmem:[#allocation95_spill] sm:$0xff] }
 0x6bf   :  { %v10696_v22 = vpop.f32.mrf.mxu3  ;;  %3589 = vmatpush.msra.mxu3 %v10589_v27  ;;  %3547 = vmatpush.msrb.mxu1 %v14066_v7  ;;  %v14071_v7 = vld [vmem:[#allocation97_spill] sm:$0xff]  ;;  %v14081_v27 = vld [vmem:[#allocation102_spill] sm:$0xff] }
 0x6c0   :  { %14062 = vst [vmem:[#allocation11_spill] sm:$0xff] %v10696_v22  ;;  %3659 = vmatpush.msrb.mxu0 %v14067_v32  ;;  %v14068_v22 = vld [vmem:[#allocation31_spill] sm:$0xff] }
 0x6c1   :  { %v10701_v43 = vpop.f32.mrf.mxu1  ;;  %v3123_v10 = vpop.f32.mrf.mxu2  ;;  %3590 = vmatpush.msra.mxu3 %v10594_v1  ;;  %3548 = vmatpush.msrb.mxu1 %v14068_v22  ;;  %v14073_v1 = vld [vmem:[#allocation51_spill] sm:$0xff]  ;;  %v14074_v22 = vld [vmem:[#allocation98_spill] sm:$0xff] }
 0x6c2   :  { %14065 = vst [vmem:[#allocation78_spill] sm:$0xff] %v10701_v43  ;;  %v10706_v37 = vadd.f32 %v3123_v10, %v10550_v44  ;;  %3660 = vmatpush.msrb.mxu0 %v14069_v53  ;;  %v14070_v43 = vld [vmem:[#allocation16_spill] sm:$0xff] }
 0x6c3   :  { %v3044_v34 = vpop.f32.mrf.mxu0  ;;  %3591 = vmatpush.msra.mxu3 %v10607_v24  ;;  %3549 = vmatpush.msrb.mxu1 %v14070_v43  ;;  %v14076_v24 = vld [vmem:[#allocation58_spill] sm:$0xff] }
 0x6c4   :  { %v10712_v42 = vadd.f32 %v3044_v34, %v10508_v58  ;;  %3661 = vmatpush.msrb.mxu0 %v14071_v7 }
 0x6c5   :  { %3592 = vmatpush.msra.mxu3 %v10621_v15  ;;  %3550 = vmatpush.msrb.mxu1 %v14073_v1  ;;  %v14077_v15 = vld [vmem:[#allocation99_spill] sm:$0xff] }
 0x6c6   :  { %3662 = vmatpush.msrb.mxu0 %v14074_v22  ;;  %v14079_v22 = vld [vmem:[#allocation101_spill] sm:$0xff] }
 0x6c7   :  { %v10718_v10 = vpop.f32.mrf.mxu3  ;;  %3593 = vmatpush.msra.mxu3 %v10634_v55  ;;  %3551 = vmatpush.msrb.mxu1 %v14076_v24 }
 0x6c8   :  { %14072 = vst [vmem:[#allocation26_spill] sm:$0xff] %v10718_v10  ;;  %3663 = vmatpush.msrb.mxu0 %v14077_v15  ;;  %v14078_v10 = vld [vmem:[#allocation67_spill] sm:$0xff]  ;;  %v14084_v15 = vld [vmem:[#allocation38_spill] sm:$0xff] }
 0x6c9   :  { %v10723_v32 = vpop.f32.mrf.mxu1  ;;  %v3126_v34 = vpop.f32.mrf.mxu2  ;;  %3594 = vmatpush.msra.mxu3 %v10639_v25  ;;  %3552 = vmatpush.msrb.mxu1 %v14078_v10  ;;  %v2751_v6 = vadd.f32 %v14084_v15, %v10436_v20 }
 0x6ca   :  { %14075 = vst [vmem:[#allocation68_spill] sm:$0xff] %v10723_v32  ;;  %v10728_v53 = vadd.f32 %v3126_v34, %v10550_v44  ;;  %3664 = vmatpush.msrb.mxu0 %v14079_v22  ;;  %v14080_v32 = vld [vmem:[#allocation28_spill] sm:$0xff]  ;;  %v14083_v34 = vld [vmem:[#allocation50_spill] sm:$0xff] }
 0x6cb   :  { %v3047_v7 = vpop.f32.mrf.mxu0  ;;  %3595 = vmatpush.msra.mxu3 %v10652_v38  ;;  %3553 = vmatpush.msrb.mxu1 %v14080_v32 }
 0x6cc   :  { %v10734_v55 = vadd.f32 %v3047_v7, %v10508_v58  ;;  %3665 = vmatpush.msrb.mxu0 %v14081_v27 }
 0x6cd   :  { %3554 = vmatpush.msrb.mxu1 %v14083_v34 }
 0x6ce   :  { %3666 = vmatpush.msrb.mxu0 %v14085_v41 }
 0x6cf   :  { %v10739_v25 = vpop.f32.mrf.mxu3  ;;  %3555 = vmatpush.msrb.mxu1 %v10423_v48 }
 0x6d0   :  { %14082 = vst [vmem:[#allocation27_spill] sm:$0xff] %v10739_v25 }
 0x6d1   :  { %v2791_v10 = vpop.f32.mrf.mxu1  ;;  %v3129_v38 = vpop.f32.mrf.mxu2  ;;  %3671 = vmatpush.msra.mxu1 %v10061_v39 }
 0x6d2   :  { %v10746_v7 = vadd.f32 %v2791_v10, %v2751_v6  ;;  %v10749_v22 = vadd.f32 %v3129_v38, %v10550_v44 }
 0x6d3   :  { %3672 = vmatpush.msra.mxu1 %v10087_v40 }
 0x6d4   :  { %14086 = vst [vmem:[#allocation33_spill] sm:$0xff] %v10746_v7 }
 0x6d5   :  { %3673 = vmatpush.msra.mxu1 %v10112_v61 }
 0x6d7   :  { %v3003_v27 = vpop.f32.mrf.mxu3  ;;  %3674 = vmatpush.msra.mxu1 %v10127_v63 }
 0x6d8   :  { %v10755_v15 = vadd.f32 %v3003_v27, %v10439_v50 }
 0x6d9   :  { %v2794_v41 = vpop.f32.mrf.mxu1  ;;  %3675 = vmatpush.msra.mxu1 %v10146_v31 }
 0x6da   :  { %14087 = vst [vmem:[#allocation70_spill] sm:$0xff] %v10755_v15  ;;  %v10759_v25 = vadd.f32 %v2794_v41, %v10451_v46  ;;  %v10799_v46 = vld [vmem:[%s12948_s9] ss:$2 sm:$0x7]  ;;  %v11221_v15 = vld [vmem:[%s12946_s7 + $0x98] sm:$0xff] }
 0x6db   :  { %3676 = vmatpush.msra.mxu1 %v10165_v28  ;;  %v10808_v10 = vperm.slane %v10799_v46, 0  ;;  %v14100_v41 = vld [vmem:[#allocation43_spill] sm:$0xff] }
 0x6dc   :  { %14088 = vst [vmem:[#allocation71_spill] sm:$0xff] %v10759_v25 }
 0x6dd   :  { %3677 = vmatpush.msra.mxu1 %v10199_v45  ;;  %v3050_v45 = vpop.f32.mrf.mxu0  ;;  %14098 = vst [vmem:[#allocation114_spill] sm:$0xff] %v10808_v10 }
 0x6df   :  { %v3006_v38 = vpop.f32.mrf.mxu3  ;;  %3678 = vmatpush.msra.mxu1 %v10226_v2 }
 0x6e0   :  { %v10765_v39 = vadd.f32 %v3006_v38, %v10473_v52 }
 0x6e1   :  { %v2797_v50 = vpop.f32.mrf.mxu1  ;;  %3679 = vmatpush.msra.mxu1 %v10260_v49 }
 0x6e2   :  { %v10769_v40 = vadd.f32 %v2797_v50, %v10485_v54 }
 0x6e3   :  { %3680 = vmatpush.msra.mxu1 %v10287_v11 }
 0x6e4   :  { %14089 = vst [vmem:[#allocation63_spill] sm:$0xff] %v10769_v40 }
 0x6e5   :  { %3681 = vmatpush.msra.mxu1 %v10321_v33  ;;  %v3224_v27 = vpop.f32.mrf.mxu0 }
 0x6e6   :  { %v3225_v50 = vadd.f32 %v3224_v27, %v10808_v10 }
 0x6e7   :  { %v10774_v31 = vpop.f32.mrf.mxu3  ;;  %3682 = vmatpush.msra.mxu1 %v10348_v36 }
 0x6e9   :  { %v3070_v28 = vpop.f32.mrf.mxu1  ;;  %3683 = vmatpush.msra.mxu1 %v10382_v30 }
 0x6ea   :  { %v10778_v52 = vadd.f32 %v3070_v28, %v10533_v3  ;;  %v14101_v28 = vld [vmem:[#allocation23_spill] sm:$0xff] }
 0x6eb   :  { %3684 = vmatpush.msra.mxu1 %v10418_v56 }
 0x6ec   :  { %14090 = vst [vmem:[#allocation41_spill] sm:$0xff] %v10778_v52 }
 0x6ed   :  { %3685 = vmatpush.msra.mxu1 %v10444_v9 }
 0x6ef   :  { %v3152_v2 = vpop.f32.mrf.mxu3  ;;  %3686 = vmatpush.msra.mxu1 %v10458_v23 }
 0x6f0   :  { %v10784_v49 = vadd.f32 %v3152_v2, %v10570_v18  ;;  %v14096_v18 = vld [vmem:[#allocation55_spill] sm:$0xff] }
 0x6f1   :  { %v3073_v11 = vpop.f32.mrf.mxu1 }
 0x6f2   :  { %14091 = vst [vmem:[#allocation82_spill] sm:$0xff] %v10784_v49  ;;  %v10788_v33 = vadd.f32 %v3073_v11, %v10582_v13  ;;  %v10805_v13 = vperm.slane %v14096_v18, 0 }
 0x6f4   :  { %14092 = vst [vmem:[#allocation17_spill] sm:$0xff] %v10788_v33  ;;  %v2572_v38 = vadd.f32 %v14100_v41, %v10805_v13 }
 0x6f5   :  { %14097 = vst [vmem:[#allocation49_spill] sm:$0xff] %v10805_v13 }
 0x6f6   :  { %v2613_v2 = vadd.f32 %v14101_v28, %v2572_v38 }
 0x6f7   :  { %v3155_v36 = vpop.f32.mrf.mxu3 }
 0x6f8   :  { %v10791_v63 = vadd.f32 %v3155_v36, %v10616_v57  ;;  %v3267_v36 = vadd.f32 %v3225_v50, %v2613_v2  ;;  %v3051_v2 = vadd.f32 %v3050_v45, %v10508_v58  ;;  %v14110_v58 = vld [vmem:[#allocation52_spill] sm:$0xff] }
 0x6f9   :  { %v3076_v61 = vpop.f32.mrf.mxu1 }
 0x6fa   :  { %14093 = vst [vmem:[#allocation110_spill] sm:$0xff] %v10791_v63  ;;  %v10794_v6 = vadd.f32 %v3076_v61, %v10627_v17  ;;  %v5480_v49 = vmul.f32 -1.442695, %v3267_v36  ;;  %v14111_v63 = vld [vmem:[#allocation40_spill] sm:$0xff] }
 0x6fc   :  { %14094 = vst [vmem:[#allocation72_spill] sm:$0xff] %v10794_v6  ;;  %5681 = vpow2.f32 %v5480_v49 }
 0x6ff   :  { %v3158_v54 = vpop.f32.mrf.mxu3 }
 0x700   :  { %v10802_v3 = vadd.f32 %v3158_v54, %v10661_v47 }
 0x701   :  { %v3079_v57 = vpop.f32.mrf.mxu1 }
 0x702   :  { %14095 = vst [vmem:[#allocation111_spill] sm:$0xff] %v10802_v3  ;;  %v10811_v17 = vadd.f32 %v3079_v57, %v10667_v14  ;;  %v5682_v41 = vpop.eup %5681 }
 0x703   :  { %v3271_v28 = vadd.f32 1.0, %v5682_v41 }
 0x704   :  { %14099 = vst [vmem:[#allocation86_spill] sm:$0xff] %v10811_v17 }
 0x705   :  { %5683 = vrcp.f32 %v3271_v28  ;;  %vm3277_vm2 = vweird.f32 %v3271_v28 }
 0x707   :  { %v3161_v47 = vpop.f32.mrf.mxu3 }
 0x708   :  { %v10818_v11 = vadd.f32 %v3161_v47, %v10684_v59 }
 0x709   :  { %v3082_v61 = vpop.f32.mrf.mxu1 }
 0x70a   :  { %14102 = vst [vmem:[#allocation115_spill] sm:$0xff] %v10818_v11  ;;  %v10821_v54 = vadd.f32 %v3082_v61, %v10690_v60 }
 0x70b   :  { %v5684_v61 = vpop.eup %5683 }
 0x70c   :  { %14103 = vst [vmem:[#allocation90_spill] sm:$0xff] %v10821_v54  ;;  %vm3278_vm1 = vweird.f32 %v5684_v61  ;;  %v11203_v54 = vld [vmem:[%s12946_s7 + $0xa8] sm:$0xff] }
 0x70d   :  { %vm3279_vm3 = vmor %vm3277_vm2, %vm3278_vm1 }
 0x70f   :  { %v3164_v40 = vpop.f32.mrf.mxu3 }
 0x710   :  { %v10824_v14 = vadd.f32 %v3164_v40, %v10706_v37  ;;  %v10838_v37 = vld [vmem:[%s12948_s9 + $0x1] ss:$2 sm:$0x7] }
 0x711   :  { %v3085_v57 = vpop.f32.mrf.mxu1  ;;  %v10841_v40 = vperm.slane %v10838_v37, 1 }
 0x712   :  { %14104 = vst [vmem:[#allocation118_spill] sm:$0xff] %v10824_v14  ;;  %v10827_v27 = vadd.f32 %v3085_v57, %v10712_v42  ;;  %v3355_v42 = vpop.f32.mrf.mxu0  ;;  %v10849_v57 = vperm.slane %v14096_v18, 1  ;;  %v10861_v18 = vperm.slane %v10838_v37, 0 }
 0x713   :  { %14107 = vst [vmem:[#allocation94_spill] sm:$0xff] %v10841_v40 }
 0x714   :  { %14105 = vst [vmem:[#allocation92_spill] sm:$0xff] %v10827_v27  ;;  %v2654_v45 = vadd.f32 %v14110_v58, %v10849_v57  ;;  %v11227_v27 = vld [vmem:[%s12946_s7 + $0x78] sm:$0xff] }
 0x715   :  { %14108 = vst [vmem:[#allocation31_spill] sm:$0xff] %v10849_v57 }
 0x716   :  { %v2695_v25 = vadd.f32 %v14111_v63, %v2654_v45  ;;  %14112 = vst [vmem:[#allocation16_spill] sm:$0xff] %v10861_v18 }
 0x717   :  { %v3167_v38 = vpop.f32.mrf.mxu3 }
 0x718   :  { %v10830_v59 = vadd.f32 %v3167_v38, %v10728_v53  ;;  %v10852_v38 = vperm.slane %v10799_v46, 1 }
 0x719   :  { %v3088_v50 = vpop.f32.mrf.mxu1 }
 0x71a   :  { %14106 = vst [vmem:[#allocation121_spill] sm:$0xff] %v10830_v59  ;;  %v10833_v60 = vadd.f32 %v3088_v50, %v10734_v55  ;;  %v3356_v55 = vadd.f32 %v3355_v42, %v10841_v40  ;;  %v3273_v50 = vmul.f32 %v5684_v61, %v3271_v28  ;;  %v11215_v59 = vld [vmem:[%s12946_s7 + $0x90] sm:$0xff] }
 0x71b   :  { %14109 = vst [vmem:[#allocation95_spill] sm:$0xff] %v10852_v38 }
 0x71f   :  { %v3170_v49 = vpop.f32.mrf.mxu3 }
 0x720   :  { %v10845_v53 = vadd.f32 %v3170_v49, %v10749_v22 }
 0x721   :  { %v3091_v47 = vpop.f32.mrf.mxu1 }
 0x722   :  { %v3092_v36 = vadd.f32 %v3091_v47, %v3051_v2  ;;  %v3274_v2 = vsub.f32 1.0, %v3273_v50 }
 0x724   :  { %v3398_v41 = vadd.f32 %v3356_v55, %v3092_v36  ;;  %v2969_v55 = vadd.f32 %v10519_v21, %v10413_v12  ;;  %v10865_v36 = vpop.f32.mrf.mxu2  ;;  %v3275_v3 = vmul.f32 %v5684_v61, %v3274_v2  ;;  %v3281_v21 = vand.u32 2147483647, %v3271_v28  ;;  %v11209_v12 = vld [vmem:[%s12946_s7 + $0xb0] sm:$0xff] }
 0x726   :  { %v5483_v22 = vmul.f32 -1.442695, %v3398_v41  ;;  %v3010_v41 = vadd.f32 %v10774_v31, %v2969_v55  ;;  %vm3282_vm4 = vcmp.eq.f32.partialorder %v3281_v21, 8.507059e+37 }
 0x727   :  { %v10854_v52 = vpop.f32.mrf.mxu3 }
 0x728   :  { %5685 = vpow2.f32 %v5483_v22  ;;  %v10870_v22 = vperm.slane %v10799_v46, 2 }
 0x729   :  { %v3244_v49 = vpop.f32.mrf.mxu1 }
 0x72a   :  { %v3245_v42 = vadd.f32 %v3244_v49, %v10852_v38  ;;  %v3283_v49 = vand.u32 2147483648, %v3271_v28 }
 0x72c   :  { %v3287_v47 = vadd.f32 %v3245_v42, %v2695_v25  ;;  %v3276_v25 = vadd.f32 %v5684_v61, %v3275_v3  ;;  %v3284_v55 = vor.u32 1.1754944e-38, %v3283_v49 }
 0x72e   :  { %v5481_v33 = vmul.f32 -1.442695, %v3287_v47  ;;  %v5686_v50 = vpop.eup %5685  ;;  %v3264_v47 = vpop.f32.mrf.mxu2  ;;  %v3280_v31 = vsel %vm3279_vm3, %v5684_v61, %v3276_v25 }
 0x72f   :  { %v3335_v58 = vpop.f32.mrf.mxu3  ;;  %v10872_v2 = vadd.f32 1.0, %v5686_v50  ;;  %v3285_v3 = vsel %vm3282_vm4, %v3284_v55, %v3280_v31 }
 0x730   :  { %5687 = vpow2.f32 %v5481_v33  ;;  %v3336_v63 = vadd.f32 %v3335_v58, %v10861_v18  ;;  %v3265_v58 = vadd.f32 %v3264_v47, %v10870_v22 }
 0x731   :  { %vm3408_vm14 = vweird.f32 %v10872_v2 }
 0x732   :  { %v3378_v45 = vadd.f32 %v3336_v63, %v3010_v41  ;;  %v14113_v41 = vld [vmem:[#allocation113_spill] sm:$0xff]  ;;  %v3307_v63 = vmul.f32 %v3285_v3, %v3265_v58 }
 0x733   :  { %v2736_v28 = vadd.f32 %v14113_v41, %v10436_v20  ;;  %v10884_v41 = vperm.slane %v10838_v37, 2 }
 0x734   :  { %v5482_v42 = vmul.f32 -1.442695, %v3378_v45 }
 0x735   :  { %v2777_v50 = vadd.f32 %v10611_v8, %v2736_v28  ;;  %v3375_v28 = vpop.f32.mrf.mxu1 }
 0x736   :  { %v5688_v7 = vpop.eup %5687  ;;  %5689 = vpow2.f32 %v5482_v42 }
 0x737   :  { %v3291_v33 = vadd.f32 1.0, %v5688_v7  ;;  %v3308_v25 = vadd.f32 %v3307_v63, %v2777_v50 }
 0x739   :  { %5691 = vrcp.f32 %v3291_v33  ;;  %v3303_v21 = vand.u32 2147483648, %v3291_v33  ;;  %v3301_v31 = vand.u32 2147483647, %v3291_v33  ;;  %vm3297_vm6 = vweird.f32 %v3291_v33 }
 0x73a   :  { %5693 = vrcp.f32 %v10872_v2 }
 0x73b   :  { %v3304_v8 = vor.u32 1.1754944e-38, %v3303_v21  ;;  %vm3302_vm8 = vcmp.eq.f32.partialorder %v3301_v31, 8.507059e+37 }
 0x73c   :  { %v5690_v46 = vpop.eup %5689 }
 0x73d   :  { %v3382_v45 = vadd.f32 1.0, %v5690_v46 }
 0x73f   :  { %v5692_v6 = vpop.eup %5691  ;;  %5695 = vrcp.f32 %v3382_v45  ;;  %v3392_v17 = vand.u32 2147483647, %v3382_v45  ;;  %vm3388_vm10 = vweird.f32 %v3382_v45 }
 0x740   :  { %v10879_v61 = vpop.eup %5693  ;;  %v3293_v7 = vmul.f32 %v5692_v6, %v3291_v33  ;;  %vm3298_vm5 = vweird.f32 %v5692_v6  ;;  %5697 = vtanh.f32 %v3308_v25 }
 0x741   :  { %v3404_v42 = vmul.f32 %v10879_v61, %v10872_v2  ;;  %vm3299_vm7 = vmor %vm3297_vm6, %vm3298_vm5  ;;  %vm3393_vm12 = vcmp.eq.f32.partialorder %v3392_v17, 8.507059e+37  ;;  %vm3409_vm13 = vweird.f32 %v10879_v61 }
 0x742   :  { %v3294_v49 = vsub.f32 1.0, %v3293_v7  ;;  %v3394_v7 = vand.u32 2147483648, %v3382_v45  ;;  %vm10908_vm15 = vmor %vm3408_vm14, %vm3409_vm13 }
 0x743   :  { %v3405_v46 = vsub.f32 1.0, %v3404_v42  ;;  %v3376_v42 = vadd.f32 %v3375_v28, %v10884_v41  ;;  %v3414_v28 = vand.u32 2147483648, %v10872_v2 }
 0x744   :  { %v3295_v47 = vmul.f32 %v5692_v6, %v3294_v49 }
 0x745   :  { %v5696_v55 = vpop.eup %5695  ;;  %v3406_v33 = vmul.f32 %v10879_v61, %v3405_v46 }
 0x746   :  { %v3384_v58 = vmul.f32 %v5696_v55, %v3382_v45  ;;  %v3296_v3 = vadd.f32 %v5692_v6, %v3295_v47  ;;  %vm3389_vm9 = vweird.f32 %v5696_v55  ;;  %v5698_v25 = vpop.eup %5697 }
 0x747   :  { %vm3390_vm11 = vmor %vm3388_vm10, %vm3389_vm9  ;;  %v3407_v46 = vadd.f32 %v10879_v61, %v3406_v33  ;;  %v10951_v33 = vld [vmem:[%s12946_s7 + $0x130] sm:$0xff] }
 0x748   :  { %v3385_v63 = vsub.f32 1.0, %v3384_v58  ;;  %v3300_v50 = vsel %vm3299_vm7, %v5692_v6, %v3296_v3  ;;  %v3395_v58 = vor.u32 1.1754944e-38, %v3394_v7  ;;  %v3133_v6 = vadd.f32 %v10865_v36, %v10550_v44  ;;  %v10905_v44 = vld [vmem:[%s12946_s7 + $0x178] sm:$0xff]  ;;  %v14117_v7 = vld [vmem:[#allocation120_spill] sm:$0xff] }
 0x749   :  { %v3305_v11 = vsel %vm3302_vm8, %v3304_v8, %v3300_v50  ;;  %v14116_v36 = vld [vmem:[#allocation119_spill] sm:$0xff]  ;;  %v10931_v50 = vld [vmem:[%s12946_s7 + $0x2d0] sm:$0xff] }
 0x74a   :  { %v3386_v49 = vmul.f32 %v5696_v55, %v3385_v63  ;;  %v3310_v14 = vsub.f32 1.0, %v3305_v11  ;;  %v3312_v37 = vmul.f32 %v10105_v19, %v3305_v11  ;;  %v3412_v19 = vand.u32 2147483647, %v10872_v2  ;;  %v10915_v11 = vld [vmem:[%s12946_s7 + $0x2e8] sm:$0xff] }
 0x74b   :  { %v3411_v2 = vsel %vm10908_vm15, %v10879_v61, %v3407_v46  ;;  %v3415_v63 = vor.u32 1.1754944e-38, %v3414_v28  ;;  %v10938_v61 = vld [vmem:[%s12946_s7 + $0x148] sm:$0xff]  ;;  %v10999_v46 = vld [vmem:[%s12946_s7 + $0x258] sm:$0xff] }
 0x74c   :  { %v3387_v47 = vadd.f32 %v5696_v55, %v3386_v49  ;;  %v3311_v21 = vmul.f32 %v5698_v25, %v3310_v14  ;;  %v3174_v14 = vadd.f32 %v10854_v52, %v3133_v6  ;;  %vm3413_vm0 = vcmp.eq.f32.partialorder %v3412_v19, 8.507059e+37  ;;  %v10944_v25 = vld [vmem:[%s12946_s7 + $0x2b8] sm:$0xff]  ;;  %v10978_v6 = vld [vmem:[%s12946_s7 + $0x100] sm:$0xff]  ;;  %v14120_v19 = vld [vmem:[#allocation85_spill] sm:$0xff] }
 0x74d   :  { %v3416_v49 = vsel %vm3413_vm0, %v3415_v63, %v3411_v2  ;;  %v14119_v28 = vld [vmem:[#allocation84_spill] sm:$0xff]  ;;  %v14126_v63 = vld [vmem:[#allocation10_spill] sm:$0xff]  ;;  %14162 = vst [vmem:[#allocation85_spill] sm:$0xff] %v11203_v54 }
 0x74e   :  { %v3391_v31 = vsel %vm3390_vm11, %v5696_v55, %v3387_v47  ;;  %v10891_v3 = vadd.f32 %v3312_v37, %v3311_v21  ;;  %v10925_v55 = vld [vmem:[%s12946_s7 + $0x160] sm:$0xff]  ;;  %v3421_v47 = vsub.f32 1.0, %v3416_v49  ;;  %v10970_v37 = vld [vmem:[%s12946_s7 + $0x288] sm:$0xff] }
 0x74f   :  { %v3396_v8 = vsel %vm3393_vm12, %v3395_v58, %v3391_v31  ;;  %v10984_v31 = vld [vmem:[%s12946_s7 + $0x270] sm:$0xff]  ;;  %v11030_v52 = vld [vmem:[%s12946_s7 + $0x228] sm:$0xff] }
 0x750   :  { %v3418_v45 = vmul.f32 %v3396_v8, %v3376_v42  ;;  %3445 = vmatmul.f32.vlgmr.msrb.gmra.mxu2 %v10891_v3  ;;  %3465 = vmatmul.f32.vlgmr.msrb.gmra.mxu3 %v10891_v3  ;;  %v10957_v42 = vld [vmem:[%s12946_s7 + $0x2a0] sm:$0xff]  ;;  %v11047_v2 = vld [vmem:[%s12946_s7 + $0x88] sm:$0xff] }
 0x751   :  { %3485 = vmatmul.f32.vlgmr.msra.gmra.mxu0 %v10891_v3  ;;  %3691 = vmatpush.msrb.mxu2 %v10905_v44  ;;  %v14118_v8 = vld [vmem:[#allocation83_spill] sm:$0xff] }
 0x752   :  { %v3419_v17 = vadd.f32 %v3418_v45, %v3174_v14  ;;  %3762 = vmatpush.msrb.mxu3 %v10915_v11  ;;  %3782 = vmatpush.msra.mxu0 %v14116_v36  ;;  %v11010_v14 = vld [vmem:[%s12946_s7 + $0xd0] sm:$0xff]  ;;  %v11016_v45 = vld [vmem:[%s12946_s7 + $0x240] sm:$0xff] }
 0x753   :  { %3692 = vmatpush.msrb.mxu2 %v10925_v55  ;;  %v14122_v36 = vld [vmem:[#allocation21_spill] sm:$0xff] }
 0x754   :  { %5699 = vtanh.f32 %v3419_v17  ;;  %3763 = vmatpush.msrb.mxu3 %v10931_v50  ;;  %3783 = vmatpush.msra.mxu0 %v14117_v7  ;;  %v14121_v17 = vld [vmem:[#allocation81_spill] sm:$0xff]  ;;  %v14129_v7 = vld [vmem:[#allocation60_spill] sm:$0xff]  ;;  %14164 = vst [vmem:[#allocation21_spill] sm:$0xff] %v11215_v59 }
 0x755   :  { %3693 = vmatpush.msrb.mxu2 %v10938_v61  ;;  %14163 = vst [vmem:[#allocation81_spill] sm:$0xff] %v11209_v12 }
 0x756   :  { %3764 = vmatpush.msrb.mxu3 %v10944_v25  ;;  %3784 = vmatpush.msra.mxu0 %v10188_v62  ;;  %v10964_v62 = vld [vmem:[%s12946_s7 + $0x118] sm:$0xff] }
 0x757   :  { %3694 = vmatpush.msrb.mxu2 %v10951_v33 }
 0x758   :  { %3765 = vmatpush.msrb.mxu3 %v10957_v42  ;;  %3785 = vmatpush.msra.mxu0 %v10204_v35  ;;  %v3423_v35 = vmul.f32 %v10404_v5, %v3416_v49  ;;  %v10993_v5 = vld [vmem:[%s12946_s7 + $0xe8] sm:$0xff] }
 0x759   :  { %3695 = vmatpush.msrb.mxu2 %v10964_v62  ;;  %v14130_v49 = vld [vmem:[#allocation89_spill] sm:$0xff] }
 0x75a   :  { %v5700_v21 = vpop.eup %5699  ;;  %3766 = vmatpush.msrb.mxu3 %v10970_v37  ;;  %3786 = vmatpush.msra.mxu0 %v10216_v4 }
 0x75b   :  { %v3422_v58 = vmul.f32 %v5700_v21, %v3421_v47  ;;  %3696 = vmatpush.msrb.mxu2 %v10978_v6  ;;  %v14132_v47 = vld [vmem:[#allocation29_spill] sm:$0xff]  ;;  %v14133_v21 = vld [vmem:[#allocation20_spill] sm:$0xff] }
 0x75c   :  { %3767 = vmatpush.msrb.mxu3 %v10984_v31  ;;  %3787 = vmatpush.msra.mxu0 %v14118_v8  ;;  %v14136_v8 = vld [vmem:[#allocation35_spill] sm:$0xff] }
 0x75d   :  { %v10988_v4 = vadd.f32 %v3423_v35, %v3422_v58  ;;  %3697 = vmatpush.msrb.mxu2 %v10993_v5  ;;  %v11083_v58 = vld [vmem:[%s12946_s7 + $0x28] sm:$0xff] }
 0x75e   :  { %3768 = vmatpush.msrb.mxu3 %v10999_v46  ;;  %3788 = vmatpush.msra.mxu0 %v14119_v28  ;;  %14134 = vst [vmem:[#allocation58_spill] sm:$0xff] %v11083_v58  ;;  %v14135_v35 = vld [vmem:[#allocation9_spill] sm:$0xff] }
 0x75f   :  { %3556 = vmatmul.f32.vlgmr.msrb.gmra.mxu1 %v10988_v4  ;;  %3576 = vmatmul.f32.vlgmr.msra.gmra.mxu2 %v10988_v4  ;;  %v14138_v28 = vld [vmem:[#allocation73_spill] sm:$0xff] }
 0x760   :  { %3596 = vmatmul.f32.vlgmr.msra.gmra.mxu3 %v10988_v4  ;;  %3802 = vmatpush.msrb.mxu1 %v10478_v0  ;;  %v11024_v0 = vld [vmem:[%s12946_s7 + $0xb8] sm:$0xff] }
 0x761   :  { %3698 = vmatpush.msrb.mxu2 %v11010_v14  ;;  %3769 = vmatpush.msrb.mxu3 %v11016_v45 }
 0x762   :  { %3803 = vmatpush.msrb.mxu1 %v10492_v16  ;;  %3789 = vmatpush.msra.mxu0 %v14120_v19  ;;  %v11038_v16 = vld [vmem:[%s12946_s7 + $0xa0] sm:$0xff]  ;;  %v14139_v19 = vld [vmem:[#allocation34_spill] sm:$0xff] }
 0x763   :  { %3699 = vmatpush.msrb.mxu2 %v11024_v0  ;;  %3770 = vmatpush.msrb.mxu3 %v11030_v52 }
 0x764   :  { %3804 = vmatpush.msrb.mxu1 %v10497_v26  ;;  %3790 = vmatpush.msra.mxu0 %v14121_v17  ;;  %v14123_v26 = vld [vmem:[#allocation62_spill] sm:$0xff] }
 0x765   :  { %3700 = vmatpush.msrb.mxu2 %v11038_v16  ;;  %3771 = vmatpush.msrb.mxu3 %v14070_v43  ;;  %v11056_v43 = vld [vmem:[%s12946_s7 + $0x70] sm:$0xff]  ;;  %14165 = vst [vmem:[#allocation62_spill] sm:$0xff] %v11221_v15 }
 0x766   :  { %3805 = vmatpush.msrb.mxu1 %v10513_v51  ;;  %3791 = vmatpush.msra.mxu0 %v14122_v36  ;;  %14124 = vst [vmem:[#allocation97_spill] sm:$0xff] %v11056_v43  ;;  %v14125_v51 = vld [vmem:[#allocation22_spill] sm:$0xff]  ;;  %v14142_v36 = vld [vmem:[#allocation64_spill] sm:$0xff] }
 0x767   :  { %3701 = vmatpush.msrb.mxu2 %v11047_v2  ;;  %3772 = vmatpush.msrb.mxu3 %v14073_v1  ;;  %v11065_v1 = vld [vmem:[%s12946_s7 + $0x58] sm:$0xff]  ;;  %v11107_v17 = vld [vmem:[%s12946_s7 + $0x170] sm:$0xff]  ;;  %14166 = vst [vmem:[#allocation22_spill] sm:$0xff] %v11227_v27 }
 0x768   :  { %3806 = vmatpush.msrb.mxu1 %v10526_v29  ;;  %3792 = vmatpush.msra.mxu0 %v14123_v26  ;;  %14127 = vst [vmem:[#allocation51_spill] sm:$0xff] %v11065_v1  ;;  %v14128_v29 = vld [vmem:[#allocation67_spill] sm:$0xff] }
 0x769   :  { %3702 = vmatpush.msrb.mxu2 %v11056_v43  ;;  %3773 = vmatpush.msrb.mxu3 %v14076_v24  ;;  %v11074_v24 = vld [vmem:[%s12946_s7 + $0x40] sm:$0xff]  ;;  %14141 = vst [vmem:[#allocation28_spill] sm:$0xff] %v11107_v17  ;;  %v11120_v26 = vld [vmem:[%s12946_s7 + $0x158] sm:$0xff] }
 0x76a   :  { %3807 = vmatpush.msrb.mxu1 %v14125_v51  ;;  %3793 = vmatpush.msra.mxu0 %v14126_v63  ;;  %14131 = vst [vmem:[#allocation98_spill] sm:$0xff] %v11074_v24  ;;  %v14145_v51 = vld [vmem:[#allocation75_spill] sm:$0xff] }
 0x76b   :  { %3703 = vmatpush.msrb.mxu2 %v11065_v1  ;;  %3774 = vmatpush.msrb.mxu3 %v14128_v29  ;;  %14144 = vst [vmem:[#allocation50_spill] sm:$0xff] %v11120_v26  ;;  %v11127_v63 = vld [vmem:[%s12946_s7 + $0x138] sm:$0xff]  ;;  %v11133_v29 = vld [vmem:[%s12946_s7 + $0x140] sm:$0xff] }
 0x76c   :  { %3808 = vmatpush.msrb.mxu1 %v14129_v7  ;;  %3794 = vmatpush.msra.mxu0 %v14130_v49  ;;  %14146 = vst [vmem:[#allocation38_spill] sm:$0xff] %v11127_v63  ;;  %v14148_v7 = vld [vmem:[#allocation48_spill] sm:$0xff] }
 0x76d   :  { %3704 = vmatpush.msrb.mxu2 %v11074_v24  ;;  %3775 = vmatpush.msrb.mxu3 %v14080_v32  ;;  %v11092_v32 = vld [vmem:[%s12946_s7 + $0x10] sm:$0xff]  ;;  %14147 = vst [vmem:[#allocation104_spill] sm:$0xff] %v11133_v29  ;;  %v11140_v49 = vld [vmem:[%s12946_s7 + $0x120] sm:$0xff] }
 0x76e   :  { %3809 = vmatpush.msrb.mxu1 %v14132_v47  ;;  %3795 = vmatpush.msra.mxu0 %v14133_v21  ;;  %14137 = vst [vmem:[#allocation99_spill] sm:$0xff] %v11092_v32  ;;  %v11146_v47 = vld [vmem:[%s12946_s7 + $0x128] sm:$0xff]  ;;  %v14151_v21 = vld [vmem:[#allocation79_spill] sm:$0xff] }
 0x76f   :  { %3705 = vmatpush.msrb.mxu2 %v11083_v58  ;;  %3776 = vmatpush.msrb.mxu3 %v14083_v34  ;;  %v11101_v34 = vld [vmem:[%s12946_s7 + $0x168] sm:$0xff]  ;;  %14149 = vst [vmem:[#allocation55_spill] sm:$0xff] %v11140_v49 }
 0x770   :  { %3810 = vmatpush.msrb.mxu1 %v14135_v35  ;;  %3796 = vmatpush.msra.mxu0 %v14136_v8  ;;  %14140 = vst [vmem:[#allocation101_spill] sm:$0xff] %v11101_v34  ;;  %v11153_v35 = vld [vmem:[%s12946_s7 + $0x108] sm:$0xff]  ;;  %v11159_v8 = vld [vmem:[%s12946_s7 + $0x110] sm:$0xff] }
 0x771   :  { %3706 = vmatpush.msrb.mxu2 %v11092_v32  ;;  %3777 = vmatpush.msrb.mxu3 %v10423_v48  ;;  %v11114_v48 = vld [vmem:[%s12946_s7 + $0x150] sm:$0xff]  ;;  %14150 = vst [vmem:[#allocation43_spill] sm:$0xff] %v11146_v47 }
 0x772   :  { %3811 = vmatpush.msrb.mxu1 %v14138_v28  ;;  %3797 = vmatpush.msra.mxu0 %v14139_v19  ;;  %14143 = vst [vmem:[#allocation102_spill] sm:$0xff] %v11114_v48  ;;  %v14154_v28 = vld [vmem:[#allocation14_spill] sm:$0xff] }
 0x773   :  { %3873 = vmatpush.msra.mxu2 %v11101_v34  ;;  %3893 = vmatpush.msra.mxu3 %v11107_v17  ;;  %14152 = vst [vmem:[#allocation23_spill] sm:$0xff] %v11153_v35  ;;  %v11166_v19 = vld [vmem:[%s12946_s7 + $0xf0] sm:$0xff] }
 0x774   :  { %3812 = vmatpush.msrb.mxu1 %v14142_v36  ;;  %14153 = vst [vmem:[#allocation52_spill] sm:$0xff] %v11159_v8  ;;  %v11172_v36 = vld [vmem:[%s12946_s7 + $0xf8] sm:$0xff] }
 0x775   :  { %3874 = vmatpush.msra.mxu2 %v11114_v48  ;;  %3894 = vmatpush.msra.mxu3 %v11120_v26  ;;  %14155 = vst [vmem:[#allocation40_spill] sm:$0xff] %v11166_v19 }
 0x776   :  { %3813 = vmatpush.msrb.mxu1 %v14145_v51  ;;  %14156 = vst [vmem:[#allocation113_spill] sm:$0xff] %v11172_v36  ;;  %v14157_v51 = vld [vmem:[#allocation66_spill] sm:$0xff] }
 0x777   :  { %3875 = vmatpush.msra.mxu2 %v11127_v63  ;;  %3895 = vmatpush.msra.mxu3 %v11133_v29 }
 0x778   :  { %3814 = vmatpush.msrb.mxu1 %v14148_v7  ;;  %v11179_v7 = vld [vmem:[%s12946_s7 + $0xd8] sm:$0xff] }
 0x779   :  { %3876 = vmatpush.msra.mxu2 %v11140_v49  ;;  %3896 = vmatpush.msra.mxu3 %v11146_v47  ;;  %14158 = vst [vmem:[#allocation119_spill] sm:$0xff] %v11179_v7 }
 0x77a   :  { %3815 = vmatpush.msrb.mxu1 %v14151_v21  ;;  %v11185_v21 = vld [vmem:[%s12946_s7 + $0xe0] sm:$0xff] }
 0x77b   :  { %3877 = vmatpush.msra.mxu2 %v11153_v35  ;;  %3897 = vmatpush.msra.mxu3 %v11159_v8  ;;  %14159 = vst [vmem:[#allocation120_spill] sm:$0xff] %v11185_v21 }
 0x77c   :  { %3816 = vmatpush.msrb.mxu1 %v14154_v28  ;;  %v11191_v28 = vld [vmem:[%s12946_s7 + $0xc0] sm:$0xff] }
 0x77d   :  { %3878 = vmatpush.msra.mxu2 %v11166_v19  ;;  %3898 = vmatpush.msra.mxu3 %v11172_v36  ;;  %14160 = vst [vmem:[#allocation83_spill] sm:$0xff] %v11191_v28 }
 0x77e   :  { %3817 = vmatpush.msrb.mxu1 %v14157_v51  ;;  %v11197_v51 = vld [vmem:[%s12946_s7 + $0xc8] sm:$0xff] }
 0x77f   :  { %3879 = vmatpush.msra.mxu2 %v11179_v7  ;;  %3899 = vmatpush.msra.mxu3 %v11185_v21  ;;  %14161 = vst [vmem:[#allocation84_spill] sm:$0xff] %v11197_v51 }
 0x781   :  { %3880 = vmatpush.msra.mxu2 %v11191_v28  ;;  %3900 = vmatpush.msra.mxu3 %v11197_v51 }
 0x783   :  { %3881 = vmatpush.msra.mxu2 %v11203_v54  ;;  %3901 = vmatpush.msra.mxu3 %v11209_v12  ;;  %v11233_v12 = vld [vmem:[%s12946_s7 + $0x80] sm:$0xff] }
 0x784   :  { %14167 = vst [vmem:[#allocation10_spill] sm:$0xff] %v11233_v12 }
 0x785   :  { %3882 = vmatpush.msra.mxu2 %v11215_v59  ;;  %3902 = vmatpush.msra.mxu3 %v11221_v15  ;;  %v11239_v59 = vld [vmem:[%s12946_s7 + $0x60] sm:$0xff]  ;;  %v11245_v15 = vld [vmem:[%s12946_s7 + $0x68] sm:$0xff] }
 0x786   :  { %14168 = vst [vmem:[#allocation67_spill] sm:$0xff] %v11239_v59 }
 0x787   :  { %3883 = vmatpush.msra.mxu2 %v11227_v27  ;;  %3903 = vmatpush.msra.mxu3 %v11233_v12  ;;  %14169 = vst [vmem:[#allocation60_spill] sm:$0xff] %v11245_v15  ;;  %v11251_v27 = vld [vmem:[%s12946_s7 + $0x48] sm:$0xff] }
 0x788   :  { %14170 = vst [vmem:[#allocation89_spill] sm:$0xff] %v11251_v27 }
 0x789   :  { %3884 = vmatpush.msra.mxu2 %v11239_v59  ;;  %3904 = vmatpush.msra.mxu3 %v11245_v15  ;;  %v11258_v59 = vld [vmem:[%s12946_s7 + $0x30] sm:$0xff]  ;;  %v11265_v15 = vld [vmem:[%s12946_s7 + $0x18] sm:$0xff] }
 0x78a   :  { %14171 = vst [vmem:[#allocation29_spill] sm:$0xff] %v11258_v59 }
 0x78b   :  { %3885 = vmatpush.msra.mxu2 %v11251_v27  ;;  %3905 = vmatpush.msra.mxu3 %v10382_v30  ;;  %14172 = vst [vmem:[#allocation20_spill] sm:$0xff] %v11265_v15  ;;  %v11272_v30 = vld [vmem:[%s12946_s7] sm:$0xff]  ;;  %v14175_v27 = vld [vmem:[#allocation25_spill] sm:$0xff] }
 0x78c   :  { %14173 = vst [vmem:[#allocation9_spill] sm:$0xff] %v11272_v30  ;;  %v2657_v12 = vadd.f32 %v14175_v27, %v10849_v57 }
 0x78d   :  { %3886 = vmatpush.msra.mxu2 %v11258_v59  ;;  %3906 = vmatpush.msra.mxu3 %v10418_v56  ;;  %v14174_v56 = vld [vmem:[#allocation18_spill] sm:$0xff] }
 0x78e   :  { %v2575_v59 = vadd.f32 %v14174_v56, %v10805_v13 }
 0x78f   :  { %3887 = vmatpush.msra.mxu2 %v11265_v15  ;;  %3907 = vmatpush.msra.mxu3 %v10444_v9  ;;  %v14176_v15 = vld [vmem:[#allocation42_spill] sm:$0xff]  ;;  %v14177_v9 = vld [vmem:[#allocation87_spill] sm:$0xff] }
 0x790   :  { %v2616_v28 = vadd.f32 %v14176_v15, %v2575_v59  ;;  %v2698_v21 = vadd.f32 %v14177_v9, %v2657_v12 }
 0x791   :  { %3888 = vmatpush.msra.mxu2 %v11272_v30  ;;  %3908 = vmatpush.msra.mxu3 %v10458_v23 }
 0x7d3   :  { %v3446_v54 = vpop.f32.mrf.mxu2  ;;  %v3466_v51 = vpop.f32.mrf.mxu3 }
 0x7d4   :  { %v3447_v7 = vadd.f32 %v3446_v54, %v10808_v10  ;;  %v3467_v36 = vadd.f32 %v3466_v51, %v10852_v38 }
 0x7d6   :  { %v3489_v19 = vadd.f32 %v3447_v7, %v2616_v28  ;;  %v3509_v30 = vadd.f32 %v3467_v36, %v2698_v21 }
 0x7d8   :  { %v5484_v8 = vmul.f32 -1.442695, %v3489_v19  ;;  %v5485_v23 = vmul.f32 -1.442695, %v3509_v30 }
 0x7da   :  { %5701 = vpow2.f32 %v5484_v8 }
 0x7db   :  { %5703 = vpow2.f32 %v5485_v23 }
 0x7dc   :  { %v3557_v56 = vpop.f32.mrf.mxu1 }
 0x7dd   :  { %v3558_v13 = vadd.f32 %v3557_v56, %v10861_v18  ;;  %v3486_v56 = vpop.f32.mrf.mxu0 }
 0x7df   :  { %v3600_v27 = vadd.f32 %v3558_v13, %v10765_v39 }
 0x7e0   :  { %v5702_v57 = vpop.eup %5701 }
 0x7e1   :  { %v5704_v35 = vpop.eup %5703  ;;  %v3493_v15 = vadd.f32 1.0, %v5702_v57  ;;  %v5486_v59 = vmul.f32 -1.442695, %v3600_v27 }
 0x7e2   :  { %v3513_v12 = vadd.f32 1.0, %v5704_v35  ;;  %v3577_v9 = vpop.f32.mrf.mxu2 }
 0x7e3   :  { %5705 = vrcp.f32 %v3493_v15  ;;  %v3578_v54 = vadd.f32 %v3577_v9, %v10841_v40  ;;  %v3505_v57 = vand.u32 2147483648, %v3493_v15  ;;  %v3503_v23 = vand.u32 2147483647, %v3493_v15  ;;  %v14179_v40 = vld [vmem:[#allocation88_spill] sm:$0xff] }
 0x7e4   :  { %5707 = vrcp.f32 %v3513_v12  ;;  %vm3499_vm2 = vweird.f32 %v3493_v15  ;;  %vm3519_vm6 = vweird.f32 %v3513_v12 }
 0x7e5   :  { %5709 = vpow2.f32 %v5486_v59  ;;  %v3620_v19 = vadd.f32 %v3578_v54, %v10833_v60  ;;  %v3506_v60 = vor.u32 1.1754944e-38, %v3505_v57  ;;  %vm3504_vm4 = vcmp.eq.f32.partialorder %v3503_v23, 8.507059e+37 }
 0x7e6   :  { %v3523_v57 = vand.u32 2147483647, %v3513_v12 }
 0x7e7   :  { %v5487_v8 = vmul.f32 -1.442695, %v3620_v19  ;;  %v14178_v19 = vld [vmem:[#allocation117_spill] sm:$0xff] }
 0x7e8   :  { %vm3524_vm9 = vcmp.eq.f32.partialorder %v3523_v57, 8.507059e+37 }
 0x7e9   :  { %v5706_v36 = vpop.eup %5705  ;;  %5711 = vpow2.f32 %v5487_v8  ;;  %v2739_v8 = vadd.f32 %v14178_v19, %v10436_v20 }
 0x7ea   :  { %v5708_v7 = vpop.eup %5707  ;;  %v3495_v21 = vmul.f32 %v5706_v36, %v3493_v15  ;;  %vm3500_vm1 = vweird.f32 %v5706_v36 }
 0x7eb   :  { %v5710_v28 = vpop.eup %5709  ;;  %v3515_v39 = vmul.f32 %v5708_v7, %v3513_v12  ;;  %vm3501_vm3 = vmor %vm3499_vm2, %vm3500_vm1  ;;  %vm3520_vm5 = vweird.f32 %v5708_v7 }
 0x7ec   :  { %v3496_v13 = vsub.f32 1.0, %v3495_v21  ;;  %v3604_v51 = vadd.f32 1.0, %v5710_v28  ;;  %v3487_v21 = vadd.f32 %v3486_v56, %v10870_v22  ;;  %vm3521_vm7 = vmor %vm3519_vm6, %vm3520_vm5 }
 0x7ed   :  { %v3516_v30 = vsub.f32 1.0, %v3515_v39 }
 0x7ee   :  { %v3497_v35 = vmul.f32 %v5706_v36, %v3496_v13  ;;  %5713 = vrcp.f32 %v3604_v51  ;;  %v3616_v56 = vand.u32 2147483648, %v3604_v51  ;;  %vm3610_vm10 = vweird.f32 %v3604_v51 }
 0x7ef   :  { %v3517_v27 = vmul.f32 %v5708_v7, %v3516_v30  ;;  %v5712_v59 = vpop.eup %5711  ;;  %v2780_v30 = vadd.f32 %v14179_v40, %v2739_v8 }
 0x7f0   :  { %v3498_v9 = vadd.f32 %v5706_v36, %v3497_v35  ;;  %v3624_v54 = vadd.f32 1.0, %v5712_v59  ;;  %v3525_v35 = vand.u32 2147483648, %v3513_v12  ;;  %v3617_v12 = vor.u32 1.1754944e-38, %v3616_v56 }
 0x7f1   :  { %v3518_v13 = vadd.f32 %v5708_v7, %v3517_v27 }
 0x7f2   :  { %v3502_v28 = vsel %vm3501_vm3, %v5706_v36, %v3498_v9  ;;  %5715 = vrcp.f32 %v3624_v54  ;;  %v3526_v20 = vor.u32 1.1754944e-38, %v3525_v35  ;;  %v3614_v9 = vand.u32 2147483647, %v3604_v51 }
 0x7f3   :  { %v3507_v39 = vsel %vm3504_vm4, %v3506_v60, %v3502_v28  ;;  %v3522_v19 = vsel %vm3521_vm7, %v5708_v7, %v3518_v13  ;;  %v3597_v60 = vpop.f32.mrf.mxu3  ;;  %vm3630_vm14 = vweird.f32 %v3624_v54 }
 0x7f4   :  { %v5714_v18 = vpop.eup %5713  ;;  %v3529_v38 = vmul.f32 %v3507_v39, %v3487_v21  ;;  %v3527_v40 = vsel %vm3524_vm9, %v3526_v20, %v3522_v19  ;;  %vm3615_vm12 = vcmp.eq.f32.partialorder %v3614_v9, 8.507059e+37  ;;  %v11321_v9 = vld [vmem:[%s12946_s7 + $0x2c0] sm:$0xff] }
 0x7f5   :  { %v3606_v15 = vmul.f32 %v5714_v18, %v3604_v51  ;;  %vm3611_vm8 = vweird.f32 %v5714_v18  ;;  %v3532_v7 = vsub.f32 1.0, %v3527_v40  ;;  %v3534_v57 = vmul.f32 %v3527_v40, %v10891_v3  ;;  %v11330_v40 = vld [vmem:[%s12946_s7 + $0x2a8] sm:$0xff] }
 0x7f6   :  { %v3530_v59 = vadd.f32 %v3529_v38, %v2780_v30  ;;  %vm3612_vm11 = vmor %vm3610_vm10, %vm3611_vm8  ;;  %v3598_v38 = vadd.f32 %v3597_v60, %v10884_v41  ;;  %v3636_v30 = vand.u32 2147483648, %v3624_v54  ;;  %v3634_v51 = vand.u32 2147483647, %v3624_v54 }
 0x7f7   :  { %v3607_v10 = vsub.f32 1.0, %v3606_v15 }
 0x7f8   :  { %5717 = vtanh.f32 %v3530_v59  ;;  %v5716_v36 = vpop.eup %5715  ;;  %v3637_v56 = vor.u32 1.1754944e-38, %v3636_v30  ;;  %vm3635_vm0 = vcmp.eq.f32.partialorder %v3634_v51, 8.507059e+37  ;;  %v11406_v30 = vld [vmem:[%s12946_s7 + $0x298] sm:$0xff]  ;;  %v11438_v51 = vld [vmem:[%s12946_s7 + $0x200] sm:$0xff] }
 0x7f9   :  { %v3608_v23 = vmul.f32 %v5714_v18, %v3607_v10  ;;  %v3626_v27 = vmul.f32 %v5716_v36, %v3624_v54  ;;  %vm3631_vm13 = vweird.f32 %v5716_v36  ;;  %v11313_v54 = vld [vmem:[%s12946_s7 + $0x2d8] sm:$0xff]  ;;  %14181 = vst [vmem:[#allocation73_spill] sm:$0xff] %v11406_v30 }
 0x7fa   :  { %vm3632_vm15 = vmor %vm3630_vm14, %vm3631_vm13  ;;  %14183 = vst [vmem:[#allocation64_spill] sm:$0xff] %v11438_v51 }
 0x7fb   :  { %v3609_v8 = vadd.f32 %v5714_v18, %v3608_v23  ;;  %v3627_v21 = vsub.f32 1.0, %v3626_v27 }
 0x7fd   :  { %v3613_v28 = vsel %vm3612_vm11, %v5714_v18, %v3609_v8  ;;  %v3628_v13 = vmul.f32 %v5716_v36, %v3627_v21  ;;  %v11350_v21 = vld [vmem:[%s12946_s7 + $0x2f8] sm:$0xff] }
 0x7fe   :  { %v5718_v39 = vpop.eup %5717  ;;  %v3618_v10 = vsel %vm3615_vm12, %v3617_v12, %v3613_v28  ;;  %v11358_v12 = vld [vmem:[%s12946_s7 + $0x278] sm:$0xff]  ;;  %v11372_v28 = vld [vmem:[%s12946_s7 + $0x260] sm:$0xff] }
 0x7ff   :  { %v3640_v35 = vmul.f32 %v3618_v10, %v3598_v38  ;;  %v3533_v15 = vmul.f32 %v5718_v39, %v3532_v7  ;;  %v3629_v20 = vadd.f32 %v5716_v36, %v3628_v13  ;;  %v11364_v38 = vld [vmem:[%s12946_s7 + $0x2e0] sm:$0xff]  ;;  %v11378_v7 = vld [vmem:[%s12946_s7 + $0x2c8] sm:$0xff]  ;;  %v11392_v13 = vld [vmem:[%s12946_s7 + $0x2b0] sm:$0xff] }
 0x800   :  { %v11386_v39 = vld [vmem:[%s12946_s7 + $0x248] sm:$0xff]  ;;  %14180 = vst [vmem:[#allocation35_spill] sm:$0xff] %v11392_v13  ;;  %v11400_v10 = vld [vmem:[%s12946_s7 + $0x230] sm:$0xff] }
 0x801   :  { %v3641_v59 = vadd.f32 %v3640_v35, %v10845_v53  ;;  %v11295_v19 = vadd.f32 %v3534_v57, %v3533_v15  ;;  %v3633_v18 = vsel %vm3632_vm15, %v5716_v36, %v3629_v20  ;;  %v11305_v53 = vld [vmem:[%s12946_s7 + $0x2f0] sm:$0xff]  ;;  %v11419_v15 = vld [vmem:[%s12946_s7 + $0x218] sm:$0xff]  ;;  %v11425_v57 = vld [vmem:[%s12946_s7 + $0x280] sm:$0xff] }
 0x802   :  { %v3638_v3 = vsel %vm3635_vm0, %v3637_v56, %v3633_v18  ;;  %v11412_v35 = vld [vmem:[%s12946_s7 + $0x210] sm:$0xff]  ;;  %14182 = vst [vmem:[#allocation34_spill] sm:$0xff] %v11425_v57  ;;  %v11431_v20 = vld [vmem:[%s12946_s7 + $0x1f8] sm:$0xff]  ;;  %v11450_v18 = vld [vmem:[%s12946_s7 + $0x1e0] sm:$0xff] }
 0x803   :  { %5719 = vtanh.f32 %v3641_v59  ;;  %3667 = vmatmul.f32.vlgmr.msrb.gmra.mxu0 %v11295_v19  ;;  %3687 = vmatmul.f32.vlgmr.msra.gmra.mxu1 %v11295_v19  ;;  %v3643_v36 = vsub.f32 1.0, %v3638_v3  ;;  %v3645_v60 = vmul.f32 %v3638_v3, %v10988_v4  ;;  %v11340_v4 = vld [vmem:[%s12946_s7 + $0x290] sm:$0xff]  ;;  %v11444_v59 = vld [vmem:[%s12946_s7 + $0x268] sm:$0xff]  ;;  %14185 = vst [vmem:[#allocation48_spill] sm:$0xff] %v11450_v18 }
 0x804   :  { %3707 = vmatmul.f32.vlgmr.msrb.gmra.mxu2 %v11295_v19  ;;  %3913 = vmatpush.msrb.mxu0 %v10905_v44  ;;  %14184 = vst [vmem:[#allocation75_spill] sm:$0xff] %v11444_v59  ;;  %v11457_v56 = vld [vmem:[%s12946_s7 + $0x1e8] sm:$0xff]  ;;  %v11463_v3 = vld [vmem:[%s12946_s7 + $0x250] sm:$0xff] }
 0x805   :  { %3984 = vmatpush.msra.mxu1 %v10915_v11  ;;  %4004 = vmatpush.msrb.mxu2 %v11305_v53  ;;  %14186 = vst [vmem:[#allocation79_spill] sm:$0xff] %v11457_v56 }
 0x806   :  { %3914 = vmatpush.msrb.mxu0 %v10925_v55  ;;  %14187 = vst [vmem:[#allocation14_spill] sm:$0xff] %v11463_v3 }
 0x807   :  { %3985 = vmatpush.msra.mxu1 %v10931_v50  ;;  %4005 = vmatpush.msrb.mxu2 %v11313_v54 }
 0x808   :  { %3915 = vmatpush.msrb.mxu0 %v10938_v61 }
 0x809   :  { %v5720_v23 = vpop.eup %5719  ;;  %3986 = vmatpush.msra.mxu1 %v10944_v25  ;;  %4006 = vmatpush.msrb.mxu2 %v11321_v9 }
 0x80a   :  { %v3644_v27 = vmul.f32 %v5720_v23, %v3643_v36  ;;  %3916 = vmatpush.msrb.mxu0 %v10951_v33  ;;  %v11469_v36 = vld [vmem:[%s12946_s7 + $0x1c8] sm:$0xff]  ;;  %v11476_v23 = vld [vmem:[%s12946_s7 + $0x1d0] sm:$0xff] }
 0x80b   :  { %3987 = vmatpush.msra.mxu1 %v10957_v42  ;;  %4007 = vmatpush.msrb.mxu2 %v11330_v40  ;;  %14188 = vst [vmem:[#allocation66_spill] sm:$0xff] %v11469_v36 }
 0x80c   :  { %v11333_v8 = vadd.f32 %v3645_v60, %v3644_v27  ;;  %3917 = vmatpush.msrb.mxu0 %v10964_v62  ;;  %14189 = vst [vmem:[#allocation18_spill] sm:$0xff] %v11476_v23  ;;  %v11482_v27 = vld [vmem:[%s12946_s7 + $0x238] sm:$0xff]  ;;  %v11488_v60 = vld [vmem:[%s12946_s7 + $0x1b0] sm:$0xff] }
 0x80d   :  { %3988 = vmatpush.msra.mxu1 %v10970_v37  ;;  %4008 = vmatpush.msrb.mxu2 %v11340_v4  ;;  %14190 = vst [vmem:[#allocation25_spill] sm:$0xff] %v11482_v27 }
 0x80e   :  { %3778 = vmatmul.f32.vlgmr.msrb.gmra.mxu3 %v11333_v8  ;;  %3798 = vmatmul.f32.vlgmr.msra.gmra.mxu0 %v11333_v8  ;;  %14191 = vst [vmem:[#allocation42_spill] sm:$0xff] %v11488_v60 }
 0x80f   :  { %3818 = vmatmul.f32.vlgmr.msrb.gmra.mxu1 %v11333_v8  ;;  %3918 = vmatpush.msrb.mxu0 %v10978_v6 }
 0x810   :  { %4024 = vmatpush.msrb.mxu3 %v11350_v21  ;;  %3989 = vmatpush.msra.mxu1 %v10984_v31 }
 0x811   :  { %3919 = vmatpush.msrb.mxu0 %v10993_v5  ;;  %4009 = vmatpush.msrb.mxu2 %v11358_v12 }
 0x812   :  { %4025 = vmatpush.msrb.mxu3 %v11364_v38  ;;  %3990 = vmatpush.msra.mxu1 %v10999_v46 }
 0x813   :  { %3920 = vmatpush.msrb.mxu0 %v11010_v14  ;;  %4010 = vmatpush.msrb.mxu2 %v11372_v28 }
 0x814   :  { %4026 = vmatpush.msrb.mxu3 %v11378_v7  ;;  %3991 = vmatpush.msra.mxu1 %v11016_v45 }
 0x815   :  { %3921 = vmatpush.msrb.mxu0 %v11024_v0  ;;  %4011 = vmatpush.msrb.mxu2 %v11386_v39 }
 0x816   :  { %4027 = vmatpush.msrb.mxu3 %v11392_v13  ;;  %3992 = vmatpush.msra.mxu1 %v11030_v52 }
 0x817   :  { %3922 = vmatpush.msrb.mxu0 %v11038_v16  ;;  %4012 = vmatpush.msrb.mxu2 %v11400_v10 }
 0x818   :  { %4028 = vmatpush.msrb.mxu3 %v11406_v30  ;;  %3993 = vmatpush.msra.mxu1 %v11412_v35 }
 0x819   :  { %3923 = vmatpush.msrb.mxu0 %v11047_v2  ;;  %4013 = vmatpush.msrb.mxu2 %v11419_v15 }
 0x81a   :  { %4029 = vmatpush.msrb.mxu3 %v11425_v57  ;;  %3994 = vmatpush.msra.mxu1 %v11431_v20 }
 0x81b   :  { %3924 = vmatpush.msrb.mxu0 %v11056_v43  ;;  %4014 = vmatpush.msrb.mxu2 %v11438_v51  ;;  %v14237_v43 = vld [vmem:[#allocation92_spill] sm:$0xff] }
 0x81c   :  { %4030 = vmatpush.msrb.mxu3 %v11444_v59  ;;  %3995 = vmatpush.msra.mxu1 %v11450_v18  ;;  %v11507_v59 = vld [vmem:[%s12946_s7 + $0x198] sm:$0xff] }
 0x81d   :  { %3925 = vmatpush.msrb.mxu0 %v11065_v1  ;;  %4015 = vmatpush.msrb.mxu2 %v11457_v56  ;;  %14194 = vst [vmem:[#allocation88_spill] sm:$0xff] %v11507_v59 }
 0x81e   :  { %4031 = vmatpush.msrb.mxu3 %v11463_v3  ;;  %3996 = vmatpush.msra.mxu1 %v11469_v36  ;;  %v11495_v3 = vld [vmem:[%s12946_s7 + $0x1b8] sm:$0xff] }
 0x81f   :  { %3926 = vmatpush.msrb.mxu0 %v11074_v24  ;;  %4016 = vmatpush.msrb.mxu2 %v11476_v23  ;;  %14192 = vst [vmem:[#allocation87_spill] sm:$0xff] %v11495_v3  ;;  %v14235_v23 = vld [vmem:[#allocation95_spill] sm:$0xff] }
 0x820   :  { %4032 = vmatpush.msrb.mxu3 %v11482_v27  ;;  %3997 = vmatpush.msra.mxu1 %v11488_v60  ;;  %v11501_v27 = vld [vmem:[%s12946_s7 + $0x220] sm:$0xff] }
 0x821   :  { %3927 = vmatpush.msrb.mxu0 %v11083_v58  ;;  %4017 = vmatpush.msrb.mxu2 %v11495_v3  ;;  %14193 = vst [vmem:[#allocation117_spill] sm:$0xff] %v11501_v27  ;;  %v11514_v58 = vld [vmem:[%s12946_s7 + $0x1a0] sm:$0xff] }
 0x822   :  { %4033 = vmatpush.msrb.mxu3 %v11501_v27  ;;  %3998 = vmatpush.msra.mxu1 %v11507_v59  ;;  %14195 = vst [vmem:[#allocation122_spill] sm:$0xff] %v11514_v58  ;;  %v11520_v27 = vld [vmem:[%s12946_s7 + $0x208] sm:$0xff]  ;;  %v11526_v59 = vld [vmem:[%s12946_s7 + $0x180] sm:$0xff] }
 0x823   :  { %3928 = vmatpush.msrb.mxu0 %v11092_v32  ;;  %4018 = vmatpush.msrb.mxu2 %v11514_v58  ;;  %14196 = vst [vmem:[#allocation123_spill] sm:$0xff] %v11520_v27  ;;  %v11532_v32 = vld [vmem:[%s12946_s7 + $0x188] sm:$0xff] }
 0x824   :  { %4034 = vmatpush.msrb.mxu3 %v11520_v27  ;;  %14197 = vst [vmem:[#allocation124_spill] sm:$0xff] %v11526_v59  ;;  %3999 = vmatpush.msra.mxu1 %v11526_v59  ;;  %v11539_v27 = vld [vmem:[%s12946_s7 + $0x1f0] sm:$0xff]  ;;  %v11547_v59 = vld [vmem:[%s12946_s7 + $0x1d8] sm:$0xff] }
 0x825   :  { %14198 = vst [vmem:[#allocation125_spill] sm:$0xff] %v11532_v32  ;;  %4019 = vmatpush.msrb.mxu2 %v11532_v32  ;;  %4095 = vmatpush.msra.mxu0 %v11101_v34  ;;  %v11555_v34 = vld [vmem:[%s12946_s7 + $0x1c0] sm:$0xff]  ;;  %v14214_v32 = vld [vmem:[#allocation21_spill] sm:$0xff] }
 0x826   :  { %14199 = vst [vmem:[#allocation126_spill] sm:$0xff] %v11539_v27  ;;  %4035 = vmatpush.msrb.mxu3 %v11539_v27  ;;  %4115 = vmatpush.msrb.mxu1 %v11107_v17  ;;  %v11563_v27 = vld [vmem:[%s12946_s7 + $0x1a8] sm:$0xff] }
 0x827   :  { %4096 = vmatpush.msra.mxu0 %v11114_v48  ;;  %14200 = vst [vmem:[#allocation127_spill] sm:$0xff] %v11547_v59  ;;  %v14212_v48 = vld [vmem:[#allocation85_spill] sm:$0xff] }
 0x828   :  { %4036 = vmatpush.msrb.mxu3 %v11547_v59  ;;  %4116 = vmatpush.msrb.mxu1 %v11120_v26  ;;  %14201 = vst [vmem:[#allocation128_spill] sm:$0xff] %v11555_v34  ;;  %v14203_v59 = vld [vmem:[#allocation23_spill] sm:$0xff]  ;;  %v14213_v17 = vld [vmem:[#allocation81_spill] sm:$0xff] }
 0x829   :  { %4097 = vmatpush.msra.mxu0 %v11127_v63  ;;  %14202 = vst [vmem:[#allocation129_spill] sm:$0xff] %v11563_v27  ;;  %v11571_v63 = vld [vmem:[%s12946_s7 + $0x190] sm:$0xff]  ;;  %v14208_v26 = vld [vmem:[#allocation119_spill] sm:$0xff] }
 0x82a   :  { %4037 = vmatpush.msrb.mxu3 %v11555_v34  ;;  %4117 = vmatpush.msrb.mxu1 %v11133_v29  ;;  %14204 = vst [vmem:[#allocation130_spill] sm:$0xff] %v11571_v63  ;;  %v14205_v34 = vld [vmem:[#allocation52_spill] sm:$0xff]  ;;  %v14207_v29 = vld [vmem:[#allocation113_spill] sm:$0xff] }
 0x82b   :  { %4098 = vmatpush.msra.mxu0 %v11140_v49  ;;  %v14206_v49 = vld [vmem:[#allocation40_spill] sm:$0xff]  ;;  %v14232_v58 = vld [vmem:[#allocation61_spill] sm:$0xff] }
 0x82c   :  { %4038 = vmatpush.msrb.mxu3 %v11563_v27  ;;  %4118 = vmatpush.msrb.mxu1 %v11146_v47  ;;  %v14209_v27 = vld [vmem:[#allocation120_spill] sm:$0xff]  ;;  %v14210_v47 = vld [vmem:[#allocation83_spill] sm:$0xff] }
 0x82d   :  { %4099 = vmatpush.msra.mxu0 %v14203_v59  ;;  %v14211_v59 = vld [vmem:[#allocation84_spill] sm:$0xff] }
 0x82e   :  { %4039 = vmatpush.msrb.mxu3 %v11571_v63  ;;  %4119 = vmatpush.msrb.mxu1 %v14205_v34  ;;  %v14215_v63 = vld [vmem:[#allocation62_spill] sm:$0xff] }
 0x82f   :  { %4100 = vmatpush.msra.mxu0 %v14206_v49  ;;  %v14216_v34 = vld [vmem:[#allocation22_spill] sm:$0xff] }
 0x830   :  { %4120 = vmatpush.msrb.mxu1 %v14207_v29  ;;  %v14217_v49 = vld [vmem:[#allocation10_spill] sm:$0xff]  ;;  %v14218_v29 = vld [vmem:[#allocation67_spill] sm:$0xff] }
 0x831   :  { %4101 = vmatpush.msra.mxu0 %v14208_v26  ;;  %v14219_v26 = vld [vmem:[#allocation60_spill] sm:$0xff] }
 0x832   :  { %4121 = vmatpush.msrb.mxu1 %v14209_v27  ;;  %v14220_v27 = vld [vmem:[#allocation89_spill] sm:$0xff] }
 0x833   :  { %4102 = vmatpush.msra.mxu0 %v14210_v47 }
 0x834   :  { %4122 = vmatpush.msrb.mxu1 %v14211_v59 }
 0x835   :  { %4103 = vmatpush.msra.mxu0 %v14212_v48  ;;  %v11593_v48 = vld [vmem:[%s12946_s7 + $0x50] sm:$0xff] }
 0x836   :  { %4123 = vmatpush.msrb.mxu1 %v14213_v17  ;;  %14221 = vst [vmem:[#allocation131_spill] sm:$0xff] %v11593_v48 }
 0x837   :  { %4104 = vmatpush.msra.mxu0 %v14214_v32  ;;  %v14222_v32 = vld [vmem:[#allocation29_spill] sm:$0xff] }
 0x838   :  { %4124 = vmatpush.msrb.mxu1 %v14215_v63  ;;  %v14231_v63 = vld [vmem:[#allocation91_spill] sm:$0xff] }
 0x839   :  { %4105 = vmatpush.msra.mxu0 %v14216_v34  ;;  %v11600_v34 = vld [vmem:[%s12946_s7 + $0x38] sm:$0xff] }
 0x83a   :  { %4125 = vmatpush.msrb.mxu1 %v14217_v49  ;;  %14223 = vst [vmem:[#allocation132_spill] sm:$0xff] %v11600_v34 }
 0x83b   :  { %4106 = vmatpush.msra.mxu0 %v14218_v29  ;;  %v14224_v29 = vld [vmem:[#allocation20_spill] sm:$0xff] }
 0x83c   :  { %4126 = vmatpush.msrb.mxu1 %v14219_v26  ;;  %v14226_v26 = vld [vmem:[#allocation9_spill] sm:$0xff] }
 0x83d   :  { %4107 = vmatpush.msra.mxu0 %v14220_v27  ;;  %v11607_v27 = vld [vmem:[%s12946_s7 + $0x20] sm:$0xff] }
 0x83e   :  { %4127 = vmatpush.msrb.mxu1 %v11593_v48  ;;  %14225 = vst [vmem:[#allocation133_spill] sm:$0xff] %v11607_v27  ;;  %v14228_v48 = vld [vmem:[#allocation49_spill] sm:$0xff] }
 0x83f   :  { %4108 = vmatpush.msra.mxu0 %v14222_v32  ;;  %v11614_v32 = vld [vmem:[%s12946_s7 + $0x8] sm:$0xff] }
 0x840   :  { %4128 = vmatpush.msrb.mxu1 %v11600_v34  ;;  %14227 = vst [vmem:[#allocation134_spill] sm:$0xff] %v11614_v32  ;;  %v14229_v34 = vld [vmem:[#allocation8_spill] sm:$0xff] }
 0x841   :  { %4109 = vmatpush.msra.mxu0 %v14224_v29  ;;  %v2578_v49 = vadd.f32 %v14229_v34, %v14228_v48  ;;  %v14230_v29 = vld [vmem:[#allocation31_spill] sm:$0xff]  ;;  %v14236_v48 = vld [vmem:[#allocation94_spill] sm:$0xff] }
 0x842   :  { %4129 = vmatpush.msrb.mxu1 %v11607_v27  ;;  %v2660_v17 = vadd.f32 %v14231_v63, %v14230_v29  ;;  %v14233_v27 = vld [vmem:[#allocation13_spill] sm:$0xff] }
 0x843   :  { %4110 = vmatpush.msra.mxu0 %v14226_v26  ;;  %v2619_v3 = vadd.f32 %v14232_v58, %v2578_v49  ;;  %v14234_v26 = vld [vmem:[#allocation114_spill] sm:$0xff] }
 0x844   :  { %4130 = vmatpush.msrb.mxu1 %v11614_v32  ;;  %v2701_v60 = vadd.f32 %v14233_v27, %v2660_v17 }
 0x880   :  { %v3668_v59 = vpop.f32.mrf.mxu0  ;;  %v3688_v47 = vpop.f32.mrf.mxu1 }
 0x881   :  { %v3669_v24 = vadd.f32 %v3668_v59, %v14234_v26  ;;  %v3689_v57 = vadd.f32 %v3688_v47, %v14235_v23  ;;  %v14238_v47 = vld [vmem:[#allocation16_spill] sm:$0xff] }
 0x883   :  { %v3711_v36 = vadd.f32 %v3669_v24, %v2619_v3  ;;  %v3731_v1 = vadd.f32 %v3689_v57, %v2701_v60  ;;  %v14239_v57 = vld [vmem:[#allocation70_spill] sm:$0xff] }
 0x885   :  { %v5488_v56 = vmul.f32 -1.442695, %v3711_v36  ;;  %v5489_v32 = vmul.f32 -1.442695, %v3731_v1 }
 0x887   :  { %5721 = vpow2.f32 %v5488_v56 }
 0x888   :  { %5723 = vpow2.f32 %v5489_v32 }
 0x88b   :  { %v3799_v34 = vpop.f32.mrf.mxu0 }
 0x88c   :  { %v3800_v30 = vadd.f32 %v3799_v34, %v14236_v48 }
 0x88d   :  { %v5722_v63 = vpop.eup %5721 }
 0x88e   :  { %v5724_v29 = vpop.eup %5723  ;;  %v3715_v18 = vadd.f32 1.0, %v5722_v63  ;;  %v3842_v58 = vadd.f32 %v3800_v30, %v14237_v43 }
 0x88f   :  { %v3735_v49 = vadd.f32 1.0, %v5724_v29 }
 0x890   :  { %5725 = vrcp.f32 %v3715_v18  ;;  %v5491_v59 = vmul.f32 -1.442695, %v3842_v58  ;;  %v3727_v43 = vand.u32 2147483648, %v3715_v18  ;;  %v3725_v30 = vand.u32 2147483647, %v3715_v18 }
 0x891   :  { %5727 = vrcp.f32 %v3735_v49  ;;  %v3779_v17 = vpop.f32.mrf.mxu3  ;;  %vm3721_vm2 = vweird.f32 %v3715_v18  ;;  %vm3741_vm6 = vweird.f32 %v3735_v49  ;;  %v3745_v51 = vand.u32 2147483647, %v3735_v49 }
 0x892   :  { %v3780_v24 = vadd.f32 %v3779_v17, %v14238_v47  ;;  %5729 = vpow2.f32 %v5491_v59  ;;  %v3708_v17 = vpop.f32.mrf.mxu2  ;;  %vm3726_vm4 = vcmp.eq.f32.partialorder %v3725_v30, 8.507059e+37 }
 0x893   :  { %vm3746_vm8 = vcmp.eq.f32.partialorder %v3745_v51, 8.507059e+37 }
 0x894   :  { %v3822_v1 = vadd.f32 %v3780_v24, %v14239_v57  ;;  %v14240_v57 = vld [vmem:[#allocation15_spill] sm:$0xff] }
 0x896   :  { %v5726_v56 = vpop.eup %5725  ;;  %v5490_v32 = vmul.f32 -1.442695, %v3822_v1  ;;  %v14241_v1 = vld [vmem:[#allocation69_spill] sm:$0xff] }
 0x897   :  { %v5728_v3 = vpop.eup %5727  ;;  %v3717_v36 = vmul.f32 %v5726_v56, %v3715_v18  ;;  %vm3722_vm1 = vweird.f32 %v5726_v56  ;;  %v2742_v47 = vadd.f32 %v14241_v1, %v14240_v57 }
 0x898   :  { %v3737_v27 = vmul.f32 %v5728_v3, %v3735_v49  ;;  %5731 = vpow2.f32 %v5490_v32  ;;  %v5730_v34 = vpop.eup %5729  ;;  %vm3723_vm3 = vmor %vm3721_vm2, %vm3722_vm1  ;;  %v3728_v32 = vor.u32 1.1754944e-38, %v3727_v43  ;;  %vm3742_vm5 = vweird.f32 %v5728_v3 }
 0x899   :  { %v3718_v60 = vsub.f32 1.0, %v3717_v36  ;;  %v11629_v48 = vadd.f32 1.0, %v5730_v34  ;;  %v3709_v36 = vadd.f32 %v3708_v17, %v10870_v22  ;;  %vm3743_vm7 = vmor %vm3741_vm6, %vm3742_vm5 }
 0x89a   :  { %v3738_v63 = vsub.f32 1.0, %v3737_v27 }
 0x89b   :  { %v3719_v29 = vmul.f32 %v5726_v56, %v3718_v60  ;;  %5733 = vrcp.f32 %v11629_v48  ;;  %vm3852_vm14 = vweird.f32 %v11629_v48 }
 0x89c   :  { %v3739_v58 = vmul.f32 %v5728_v3, %v3738_v63  ;;  %v14242_v63 = vld [vmem:[#allocation54_spill] sm:$0xff] }
 0x89d   :  { %v3720_v59 = vadd.f32 %v5726_v56, %v3719_v29  ;;  %v2783_v26 = vadd.f32 %v14242_v63, %v2742_v47  ;;  %v3747_v29 = vand.u32 2147483648, %v3735_v49 }
 0x89e   :  { %v5732_v24 = vpop.eup %5731  ;;  %v3740_v23 = vadd.f32 %v5728_v3, %v3739_v58 }
 0x89f   :  { %v3724_v27 = vsel %vm3723_vm3, %v5726_v56, %v3720_v59  ;;  %v3826_v60 = vadd.f32 1.0, %v5732_v24  ;;  %v3748_v43 = vor.u32 1.1754944e-38, %v3747_v29 }
 0x8a0   :  { %v3729_v34 = vsel %vm3726_vm4, %v3728_v32, %v3724_v27  ;;  %v3744_v57 = vsel %vm3743_vm7, %v5728_v3, %v3740_v23  ;;  %v3819_v3 = vpop.f32.mrf.mxu1 }
 0x8a1   :  { %v3751_v18 = vmul.f32 %v3729_v34, %v3709_v36  ;;  %5735 = vrcp.f32 %v3826_v60  ;;  %v5734_v13 = vpop.eup %5733  ;;  %v3749_v17 = vsel %vm3746_vm8, %v3748_v43, %v3744_v57  ;;  %v3836_v36 = vand.u32 2147483647, %v3826_v60 }
 0x8a2   :  { %v3848_v56 = vmul.f32 %v5734_v13, %v11629_v48  ;;  %v3754_v24 = vsub.f32 1.0, %v3749_v17  ;;  %v3838_v27 = vand.u32 2147483648, %v3826_v60  ;;  %vm3832_vm10 = vweird.f32 %v3826_v60 }
 0x8a3   :  { %v3752_v1 = vadd.f32 %v3751_v18, %v2783_v26  ;;  %v3756_v26 = vmul.f32 %v3749_v17, %v11295_v19  ;;  %v3820_v57 = vadd.f32 %v3819_v3, %v10884_v41  ;;  %vm3837_vm12 = vcmp.eq.f32.partialorder %v3836_v36, 8.507059e+37  ;;  %v14264_v36 = vld [vmem:[#allocation25_spill] sm:$0xff]  ;;  %v14270_v3 = vld [vmem:[#allocation50_spill] sm:$0xff] }
 0x8a4   :  { %v3849_v58 = vsub.f32 1.0, %v3848_v56  ;;  %v3839_v51 = vor.u32 1.1754944e-38, %v3838_v27  ;;  %vm3853_vm13 = vweird.f32 %v5734_v13  ;;  %v3856_v56 = vand.u32 2147483647, %v11629_v48  ;;  %v14265_v27 = vld [vmem:[#allocation125_spill] sm:$0xff] }
 0x8a5   :  { %5737 = vtanh.f32 %v3752_v1  ;;  %vm3854_vm15 = vmor %vm3852_vm14, %vm3853_vm13 }
 0x8a6   :  { %v3850_v23 = vmul.f32 %v5734_v13, %v3849_v58  ;;  %vm3857_vm0 = vcmp.eq.f32.partialorder %v3856_v56, 8.507059e+37  ;;  %v14260_v58 = vld [vmem:[#allocation14_spill] sm:$0xff]  ;;  %v14279_v56 = vld [vmem:[#allocation52_spill] sm:$0xff] }
 0x8a7   :  { %v5736_v30 = vpop.eup %5735 }
 0x8a8   :  { %v3828_v59 = vmul.f32 %v5736_v30, %v3826_v60  ;;  %vm3833_vm9 = vweird.f32 %v5736_v30  ;;  %v3851_v19 = vadd.f32 %v5734_v13, %v3850_v23  ;;  %v3858_v60 = vand.u32 2147483648, %v11629_v48  ;;  %v14257_v48 = vld [vmem:[#allocation87_spill] sm:$0xff]  ;;  %v14269_v23 = vld [vmem:[#allocation102_spill] sm:$0xff] }
 0x8a9   :  { %vm3834_vm11 = vmor %vm3832_vm10, %vm3833_vm9 }
 0x8aa   :  { %v3829_v47 = vsub.f32 1.0, %v3828_v59  ;;  %v3859_v59 = vor.u32 1.1754944e-38, %v3858_v60  ;;  %v14277_v60 = vld [vmem:[#allocation127_spill] sm:$0xff] }
 0x8ab   :  { %v5738_v32 = vpop.eup %5737 }
 0x8ac   :  { %v3755_v34 = vmul.f32 %v5738_v32, %v3754_v24  ;;  %v3830_v49 = vmul.f32 %v5736_v30, %v3829_v47  ;;  %v14261_v24 = vld [vmem:[#allocation122_spill] sm:$0xff]  ;;  %v14262_v47 = vld [vmem:[#allocation99_spill] sm:$0xff]  ;;  %v14263_v32 = vld [vmem:[#allocation124_spill] sm:$0xff] }
 0x8ae   :  { %v3831_v63 = vadd.f32 %v5736_v30, %v3830_v49  ;;  %v11638_v29 = vadd.f32 %v3756_v26, %v3755_v34  ;;  %v14266_v34 = vld [vmem:[#allocation101_spill] sm:$0xff]  ;;  %v14267_v49 = vld [vmem:[#allocation28_spill] sm:$0xff] }
 0x8af   :  { %v14268_v26 = vld [vmem:[#allocation117_spill] sm:$0xff] }
 0x8b0   :  { %v3835_v18 = vsel %vm3834_vm11, %v5736_v30, %v3831_v63  ;;  %3889 = vmatmul.f32.vlgmr.msra.gmra.mxu2 %v11638_v29  ;;  %3909 = vmatmul.f32.vlgmr.msra.gmra.mxu3 %v11638_v29  ;;  %v14243_v30 = vld [vmem:[#allocation121_spill] sm:$0xff]  ;;  %v14271_v63 = vld [vmem:[#allocation123_spill] sm:$0xff] }
 0x8b1   :  { %v3840_v1 = vsel %vm3837_vm12, %v3839_v51, %v3835_v18  ;;  %3929 = vmatmul.f32.vlgmr.msrb.gmra.mxu0 %v11638_v29  ;;  %4135 = vmatpush.msra.mxu2 %v10905_v44  ;;  %v3855_v44 = vsel %vm3854_vm15, %v5734_v13, %v3851_v19  ;;  %v14259_v13 = vld [vmem:[#allocation88_spill] sm:$0xff]  ;;  %v14272_v51 = vld [vmem:[#allocation38_spill] sm:$0xff]  ;;  %v14276_v19 = vld [vmem:[#allocation43_spill] sm:$0xff] }
 0x8b2   :  { %v3862_v43 = vmul.f32 %v3840_v1, %v3820_v57  ;;  %4206 = vmatpush.msra.mxu3 %v10915_v11  ;;  %4226 = vmatpush.msrb.mxu0 %v11305_v53  ;;  %v3860_v11 = vsel %vm3857_vm0, %v3859_v59, %v3855_v44  ;;  %v14273_v57 = vld [vmem:[#allocation104_spill] sm:$0xff]  ;;  %v14274_v18 = vld [vmem:[#allocation126_spill] sm:$0xff]  ;;  %v14275_v1 = vld [vmem:[#allocation55_spill] sm:$0xff] }
 0x8b3   :  { %4136 = vmatpush.msra.mxu2 %v10925_v55  ;;  %v3865_v55 = vsub.f32 1.0, %v3860_v11  ;;  %v14282_v44 = vld [vmem:[#allocation113_spill] sm:$0xff] }
 0x8b4   :  { %v3863_v17 = vadd.f32 %v3862_v43, %v14243_v30  ;;  %4207 = vmatpush.msra.mxu3 %v10931_v50  ;;  %4227 = vmatpush.msrb.mxu0 %v11313_v54  ;;  %v14278_v43 = vld [vmem:[#allocation23_spill] sm:$0xff]  ;;  %v14280_v30 = vld [vmem:[#allocation128_spill] sm:$0xff]  ;;  %v14283_v59 = vld [vmem:[#allocation129_spill] sm:$0xff] }
 0x8b5   :  { %4137 = vmatpush.msra.mxu2 %v10938_v61 }
 0x8b6   :  { %5739 = vtanh.f32 %v3863_v17  ;;  %4208 = vmatpush.msra.mxu3 %v10944_v25  ;;  %4228 = vmatpush.msrb.mxu0 %v11321_v9  ;;  %v3867_v25 = vmul.f32 %v3860_v11, %v11333_v8  ;;  %v14258_v8 = vld [vmem:[#allocation58_spill] sm:$0xff]  ;;  %v14281_v17 = vld [vmem:[#allocation40_spill] sm:$0xff]  ;;  %v14284_v11 = vld [vmem:[#allocation119_spill] sm:$0xff] }
 0x8b7   :  { %4138 = vmatpush.msra.mxu2 %v10951_v33 }
 0x8b8   :  { %4209 = vmatpush.msra.mxu3 %v10957_v42  ;;  %4229 = vmatpush.msrb.mxu0 %v11330_v40  ;;  %v14244_v42 = vld [vmem:[#allocation35_spill] sm:$0xff] }
 0x8b9   :  { %4139 = vmatpush.msra.mxu2 %v10964_v62  ;;  %v14245_v62 = vld [vmem:[#allocation64_spill] sm:$0xff] }
 0x8ba   :  { %4210 = vmatpush.msra.mxu3 %v10970_v37  ;;  %4230 = vmatpush.msrb.mxu0 %v11340_v4  ;;  %v14246_v37 = vld [vmem:[#allocation97_spill] sm:$0xff] }
 0x8bb   :  { %4140 = vmatpush.msra.mxu2 %v10978_v6  ;;  %v14247_v6 = vld [vmem:[#allocation48_spill] sm:$0xff] }
 0x8bc   :  { %v5740_v50 = vpop.eup %5739  ;;  %4211 = vmatpush.msra.mxu3 %v10984_v31  ;;  %4231 = vmatpush.msrb.mxu0 %v11358_v12  ;;  %v14248_v31 = vld [vmem:[#allocation73_spill] sm:$0xff] }
 0x8bd   :  { %v3866_v61 = vmul.f32 %v5740_v50, %v3865_v55  ;;  %4141 = vmatpush.msra.mxu2 %v10993_v5  ;;  %v14249_v5 = vld [vmem:[#allocation79_spill] sm:$0xff]  ;;  %v14285_v55 = vld [vmem:[#allocation120_spill] sm:$0xff]  ;;  %v14286_v50 = vld [vmem:[#allocation130_spill] sm:$0xff] }
 0x8be   :  { %4212 = vmatpush.msra.mxu3 %v10999_v46  ;;  %4232 = vmatpush.msrb.mxu0 %v11372_v28  ;;  %v14250_v46 = vld [vmem:[#allocation51_spill] sm:$0xff] }
 0x8bf   :  { %v11670_v33 = vadd.f32 %v3867_v25, %v3866_v61  ;;  %4142 = vmatpush.msra.mxu2 %v11010_v14  ;;  %v14251_v14 = vld [vmem:[#allocation66_spill] sm:$0xff]  ;;  %v14287_v61 = vld [vmem:[#allocation83_spill] sm:$0xff]  ;;  %v14288_v25 = vld [vmem:[#allocation84_spill] sm:$0xff] }
 0x8c0   :  { %4213 = vmatpush.msra.mxu3 %v11016_v45  ;;  %4233 = vmatpush.msrb.mxu0 %v11386_v39  ;;  %v14252_v45 = vld [vmem:[#allocation34_spill] sm:$0xff] }
 0x8c1   :  { %4000 = vmatmul.f32.vlgmr.msra.gmra.mxu1 %v11670_v33  ;;  %4020 = vmatmul.f32.vlgmr.msrb.gmra.mxu2 %v11670_v33 }
 0x8c2   :  { %4040 = vmatmul.f32.vlgmr.msrb.gmra.mxu3 %v11670_v33  ;;  %4246 = vmatpush.msra.mxu1 %v11350_v21 }
 0x8c3   :  { %4143 = vmatpush.msra.mxu2 %v11024_v0  ;;  %4214 = vmatpush.msra.mxu3 %v11030_v52  ;;  %v14253_v0 = vld [vmem:[#allocation18_spill] sm:$0xff] }
 0x8c4   :  { %4247 = vmatpush.msra.mxu1 %v11364_v38  ;;  %4234 = vmatpush.msrb.mxu0 %v11400_v10  ;;  %v14254_v52 = vld [vmem:[#allocation98_spill] sm:$0xff] }
 0x8c5   :  { %4144 = vmatpush.msra.mxu2 %v11038_v16  ;;  %4215 = vmatpush.msra.mxu3 %v11412_v35  ;;  %v14255_v16 = vld [vmem:[#allocation42_spill] sm:$0xff] }
 0x8c6   :  { %4248 = vmatpush.msra.mxu1 %v11378_v7  ;;  %4235 = vmatpush.msrb.mxu0 %v11419_v15 }
 0x8c7   :  { %4145 = vmatpush.msra.mxu2 %v11047_v2  ;;  %4216 = vmatpush.msra.mxu3 %v11431_v20  ;;  %v14256_v2 = vld [vmem:[#allocation75_spill] sm:$0xff] }
 0x8c8   :  { %4249 = vmatpush.msra.mxu1 %v14244_v42  ;;  %4236 = vmatpush.msrb.mxu0 %v14245_v62 }
 0x8c9   :  { %4146 = vmatpush.msra.mxu2 %v14246_v37  ;;  %4217 = vmatpush.msra.mxu3 %v14247_v6  ;;  %v14289_v37 = vld [vmem:[#allocation85_spill] sm:$0xff] }
 0x8ca   :  { %4250 = vmatpush.msra.mxu1 %v14248_v31  ;;  %4237 = vmatpush.msrb.mxu0 %v14249_v5 }
 0x8cb   :  { %4147 = vmatpush.msra.mxu2 %v14250_v46  ;;  %4218 = vmatpush.msra.mxu3 %v14251_v14  ;;  %v14290_v46 = vld [vmem:[#allocation81_spill] sm:$0xff] }
 0x8cc   :  { %4251 = vmatpush.msra.mxu1 %v14252_v45  ;;  %4238 = vmatpush.msrb.mxu0 %v14253_v0 }
 0x8cd   :  { %4148 = vmatpush.msra.mxu2 %v14254_v52  ;;  %4219 = vmatpush.msra.mxu3 %v14255_v16  ;;  %v14291_v52 = vld [vmem:[#allocation21_spill] sm:$0xff] }
 0x8ce   :  { %4252 = vmatpush.msra.mxu1 %v14256_v2  ;;  %4239 = vmatpush.msrb.mxu0 %v14257_v48 }
 0x8cf   :  { %4149 = vmatpush.msra.mxu2 %v14258_v8  ;;  %4220 = vmatpush.msra.mxu3 %v14259_v13  ;;  %v14292_v8 = vld [vmem:[#allocation62_spill] sm:$0xff] }
 0x8d0   :  { %4253 = vmatpush.msra.mxu1 %v14260_v58  ;;  %4240 = vmatpush.msrb.mxu0 %v14261_v24 }
 0x8d1   :  { %4150 = vmatpush.msra.mxu2 %v14262_v47  ;;  %4221 = vmatpush.msra.mxu3 %v14263_v32  ;;  %v14293_v47 = vld [vmem:[#allocation22_spill] sm:$0xff] }
 0x8d2   :  { %4254 = vmatpush.msra.mxu1 %v14264_v36  ;;  %4241 = vmatpush.msrb.mxu0 %v14265_v27 }
 0x8d3   :  { %4317 = vmatpush.msrb.mxu2 %v14266_v34  ;;  %4337 = vmatpush.msrb.mxu3 %v14267_v49  ;;  %v14294_v34 = vld [vmem:[#allocation10_spill] sm:$0xff]  ;;  %v14295_v49 = vld [vmem:[#allocation67_spill] sm:$0xff] }
 0x8d4   :  { %4255 = vmatpush.msra.mxu1 %v14268_v26 }
 0x8d5   :  { %4318 = vmatpush.msrb.mxu2 %v14269_v23  ;;  %4338 = vmatpush.msrb.mxu3 %v14270_v3  ;;  %v14296_v23 = vld [vmem:[#allocation60_spill] sm:$0xff]  ;;  %v14297_v3 = vld [vmem:[#allocation89_spill] sm:$0xff] }
 0x8d6   :  { %4256 = vmatpush.msra.mxu1 %v14271_v63 }
 0x8d7   :  { %4319 = vmatpush.msrb.mxu2 %v14272_v51  ;;  %4339 = vmatpush.msrb.mxu3 %v14273_v57  ;;  %v14298_v51 = vld [vmem:[#allocation131_spill] sm:$0xff]  ;;  %v14299_v57 = vld [vmem:[#allocation29_spill] sm:$0xff] }
 0x8d8   :  { %4257 = vmatpush.msra.mxu1 %v14274_v18 }
 0x8d9   :  { %4320 = vmatpush.msrb.mxu2 %v14275_v1  ;;  %4340 = vmatpush.msrb.mxu3 %v14276_v19  ;;  %v14300_v1 = vld [vmem:[#allocation132_spill] sm:$0xff] }
 0x8da   :  { %4258 = vmatpush.msra.mxu1 %v14277_v60  ;;  %v14301_v19 = vld [vmem:[#allocation20_spill] sm:$0xff] }
 0x8db   :  { %4321 = vmatpush.msrb.mxu2 %v14278_v43  ;;  %4341 = vmatpush.msrb.mxu3 %v14279_v56  ;;  %v14302_v43 = vld [vmem:[#allocation133_spill] sm:$0xff] }
 0x8dc   :  { %4259 = vmatpush.msra.mxu1 %v14280_v30  ;;  %v14303_v56 = vld [vmem:[#allocation9_spill] sm:$0xff] }
 0x8dd   :  { %4322 = vmatpush.msrb.mxu2 %v14281_v17  ;;  %4342 = vmatpush.msrb.mxu3 %v14282_v44  ;;  %v14304_v17 = vld [vmem:[#allocation134_spill] sm:$0xff]  ;;  %v14305_v44 = vld [vmem:[#allocation49_spill] sm:$0xff] }
 0x8de   :  { %4260 = vmatpush.msra.mxu1 %v14283_v59  ;;  %v14316_v59 = vld [vmem:[#allocation16_spill] sm:$0xff] }
 0x8df   :  { %4323 = vmatpush.msrb.mxu2 %v14284_v11  ;;  %4343 = vmatpush.msrb.mxu3 %v14285_v55  ;;  %v14306_v11 = vld [vmem:[#allocation93_spill] sm:$0xff] }
 0x8e0   :  { %4261 = vmatpush.msra.mxu1 %v14286_v50  ;;  %v2581_v55 = vadd.f32 %v14306_v11, %v14305_v44  ;;  %v14313_v11 = vld [vmem:[#allocation47_spill] sm:$0xff]  ;;  %v14314_v44 = vld [vmem:[#allocation36_spill] sm:$0xff] }
 0x8e1   :  { %4324 = vmatpush.msrb.mxu2 %v14287_v61  ;;  %4344 = vmatpush.msrb.mxu3 %v14288_v25  ;;  %v14307_v61 = vld [vmem:[#allocation31_spill] sm:$0xff]  ;;  %v14308_v25 = vld [vmem:[#allocation96_spill] sm:$0xff] }
 0x8e3   :  { %4325 = vmatpush.msrb.mxu2 %v14289_v37  ;;  %4345 = vmatpush.msrb.mxu3 %v14290_v46  ;;  %v2663_v37 = vadd.f32 %v14308_v25, %v14307_v61  ;;  %v14315_v61 = vld [vmem:[#allocation27_spill] sm:$0xff] }
 0x8e5   :  { %4326 = vmatpush.msrb.mxu2 %v14291_v52  ;;  %4346 = vmatpush.msrb.mxu3 %v14292_v8  ;;  %v14309_v8 = vld [vmem:[#allocation30_spill] sm:$0xff] }
 0x8e7   :  { %4327 = vmatpush.msrb.mxu2 %v14293_v47  ;;  %4347 = vmatpush.msrb.mxu3 %v14294_v34  ;;  %v2622_v47 = vadd.f32 %v14309_v8, %v2581_v55  ;;  %v14310_v34 = vld [vmem:[#allocation44_spill] sm:$0xff] }
 0x8e9   :  { %4328 = vmatpush.msrb.mxu2 %v14295_v49  ;;  %4348 = vmatpush.msrb.mxu3 %v14296_v23  ;;  %v2704_v49 = vadd.f32 %v14310_v34, %v2663_v37  ;;  %v14311_v23 = vld [vmem:[#allocation114_spill] sm:$0xff] }
 0x8eb   :  { %4329 = vmatpush.msrb.mxu2 %v14297_v3  ;;  %4349 = vmatpush.msrb.mxu3 %v14298_v51  ;;  %v2960_v51 = vadd.f32 %v14314_v44, %v14313_v11 }
 0x8ed   :  { %4330 = vmatpush.msrb.mxu2 %v14299_v57  ;;  %4350 = vmatpush.msrb.mxu3 %v14300_v1  ;;  %v14312_v57 = vld [vmem:[#allocation95_spill] sm:$0xff]  ;;  %v3001_v50 = vadd.f32 %v14315_v61, %v2960_v51 }
 0x8ef   :  { %4331 = vmatpush.msrb.mxu2 %v14301_v19  ;;  %4351 = vmatpush.msrb.mxu3 %v14302_v43 }
 0x8f1   :  { %4332 = vmatpush.msrb.mxu2 %v14303_v56  ;;  %4352 = vmatpush.msrb.mxu3 %v14304_v17 }
 0x933   :  { %v3890_v46 = vpop.f32.mrf.mxu2  ;;  %v3910_v52 = vpop.f32.mrf.mxu3 }
 0x934   :  { %v3891_v3 = vadd.f32 %v3890_v46, %v14311_v23  ;;  %v3911_v19 = vadd.f32 %v3910_v52, %v14312_v57  ;;  %v14321_v57 = vld [vmem:[#allocation78_spill] sm:$0xff] }
 0x936   :  { %v3933_v43 = vadd.f32 %v3891_v3, %v2622_v47  ;;  %v3953_v56 = vadd.f32 %v3911_v19, %v2704_v49  ;;  %v14317_v47 = vld [vmem:[#allocation94_spill] sm:$0xff] }
 0x938   :  { %v5492_v1 = vmul.f32 -1.442695, %v3933_v43  ;;  %v5493_v17 = vmul.f32 -1.442695, %v3953_v56 }
 0x93a   :  { %5741 = vpow2.f32 %v5492_v1 }
 0x93b   :  { %5743 = vpow2.f32 %v5493_v17  ;;  %v14318_v17 = vld [vmem:[#allocation90_spill] sm:$0xff] }
 0x93e   :  { %v4001_v25 = vpop.f32.mrf.mxu1 }
 0x93f   :  { %v4002_v55 = vadd.f32 %v4001_v25, %v14316_v59  ;;  %v3930_v59 = vpop.f32.mrf.mxu0 }
 0x940   :  { %v5742_v8 = vpop.eup %5741 }
 0x941   :  { %v5744_v37 = vpop.eup %5743  ;;  %v3937_v34 = vadd.f32 1.0, %v5742_v8  ;;  %v4044_v46 = vadd.f32 %v4002_v55, %v3001_v50 }
 0x942   :  { %v3957_v23 = vadd.f32 1.0, %v5744_v37 }
 0x943   :  { %5745 = vrcp.f32 %v3937_v34  ;;  %v5494_v52 = vmul.f32 -1.442695, %v4044_v46  ;;  %v3949_v8 = vand.u32 2147483648, %v3937_v34  ;;  %v3947_v46 = vand.u32 2147483647, %v3937_v34 }
 0x944   :  { %5747 = vrcp.f32 %v3957_v23  ;;  %v4021_v43 = vpop.f32.mrf.mxu2  ;;  %vm3943_vm2 = vweird.f32 %v3937_v34  ;;  %v3969_v60 = vand.u32 2147483648, %v3957_v23  ;;  %vm3963_vm6 = vweird.f32 %v3957_v23 }
 0x945   :  { %v4022_v1 = vadd.f32 %v4021_v43, %v14317_v47  ;;  %5749 = vpow2.f32 %v5494_v52  ;;  %v3950_v47 = vor.u32 1.1754944e-38, %v3949_v8  ;;  %vm3948_vm4 = vcmp.eq.f32.partialorder %v3947_v46, 8.507059e+37 }
 0x946   :  { %v3970_v18 = vor.u32 1.1754944e-38, %v3969_v60 }
 0x947   :  { %v4064_v49 = vadd.f32 %v4022_v1, %v14318_v17  ;;  %v14319_v1 = vld [vmem:[#allocation15_spill] sm:$0xff]  ;;  %v14320_v17 = vld [vmem:[#allocation65_spill] sm:$0xff] }
 0x949   :  { %v5746_v44 = vpop.eup %5745  ;;  %v5495_v3 = vmul.f32 -1.442695, %v4064_v49  ;;  %v2745_v49 = vadd.f32 %v14320_v17, %v14319_v1 }
 0x94a   :  { %v5748_v19 = vpop.eup %5747  ;;  %v3939_v51 = vmul.f32 %v5746_v44, %v3937_v34  ;;  %vm3944_vm1 = vweird.f32 %v5746_v44 }
 0x94b   :  { %v3959_v61 = vmul.f32 %v5748_v19, %v3957_v23  ;;  %5751 = vpow2.f32 %v5495_v3  ;;  %v5750_v56 = vpop.eup %5749  ;;  %vm3945_vm3 = vmor %vm3943_vm2, %vm3944_vm1  ;;  %v3931_v3 = vadd.f32 %v3930_v59, %v10870_v22  ;;  %vm3964_vm5 = vweird.f32 %v5748_v19 }
 0x94c   :  { %v3940_v25 = vsub.f32 1.0, %v3939_v51  ;;  %v4048_v55 = vadd.f32 1.0, %v5750_v56  ;;  %v2786_v30 = vadd.f32 %v14321_v57, %v2745_v49  ;;  %vm3965_vm7 = vmor %vm3963_vm6, %vm3964_vm5 }
 0x94d   :  { %v3960_v50 = vsub.f32 1.0, %v3959_v61 }
 0x94e   :  { %v3941_v37 = vmul.f32 %v5746_v44, %v3940_v25  ;;  %5753 = vrcp.f32 %v4048_v55  ;;  %vm4054_vm10 = vweird.f32 %v4048_v55 }
 0x94f   :  { %v3961_v11 = vmul.f32 %v5748_v19, %v3960_v50 }
 0x950   :  { %v3942_v52 = vadd.f32 %v5746_v44, %v3941_v37  ;;  %v3967_v37 = vand.u32 2147483647, %v3957_v23 }
 0x951   :  { %v5752_v43 = vpop.eup %5751  ;;  %v3962_v25 = vadd.f32 %v5748_v19, %v3961_v11  ;;  %v4058_v11 = vand.u32 2147483647, %v4048_v55 }
 0x952   :  { %v3946_v51 = vsel %vm3945_vm3, %v5746_v44, %v3942_v52  ;;  %v4068_v61 = vadd.f32 1.0, %v5752_v43  ;;  %v4060_v44 = vand.u32 2147483648, %v4048_v55  ;;  %vm3968_vm8 = vcmp.eq.f32.partialorder %v3967_v37, 8.507059e+37  ;;  %v4041_v43 = vpop.f32.mrf.mxu3 }
 0x953   :  { %v3951_v56 = vsel %vm3948_vm4, %v3950_v47, %v3946_v51  ;;  %v3966_v8 = vsel %vm3965_vm7, %v5748_v19, %v3962_v25  ;;  %v4042_v60 = vadd.f32 %v4041_v43, %v10884_v41  ;;  %vm4059_vm12 = vcmp.eq.f32.partialorder %v4058_v11, 8.507059e+37  ;;  %v11792_v11 = vld [vmem:[%s12946_s7 + $0x160] sm:$0xff]  ;;  %v11811_v43 = vld [vmem:[%s12946_s7 + $0x2b8] sm:$0xff] }
 0x954   :  { %v3973_v50 = vmul.f32 %v3951_v56, %v3931_v3  ;;  %5755 = vrcp.f32 %v4068_v61  ;;  %v5754_v34 = vpop.eup %5753  ;;  %v3971_v57 = vsel %vm3968_vm8, %v3970_v18, %v3966_v8  ;;  %v4061_v23 = vor.u32 1.1754944e-38, %v4060_v44 }
 0x955   :  { %v4050_v17 = vmul.f32 %v5754_v34, %v4048_v55  ;;  %vm4055_vm9 = vweird.f32 %v5754_v34  ;;  %v3976_v51 = vsub.f32 1.0, %v3971_v57  ;;  %v4080_v18 = vand.u32 2147483648, %v4068_v61 }
 0x956   :  { %v3974_v1 = vadd.f32 %v3973_v50, %v2786_v30  ;;  %vm4056_vm11 = vmor %vm4054_vm10, %vm4055_vm9  ;;  %vm4074_vm14 = vweird.f32 %v4068_v61  ;;  %v4078_v55 = vand.u32 2147483647, %v4068_v61 }
 0x957   :  { %v4051_v59 = vsub.f32 1.0, %v4050_v17 }
 0x958   :  { %5757 = vtanh.f32 %v3974_v1  ;;  %v3978_v1 = vmul.f32 %v3971_v57, %v11638_v29  ;;  %v4081_v29 = vor.u32 1.1754944e-38, %v4080_v18  ;;  %vm4079_vm0 = vcmp.eq.f32.partialorder %v4078_v55, 8.507059e+37  ;;  %v11798_v57 = vld [vmem:[%s12946_s7 + $0x2d0] sm:$0xff]  ;;  %v12094_v55 = vld [vmem:[%s12946_s7 + $0x78] sm:$0xff] }
 0x959   :  { %v4052_v46 = vmul.f32 %v5754_v34, %v4051_v59  ;;  %v14322_v59 = vld [vmem:[#allocation118_spill] sm:$0xff]  ;;  %14343 = vst [vmem:[#allocation51_spill] sm:$0xff] %v12094_v55 }
 0x95a   :  { %v5756_v47 = vpop.eup %5755  ;;  %v12076_v18 = vld [vmem:[%s12946_s7 + $0xb0] sm:$0xff] }
 0x95b   :  { %v4070_v52 = vmul.f32 %v5756_v47, %v4068_v61  ;;  %v4053_v49 = vadd.f32 %v5754_v34, %v4052_v46  ;;  %vm4075_vm13 = vweird.f32 %v5756_v47  ;;  %v11785_v61 = vld [vmem:[%s12946_s7 + $0x2e8] sm:$0xff]  ;;  %14340 = vst [vmem:[#allocation48_spill] sm:$0xff] %v12076_v18 }
 0x95c   :  { %vm4076_vm15 = vmor %vm4074_vm14, %vm4075_vm13 }
 0x95d   :  { %v4071_v3 = vsub.f32 1.0, %v4070_v52  ;;  %v4057_v19 = vsel %vm4056_vm11, %v5754_v34, %v4053_v49  ;;  %v11779_v34 = vld [vmem:[%s12946_s7 + $0x178] sm:$0xff] }
 0x95e   :  { %v5758_v30 = vpop.eup %5757  ;;  %v4062_v25 = vsel %vm4059_vm12, %v4061_v23, %v4057_v19  ;;  %v11869_v19 = vld [vmem:[%s12946_s7 + $0xd0] sm:$0xff] }
 0x95f   :  { %v4072_v56 = vmul.f32 %v5756_v47, %v4071_v3  ;;  %v3977_v50 = vmul.f32 %v5758_v30, %v3976_v51  ;;  %v4084_v37 = vmul.f32 %v4062_v25, %v4042_v60  ;;  %v11825_v51 = vld [vmem:[%s12946_s7 + $0x2a0] sm:$0xff]  ;;  %v11856_v60 = vld [vmem:[%s12946_s7 + $0xe8] sm:$0xff] }
 0x960   :  { %v12064_v25 = vld [vmem:[%s12946_s7 + $0xc8] sm:$0xff] }
 0x961   :  { %v4073_v17 = vadd.f32 %v5756_v47, %v4072_v56  ;;  %v11770_v8 = vadd.f32 %v3978_v1, %v3977_v50  ;;  %v4085_v44 = vadd.f32 %v4084_v37, %v14322_v59  ;;  %v11883_v1 = vld [vmem:[%s12946_s7 + $0xb8] sm:$0xff]  ;;  %v12058_v56 = vld [vmem:[%s12946_s7 + $0xc0] sm:$0xff]  ;;  %14338 = vst [vmem:[#allocation64_spill] sm:$0xff] %v12064_v25  ;;  %v12070_v50 = vld [vmem:[%s12946_s7 + $0xa8] sm:$0xff] }
 0x962   :  { %14337 = vst [vmem:[#allocation35_spill] sm:$0xff] %v12058_v56  ;;  %v12082_v37 = vld [vmem:[%s12946_s7 + $0x90] sm:$0xff]  ;;  %v12100_v59 = vld [vmem:[%s12946_s7 + $0x80] sm:$0xff] }
 0x963   :  { %v4077_v46 = vsel %vm4076_vm15, %v5756_v47, %v4073_v17  ;;  %4111 = vmatmul.f32.vlgmr.msra.gmra.mxu0 %v11770_v8  ;;  %4131 = vmatmul.f32.vlgmr.msrb.gmra.mxu1 %v11770_v8  ;;  %5759 = vtanh.f32 %v4085_v44  ;;  %14339 = vst [vmem:[#allocation97_spill] sm:$0xff] %v12070_v50  ;;  %v12088_v17 = vld [vmem:[%s12946_s7 + $0x98] sm:$0xff]  ;;  %v12106_v44 = vld [vmem:[%s12946_s7 + $0x60] sm:$0xff] }
 0x964   :  { %4151 = vmatmul.f32.vlgmr.msra.gmra.mxu2 %v11770_v8  ;;  %4357 = vmatpush.msra.mxu0 %v11779_v34  ;;  %v4082_v47 = vsel %vm4079_vm0, %v4081_v29, %v4077_v46  ;;  %14341 = vst [vmem:[#allocation73_spill] sm:$0xff] %v12082_v37  ;;  %v12112_v46 = vld [vmem:[%s12946_s7 + $0x68] sm:$0xff] }
 0x965   :  { %4428 = vmatpush.msrb.mxu1 %v11785_v61  ;;  %4448 = vmatpush.msra.mxu2 %v11305_v53  ;;  %v11805_v53 = vld [vmem:[%s12946_s7 + $0x148] sm:$0xff]  ;;  %v4087_v52 = vsub.f32 1.0, %v4082_v47  ;;  %v4089_v23 = vmul.f32 %v4082_v47, %v11670_v33  ;;  %14342 = vst [vmem:[#allocation79_spill] sm:$0xff] %v12088_v17  ;;  %v14348_v47 = vld [vmem:[#allocation131_spill] sm:$0xff] }
 0x966   :  { %4358 = vmatpush.msra.mxu0 %v11792_v11  ;;  %v11840_v33 = vld [vmem:[%s12946_s7 + $0x288] sm:$0xff]  ;;  %14344 = vst [vmem:[#allocation66_spill] sm:$0xff] %v12100_v59 }
 0x967   :  { %4429 = vmatpush.msrb.mxu1 %v11798_v57  ;;  %4449 = vmatpush.msra.mxu2 %v11313_v54  ;;  %v11818_v54 = vld [vmem:[%s12946_s7 + $0x130] sm:$0xff]  ;;  %14345 = vst [vmem:[#allocation34_spill] sm:$0xff] %v12106_v44  ;;  %v12118_v29 = vld [vmem:[%s12946_s7 + $0x48] sm:$0xff] }
 0x968   :  { %4359 = vmatpush.msra.mxu0 %v11805_v53  ;;  %14346 = vst [vmem:[#allocation18_spill] sm:$0xff] %v12112_v46 }
 0x969   :  { %4430 = vmatpush.msrb.mxu1 %v11811_v43  ;;  %4450 = vmatpush.msra.mxu2 %v11321_v9  ;;  %v5760_v49 = vpop.eup %5759  ;;  %v11832_v9 = vld [vmem:[%s12946_s7 + $0x118] sm:$0xff]  ;;  %14347 = vst [vmem:[#allocation98_spill] sm:$0xff] %v12118_v29 }
 0x96a   :  { %4360 = vmatpush.msra.mxu0 %v11818_v54  ;;  %v4088_v3 = vmul.f32 %v5760_v49, %v4087_v52  ;;  %v12125_v52 = vld [vmem:[%s12946_s7 + $0x30] sm:$0xff]  ;;  %v14350_v49 = vld [vmem:[#allocation132_spill] sm:$0xff] }
 0x96b   :  { %4431 = vmatpush.msrb.mxu1 %v11825_v51  ;;  %4451 = vmatpush.msra.mxu2 %v11330_v40  ;;  %v11847_v40 = vld [vmem:[%s12946_s7 + $0x100] sm:$0xff]  ;;  %14349 = vst [vmem:[#allocation42_spill] sm:$0xff] %v12125_v52 }
 0x96c   :  { %4361 = vmatpush.msra.mxu0 %v11832_v9  ;;  %v11835_v30 = vadd.f32 %v4089_v23, %v4088_v3  ;;  %v12132_v3 = vld [vmem:[%s12946_s7 + $0x18] sm:$0xff]  ;;  %v14352_v23 = vld [vmem:[#allocation133_spill] sm:$0xff] }
 0x96d   :  { %4432 = vmatpush.msrb.mxu1 %v11840_v33  ;;  %4452 = vmatpush.msra.mxu2 %v11340_v4  ;;  %v11863_v4 = vld [vmem:[%s12946_s7 + $0x270] sm:$0xff]  ;;  %14351 = vst [vmem:[#allocation75_spill] sm:$0xff] %v12132_v3 }
 0x96e   :  { %4362 = vmatpush.msra.mxu0 %v11847_v40  ;;  %4222 = vmatmul.f32.vlgmr.msra.gmra.mxu3 %v11835_v30 }
 0x96f   :  { %4242 = vmatmul.f32.vlgmr.msrb.gmra.mxu0 %v11835_v30  ;;  %4262 = vmatmul.f32.vlgmr.msra.gmra.mxu1 %v11835_v30 }
 0x970   :  { %4363 = vmatpush.msra.mxu0 %v11856_v60  ;;  %4468 = vmatpush.msra.mxu3 %v11350_v21  ;;  %v11877_v21 = vld [vmem:[%s12946_s7 + $0x258] sm:$0xff] }
 0x971   :  { %4433 = vmatpush.msrb.mxu1 %v11863_v4  ;;  %4453 = vmatpush.msra.mxu2 %v11358_v12  ;;  %v11891_v12 = vld [vmem:[%s12946_s7 + $0x240] sm:$0xff] }
 0x972   :  { %4364 = vmatpush.msra.mxu0 %v11869_v19  ;;  %4469 = vmatpush.msra.mxu3 %v11364_v38  ;;  %v11897_v38 = vld [vmem:[%s12946_s7 + $0xa0] sm:$0xff] }
 0x973   :  { %4434 = vmatpush.msrb.mxu1 %v11877_v21  ;;  %4454 = vmatpush.msra.mxu2 %v11372_v28  ;;  %v11905_v28 = vld [vmem:[%s12946_s7 + $0x228] sm:$0xff] }
 0x974   :  { %4365 = vmatpush.msra.mxu0 %v11883_v1  ;;  %4470 = vmatpush.msra.mxu3 %v11378_v7  ;;  %v11911_v7 = vld [vmem:[%s12946_s7 + $0x88] sm:$0xff] }
 0x975   :  { %4435 = vmatpush.msrb.mxu1 %v11891_v12  ;;  %4455 = vmatpush.msra.mxu2 %v11386_v39  ;;  %v11920_v39 = vld [vmem:[%s12946_s7 + $0x70] sm:$0xff] }
 0x976   :  { %4366 = vmatpush.msra.mxu0 %v11897_v38  ;;  %4471 = vmatpush.msra.mxu3 %v14244_v42  ;;  %14323 = vst [vmem:[#allocation8_spill] sm:$0xff] %v11920_v39  ;;  %v11966_v42 = vld [vmem:[%s12946_s7 + $0x168] sm:$0xff] }
 0x977   :  { %4436 = vmatpush.msrb.mxu1 %v11905_v28  ;;  %4456 = vmatpush.msra.mxu2 %v11400_v10  ;;  %v11929_v10 = vld [vmem:[%s12946_s7 + $0x58] sm:$0xff] }
 0x978   :  { %4367 = vmatpush.msra.mxu0 %v11911_v7  ;;  %4472 = vmatpush.msra.mxu3 %v14248_v31  ;;  %14324 = vst [vmem:[#allocation91_spill] sm:$0xff] %v11929_v10  ;;  %v11982_v31 = vld [vmem:[%s12946_s7 + $0x150] sm:$0xff] }
 0x979   :  { %4437 = vmatpush.msrb.mxu1 %v11412_v35  ;;  %4457 = vmatpush.msra.mxu2 %v11419_v15  ;;  %v11938_v35 = vld [vmem:[%s12946_s7 + $0x40] sm:$0xff]  ;;  %v11947_v15 = vld [vmem:[%s12946_s7 + $0x28] sm:$0xff] }
 0x97a   :  { %4368 = vmatpush.msra.mxu0 %v11920_v39  ;;  %4473 = vmatpush.msra.mxu3 %v14252_v45  ;;  %14325 = vst [vmem:[#allocation61_spill] sm:$0xff] %v11938_v35  ;;  %v11995_v45 = vld [vmem:[%s12946_s7 + $0x138] sm:$0xff] }
 0x97b   :  { %4438 = vmatpush.msrb.mxu1 %v11431_v20  ;;  %4458 = vmatpush.msra.mxu2 %v14245_v62  ;;  %14326 = vst [vmem:[#allocation13_spill] sm:$0xff] %v11947_v15  ;;  %v11956_v20 = vld [vmem:[%s12946_s7 + $0x10] sm:$0xff] }
 0x97c   :  { %4369 = vmatpush.msra.mxu0 %v11929_v10  ;;  %4474 = vmatpush.msra.mxu3 %v14256_v2  ;;  %14327 = vst [vmem:[#allocation92_spill] sm:$0xff] %v11956_v20  ;;  %v11975_v62 = vld [vmem:[%s12946_s7 + $0x170] sm:$0xff]  ;;  %v12008_v2 = vld [vmem:[%s12946_s7 + $0x120] sm:$0xff] }
 0x97d   :  { %4439 = vmatpush.msrb.mxu1 %v14247_v6  ;;  %4459 = vmatpush.msra.mxu2 %v14249_v5  ;;  %v14328_v6 = vld [vmem:[#allocation126_spill] sm:$0xff] }
 0x97e   :  { %4370 = vmatpush.msra.mxu0 %v11938_v35  ;;  %4475 = vmatpush.msra.mxu3 %v14260_v58  ;;  %v11988_v5 = vld [vmem:[%s12946_s7 + $0x158] sm:$0xff]  ;;  %v12021_v58 = vld [vmem:[%s12946_s7 + $0x108] sm:$0xff] }
 0x97f   :  { %4440 = vmatpush.msrb.mxu1 %v14251_v14  ;;  %4460 = vmatpush.msra.mxu2 %v14253_v0  ;;  %v14329_v14 = vld [vmem:[#allocation127_spill] sm:$0xff] }
 0x980   :  { %4371 = vmatpush.msra.mxu0 %v11947_v15  ;;  %4476 = vmatpush.msra.mxu3 %v14264_v36  ;;  %v12001_v0 = vld [vmem:[%s12946_s7 + $0x140] sm:$0xff]  ;;  %v12034_v36 = vld [vmem:[%s12946_s7 + $0xf0] sm:$0xff] }
 0x981   :  { %4441 = vmatpush.msrb.mxu1 %v14255_v16  ;;  %4461 = vmatpush.msra.mxu2 %v14257_v48  ;;  %v14330_v16 = vld [vmem:[#allocation128_spill] sm:$0xff]  ;;  %14333 = vst [vmem:[#allocation70_spill] sm:$0xff] %v12034_v36 }
 0x982   :  { %4372 = vmatpush.msra.mxu0 %v11956_v20  ;;  %4477 = vmatpush.msra.mxu3 %v14268_v26  ;;  %v12014_v48 = vld [vmem:[%s12946_s7 + $0x128] sm:$0xff]  ;;  %v12046_v26 = vld [vmem:[%s12946_s7 + $0xd8] sm:$0xff] }
 0x983   :  { %4442 = vmatpush.msrb.mxu1 %v14259_v13  ;;  %4462 = vmatpush.msra.mxu2 %v14261_v24  ;;  %v14331_v13 = vld [vmem:[#allocation129_spill] sm:$0xff]  ;;  %14335 = vst [vmem:[#allocation54_spill] sm:$0xff] %v12046_v26 }
 0x984   :  { %4539 = vmatpush.msrb.mxu0 %v11966_v42  ;;  %4478 = vmatpush.msra.mxu3 %v14271_v63  ;;  %v12027_v24 = vld [vmem:[%s12946_s7 + $0x110] sm:$0xff]  ;;  %v12052_v63 = vld [vmem:[%s12946_s7 + $0xe0] sm:$0xff] }
 0x985   :  { %4443 = vmatpush.msrb.mxu1 %v14263_v32  ;;  %4463 = vmatpush.msra.mxu2 %v14265_v27  ;;  %v14332_v32 = vld [vmem:[#allocation130_spill] sm:$0xff]  ;;  %14336 = vst [vmem:[#allocation121_spill] sm:$0xff] %v12052_v63 }
 0x986   :  { %4479 = vmatpush.msra.mxu3 %v14328_v6  ;;  %4540 = vmatpush.msrb.mxu0 %v11982_v31  ;;  %v12040_v27 = vld [vmem:[%s12946_s7 + $0xf8] sm:$0xff]  ;;  %v12139_v6 = vld [vmem:[%s12946_s7] sm:$0xff] }
 0x987   :  { %4559 = vmatpush.msra.mxu1 %v11975_v62  ;;  %14334 = vst [vmem:[#allocation69_spill] sm:$0xff] %v12040_v27 }
 0x988   :  { %4480 = vmatpush.msra.mxu3 %v14329_v14  ;;  %4541 = vmatpush.msrb.mxu0 %v11995_v45  ;;  %14353 = vst [vmem:[#allocation87_spill] sm:$0xff] %v12139_v6  ;;  %v14354_v14 = vld [vmem:[#allocation134_spill] sm:$0xff] }
 0x989   :  { %4560 = vmatpush.msra.mxu1 %v11988_v5 }
 0x98a   :  { %4481 = vmatpush.msra.mxu3 %v14330_v16  ;;  %4542 = vmatpush.msrb.mxu0 %v12008_v2  ;;  %v14355_v16 = vld [vmem:[#allocation49_spill] sm:$0xff] }
 0x98b   :  { %4561 = vmatpush.msra.mxu1 %v12001_v0 }
 0x98c   :  { %4482 = vmatpush.msra.mxu3 %v14331_v13  ;;  %4543 = vmatpush.msrb.mxu0 %v12021_v58  ;;  %v14356_v13 = vld [vmem:[#allocation100_spill] sm:$0xff] }
 0x98d   :  { %4562 = vmatpush.msra.mxu1 %v12014_v48 }
 0x98e   :  { %4483 = vmatpush.msra.mxu3 %v14332_v32  ;;  %4544 = vmatpush.msrb.mxu0 %v12034_v36  ;;  %v2584_v32 = vadd.f32 %v14356_v13, %v14355_v16 }
 0x98f   :  { %4563 = vmatpush.msra.mxu1 %v12027_v24 }
 0x990   :  { %4545 = vmatpush.msrb.mxu0 %v12046_v26 }
 0x991   :  { %4564 = vmatpush.msra.mxu1 %v12040_v27 }
 0x992   :  { %4546 = vmatpush.msrb.mxu0 %v12058_v56  ;;  %v14363_v56 = vld [vmem:[#allocation94_spill] sm:$0xff] }
 0x993   :  { %4565 = vmatpush.msra.mxu1 %v12052_v63 }
 0x994   :  { %4547 = vmatpush.msrb.mxu0 %v12070_v50 }
 0x995   :  { %4566 = vmatpush.msra.mxu1 %v12064_v25 }
 0x996   :  { %4548 = vmatpush.msrb.mxu0 %v12082_v37  ;;  %v14362_v37 = vld [vmem:[#allocation95_spill] sm:$0xff] }
 0x997   :  { %4567 = vmatpush.msra.mxu1 %v12076_v18 }
 0x998   :  { %4549 = vmatpush.msrb.mxu0 %v12094_v55  ;;  %v14361_v55 = vld [vmem:[#allocation114_spill] sm:$0xff] }
 0x999   :  { %4568 = vmatpush.msra.mxu1 %v12088_v17 }
 0x99a   :  { %4550 = vmatpush.msrb.mxu0 %v12106_v44 }
 0x99b   :  { %4569 = vmatpush.msra.mxu1 %v12100_v59 }
 0x99c   :  { %4551 = vmatpush.msrb.mxu0 %v12118_v29 }
 0x99d   :  { %4570 = vmatpush.msra.mxu1 %v12112_v46 }
 0x99e   :  { %4552 = vmatpush.msrb.mxu0 %v12125_v52 }
 0x99f   :  { %4571 = vmatpush.msra.mxu1 %v14348_v47  ;;  %v14357_v47 = vld [vmem:[#allocation31_spill] sm:$0xff] }
 0x9a0   :  { %4553 = vmatpush.msrb.mxu0 %v12132_v3  ;;  %v14359_v3 = vld [vmem:[#allocation37_spill] sm:$0xff] }
 0x9a1   :  { %4572 = vmatpush.msra.mxu1 %v14350_v49  ;;  %v14358_v49 = vld [vmem:[#allocation103_spill] sm:$0xff]  ;;  %v2625_v44 = vadd.f32 %v14359_v3, %v2584_v32  ;;  %v14364_v3 = vld [vmem:[#allocation86_spill] sm:$0xff] }
 0x9a2   :  { %4554 = vmatpush.msrb.mxu0 %v12139_v6  ;;  %v2666_v52 = vadd.f32 %v14358_v49, %v14357_v47 }
 0x9a3   :  { %4573 = vmatpush.msra.mxu1 %v14352_v23  ;;  %v14360_v23 = vld [vmem:[#allocation56_spill] sm:$0xff] }
 0x9a4   :  { %v2707_v59 = vadd.f32 %v14360_v23, %v2666_v52  ;;  %v14365_v52 = vld [vmem:[#allocation47_spill] sm:$0xff] }
 0x9a5   :  { %4574 = vmatpush.msra.mxu1 %v14354_v14 }
 0x9e0   :  { %v4112_v29 = vpop.f32.mrf.mxu0  ;;  %v4132_v46 = vpop.f32.mrf.mxu1 }
 0x9e1   :  { %v4113_v17 = vadd.f32 %v4112_v29, %v14361_v55  ;;  %v4133_v18 = vadd.f32 %v4132_v46, %v14362_v37  ;;  %v14366_v29 = vld [vmem:[#allocation59_spill] sm:$0xff] }
 0x9e2   :  { %v2957_v23 = vadd.f32 %v14366_v29, %v14365_v52 }
 0x9e3   :  { %v4155_v50 = vadd.f32 %v4113_v17, %v2625_v44  ;;  %v4175_v6 = vadd.f32 %v4133_v18, %v2707_v59 }
 0x9e5   :  { %v5496_v25 = vmul.f32 -1.442695, %v4155_v50  ;;  %v5497_v14 = vmul.f32 -1.442695, %v4175_v6  ;;  %v14367_v50 = vld [vmem:[#allocation26_spill] sm:$0xff] }
 0x9e6   :  { %v2998_v59 = vadd.f32 %v14367_v50, %v2957_v23 }
 0x9e7   :  { %5761 = vpow2.f32 %v5496_v25  ;;  %v14368_v25 = vld [vmem:[#allocation16_spill] sm:$0xff]  ;;  %v4152_v50 = vpop.f32.mrf.mxu2 }
 0x9e8   :  { %5763 = vpow2.f32 %v5497_v14 }
 0x9ec   :  { %v4243_v13 = vpop.f32.mrf.mxu0 }
 0x9ed   :  { %v5762_v16 = vpop.eup %5761  ;;  %v4244_v49 = vadd.f32 %v4243_v13, %v14363_v56 }
 0x9ee   :  { %v5764_v47 = vpop.eup %5763  ;;  %v4159_v63 = vadd.f32 1.0, %v5762_v16 }
 0x9ef   :  { %v4179_v26 = vadd.f32 1.0, %v5764_v47  ;;  %v4286_v32 = vadd.f32 %v4244_v49, %v14364_v3 }
 0x9f0   :  { %5765 = vrcp.f32 %v4159_v63  ;;  %v4171_v37 = vand.u32 2147483648, %v4159_v63  ;;  %vm4165_vm2 = vweird.f32 %v4159_v63 }
 0x9f1   :  { %5767 = vrcp.f32 %v4179_v26  ;;  %v5499_v17 = vmul.f32 -1.442695, %v4286_v32  ;;  %v4223_v18 = vpop.f32.mrf.mxu3  ;;  %v4169_v32 = vand.u32 2147483647, %v4159_v63  ;;  %vm4185_vm6 = vweird.f32 %v4179_v26 }
 0x9f2   :  { %v4224_v44 = vadd.f32 %v4223_v18, %v14368_v25  ;;  %v4189_v27 = vand.u32 2147483647, %v4179_v26 }
 0x9f3   :  { %5769 = vpow2.f32 %v5499_v17  ;;  %v4172_v17 = vor.u32 1.1754944e-38, %v4171_v37  ;;  %vm4170_vm4 = vcmp.eq.f32.partialorder %v4169_v32, 8.507059e+37 }
 0x9f4   :  { %v4266_v46 = vadd.f32 %v4224_v44, %v2998_v59  ;;  %v14369_v44 = vld [vmem:[#allocation15_spill] sm:$0xff]  ;;  %vm4190_vm8 = vcmp.eq.f32.partialorder %v4189_v27, 8.507059e+37  ;;  %v4263_v27 = vpop.f32.mrf.mxu1 }
 0x9f6   :  { %v5766_v6 = vpop.eup %5765  ;;  %v5498_v16 = vmul.f32 -1.442695, %v4266_v46  ;;  %v14370_v46 = vld [vmem:[#allocation12_spill] sm:$0xff] }
 0x9f7   :  { %v5768_v14 = vpop.eup %5767  ;;  %v4161_v13 = vmul.f32 %v5766_v6, %v4159_v63  ;;  %vm4166_vm1 = vweird.f32 %v5766_v6 }
 0x9f8   :  { %v4181_v47 = vmul.f32 %v5768_v14, %v4179_v26  ;;  %5771 = vpow2.f32 %v5498_v16  ;;  %vm4167_vm3 = vmor %vm4165_vm2, %vm4166_vm1  ;;  %v4153_v16 = vadd.f32 %v4152_v50, %v10870_v22  ;;  %vm4186_vm5 = vweird.f32 %v5768_v14 }
 0x9f9   :  { %v4162_v56 = vsub.f32 1.0, %v4161_v13  ;;  %v5770_v49 = vpop.eup %5769  ;;  %v2748_v13 = vadd.f32 %v14370_v46, %v14369_v44  ;;  %vm4187_vm7 = vmor %vm4185_vm6, %vm4186_vm5 }
 0x9fa   :  { %v4182_v3 = vsub.f32 1.0, %v4181_v47  ;;  %v12157_v52 = vadd.f32 1.0, %v5770_v49 }
 0x9fb   :  { %v4163_v29 = vmul.f32 %v5766_v6, %v4162_v56 }
 0x9fc   :  { %v4183_v23 = vmul.f32 %v5768_v14, %v4182_v3  ;;  %5773 = vrcp.f32 %v12157_v52  ;;  %v14371_v3 = vld [vmem:[#allocation68_spill] sm:$0xff]  ;;  %vm4296_vm14 = vweird.f32 %v12157_v52 }
 0x9fd   :  { %v4164_v18 = vadd.f32 %v5766_v6, %v4163_v29  ;;  %v2789_v55 = vadd.f32 %v14371_v3, %v2748_v13  ;;  %v4191_v29 = vand.u32 2147483648, %v4179_v26 }
 0x9fe   :  { %v5772_v59 = vpop.eup %5771  ;;  %v4184_v49 = vadd.f32 %v5768_v14, %v4183_v23 }
 0x9ff   :  { %v4168_v47 = vsel %vm4167_vm3, %v5766_v6, %v4164_v18  ;;  %v4270_v25 = vadd.f32 1.0, %v5772_v59  ;;  %v4192_v46 = vor.u32 1.1754944e-38, %v4191_v29  ;;  %v4264_v29 = vadd.f32 %v4263_v27, %v10884_v41  ;;  %v12237_v27 = vld [vmem:[%s12946_s7 + $0x260] sm:$0xff] }
 0xa00   :  { %v4173_v56 = vsel %vm4170_vm4, %v4172_v17, %v4168_v47  ;;  %v4188_v44 = vsel %vm4187_vm7, %v5768_v14, %v4184_v49 }
 0xa01   :  { %v4195_v63 = vmul.f32 %v4173_v56, %v4153_v16  ;;  %5775 = vrcp.f32 %v4270_v25  ;;  %v4193_v32 = vsel %vm4190_vm8, %v4192_v46, %v4188_v44  ;;  %v4282_v16 = vand.u32 2147483648, %v4270_v25 }
 0xa02   :  { %v12164_v37 = vpop.eup %5773  ;;  %v4198_v18 = vsub.f32 1.0, %v4193_v32  ;;  %v4200_v47 = vmul.f32 %v4193_v32, %v11770_v8  ;;  %vm4276_vm10 = vweird.f32 %v4270_v25  ;;  %v4302_v46 = vand.u32 2147483648, %v12157_v52 }
 0xa03   :  { %v4196_v36 = vadd.f32 %v4195_v63, %v2789_v55  ;;  %v4292_v6 = vmul.f32 %v12164_v37, %v12157_v52  ;;  %v4280_v55 = vand.u32 2147483647, %v4270_v25  ;;  %v4283_v3 = vor.u32 1.1754944e-38, %v4282_v16 }
 0xa04   :  { %vm4297_vm13 = vweird.f32 %v12164_v37  ;;  %v4300_v32 = vand.u32 2147483647, %v12157_v52  ;;  %v12204_v52 = vld [vmem:[%s12946_s7 + $0x2c0] sm:$0xff] }
 0xa05   :  { %5777 = vtanh.f32 %v4196_v36  ;;  %v4293_v17 = vsub.f32 1.0, %v4292_v6  ;;  %vm4281_vm12 = vcmp.eq.f32.partialorder %v4280_v55, 8.507059e+37  ;;  %vm4298_vm15 = vmor %vm4296_vm14, %vm4297_vm13 }
 0xa06   :  { %vm4301_vm0 = vcmp.eq.f32.partialorder %v4300_v32, 8.507059e+37  ;;  %v12303_v32 = vld [vmem:[%s12946_s7 + $0x2b0] sm:$0xff] }
 0xa07   :  { %v5776_v23 = vpop.eup %5775  ;;  %v4294_v36 = vmul.f32 %v12164_v37, %v4293_v17 }
 0xa08   :  { %v4272_v50 = vmul.f32 %v5776_v23, %v4270_v25  ;;  %vm4277_vm9 = vweird.f32 %v5776_v23  ;;  %v12183_v25 = vld [vmem:[%s12946_s7 + $0x2f0] sm:$0xff] }
 0xa09   :  { %vm4278_vm11 = vmor %vm4276_vm10, %vm4277_vm9  ;;  %v4295_v44 = vadd.f32 %v12164_v37, %v4294_v36 }
 0xa0a   :  { %v4273_v13 = vsub.f32 1.0, %v4272_v50  ;;  %v14372_v50 = vld [vmem:[#allocation115_spill] sm:$0xff] }
 0xa0b   :  { %v5778_v59 = vpop.eup %5777  ;;  %v4299_v17 = vsel %vm4298_vm15, %v12164_v37, %v4295_v44  ;;  %v12212_v37 = vld [vmem:[%s12946_s7 + $0x2a8] sm:$0xff] }
 0xa0c   :  { %v4199_v26 = vmul.f32 %v5778_v59, %v4198_v18  ;;  %v4274_v56 = vmul.f32 %v5776_v23, %v4273_v13  ;;  %v4303_v59 = vor.u32 1.1754944e-38, %v4302_v46  ;;  %v12284_v44 = vld [vmem:[%s12946_s7 + $0x2c8] sm:$0xff]  ;;  %v12290_v46 = vld [vmem:[%s12946_s7 + $0x218] sm:$0xff] }
 0xa0d   :  { %14373 = vst [vmem:[#allocation58_spill] sm:$0xff] %v12290_v46 }
 0xa0e   :  { %v12170_v14 = vadd.f32 %v4200_v47, %v4199_v26  ;;  %v4275_v49 = vadd.f32 %v5776_v23, %v4274_v56  ;;  %v4304_v13 = vsel %vm4301_vm0, %v4303_v59, %v4299_v17  ;;  %v12220_v26 = vld [vmem:[%s12946_s7 + $0x290] sm:$0xff]  ;;  %v12228_v47 = vld [vmem:[%s12946_s7 + $0x278] sm:$0xff]  ;;  %v12328_v59 = vld [vmem:[%s12946_s7 + $0x1e8] sm:$0xff] }
 0xa0f   :  { %v4309_v16 = vsub.f32 1.0, %v4304_v13  ;;  %v4311_v36 = vmul.f32 %v4304_v13, %v11835_v30  ;;  %v12257_v30 = vld [vmem:[%s12946_s7 + $0x2f8] sm:$0xff]  ;;  %14377 = vst [vmem:[#allocation99_spill] sm:$0xff] %v12328_v59  ;;  %v12335_v13 = vld [vmem:[%s12946_s7 + $0x1c8] sm:$0xff] }
 0xa10   :  { %4333 = vmatmul.f32.vlgmr.msrb.gmra.mxu2 %v12170_v14  ;;  %4353 = vmatmul.f32.vlgmr.msrb.gmra.mxu3 %v12170_v14  ;;  %v4279_v63 = vsel %vm4278_vm11, %v5776_v23, %v4275_v49  ;;  %v12194_v23 = vld [vmem:[%s12946_s7 + $0x2d8] sm:$0xff]  ;;  %14378 = vst [vmem:[#allocation124_spill] sm:$0xff] %v12335_v13 }
 0xa11   :  { %4373 = vmatmul.f32.vlgmr.msra.gmra.mxu0 %v12170_v14  ;;  %4579 = vmatpush.msrb.mxu2 %v11779_v34  ;;  %v4284_v8 = vsel %vm4281_vm12, %v4283_v3, %v4279_v63  ;;  %v12247_v3 = vld [vmem:[%s12946_s7 + $0x248] sm:$0xff]  ;;  %v12271_v63 = vld [vmem:[%s12946_s7 + $0x230] sm:$0xff]  ;;  %v12322_v17 = vld [vmem:[%s12946_s7 + $0x298] sm:$0xff] }
 0xa12   :  { %4650 = vmatpush.msrb.mxu3 %v11785_v61  ;;  %4670 = vmatpush.msra.mxu0 %v12183_v25  ;;  %v4306_v6 = vmul.f32 %v4284_v8, %v4264_v29  ;;  %v12265_v29 = vld [vmem:[%s12946_s7 + $0x2e0] sm:$0xff]  ;;  %v12278_v8 = vld [vmem:[%s12946_s7 + $0x210] sm:$0xff] }
 0xa13   :  { %4580 = vmatpush.msrb.mxu2 %v11792_v11 }
 0xa14   :  { %4651 = vmatpush.msrb.mxu3 %v11798_v57  ;;  %4671 = vmatpush.msra.mxu0 %v12194_v23  ;;  %v4307_v18 = vadd.f32 %v4306_v6, %v14372_v50  ;;  %v12297_v6 = vld [vmem:[%s12946_s7 + $0x1f8] sm:$0xff]  ;;  %v12309_v50 = vld [vmem:[%s12946_s7 + $0x200] sm:$0xff] }
 0xa15   :  { %4581 = vmatpush.msrb.mxu2 %v11805_v53  ;;  %14374 = vst [vmem:[#allocation88_spill] sm:$0xff] %v12297_v6 }
 0xa16   :  { %4652 = vmatpush.msrb.mxu3 %v11811_v43  ;;  %4672 = vmatpush.msra.mxu0 %v12204_v52  ;;  %5779 = vtanh.f32 %v4307_v18  ;;  %14375 = vst [vmem:[#allocation14_spill] sm:$0xff] %v12309_v50  ;;  %v12316_v18 = vld [vmem:[%s12946_s7 + $0x1e0] sm:$0xff] }
 0xa17   :  { %4582 = vmatpush.msrb.mxu2 %v11818_v54  ;;  %14376 = vst [vmem:[#allocation122_spill] sm:$0xff] %v12316_v18 }
 0xa18   :  { %4653 = vmatpush.msrb.mxu3 %v11825_v51  ;;  %4673 = vmatpush.msra.mxu0 %v12212_v37 }
 0xa19   :  { %4583 = vmatpush.msrb.mxu2 %v11832_v9 }
 0xa1a   :  { %4654 = vmatpush.msrb.mxu3 %v11840_v33  ;;  %4674 = vmatpush.msra.mxu0 %v12220_v26 }
 0xa1b   :  { %4584 = vmatpush.msrb.mxu2 %v11847_v40 }
 0xa1c   :  { %4655 = vmatpush.msrb.mxu3 %v11863_v4  ;;  %4675 = vmatpush.msra.mxu0 %v12228_v47  ;;  %v5780_v56 = vpop.eup %5779 }
 0xa1d   :  { %4585 = vmatpush.msrb.mxu2 %v11856_v60  ;;  %v4310_v55 = vmul.f32 %v5780_v56, %v4309_v16  ;;  %v12341_v16 = vld [vmem:[%s12946_s7 + $0x280] sm:$0xff]  ;;  %v12347_v56 = vld [vmem:[%s12946_s7 + $0x1d0] sm:$0xff] }
 0xa1e   :  { %4656 = vmatpush.msrb.mxu3 %v11877_v21  ;;  %4676 = vmatpush.msra.mxu0 %v12237_v27  ;;  %14379 = vst [vmem:[#allocation25_spill] sm:$0xff] %v12341_v16 }
 0xa1f   :  { %4586 = vmatpush.msrb.mxu2 %v11869_v19  ;;  %v12241_v49 = vadd.f32 %v4311_v36, %v4310_v55  ;;  %14380 = vst [vmem:[#allocation125_spill] sm:$0xff] %v12347_v56  ;;  %v12354_v55 = vld [vmem:[%s12946_s7 + $0x1b0] sm:$0xff]  ;;  %v12360_v36 = vld [vmem:[%s12946_s7 + $0x268] sm:$0xff] }
 0xa20   :  { %4657 = vmatpush.msrb.mxu3 %v11891_v12  ;;  %4677 = vmatpush.msra.mxu0 %v12247_v3  ;;  %14381 = vst [vmem:[#allocation101_spill] sm:$0xff] %v12354_v55 }
 0xa21   :  { %4587 = vmatpush.msrb.mxu2 %v11883_v1  ;;  %4444 = vmatmul.f32.vlgmr.msrb.gmra.mxu1 %v12241_v49  ;;  %14382 = vst [vmem:[#allocation28_spill] sm:$0xff] %v12360_v36 }
 0xa22   :  { %4464 = vmatmul.f32.vlgmr.msra.gmra.mxu2 %v12241_v49  ;;  %4484 = vmatmul.f32.vlgmr.msra.gmra.mxu3 %v12241_v49 }
 0xa23   :  { %4690 = vmatpush.msrb.mxu1 %v12257_v30  ;;  %4588 = vmatpush.msrb.mxu2 %v11897_v38 }
 0xa24   :  { %4658 = vmatpush.msrb.mxu3 %v11905_v28  ;;  %4678 = vmatpush.msra.mxu0 %v12271_v63 }
 0xa25   :  { %4691 = vmatpush.msrb.mxu1 %v12265_v29  ;;  %4589 = vmatpush.msrb.mxu2 %v11911_v7 }
 0xa26   :  { %4659 = vmatpush.msrb.mxu3 %v12278_v8  ;;  %4679 = vmatpush.msra.mxu0 %v12290_v46 }
 0xa27   :  { %4692 = vmatpush.msrb.mxu1 %v12284_v44  ;;  %4590 = vmatpush.msrb.mxu2 %v11920_v39 }
 0xa28   :  { %4660 = vmatpush.msrb.mxu3 %v12297_v6  ;;  %4680 = vmatpush.msra.mxu0 %v12309_v50 }
 0xa29   :  { %4693 = vmatpush.msrb.mxu1 %v12303_v32  ;;  %4591 = vmatpush.msrb.mxu2 %v11929_v10 }
 0xa2a   :  { %4661 = vmatpush.msrb.mxu3 %v12316_v18  ;;  %4681 = vmatpush.msra.mxu0 %v12328_v59 }
 0xa2b   :  { %4694 = vmatpush.msrb.mxu1 %v12322_v17  ;;  %4592 = vmatpush.msrb.mxu2 %v11938_v35 }
 0xa2c   :  { %4662 = vmatpush.msrb.mxu3 %v12335_v13  ;;  %4682 = vmatpush.msra.mxu0 %v12347_v56  ;;  %v12366_v56 = vld [vmem:[%s12946_s7 + $0x1b8] sm:$0xff] }
 0xa2d   :  { %4695 = vmatpush.msrb.mxu1 %v12341_v16  ;;  %4593 = vmatpush.msrb.mxu2 %v11947_v15  ;;  %14383 = vst [vmem:[#allocation117_spill] sm:$0xff] %v12366_v56  ;;  %v12379_v15 = vld [vmem:[%s12946_s7 + $0x250] sm:$0xff]  ;;  %v14425_v16 = vld [vmem:[#allocation11_spill] sm:$0xff] }
 0xa2e   :  { %4663 = vmatpush.msrb.mxu3 %v12354_v55  ;;  %4683 = vmatpush.msra.mxu0 %v12366_v56  ;;  %v12373_v55 = vld [vmem:[%s12946_s7 + $0x198] sm:$0xff]  ;;  %14385 = vst [vmem:[#allocation50_spill] sm:$0xff] %v12379_v15  ;;  %v12385_v56 = vld [vmem:[%s12946_s7 + $0x1a0] sm:$0xff] }
 0xa2f   :  { %4696 = vmatpush.msrb.mxu1 %v12360_v36  ;;  %4594 = vmatpush.msrb.mxu2 %v11956_v20  ;;  %14384 = vst [vmem:[#allocation102_spill] sm:$0xff] %v12373_v55  ;;  %v12391_v20 = vld [vmem:[%s12946_s7 + $0x180] sm:$0xff] }
 0xa30   :  { %4664 = vmatpush.msrb.mxu3 %v12373_v55  ;;  %14386 = vst [vmem:[#allocation123_spill] sm:$0xff] %v12385_v56  ;;  %4684 = vmatpush.msra.mxu0 %v12385_v56  ;;  %v12398_v55 = vld [vmem:[%s12946_s7 + $0x238] sm:$0xff]  ;;  %v12404_v56 = vld [vmem:[%s12946_s7 + $0x188] sm:$0xff] }
 0xa31   :  { %4697 = vmatpush.msrb.mxu1 %v12379_v15  ;;  %14387 = vst [vmem:[#allocation38_spill] sm:$0xff] %v12391_v20  ;;  %4761 = vmatpush.msra.mxu2 %v11966_v42  ;;  %v12412_v42 = vld [vmem:[%s12946_s7 + $0x220] sm:$0xff]  ;;  %v14420_v15 = vld [vmem:[#allocation57_spill] sm:$0xff] }
 0xa32   :  { %4665 = vmatpush.msrb.mxu3 %v12391_v20  ;;  %14388 = vst [vmem:[#allocation104_spill] sm:$0xff] %v12398_v55  ;;  %4685 = vmatpush.msra.mxu0 %v12404_v56  ;;  %v12420_v20 = vld [vmem:[%s12946_s7 + $0x208] sm:$0xff] }
 0xa33   :  { %4698 = vmatpush.msrb.mxu1 %v12398_v55  ;;  %14389 = vst [vmem:[#allocation55_spill] sm:$0xff] %v12404_v56  ;;  %4762 = vmatpush.msra.mxu2 %v11982_v31  ;;  %v12436_v31 = vld [vmem:[%s12946_s7 + $0x1d8] sm:$0xff] }
 0xa34   :  { %4781 = vmatpush.msra.mxu3 %v11975_v62  ;;  %14390 = vst [vmem:[#allocation43_spill] sm:$0xff] %v12412_v42  ;;  %v12428_v62 = vld [vmem:[%s12946_s7 + $0x1f0] sm:$0xff] }
 0xa35   :  { %4699 = vmatpush.msrb.mxu1 %v12412_v42  ;;  %4763 = vmatpush.msra.mxu2 %v11995_v45  ;;  %14391 = vst [vmem:[#allocation23_spill] sm:$0xff] %v12420_v20  ;;  %v12444_v45 = vld [vmem:[%s12946_s7 + $0x1c0] sm:$0xff]  ;;  %v14410_v56 = vld [vmem:[#allocation18_spill] sm:$0xff] }
 0xa36   :  { %4782 = vmatpush.msra.mxu3 %v11988_v5  ;;  %14392 = vst [vmem:[#allocation52_spill] sm:$0xff] %v12428_v62  ;;  %v14394_v5 = vld [vmem:[#allocation70_spill] sm:$0xff] }
 0xa37   :  { %4700 = vmatpush.msrb.mxu1 %v12420_v20  ;;  %4764 = vmatpush.msra.mxu2 %v12008_v2  ;;  %14393 = vst [vmem:[#allocation40_spill] sm:$0xff] %v12436_v31  ;;  %v14397_v2 = vld [vmem:[#allocation54_spill] sm:$0xff] }
 0xa38   :  { %4783 = vmatpush.msra.mxu3 %v12001_v0  ;;  %14395 = vst [vmem:[#allocation113_spill] sm:$0xff] %v12444_v45  ;;  %v14396_v0 = vld [vmem:[#allocation69_spill] sm:$0xff]  ;;  %v14411_v20 = vld [vmem:[#allocation98_spill] sm:$0xff] }
 0xa39   :  { %4701 = vmatpush.msrb.mxu1 %v12428_v62  ;;  %4765 = vmatpush.msra.mxu2 %v12021_v58  ;;  %v14399_v58 = vld [vmem:[#allocation121_spill] sm:$0xff]  ;;  %v14409_v62 = vld [vmem:[#allocation34_spill] sm:$0xff] }
 0xa3a   :  { %4784 = vmatpush.msra.mxu3 %v12014_v48  ;;  %v12452_v48 = vld [vmem:[%s12946_s7 + $0x1a8] sm:$0xff]  ;;  %v14419_v42 = vld [vmem:[#allocation46_spill] sm:$0xff] }
 0xa3b   :  { %4702 = vmatpush.msrb.mxu1 %v12436_v31  ;;  %4766 = vmatpush.msra.mxu2 %v14394_v5  ;;  %14398 = vst [vmem:[#allocation119_spill] sm:$0xff] %v12452_v48  ;;  %v12460_v5 = vld [vmem:[%s12946_s7 + $0x190] sm:$0xff] }
 0xa3c   :  { %4785 = vmatpush.msra.mxu3 %v12027_v24  ;;  %v14400_v24 = vld [vmem:[#allocation35_spill] sm:$0xff]  ;;  %14401 = vst [vmem:[#allocation120_spill] sm:$0xff] %v12460_v5  ;;  %v14405_v31 = vld [vmem:[#allocation73_spill] sm:$0xff] }
 0xa3d   :  { %4703 = vmatpush.msrb.mxu1 %v12444_v45  ;;  %4767 = vmatpush.msra.mxu2 %v14397_v2  ;;  %v14403_v2 = vld [vmem:[#allocation97_spill] sm:$0xff]  ;;  %v14404_v45 = vld [vmem:[#allocation48_spill] sm:$0xff] }
 0xa3e   :  { %4786 = vmatpush.msra.mxu3 %v14396_v0  ;;  %v14402_v0 = vld [vmem:[#allocation64_spill] sm:$0xff] }
 0xa3f   :  { %4704 = vmatpush.msrb.mxu1 %v12452_v48  ;;  %4768 = vmatpush.msra.mxu2 %v14400_v24  ;;  %v14406_v48 = vld [vmem:[#allocation79_spill] sm:$0xff]  ;;  %v14408_v24 = vld [vmem:[#allocation66_spill] sm:$0xff] }
 0xa40   :  { %4787 = vmatpush.msra.mxu3 %v14399_v58  ;;  %v14407_v58 = vld [vmem:[#allocation51_spill] sm:$0xff] }
 0xa41   :  { %4705 = vmatpush.msrb.mxu1 %v12460_v5  ;;  %4769 = vmatpush.msra.mxu2 %v14403_v2  ;;  %v14415_v2 = vld [vmem:[#allocation49_spill] sm:$0xff] }
 0xa42   :  { %4788 = vmatpush.msra.mxu3 %v14402_v0  ;;  %v6227_v0 = vld [vmem:[%s12946_s7 + $0x50] sm:$0xff] }
 0xa43   :  { %4770 = vmatpush.msra.mxu2 %v14405_v31  ;;  %v6228_v31 = vld [vmem:[%s12946_s7 + $0x38] sm:$0xff] }
 0xa44   :  { %4789 = vmatpush.msra.mxu3 %v14404_v45  ;;  %v14412_v45 = vld [vmem:[#allocation42_spill] sm:$0xff] }
 0xa45   :  { %4771 = vmatpush.msra.mxu2 %v14407_v58  ;;  %v14416_v58 = vld [vmem:[#allocation105_spill] sm:$0xff] }
 0xa46   :  { %4790 = vmatpush.msra.mxu3 %v14406_v48  ;;  %v14413_v48 = vld [vmem:[#allocation75_spill] sm:$0xff] }
 0xa47   :  { %4772 = vmatpush.msra.mxu2 %v14409_v62  ;;  %v6230_v62 = vld [vmem:[%s12946_s7 + $0x8] sm:$0xff] }
 0xa48   :  { %4791 = vmatpush.msra.mxu3 %v14408_v24  ;;  %v2587_v24 = vadd.f32 %v14416_v58, %v14415_v2  ;;  %v14423_v58 = vld [vmem:[#allocation47_spill] sm:$0xff]  ;;  %v14424_v2 = vld [vmem:[#allocation45_spill] sm:$0xff] }
 0xa49   :  { %4773 = vmatpush.msra.mxu2 %v14411_v20  ;;  %v14414_v20 = vld [vmem:[#allocation87_spill] sm:$0xff]  ;;  %v2954_v10 = vadd.f32 %v14424_v2, %v14423_v58 }
 0xa4a   :  { %4792 = vmatpush.msra.mxu3 %v14410_v56  ;;  %v6229_v56 = vld [vmem:[%s12946_s7 + $0x20] sm:$0xff]  ;;  %v2628_v55 = vadd.f32 %v14419_v42, %v2587_v24 }
 0xa4b   :  { %4774 = vmatpush.msra.mxu2 %v14412_v45  ;;  %v14418_v45 = vld [vmem:[#allocation106_spill] sm:$0xff]  ;;  %v2995_v6 = vadd.f32 %v14425_v16, %v2954_v10  ;;  %v14426_v42 = vld [vmem:[#allocation16_spill] sm:$0xff] }
 0xa4c   :  { %4793 = vmatpush.msra.mxu3 %v6227_v0  ;;  %v14417_v0 = vld [vmem:[#allocation31_spill] sm:$0xff] }
 0xa4d   :  { %4775 = vmatpush.msra.mxu2 %v14413_v48 }
 0xa4e   :  { %4794 = vmatpush.msra.mxu3 %v6228_v31  ;;  %v2669_v31 = vadd.f32 %v14418_v45, %v14417_v0 }
 0xa4f   :  { %4776 = vmatpush.msra.mxu2 %v14414_v20  ;;  %v14422_v20 = vld [vmem:[#allocation95_spill] sm:$0xff] }
 0xa50   :  { %4795 = vmatpush.msra.mxu3 %v6229_v56  ;;  %v2710_v13 = vadd.f32 %v14420_v15, %v2669_v31  ;;  %v14421_v56 = vld [vmem:[#allocation114_spill] sm:$0xff] }
 0xa52   :  { %4796 = vmatpush.msra.mxu3 %v6230_v62 }
 0xa93   :  { %v4334_v5 = vpop.f32.mrf.mxu2  ;;  %v4354_v48 = vpop.f32.mrf.mxu3 }
 0xa94   :  { %v4335_v59 = vadd.f32 %v4334_v5, %v14421_v56  ;;  %v4355_v35 = vadd.f32 %v4354_v48, %v14422_v20 }
 0xa96   :  { %v4377_v36 = vadd.f32 %v4335_v59, %v2628_v55  ;;  %v4397_v18 = vadd.f32 %v4355_v35, %v2710_v13  ;;  %v14428_v13 = vld [vmem:[#allocation72_spill] sm:$0xff] }
 0xa98   :  { %v5500_v50 = vmul.f32 -1.442695, %v4377_v36  ;;  %v5501_v62 = vmul.f32 -1.442695, %v4397_v18 }
 0xa9a   :  { %5781 = vpow2.f32 %v5500_v50  ;;  %v14427_v50 = vld [vmem:[#allocation94_spill] sm:$0xff] }
 0xa9b   :  { %5783 = vpow2.f32 %v5501_v62 }
 0xa9e   :  { %v4445_v45 = vpop.f32.mrf.mxu1 }
 0xa9f   :  { %v4446_v24 = vadd.f32 %v4445_v45, %v14426_v42  ;;  %v4374_v42 = vpop.f32.mrf.mxu0 }
 0xaa0   :  { %v5782_v0 = vpop.eup %5781 }
 0xaa1   :  { %v5784_v15 = vpop.eup %5783  ;;  %v4381_v31 = vadd.f32 1.0, %v5782_v0  ;;  %v4488_v56 = vadd.f32 %v4446_v24, %v2995_v6 }
 0xaa2   :  { %v4401_v5 = vadd.f32 1.0, %v5784_v15 }
 0xaa3   :  { %5785 = vrcp.f32 %v4381_v31  ;;  %v5502_v35 = vmul.f32 -1.442695, %v4488_v56  ;;  %v4393_v0 = vand.u32 2147483648, %v4381_v31  ;;  %v4391_v56 = vand.u32 2147483647, %v4381_v31 }
 0xaa4   :  { %5787 = vrcp.f32 %v4401_v5  ;;  %vm4387_vm2 = vweird.f32 %v4381_v31  ;;  %vm4407_vm6 = vweird.f32 %v4401_v5 }
 0xaa5   :  { %v4465_v59 = vpop.f32.mrf.mxu2  ;;  %5789 = vpow2.f32 %v5502_v35  ;;  %vm4392_vm4 = vcmp.eq.f32.partialorder %v4391_v56, 8.507059e+37 }
 0xaa6   :  { %v4466_v18 = vadd.f32 %v4465_v59, %v14427_v50 }
 0xaa8   :  { %v4508_v55 = vadd.f32 %v4466_v18, %v14428_v13  ;;  %v4394_v18 = vor.u32 1.1754944e-38, %v4393_v0 }
 0xaa9   :  { %v5786_v36 = vpop.eup %5785 }
 0xaaa   :  { %v5788_v2 = vpop.eup %5787  ;;  %v4383_v48 = vmul.f32 %v5786_v36, %v4381_v31  ;;  %v5503_v62 = vmul.f32 -1.442695, %v4508_v55  ;;  %vm4388_vm1 = vweird.f32 %v5786_v36  ;;  %v4375_v55 = vadd.f32 %v4374_v42, %v10870_v22  ;;  %v14429_v31 = vld [vmem:[#allocation33_spill] sm:$0xff] }
 0xaab   :  { %v4403_v10 = vmul.f32 %v5788_v2, %v4401_v5  ;;  %v5790_v16 = vpop.eup %5789  ;;  %vm4389_vm3 = vmor %vm4387_vm2, %vm4388_vm1  ;;  %vm4408_vm5 = vweird.f32 %v5788_v2 }
 0xaac   :  { %v4384_v45 = vsub.f32 1.0, %v4383_v48  ;;  %5791 = vpow2.f32 %v5503_v62  ;;  %v4492_v6 = vadd.f32 1.0, %v5790_v16  ;;  %vm4409_vm7 = vmor %vm4407_vm6, %vm4408_vm5 }
 0xaad   :  { %v4404_v15 = vsub.f32 1.0, %v4403_v10 }
 0xaae   :  { %v4385_v24 = vmul.f32 %v5786_v36, %v4384_v45  ;;  %5793 = vrcp.f32 %v4492_v6  ;;  %v4413_v45 = vand.u32 2147483648, %v4401_v5  ;;  %v4504_v42 = vand.u32 2147483648, %v4492_v6 }
 0xaaf   :  { %v4405_v35 = vmul.f32 %v5788_v2, %v4404_v15  ;;  %v4411_v15 = vand.u32 2147483647, %v4401_v5  ;;  %vm4498_vm10 = vweird.f32 %v4492_v6 }
 0xab0   :  { %v4386_v59 = vadd.f32 %v5786_v36, %v4385_v24  ;;  %v4414_v46 = vor.u32 1.1754944e-38, %v4413_v45  ;;  %v4505_v5 = vor.u32 1.1754944e-38, %v4504_v42  ;;  %v14430_v42 = vld [vmem:[#allocation111_spill] sm:$0xff] }
 0xab1   :  { %v4406_v10 = vadd.f32 %v5788_v2, %v4405_v35  ;;  %vm4412_vm8 = vcmp.eq.f32.partialorder %v4411_v15, 8.507059e+37 }
 0xab2   :  { %v5792_v13 = vpop.eup %5791  ;;  %v4390_v58 = vsel %vm4389_vm3, %v5786_v36, %v4386_v59  ;;  %v4502_v36 = vand.u32 2147483647, %v4492_v6  ;;  %v4485_v59 = vpop.f32.mrf.mxu3 }
 0xab3   :  { %v4395_v48 = vsel %vm4392_vm4, %v4394_v18, %v4390_v58  ;;  %v4512_v62 = vadd.f32 1.0, %v5792_v13  ;;  %v4410_v0 = vsel %vm4409_vm7, %v5788_v2, %v4406_v10  ;;  %v4486_v2 = vadd.f32 %v4485_v59, %v10884_v41  ;;  %v14463_v59 = vld [vmem:[#allocation108_spill] sm:$0xff] }
 0xab4   :  { %v4417_v16 = vmul.f32 %v4395_v48, %v4375_v55  ;;  %v5794_v50 = vpop.eup %5793  ;;  %v4415_v56 = vsel %vm4412_vm8, %v4414_v46, %v4410_v0  ;;  %vm4503_vm12 = vcmp.eq.f32.partialorder %v4502_v36, 8.507059e+37 }
 0xab5   :  { %5795 = vrcp.f32 %v4512_v62  ;;  %v4494_v24 = vmul.f32 %v5794_v50, %v4492_v6  ;;  %vm4499_vm9 = vweird.f32 %v5794_v50  ;;  %v4420_v55 = vsub.f32 1.0, %v4415_v56 }
 0xab6   :  { %v4418_v20 = vadd.f32 %v4417_v16, %v14429_v31  ;;  %vm4500_vm11 = vmor %vm4498_vm10, %vm4499_vm9  ;;  %v4524_v46 = vand.u32 2147483648, %v4512_v62  ;;  %v4522_v31 = vand.u32 2147483647, %v4512_v62  ;;  %vm4518_vm14 = vweird.f32 %v4512_v62 }
 0xab7   :  { %v4495_v39 = vsub.f32 1.0, %v4494_v24 }
 0xab8   :  { %5797 = vtanh.f32 %v4418_v20  ;;  %vm4523_vm0 = vcmp.eq.f32.partialorder %v4522_v31, 8.507059e+37 }
 0xab9   :  { %v4496_v58 = vmul.f32 %v5794_v50, %v4495_v39  ;;  %v4422_v39 = vmul.f32 %v4415_v56, %v12170_v14 }
 0xabb   :  { %v5796_v35 = vpop.eup %5795  ;;  %v4497_v13 = vadd.f32 %v5794_v50, %v4496_v58 }
 0xabc   :  { %v4514_v18 = vmul.f32 %v5796_v35, %v4512_v62  ;;  %vm4519_vm13 = vweird.f32 %v5796_v35 }
 0xabd   :  { %v4501_v10 = vsel %vm4500_vm11, %v5794_v50, %v4497_v13  ;;  %vm4520_vm15 = vmor %vm4518_vm14, %vm4519_vm13  ;;  %v4525_v50 = vor.u32 1.1754944e-38, %v4524_v46  ;;  %v5008_v13 = vld [vmem:[%s12949_s10 + $0xf0] sm:$0xff]  ;;  %v5007_v46 = vld [vmem:[%s12949_s10 + $0xe8] sm:$0xff] }
 0xabe   :  { %v5798_v48 = vpop.eup %5797  ;;  %v4515_v16 = vsub.f32 1.0, %v4514_v18  ;;  %v4506_v20 = vsel %vm4503_vm12, %v4505_v5, %v4501_v10 }
 0xabf   :  { %v4421_v45 = vmul.f32 %v5798_v48, %v4420_v55  ;;  %v4528_v24 = vmul.f32 %v4506_v20, %v4486_v2  ;;  %v14464_v48 = vld [vmem:[#allocation19_spill] sm:$0xff]  ;;  %v14465_v2 = vld [vmem:[#allocation24_spill] sm:$0xff]  ;;  %v14466_v20 = vld [vmem:[#allocation114_spill] sm:$0xff] }
 0xac0   :  { %v4516_v15 = vmul.f32 %v5796_v35, %v4515_v16 }
 0xac1   :  { %v12506_v0 = vadd.f32 %v4422_v39, %v4421_v45  ;;  %v4529_v58 = vadd.f32 %v4528_v24, %v14430_v42  ;;  %v14467_v39 = vld [vmem:[#allocation95_spill] sm:$0xff] }
 0xac2   :  { %v4517_v6 = vadd.f32 %v5796_v35, %v4516_v15 }
 0xac3   :  { %4555 = vmatmul.f32.vlgmr.msrb.gmra.mxu0 %v12506_v0  ;;  %4575 = vmatmul.f32.vlgmr.msra.gmra.mxu1 %v12506_v0  ;;  %5799 = vtanh.f32 %v4529_v58 }
 0xac4   :  { %v4521_v36 = vsel %vm4520_vm15, %v5796_v35, %v4517_v6  ;;  %4595 = vmatmul.f32.vlgmr.msrb.gmra.mxu2 %v12506_v0  ;;  %4801 = vmatpush.msrb.mxu0 %v11779_v34  ;;  %v14462_v35 = vld [vmem:[#allocation31_spill] sm:$0xff] }
 0xac5   :  { %4871 = vmatpush.msra.mxu1 %v11785_v61  ;;  %4891 = vmatpush.msrb.mxu2 %v12183_v25  ;;  %v4526_v14 = vsel %vm4523_vm0, %v4525_v50, %v4521_v36  ;;  %v2672_v18 = vadd.f32 %v14463_v59, %v14462_v35  ;;  %v5006_v6 = vld [vmem:[%s12949_s10 + $0xe0] sm:$0xff]  ;;  %v5005_v50 = vld [vmem:[%s12949_s10 + $0xd8] sm:$0xff]  ;;  %v5004_v36 = vld [vmem:[%s12949_s10 + $0xd0] sm:$0xff] }
 0xac6   :  { %4802 = vmatpush.msrb.mxu0 %v11792_v11  ;;  %v4531_v62 = vsub.f32 1.0, %v4526_v14  ;;  %v4533_v25 = vmul.f32 %v4526_v14, %v12241_v49  ;;  %v14454_v49 = vld [vmem:[#allocation55_spill] sm:$0xff]  ;;  %v5003_v14 = vld [vmem:[%s12949_s10 + $0xc8] sm:$0xff] }
 0xac7   :  { %4872 = vmatpush.msra.mxu1 %v11798_v57  ;;  %4892 = vmatpush.msrb.mxu2 %v12194_v23  ;;  %v14431_v57 = vld [vmem:[#allocation8_spill] sm:$0xff]  ;;  %v14448_v23 = vld [vmem:[#allocation117_spill] sm:$0xff]  ;;  %v2713_v10 = vadd.f32 %v14465_v2, %v2672_v18 }
 0xac8   :  { %4803 = vmatpush.msrb.mxu0 %v11805_v53  ;;  %v14432_v53 = vld [vmem:[#allocation58_spill] sm:$0xff]  ;;  %v4995_v18 = vld [vmem:[%s12949_s10 + $0x88] sm:$0xff] }
 0xac9   :  { %4873 = vmatpush.msra.mxu1 %v11811_v43  ;;  %4893 = vmatpush.msrb.mxu2 %v12204_v52  ;;  %v5800_v34 = vpop.eup %5799  ;;  %v14433_v43 = vld [vmem:[#allocation88_spill] sm:$0xff]  ;;  %v14449_v52 = vld [vmem:[#allocation102_spill] sm:$0xff] }
 0xaca   :  { %4804 = vmatpush.msrb.mxu0 %v11818_v54  ;;  %v4532_v61 = vmul.f32 %v5800_v34, %v4531_v62  ;;  %v14434_v54 = vld [vmem:[#allocation25_spill] sm:$0xff]  ;;  %v5002_v62 = vld [vmem:[%s12949_s10 + $0xc0] sm:$0xff] }
 0xacb   :  { %4874 = vmatpush.msra.mxu1 %v11825_v51  ;;  %4894 = vmatpush.msrb.mxu2 %v12212_v37  ;;  %v14435_v51 = vld [vmem:[#allocation91_spill] sm:$0xff] }
 0xacc   :  { %4805 = vmatpush.msrb.mxu0 %v11832_v9  ;;  %v12526_v11 = vadd.f32 %v4533_v25, %v4532_v61  ;;  %v14436_v9 = vld [vmem:[#allocation14_spill] sm:$0xff]  ;;  %v14450_v37 = vld [vmem:[#allocation43_spill] sm:$0xff] }
 0xacd   :  { %4875 = vmatpush.msra.mxu1 %v11840_v33  ;;  %4895 = vmatpush.msrb.mxu2 %v12220_v26  ;;  %v14437_v33 = vld [vmem:[#allocation122_spill] sm:$0xff]  ;;  %v14451_v26 = vld [vmem:[#allocation123_spill] sm:$0xff] }
 0xace   :  { %4806 = vmatpush.msrb.mxu0 %v11847_v40  ;;  %4666 = vmatmul.f32.vlgmr.msrb.gmra.mxu3 %v12526_v11  ;;  %v14438_v40 = vld [vmem:[#allocation28_spill] sm:$0xff]  ;;  %v4993_v61 = vld [vmem:[%s12949_s10 + $0x78] sm:$0xff] }
 0xacf   :  { %4686 = vmatmul.f32.vlgmr.msra.gmra.mxu0 %v12526_v11  ;;  %4706 = vmatmul.f32.vlgmr.msrb.gmra.mxu1 %v12526_v11 }
 0xad0   :  { %4807 = vmatpush.msrb.mxu0 %v11856_v60  ;;  %4876 = vmatpush.msra.mxu1 %v11863_v4  ;;  %v14439_v60 = vld [vmem:[#allocation61_spill] sm:$0xff]  ;;  %v14440_v4 = vld [vmem:[#allocation99_spill] sm:$0xff] }
 0xad1   :  { %4911 = vmatpush.msrb.mxu3 %v12257_v30  ;;  %4896 = vmatpush.msrb.mxu2 %v12228_v47  ;;  %v14452_v47 = vld [vmem:[#allocation38_spill] sm:$0xff]  ;;  %v14456_v30 = vld [vmem:[#allocation40_spill] sm:$0xff] }
 0xad2   :  { %4808 = vmatpush.msrb.mxu0 %v11869_v19  ;;  %4877 = vmatpush.msra.mxu1 %v11877_v21  ;;  %v14441_v19 = vld [vmem:[#allocation124_spill] sm:$0xff]  ;;  %v14442_v21 = vld [vmem:[#allocation50_spill] sm:$0xff] }
 0xad3   :  { %4912 = vmatpush.msrb.mxu3 %v12265_v29  ;;  %4897 = vmatpush.msrb.mxu2 %v12237_v27  ;;  %v14453_v27 = vld [vmem:[#allocation23_spill] sm:$0xff]  ;;  %v14457_v29 = vld [vmem:[#allocation113_spill] sm:$0xff] }
 0xad4   :  { %4809 = vmatpush.msrb.mxu0 %v11883_v1  ;;  %4878 = vmatpush.msra.mxu1 %v11891_v12  ;;  %v14443_v1 = vld [vmem:[#allocation13_spill] sm:$0xff] }
 0xad5   :  { %4913 = vmatpush.msrb.mxu3 %v12284_v44  ;;  %4898 = vmatpush.msrb.mxu2 %v12247_v3  ;;  %v14444_v12 = vld [vmem:[#allocation125_spill] sm:$0xff]  ;;  %v14455_v3 = vld [vmem:[#allocation52_spill] sm:$0xff]  ;;  %v5009_v44 = vld [vmem:[%s12949_s10 + $0xf8] sm:$0xff] }
 0xad6   :  { %4810 = vmatpush.msrb.mxu0 %v11897_v38  ;;  %4879 = vmatpush.msra.mxu1 %v11905_v28  ;;  %v14445_v38 = vld [vmem:[#allocation101_spill] sm:$0xff]  ;;  %v14446_v28 = vld [vmem:[#allocation104_spill] sm:$0xff] }
 0xad7   :  { %4914 = vmatpush.msrb.mxu3 %v12303_v32  ;;  %4899 = vmatpush.msrb.mxu2 %v12271_v63  ;;  %v14458_v63 = vld [vmem:[#allocation119_spill] sm:$0xff]  ;;  %v14460_v32 = vld [vmem:[#allocation49_spill] sm:$0xff] }
 0xad8   :  { %4811 = vmatpush.msrb.mxu0 %v11911_v7  ;;  %4880 = vmatpush.msra.mxu1 %v12278_v8  ;;  %v14447_v7 = vld [vmem:[#allocation92_spill] sm:$0xff] }
 0xad9   :  { %4915 = vmatpush.msrb.mxu3 %v12322_v17  ;;  %4900 = vmatpush.msrb.mxu2 %v14432_v53  ;;  %v14459_v8 = vld [vmem:[#allocation120_spill] sm:$0xff]  ;;  %v14461_v17 = vld [vmem:[#allocation107_spill] sm:$0xff] }
 0xada   :  { %4812 = vmatpush.msrb.mxu0 %v14431_v57  ;;  %4881 = vmatpush.msra.mxu1 %v14433_v43  ;;  %v2590_v56 = vadd.f32 %v14461_v17, %v14460_v32  ;;  %v14468_v57 = vld [vmem:[#allocation94_spill] sm:$0xff] }
 0xadb   :  { %4916 = vmatpush.msrb.mxu3 %v14434_v54  ;;  %4901 = vmatpush.msrb.mxu2 %v14436_v9  ;;  %v5001_v43 = vld [vmem:[%s12949_s10 + $0xb8] sm:$0xff]  ;;  %v4992_v9 = vld [vmem:[%s12949_s10 + $0x70] sm:$0xff] }
 0xadc   :  { %4813 = vmatpush.msrb.mxu0 %v14435_v51  ;;  %4882 = vmatpush.msra.mxu1 %v14437_v33  ;;  %v2631_v16 = vadd.f32 %v14464_v48, %v2590_v56  ;;  %v4994_v48 = vld [vmem:[%s12949_s10 + $0x80] sm:$0xff] }
 0xadd   :  { %4917 = vmatpush.msrb.mxu3 %v14438_v40  ;;  %4902 = vmatpush.msrb.mxu2 %v14440_v4  ;;  %v14469_v40 = vld [vmem:[#allocation17_spill] sm:$0xff] }
 0xade   :  { %4814 = vmatpush.msrb.mxu0 %v14439_v60  ;;  %4883 = vmatpush.msra.mxu1 %v14441_v19  ;;  %v5000_v4 = vld [vmem:[%s12949_s10 + $0xb0] sm:$0xff]  ;;  %v4991_v19 = vld [vmem:[%s12949_s10 + $0x68] sm:$0xff] }
 0xadf   :  { %4918 = vmatpush.msrb.mxu3 %v14442_v21  ;;  %4903 = vmatpush.msrb.mxu2 %v14444_v12  ;;  %v14470_v21 = vld [vmem:[#allocation47_spill] sm:$0xff] }
 0xae0   :  { %4815 = vmatpush.msrb.mxu0 %v14443_v1  ;;  %4884 = vmatpush.msra.mxu1 %v14445_v38  ;;  %v14471_v1 = vld [vmem:[#allocation53_spill] sm:$0xff] }
 0xae1   :  { %4919 = vmatpush.msrb.mxu3 %v14446_v28  ;;  %4904 = vmatpush.msrb.mxu2 %v14448_v23  ;;  %v2951_v12 = vadd.f32 %v14471_v1, %v14470_v21  ;;  %v4999_v38 = vld [vmem:[%s12949_s10 + $0xa8] sm:$0xff]  ;;  %v4990_v23 = vld [vmem:[%s12949_s10 + $0x60] sm:$0xff] }
 0xae2   :  { %4816 = vmatpush.msrb.mxu0 %v14447_v7  ;;  %4885 = vmatpush.msra.mxu1 %v14449_v52  ;;  %v14472_v52 = vld [vmem:[#allocation77_spill] sm:$0xff] }
 0xae3   :  { %4920 = vmatpush.msrb.mxu3 %v14450_v37  ;;  %4905 = vmatpush.msrb.mxu2 %v14451_v26  ;;  %v2992_v37 = vadd.f32 %v14472_v52, %v2951_v12  ;;  %v14473_v26 = vld [vmem:[#allocation16_spill] sm:$0xff]  ;;  %v4980_v12 = vld [vmem:[%s12949_s10 + $0x10] sm:$0xff] }
 0xae4   :  { %4886 = vmatpush.msra.mxu1 %v14452_v47  ;;  %5010 = vmatpush.msra.mxu0 %v5009_v44  ;;  %v4987_v44 = vld [vmem:[%s12949_s10 + $0x48] sm:$0xff]  ;;  %v4978_v52 = vld [vmem:[%s12949_s10] sm:$0xff] }
 0xae5   :  { %4921 = vmatpush.msrb.mxu3 %v14453_v27  ;;  %4906 = vmatpush.msrb.mxu2 %v14454_v49  ;;  %v4998_v27 = vld [vmem:[%s12949_s10 + $0xa0] sm:$0xff]  ;;  %v4989_v49 = vld [vmem:[%s12949_s10 + $0x58] sm:$0xff] }
 0xae6   :  { %5011 = vmatpush.msra.mxu0 %v5008_v13  ;;  %5030 = vmatpush.msrb.mxu1 %v4993_v61 }
 0xae7   :  { %4922 = vmatpush.msrb.mxu3 %v14455_v3  ;;  %v4997_v3 = vld [vmem:[%s12949_s10 + $0x98] sm:$0xff] }
 0xae8   :  { %5012 = vmatpush.msra.mxu0 %v5007_v46  ;;  %5031 = vmatpush.msrb.mxu1 %v4992_v9 }
 0xae9   :  { %4923 = vmatpush.msrb.mxu3 %v14456_v30  ;;  %v4988_v30 = vld [vmem:[%s12949_s10 + $0x50] sm:$0xff] }
 0xaea   :  { %5013 = vmatpush.msra.mxu0 %v5006_v6  ;;  %5032 = vmatpush.msrb.mxu1 %v4991_v19  ;;  %v4981_v19 = vld [vmem:[%s12949_s10 + $0x18] sm:$0xff] }
 0xaeb   :  { %4924 = vmatpush.msrb.mxu3 %v14457_v29 }
 0xaec   :  { %5014 = vmatpush.msra.mxu0 %v5005_v50  ;;  %5033 = vmatpush.msrb.mxu1 %v4990_v23 }
 0xaed   :  { %4925 = vmatpush.msrb.mxu3 %v14458_v63  ;;  %v4996_v63 = vld [vmem:[%s12949_s10 + $0x90] sm:$0xff] }
 0xaee   :  { %5015 = vmatpush.msra.mxu0 %v5004_v36  ;;  %5034 = vmatpush.msrb.mxu1 %v4989_v49  ;;  %v4983_v36 = vld [vmem:[%s12949_s10 + $0x28] sm:$0xff] }
 0xaef   :  { %4926 = vmatpush.msrb.mxu3 %v14459_v8 }
 0xaf0   :  { %5016 = vmatpush.msra.mxu0 %v5003_v14  ;;  %5035 = vmatpush.msrb.mxu1 %v4988_v30 }
 0xaf2   :  { %5017 = vmatpush.msra.mxu0 %v5002_v62  ;;  %5036 = vmatpush.msrb.mxu1 %v4987_v44 }
 0xaf4   :  { %5018 = vmatpush.msra.mxu0 %v5001_v43  ;;  %v4982_v43 = vld [vmem:[%s12949_s10 + $0x20] sm:$0xff] }
 0xaf6   :  { %5019 = vmatpush.msra.mxu0 %v5000_v4 }
 0xaf8   :  { %5020 = vmatpush.msra.mxu0 %v4999_v38 }
 0xafa   :  { %5021 = vmatpush.msra.mxu0 %v4998_v27 }
 0xafc   :  { %5022 = vmatpush.msra.mxu0 %v4997_v3 }
 0xafe   :  { %5023 = vmatpush.msra.mxu0 %v4996_v63 }
 0xb00   :  { %5024 = vmatpush.msra.mxu0 %v4995_v18 }
 0xb02   :  { %5025 = vmatpush.msra.mxu0 %v4994_v48 }
 0xb40   :  { %v4556_v5 = vpop.f32.mrf.mxu0  ;;  %v4576_v55 = vpop.f32.mrf.mxu1 }
 0xb41   :  { %v4557_v45 = vadd.f32 %v4556_v5, %v14466_v20  ;;  %v4577_v15 = vadd.f32 %v4576_v55, %v14467_v39  ;;  %v4986_v5 = vld [vmem:[%s12949_s10 + $0x40] sm:$0xff] }
 0xb42   :  { %5037 = vmatpush.msrb.mxu1 %v4986_v5 }
 0xb43   :  { %v4599_v24 = vadd.f32 %v4557_v45, %v2631_v16  ;;  %v4619_v31 = vadd.f32 %v4577_v15, %v2713_v10  ;;  %v4985_v45 = vld [vmem:[%s12949_s10 + $0x38] sm:$0xff] }
 0xb44   :  { %5038 = vmatpush.msrb.mxu1 %v4985_v45  ;;  %v14475_v45 = vld [vmem:[#allocation110_spill] sm:$0xff] }
 0xb45   :  { %v5504_v42 = vmul.f32 -1.442695, %v4599_v24  ;;  %v5505_v58 = vmul.f32 -1.442695, %v4619_v31 }
 0xb47   :  { %5801 = vpow2.f32 %v5504_v42  ;;  %v4596_v6 = vpop.f32.mrf.mxu2  ;;  %v4984_v42 = vld [vmem:[%s12949_s10 + $0x30] sm:$0xff] }
 0xb48   :  { %5803 = vpow2.f32 %v5505_v58  ;;  %v4597_v62 = vadd.f32 %v4596_v6, %v10870_v22  ;;  %5039 = vmatpush.msrb.mxu1 %v4984_v42  ;;  %v14476_v6 = vld [vmem:[#allocation39_spill] sm:$0xff] }
 0xb4a   :  { %5040 = vmatpush.msrb.mxu1 %v4983_v36 }
 0xb4c   :  { %v4687_v34 = vpop.f32.mrf.mxu0  ;;  %5041 = vmatpush.msrb.mxu1 %v4982_v43  ;;  %v5102_v43 = vld [vmem:[%s12949_s10 + $0x1f8] sm:$0xff] }
 0xb4d   :  { %v5802_v25 = vpop.eup %5801  ;;  %v4688_v53 = vadd.f32 %v4687_v34, %v14468_v57 }
 0xb4e   :  { %v5804_v54 = vpop.eup %5803  ;;  %v12621_v51 = vadd.f32 1.0, %v5802_v25  ;;  %5042 = vmatpush.msrb.mxu1 %v4981_v19 }
 0xb4f   :  { %v12626_v33 = vadd.f32 1.0, %v5804_v54  ;;  %v4730_v60 = vadd.f32 %v4688_v53, %v14469_v40 }
 0xb50   :  { %5805 = vrcp.f32 %v12621_v51  ;;  %v4615_v10 = vand.u32 2147483648, %v12621_v51  ;;  %v4613_v46 = vand.u32 2147483647, %v12621_v51  ;;  %vm4609_vm2 = vweird.f32 %v12621_v51  ;;  %5043 = vmatpush.msrb.mxu1 %v4980_v12  ;;  %v14480_v12 = vld [vmem:[#allocation76_spill] sm:$0xff] }
 0xb51   :  { %5807 = vrcp.f32 %v12626_v33  ;;  %v5507_v28 = vmul.f32 -1.442695, %v4730_v60  ;;  %v4667_v7 = vpop.f32.mrf.mxu3  ;;  %v4635_v54 = vand.u32 2147483648, %v12626_v33  ;;  %vm4629_vm6 = vweird.f32 %v12626_v33  ;;  %v14474_v60 = vld [vmem:[#allocation71_spill] sm:$0xff] }
 0xb52   :  { %v4668_v47 = vadd.f32 %v4667_v7, %v14473_v26  ;;  %v4616_v50 = vor.u32 1.1754944e-38, %v4615_v10  ;;  %vm4614_vm4 = vcmp.eq.f32.partialorder %v4613_v46, 8.507059e+37  ;;  %v4633_v9 = vand.u32 2147483647, %v12626_v33 }
 0xb53   :  { %5809 = vpow2.f32 %v5507_v28  ;;  %v4636_v38 = vor.u32 1.1754944e-38, %v4635_v54  ;;  %v4979_v28 = vld [vmem:[%s12949_s10 + $0x8] sm:$0xff] }
 0xb54   :  { %v4710_v29 = vadd.f32 %v4668_v47, %v2992_v37  ;;  %vm4634_vm8 = vcmp.eq.f32.partialorder %v4633_v9, 8.507059e+37  ;;  %5044 = vmatpush.msrb.mxu1 %v4979_v28  ;;  %v14478_v54 = vld [vmem:[#allocation109_spill] sm:$0xff]  ;;  %v14479_v9 = vld [vmem:[#allocation112_spill] sm:$0xff] }
 0xb56   :  { %v5806_v8 = vpop.eup %5805  ;;  %v5506_v59 = vmul.f32 -1.442695, %v4710_v29  ;;  %5045 = vmatpush.msrb.mxu1 %v4978_v52 }
 0xb57   :  { %v12665_v17 = vpop.eup %5807  ;;  %v4605_v56 = vmul.f32 %v5806_v8, %v12621_v51  ;;  %vm4610_vm1 = vweird.f32 %v5806_v8 }
 0xb58   :  { %v4625_v13 = vmul.f32 %v12665_v17, %v12626_v33  ;;  %5811 = vpow2.f32 %v5506_v59  ;;  %vm4611_vm3 = vmor %vm4609_vm2, %vm4610_vm1  ;;  %vm4630_vm5 = vweird.f32 %v12665_v17 }
 0xb59   :  { %v4606_v55 = vsub.f32 1.0, %v4605_v56  ;;  %v5810_v16 = vpop.eup %5809  ;;  %vm4631_vm7 = vmor %vm4629_vm6, %vm4630_vm5  ;;  %v4707_v56 = vpop.f32.mrf.mxu1 }
 0xb5a   :  { %v4626_v2 = vsub.f32 1.0, %v4625_v13  ;;  %v12684_v24 = vadd.f32 1.0, %v5810_v16  ;;  %v4708_v5 = vadd.f32 %v4707_v56, %v10884_v41  ;;  %v5054_v56 = vld [vmem:[%s12949_s10 + $0x120] sm:$0xff] }
 0xb5b   :  { %v4607_v15 = vmul.f32 %v5806_v8, %v4606_v55 }
 0xb5c   :  { %v4627_v31 = vmul.f32 %v12665_v17, %v4626_v2  ;;  %5813 = vrcp.f32 %v12684_v24  ;;  %v4746_v16 = vand.u32 2147483648, %v12684_v24  ;;  %vm4740_vm14 = vweird.f32 %v12684_v24 }
 0xb5d   :  { %v4608_v58 = vadd.f32 %v5806_v8, %v4607_v15  ;;  %v4744_v10 = vand.u32 2147483647, %v12684_v24 }
 0xb5e   :  { %v5812_v14 = vpop.eup %5811  ;;  %v4628_v25 = vadd.f32 %v12665_v17, %v4627_v31  ;;  %v4747_v31 = vor.u32 1.1754944e-38, %v4746_v16 }
 0xb5f   :  { %v4612_v34 = vsel %vm4611_vm3, %v5806_v8, %v4608_v58  ;;  %v4714_v53 = vadd.f32 1.0, %v5812_v14  ;;  %vm4745_vm0 = vcmp.eq.f32.partialorder %v4744_v10, 8.507059e+37  ;;  %v5094_v10 = vld [vmem:[%s12949_s10 + $0x1b8] sm:$0xff] }
 0xb60   :  { %v4617_v61 = vsel %vm4614_vm4, %v4616_v50, %v4612_v34  ;;  %v4632_v1 = vsel %vm4631_vm7, %v12665_v17, %v4628_v25  ;;  %v5065_v34 = vld [vmem:[%s12949_s10 + $0x178] sm:$0xff]  ;;  %v5062_v25 = vld [vmem:[%s12949_s10 + $0x160] sm:$0xff] }
 0xb61   :  { %v4639_v51 = vmul.f32 %v4617_v61, %v4597_v62  ;;  %5815 = vrcp.f32 %v4714_v53  ;;  %v4637_v7 = vsel %vm4634_vm8, %v4636_v38, %v4632_v1  ;;  %v4726_v29 = vand.u32 2147483648, %v4714_v53  ;;  %v5064_v61 = vld [vmem:[%s12949_s10 + $0x170] sm:$0xff] }
 0xb62   :  { %v5814_v40 = vpop.eup %5813  ;;  %v4642_v47 = vsub.f32 1.0, %v4637_v7  ;;  %v4644_v63 = vmul.f32 %v4637_v7, %v12506_v0  ;;  %v4724_v44 = vand.u32 2147483647, %v4714_v53  ;;  %vm4720_vm10 = vweird.f32 %v4714_v53  ;;  %v5101_v1 = vld [vmem:[%s12949_s10 + $0x1f0] sm:$0xff]  ;;  %v5059_v7 = vld [vmem:[%s12949_s10 + $0x148] sm:$0xff] }
 0xb63   :  { %v4640_v4 = vadd.f32 %v4639_v51, %v14474_v60  ;;  %v4736_v33 = vmul.f32 %v5814_v40, %v12684_v24  ;;  %v4727_v13 = vor.u32 1.1754944e-38, %v4726_v29  ;;  %vm4741_vm13 = vweird.f32 %v5814_v40  ;;  %v14477_v24 = vld [vmem:[#allocation32_spill] sm:$0xff]  ;;  %v5060_v60 = vld [vmem:[%s12949_s10 + $0x150] sm:$0xff] }
 0xb64   :  { %vm4725_vm12 = vcmp.eq.f32.partialorder %v4724_v44, 8.507059e+37  ;;  %vm4742_vm15 = vmor %vm4740_vm14, %vm4741_vm13  ;;  %v2593_v51 = vadd.f32 %v14478_v54, %v14460_v32  ;;  %v5097_v29 = vld [vmem:[%s12949_s10 + $0x1d0] sm:$0xff]  ;;  %v14482_v44 = vld [vmem:[#allocation116_spill] sm:$0xff] }
 0xb65   :  { %5817 = vtanh.f32 %v4640_v4  ;;  %v4737_v27 = vsub.f32 1.0, %v4736_v33  ;;  %v14481_v33 = vld [vmem:[#allocation74_spill] sm:$0xff] }
 0xb66   :  { %v2634_v38 = vadd.f32 %v14480_v12, %v2593_v51  ;;  %v5089_v54 = vld [vmem:[%s12949_s10 + $0x190] sm:$0xff]  ;;  %v5088_v51 = vld [vmem:[%s12949_s10 + $0x188] sm:$0xff] }
 0xb67   :  { %v5816_v23 = vpop.eup %5815  ;;  %v4738_v17 = vmul.f32 %v5814_v40, %v4737_v27 }
 0xb68   :  { %v4716_v37 = vmul.f32 %v5816_v23, %v4714_v53  ;;  %vm4721_vm9 = vweird.f32 %v5816_v23  ;;  %v5061_v53 = vld [vmem:[%s12949_s10 + $0x158] sm:$0xff] }
 0xb69   :  { %vm4722_vm11 = vmor %vm4720_vm10, %vm4721_vm9  ;;  %v4739_v48 = vadd.f32 %v5814_v40, %v4738_v17  ;;  %v2948_v17 = vadd.f32 %v14482_v44, %v14470_v21  ;;  %v5053_v21 = vld [vmem:[%s12949_s10 + $0x118] sm:$0xff] }
 0xb6a   :  { %v4717_v3 = vsub.f32 1.0, %v4716_v37 }
 0xb6b   :  { %v5818_v49 = vpop.eup %5817  ;;  %v4743_v46 = vsel %vm4742_vm15, %v5814_v40, %v4739_v48  ;;  %v2675_v40 = vadd.f32 %v14479_v9, %v14462_v35 }
 0xb6c   :  { %v4643_v30 = vmul.f32 %v5818_v49, %v4642_v47  ;;  %v4718_v8 = vmul.f32 %v5816_v23, %v4717_v3  ;;  %v4748_v42 = vsel %vm4745_vm0, %v4747_v31, %v4743_v46  ;;  %v5058_v47 = vld [vmem:[%s12949_s10 + $0x140] sm:$0xff]  ;;  %v5057_v49 = vld [vmem:[%s12949_s10 + $0x138] sm:$0xff]  ;;  %v5093_v46 = vld [vmem:[%s12949_s10 + $0x1b0] sm:$0xff] }
 0xb6d   :  { %v4753_v58 = vsub.f32 1.0, %v4748_v42  ;;  %v4755_v14 = vmul.f32 %v4748_v42, %v12526_v11  ;;  %v5063_v11 = vld [vmem:[%s12949_s10 + $0x168] sm:$0xff]  ;;  %v2716_v28 = vadd.f32 %v14481_v33, %v2675_v40  ;;  %v5098_v3 = vld [vmem:[%s12949_s10 + $0x1d8] sm:$0xff] }
 0xb6e   :  { %v12720_v59 = vadd.f32 %v4644_v63, %v4643_v30  ;;  %v4719_v18 = vadd.f32 %v5816_v23, %v4718_v8  ;;  %v5056_v30 = vld [vmem:[%s12949_s10 + $0x130] sm:$0xff]  ;;  %v5055_v63 = vld [vmem:[%s12949_s10 + $0x128] sm:$0xff] }
 0xb6f   :  { %v5096_v8 = vld [vmem:[%s12949_s10 + $0x1c8] sm:$0xff] }
 0xb70   :  { %4777 = vmatmul.f32.vlgmr.msra.gmra.mxu2 %v12720_v59  ;;  %4797 = vmatmul.f32.vlgmr.msra.gmra.mxu3 %v12720_v59  ;;  %v4723_v55 = vsel %vm4722_vm11, %v5816_v23, %v4719_v18  ;;  %v5100_v23 = vld [vmem:[%s12949_s10 + $0x1e8] sm:$0xff] }
 0xb71   :  { %4817 = vmatmul.f32.vlgmr.msrb.gmra.mxu0 %v12720_v59  ;;  %v4728_v0 = vsel %vm4725_vm12, %v4727_v13, %v4723_v55  ;;  %5066 = vmatpush.msra.mxu2 %v5065_v34  ;;  %v5095_v13 = vld [vmem:[%s12949_s10 + $0x1c0] sm:$0xff] }
 0xb72   :  { %v4750_v2 = vmul.f32 %v4728_v0, %v4708_v5  ;;  %5103 = vmatpush.msra.mxu3 %v5102_v43  ;;  %v14483_v55 = vld [vmem:[#allocation80_spill] sm:$0xff] }
 0xb73   :  { %5067 = vmatpush.msra.mxu2 %v5064_v61  ;;  %v2989_v0 = vadd.f32 %v14483_v55, %v2948_v17  ;;  %v14485_v17 = vld [vmem:[#allocation63_spill] sm:$0xff] }
 0xb74   :  { %v4751_v15 = vadd.f32 %v4750_v2, %v14475_v45  ;;  %5104 = vmatpush.msra.mxu3 %v5101_v1  ;;  %v5087_v1 = vld [vmem:[%s12949_s10 + $0x180] sm:$0xff] }
 0xb75   :  { %5068 = vmatpush.msra.mxu2 %v5063_v11  ;;  %v5090_v11 = vld [vmem:[%s12949_s10 + $0x198] sm:$0xff] }
 0xb76   :  { %5819 = vtanh.f32 %v4751_v15  ;;  %5105 = vmatpush.msra.mxu3 %v5100_v23 }
 0xb77   :  { %5069 = vmatpush.msra.mxu2 %v5062_v25 }
 0xb79   :  { %5026 = vmatmul.f32.vlgmr.msra.gmra.mxu0 %v14476_v6  ;;  %5070 = vmatpush.msra.mxu2 %v5061_v53  ;;  %v5051_v6 = vld [vmem:[%s12949_s10 + $0x108] sm:$0xff] }
 0xb7b   :  { %5071 = vmatpush.msra.mxu2 %v5060_v60 }
 0xb7c   :  { %v5820_v50 = vpop.eup %5819 }
 0xb7d   :  { %v4754_v36 = vmul.f32 %v5820_v50, %v4753_v58  ;;  %5072 = vmatpush.msra.mxu2 %v5059_v7  ;;  %v5092_v58 = vld [vmem:[%s12949_s10 + $0x1a8] sm:$0xff] }
 0xb7f   :  { %v12732_v62 = vadd.f32 %v4755_v14, %v4754_v36  ;;  %5073 = vmatpush.msra.mxu2 %v5058_v47  ;;  %v5050_v36 = vld [vmem:[%s12949_s10 + $0x100] sm:$0xff] }
 0xb80   :  { %v5091_v14 = vld [vmem:[%s12949_s10 + $0x1a0] sm:$0xff] }
 0xb81   :  { %4887 = vmatmul.f32.vlgmr.msra.gmra.mxu1 %v12732_v62  ;;  %4907 = vmatmul.f32.vlgmr.msrb.gmra.mxu2 %v12732_v62 }
 0xb82   :  { %4927 = vmatmul.f32.vlgmr.msrb.gmra.mxu3 %v12732_v62  ;;  %5074 = vmatpush.msra.mxu2 %v5057_v49 }
 0xb84   :  { %5075 = vmatpush.msra.mxu2 %v5056_v30 }
 0xb86   :  { %5076 = vmatpush.msra.mxu2 %v5055_v63 }
 0xb88   :  { %5077 = vmatpush.msra.mxu2 %v5054_v56 }
 0xb89   :  { %5046 = vmatmul.f32.vlgmr.msrb.gmra.mxu1 %v14477_v24  ;;  %v14484_v24 = vld [vmem:[#allocation41_spill] sm:$0xff] }
 0xb8a   :  { %5078 = vmatpush.msra.mxu2 %v5053_v21 }
 0xbee   :  { %v4818_v33 = vpop.f32.mrf.mxu0 }
 0xbef   :  { %v4819_v47 = vadd.f32 %v4818_v33, %v10870_v22  ;;  %v5134_v33 = vld [vmem:[%s12950_s12 + $0x20] sm:$0xff] }
 0xbf3   :  { %v4778_v4 = vpop.f32.mrf.mxu2  ;;  %v4798_v19 = vpop.f32.mrf.mxu3 }
 0xbf4   :  { %v4779_v32 = vadd.f32 %v4778_v4, %v14466_v20  ;;  %v4799_v35 = vadd.f32 %v4798_v19, %v14467_v39  ;;  %v5099_v20 = vld [vmem:[%s12949_s10 + $0x1e0] sm:$0xff] }
 0xbf5   :  { %5106 = vmatpush.msra.mxu3 %v5099_v20 }
 0xbf6   :  { %v4821_v52 = vadd.f32 %v4779_v32, %v2634_v38  ;;  %v4841_v37 = vadd.f32 %v4799_v35, %v2716_v28  ;;  %v5145_v32 = vld [vmem:[%s12950_s12 + $0x78] sm:$0xff]  ;;  %v5144_v35 = vld [vmem:[%s12950_s12 + $0x70] sm:$0xff] }
 0xbf7   :  { %5107 = vmatpush.msra.mxu3 %v5098_v3  ;;  %5150 = vmatpush.msrb.mxu0 %v5145_v32  ;;  %v5142_v3 = vld [vmem:[%s12950_s12 + $0x60] sm:$0xff]  ;;  %v5132_v32 = vld [vmem:[%s12950_s12 + $0x10] sm:$0xff] }
 0xbf8   :  { %v5508_v39 = vmul.f32 -1.442695, %v4821_v52  ;;  %v5509_v27 = vmul.f32 -1.442695, %v4841_v37  ;;  %v5143_v52 = vld [vmem:[%s12950_s12 + $0x68] sm:$0xff] }
 0xbf9   :  { %5108 = vmatpush.msra.mxu3 %v5097_v29  ;;  %5151 = vmatpush.msrb.mxu0 %v5144_v35  ;;  %v5131_v35 = vld [vmem:[%s12950_s12 + $0x8] sm:$0xff] }
 0xbfa   :  { %5821 = vpow2.f32 %v5508_v39 }
 0xbfb   :  { %5823 = vpow2.f32 %v5509_v27  ;;  %5109 = vmatpush.msra.mxu3 %v5096_v8  ;;  %5152 = vmatpush.msrb.mxu0 %v5143_v52  ;;  %v5141_v8 = vld [vmem:[%s12950_s12 + $0x58] sm:$0xff] }
 0xbfd   :  { %5110 = vmatpush.msra.mxu3 %v5095_v13  ;;  %5153 = vmatpush.msrb.mxu0 %v5142_v3 }
 0xbfe   :  { %v4888_v18 = vpop.f32.mrf.mxu1 }
 0xbff   :  { %v4889_v48 = vadd.f32 %v4888_v18, %v14473_v26  ;;  %5111 = vmatpush.msra.mxu3 %v5094_v10  ;;  %v5052_v26 = vld [vmem:[%s12949_s10 + $0x110] sm:$0xff]  ;;  %5154 = vmatpush.msrb.mxu0 %v5141_v8 }
 0xc00   :  { %v5822_v5 = vpop.eup %5821  ;;  %5079 = vmatpush.msra.mxu2 %v5052_v26 }
 0xc01   :  { %v5824_v16 = vpop.eup %5823  ;;  %v12813_v2 = vadd.f32 1.0, %v5822_v5  ;;  %v4931_v15 = vadd.f32 %v4889_v48, %v2989_v0  ;;  %5112 = vmatpush.msra.mxu3 %v5093_v46 }
 0xc02   :  { %v12818_v45 = vadd.f32 1.0, %v5824_v16  ;;  %5080 = vmatpush.msra.mxu2 %v5051_v6 }
 0xc03   :  { %5825 = vrcp.f32 %v12813_v2  ;;  %v5510_v31 = vmul.f32 -1.442695, %v4931_v15  ;;  %5113 = vmatpush.msra.mxu3 %v5092_v58  ;;  %v4837_v60 = vand.u32 2147483648, %v12813_v2  ;;  %v4835_v38 = vand.u32 2147483647, %v12813_v2 }
 0xc04   :  { %5827 = vrcp.f32 %v12818_v45  ;;  %v4908_v42 = vpop.f32.mrf.mxu2  ;;  %5081 = vmatpush.msra.mxu2 %v5050_v36  ;;  %vm4831_vm2 = vweird.f32 %v12813_v2  ;;  %v4857_v29 = vand.u32 2147483648, %v12818_v45  ;;  %vm4851_vm6 = vweird.f32 %v12818_v45 }
 0xc05   :  { %5829 = vpow2.f32 %v5510_v31  ;;  %v4909_v50 = vadd.f32 %v4908_v42, %v14468_v57  ;;  %5114 = vmatpush.msra.mxu3 %v5091_v14  ;;  %v4838_v23 = vor.u32 1.1754944e-38, %v4837_v60  ;;  %vm4836_vm4 = vcmp.eq.f32.partialorder %v4835_v38, 8.507059e+37  ;;  %v5135_v38 = vld [vmem:[%s12950_s12 + $0x28] sm:$0xff] }
 0xc06   :  { %v4855_v22 = vand.u32 2147483647, %v12818_v45  ;;  %v4858_v13 = vor.u32 1.1754944e-38, %v4857_v29  ;;  %v5047_v52 = vpop.f32.mrf.mxu1 }
 0xc07   :  { %v4951_v34 = vadd.f32 %v4909_v50, %v14484_v24  ;;  %5115 = vmatpush.msra.mxu3 %v5090_v11 }
 0xc08   :  { %vm4856_vm8 = vcmp.eq.f32.partialorder %v4855_v22, 8.507059e+37 }
 0xc09   :  { %v5826_v61 = vpop.eup %5825  ;;  %v5511_v53 = vmul.f32 -1.442695, %v4951_v34  ;;  %5116 = vmatpush.msra.mxu3 %v5089_v54 }
 0xc0a   :  { %v12845_v25 = vpop.eup %5827  ;;  %v4827_v57 = vmul.f32 %v5826_v61, %v12813_v2  ;;  %vm4832_vm1 = vweird.f32 %v5826_v61  ;;  %v4928_v2 = vpop.f32.mrf.mxu3 }
 0xc0b   :  { %v4847_v43 = vmul.f32 %v12845_v25, %v12818_v45  ;;  %v5830_v9 = vpop.eup %5829  ;;  %5831 = vpow2.f32 %v5511_v53  ;;  %5117 = vmatpush.msra.mxu3 %v5088_v51  ;;  %vm4833_vm3 = vmor %vm4831_vm2, %vm4832_vm1  ;;  %vm4852_vm5 = vweird.f32 %v12845_v25  ;;  %v4929_v6 = vadd.f32 %v4928_v2, %v10884_v41 }
 0xc0c   :  { %v4828_v40 = vsub.f32 1.0, %v4827_v57  ;;  %v12857_v19 = vadd.f32 1.0, %v5830_v9  ;;  %vm4853_vm7 = vmor %vm4851_vm6, %vm4852_vm5  ;;  %v14486_v57 = vld [vmem:[#allocation82_spill] sm:$0xff] }
 0xc0d   :  { %v4848_v4 = vsub.f32 1.0, %v4847_v43  ;;  %5118 = vmatpush.msra.mxu3 %v5087_v1  ;;  %v5138_v1 = vld [vmem:[%s12950_s12 + $0x40] sm:$0xff] }
 0xc0e   :  { %v4829_v12 = vmul.f32 %v5826_v61, %v4828_v40  ;;  %5833 = vrcp.f32 %v12857_v19  ;;  %v4947_v55 = vand.u32 2147483648, %v12857_v19  ;;  %v4945_v48 = vand.u32 2147483647, %v12857_v19 }
 0xc0f   :  { %v4849_v28 = vmul.f32 %v12845_v25, %v4848_v4  ;;  %vm4941_vm10 = vweird.f32 %v12857_v19  ;;  %v5140_v4 = vld [vmem:[%s12950_s12 + $0x50] sm:$0xff] }
 0xc10   :  { %v4830_v7 = vadd.f32 %v5826_v61, %v4829_v12  ;;  %v4948_v15 = vor.u32 1.1754944e-38, %v4947_v55  ;;  %vm4946_vm12 = vcmp.eq.f32.partialorder %v4945_v48, 8.507059e+37  ;;  %5155 = vmatpush.msrb.mxu0 %v5140_v4  ;;  %v5136_v12 = vld [vmem:[%s12950_s12 + $0x30] sm:$0xff] }
 0xc11   :  { %v5832_v37 = vpop.eup %5831  ;;  %v4850_v49 = vadd.f32 %v12845_v25, %v4849_v28  ;;  %v5133_v28 = vld [vmem:[%s12950_s12 + $0x18] sm:$0xff] }
 0xc12   :  { %v4834_v20 = vsel %vm4833_vm3, %v5826_v61, %v4830_v7  ;;  %v4955_v27 = vadd.f32 1.0, %v5832_v37  ;;  %v5130_v7 = vld [vmem:[%s12950_s12] sm:$0xff]  ;;  %v5027_v37 = vpop.f32.mrf.mxu0 }
 0xc13   :  { %v4839_v39 = vsel %vm4836_vm4, %v4838_v23, %v4834_v20  ;;  %v4854_v18 = vsel %vm4853_vm7, %v12845_v25, %v4850_v49  ;;  %v19_v23 = vstv %s12952_s13  ;;  %v5048_v20 = vadd.f32 %v5047_v52, %v5027_v37 }
 0xc14   :  { %v4861_v30 = vmul.f32 %v4839_v39, %v4819_v47  ;;  %v5834_v63 = vpop.eup %5833  ;;  %5835 = vrcp.f32 %v4955_v27  ;;  %v4859_v21 = vsel %vm4856_vm8, %v4858_v13, %v4854_v18  ;;  %v4967_v24 = vand.u32 2147483648, %v4955_v27  ;;  %20 = vst [vmem:[#allocation7] sm:$0x1] %v19_v23 }
 0xc15   :  { %v4937_v44 = vmul.f32 %v5834_v63, %v12857_v19  ;;  %vm4942_vm9 = vweird.f32 %v5834_v63  ;;  %v4864_v26 = vsub.f32 1.0, %v4859_v21  ;;  %v4866_v36 = vmul.f32 %v4859_v21, %v12720_v59  ;;  %v5139_v19 = vld [vmem:[%s12950_s12 + $0x48] sm:$0xff] }
 0xc16   :  { %v4862_v56 = vadd.f32 %v4861_v30, %v14485_v17  ;;  %vm4943_vm11 = vmor %vm4941_vm10, %vm4942_vm9  ;;  %v4965_v61 = vand.u32 2147483647, %v4955_v27  ;;  %vm4961_vm14 = vweird.f32 %v4955_v27  ;;  %v4968_v43 = vor.u32 1.1754944e-38, %v4967_v24  ;;  %5156 = vmatpush.msrb.mxu0 %v5139_v19 }
 0xc17   :  { %v4938_v5 = vsub.f32 1.0, %v4937_v44  ;;  %vm5189_vm4 = vcmask 7168  }
 0xc18   :  { %5837 = vtanh.f32 %v4862_v56  ;;  %vm4966_vm0 = vcmp.eq.f32.partialorder %v4965_v61, 8.507059e+37  ;;  %5157 = vmatpush.msrb.mxu0 %v5138_v1 }
 0xc19   :  { %v4939_v0 = vmul.f32 %v5834_v63, %v4938_v5 }
 0xc1a   :  { %v5836_v16 = vpop.eup %5835 }
 0xc1b   :  { %v4957_v10 = vmul.f32 %v5836_v16, %v4955_v27  ;;  %v4940_v45 = vadd.f32 %v5834_v63, %v4939_v0  ;;  %vm4962_vm13 = vweird.f32 %v5836_v16  ;;  %v5519_v27 = vld [vmem:[%s12951_s11] ss:$0 sm:$0xff] }
 0xc1c   :  { %vm4963_vm15 = vmor %vm4961_vm14, %vm4962_vm13 }
 0xc1d   :  { %v4958_v31 = vsub.f32 1.0, %v4957_v10  ;;  %v4944_v42 = vsel %vm4943_vm11, %v5834_v63, %v4940_v45  ;;  %v5520_v63 = vld [vmem:[#allocation7] ss:$0 sm:$0xff] }
 0xc1e   :  { %v5838_v46 = vpop.eup %5837  ;;  %v4949_v58 = vsel %vm4946_vm12, %v4948_v15, %v4944_v42 }
 0xc1f   :  { %v4865_v50 = vmul.f32 %v5838_v46, %v4864_v26  ;;  %v4959_v14 = vmul.f32 %v5836_v16, %v4958_v31  ;;  %v4971_v34 = vmul.f32 %v4949_v58, %v4929_v6 }
 0xc21   :  { %v4867_v11 = vadd.f32 %v4866_v36, %v4865_v50  ;;  %v4960_v25 = vadd.f32 %v5836_v16, %v4959_v14  ;;  %v4972_v53 = vadd.f32 %v4971_v34, %v14486_v57 }
 0xc23   :  { %5082 = vmatmul.f32.vlgmr.msra.gmra.mxu2 %v4867_v11  ;;  %v4964_v41 = vsel %vm4963_vm15, %v5836_v16, %v4960_v25  ;;  %5839 = vtanh.f32 %v4972_v53 }
 0xc24   :  { %v4969_v54 = vsel %vm4966_vm0, %v4968_v43, %v4964_v41 }
 0xc25   :  { %v4974_v51 = vsub.f32 1.0, %v4969_v54  ;;  %v4976_v40 = vmul.f32 %v4969_v54, %v12732_v62  ;;  %v5137_v62 = vld [vmem:[%s12950_s12 + $0x38] sm:$0xff] }
 0xc26   :  { %5158 = vmatpush.msrb.mxu0 %v5137_v62 }
 0xc28   :  { %5159 = vmatpush.msrb.mxu0 %v5136_v12 }
 0xc29   :  { %v5840_v9 = vpop.eup %5839 }
 0xc2a   :  { %v4975_v59 = vmul.f32 %v5840_v9, %v4974_v51  ;;  %5160 = vmatpush.msrb.mxu0 %v5135_v38 }
 0xc2c   :  { %v4977_v60 = vadd.f32 %v4976_v40, %v4975_v59  ;;  %5161 = vmatpush.msrb.mxu0 %v5134_v33 }
 0xc2e   :  { %5119 = vmatmul.f32.vlgmr.msra.gmra.mxu3 %v4977_v60  ;;  %5162 = vmatpush.msrb.mxu0 %v5133_v28 }
 0xc30   :  { %5163 = vmatpush.msrb.mxu0 %v5132_v32 }
 0xc32   :  { %5164 = vmatpush.msrb.mxu0 %v5131_v35 }
 0xc34   :  { %5165 = vmatpush.msrb.mxu0 %v5130_v7 }
 0xca6   :  { %v5083_v47 = vpop.f32.mrf.mxu2 }
 0xca7   :  { %v5086_v39 = vadd.f32 %v5083_v47, %v5048_v20 }
 0xcb1   :  { %v5120_v49 = vpop.f32.mrf.mxu3 }
 0xcb2   :  { %v5123_v3 = vadd.f32 %v5120_v49, %v5086_v39 }
 0xcb4   :  { %v5128_v30 = vadd.f32 %v5519_v27, %v5123_v3 }
 0xcb6   :  { %5841 = vtanh.f32 %v5128_v30 }
 0xcbc   :  { %v5842_v29 = vpop.eup %5841 }
 0xcbd   :  { %5166 = vmatmul.f32.vlgmr.msrb.gmra.mxu0 %v5842_v29 }
 0xd3a   :  { %v5167_v22 = vpop.f32.mrf.mxu0 }
 0xd3b   :  { %v5168_v8 = vadd.f32 %v5520_v63, %v5167_v22 }
 0xd3d   :  { %v5512_v44 = vmul.f32 -1.442695, %v5168_v8 }
 0xd3f   :  { %5843 = vpow2.f32 %v5512_v44 }
 0xd45   :  { %v5844_v17 = vpop.eup %5843 }
 0xd46   :  { %v5173_v56 = vadd.f32 1.0, %v5844_v17 }
 0xd48   :  { %5845 = vrcp.f32 %v5173_v56  ;;  %v5185_v55 = vand.u32 2147483648, %v5173_v56  ;;  %v5183_v48 = vand.u32 2147483647, %v5173_v56  ;;  %vm5179_vm2 = vweird.f32 %v5173_v56 }
 0xd4a   :  { %v5186_v16 = vor.u32 1.1754944e-38, %v5185_v55  ;;  %vm5184_vm5 = vcmp.eq.f32.partialorder %v5183_v48, 8.507059e+37 }
 0xd4e   :  { %v5846_v18 = vpop.eup %5845 }
 0xd4f   :  { %v5175_v13 = vmul.f32 %v5846_v18, %v5173_v56  ;;  %vm5180_vm1 = vweird.f32 %v5846_v18 }
 0xd50   :  { %vm5181_vm3 = vmor %vm5179_vm2, %vm5180_vm1 }
 0xd51   :  { %v5176_v5 = vsub.f32 1.0, %v5175_v13 }
 0xd53   :  { %v5177_v0 = vmul.f32 %v5846_v18, %v5176_v5 }
 0xd55   :  { %v5178_v21 = vadd.f32 %v5846_v18, %v5177_v0 }
 0xd57   :  { %v5182_v2 = vsel %vm5181_vm3, %v5846_v18, %v5178_v21 }
 0xd58   :  { %v5187_v10 = vsel %vm5184_vm5, %v5186_v16, %v5182_v2 }
 0xd59   :  { %5190 = vst.msk [vmem:[%s12953_s14] sm:$0xff] %vm5189_vm4, %v5187_v10 }

</bundles_post_ra>
